<compile_context>
chip_gen: v7x
topology: tpu7x:2x2x1
jax: 0.10.0
libtpu: 0.0.40
codegen_flags: <defaults>
</compile_context>

<pallas_src>
import functools

import numpy as np
import jax
import jax.numpy as jnp
from jax import lax
from jax.experimental import pallas as pl
from jax.experimental.pallas import tpu as pltpu


# ----------------------------------------------------------------------------
# Generation-aware VMEM budget
# ----------------------------------------------------------------------------
@functools.lru_cache(maxsize=None)
def _tpu_vmem_config():
    """(per-step VMEM budget, vmem_limit_bytes, has 2 TensorCores)."""
    try:
        kind = jax.devices()[0].device_kind.lower()
    except Exception:
        kind = ""
    if ("v5" in kind) or ("v6" in kind) or ("v4" in kind):
        # 128 MiB physical VMEM, one TensorCore per chip.
        return 24 * 2 ** 20, 80 * 2 ** 20, False
    # v7x: 64 MiB physical VMEM, 2 TensorCores.  Unknown parts land here too
    # (a conservative budget is only a perf, never a correctness, issue).
    return 10 * 2 ** 20, 40 * 2 ** 20, ("v7" in kind)


def _pick_tile_rows(N, HO, Wp, WO, Cin, Cout, KH, KW, has_skip, split_dy):
    """Output rows per grid step: largest tile whose accounted VMEM
    (double-buffered band/skip/output blocks, resident weights, im2col
    scratch, f32 accumulator) fits the per-generation budget."""
    budget, _, two_cores = _tpu_vmem_config()
    K = KH * KW * Cin
    Kp = KW * Cin if split_dy else K
    fixed = 2 * K * Cout * 2 + 4 * Cout             # weight (x2 buffers) + bias
    fixed += 2 * (KH - 1) * Wp * Cin * 2            # halo rows of the band (x2)
    per_row = (2 * Wp * Cin * 2                               # band rows (x2)
               + 2 * WO * Cout * 2 * (2 if has_skip else 1)   # out (+skip) (x2)
               + WO * Kp * 2                                  # im2col scratch
               + (WO * Cout * 4 if split_dy else 0))          # f32 accumulator
    th = max(1, min(HO, (budget - fixed) // max(per_row, 1)))
    if 8 < th < HO:
        th = (th // 8) * 8                          # sublane-friendly tiles
    if two_cores and N == 1 and th >= HO and HO >= 2:
        th = (HO + 1) // 2                          # keep both v7x cores busy
    return int(th)


# ----------------------------------------------------------------------------
# Generic Pallas conv kernel: stride-1 VALID conv on a padded NHWC bf16 input,
# bias + optional ReLU + optional skip add fused, bf16 MXU matmuls, f32 acc.
# ----------------------------------------------------------------------------
@functools.lru_cache(maxsize=None)
def _conv_call(N, n_t, TH, Wp, Cin, Cout, KH, KW, act, has_skip, split_dy,
               vmem_limit):
    TB = TH + KH - 1                       # input band rows (output rows + halo)
    WO = Wp - KW + 1
    M = TH * WO
    K = KH * KW * Cin
    Kp = KW * Cin if split_dy else K       # im2col width actually materialized

    def kernel(*refs):
        if has_skip:
            x_ref, w_ref, b_ref, s_ref, o_ref = refs[:5]
            scratch = refs[5:]
        else:
            x_ref, w_ref, b_ref, o_ref = refs[:4]
            scratch = refs[4:]

        if split_dy:
            p_ref, acc_ref = scratch
            # dy-split path: KH accumulating matmuls over a (M, KW*Cin)
            # scratch (KHx smaller im2col footprint for the big-Cin layers).
            for dy in range(KH):
                for dx in range(KW):
                    c0 = dx * Cin
                    p_ref[:, c0:c0 + Cin] = (
                        x_ref[0, dy:dy + TH, dx:dx + WO, :].reshape(M, Cin))
                part = jnp.dot(p_ref[...], w_ref[dy],
                               preferred_element_type=jnp.float32)
                if dy == 0:
                    acc_ref[...] = part
                else:
                    acc_ref[...] = acc_ref[...] + part
            acc = acc_ref[...]
        else:
            (p_ref,) = scratch
            # single large-K bf16 matmul: im2col all KH*KW taps (no f32
            # round trip — bf16 slices go straight into the scratch).
            for dy in range(KH):
                for dx in range(KW):
                    c0 = (dy * KW + dx) * Cin
                    p_ref[:, c0:c0 + Cin] = (
                        x_ref[0, dy:dy + TH, dx:dx + WO, :].reshape(M, Cin))
            acc = jnp.dot(p_ref[...], w_ref[...],
                          preferred_element_type=jnp.float32)

        acc = acc + b_ref[...]                             # (1, Cout) broadcast
        if act:
            acc = jnp.maximum(acc, 0.0)
        out = acc.reshape(TH, WO, Cout)
        if has_skip:
            out = out + s_ref[0].astype(jnp.float32)       # fused residual add
        # TODO(synk): lane-dense (TH, WO*Cout) output slab (unmasked vst for
        # Cout < 128) needs an in-kernel (M, Cout)->(TH, WO*Cout) lane
        # relayout; kept on the proven NHWC store path for lowering safety.
        o_ref[0] = out.astype(o_ref.dtype)

    in_specs = [
        # input bands: (N*n_t, TB, Wp, Cin); one band per (n, t) grid step.
        # TODO(synk): overlapping halo rows are duplicated wrapper-side; a
        # manual double-buffered make_async_copy of overlapping bands
        # (memory_space=pl.ANY) would remove that extra HBM pass.
        pl.BlockSpec((1, TB, Wp, Cin), lambda n, t: (n * n_t + t, 0, 0, 0)),
    ]
    if split_dy:
        in_specs.append(pl.BlockSpec((KH, Kp, Cout), lambda n, t: (0, 0, 0)))
    else:
        in_specs.append(pl.BlockSpec((K, Cout), lambda n, t: (0, 0)))
    in_specs.append(pl.BlockSpec((1, Cout), lambda n, t: (0, 0)))      # bias
    if has_skip:
        in_specs.append(pl.BlockSpec((1, TH, WO, Cout),
                                     lambda n, t: (n, t, 0, 0)))

    scratch_shapes = [pltpu.VMEM((M, Kp), jnp.bfloat16)]
    if split_dy:
        scratch_shapes.append(pltpu.VMEM((M, Cout), jnp.float32))

    return pl.pallas_call(
        kernel,
        out_shape=jax.ShapeDtypeStruct((N, n_t * TH, WO, Cout), jnp.bfloat16),
        grid=(N, n_t),
        in_specs=in_specs,
        out_specs=pl.BlockSpec((1, TH, WO, Cout), lambda n, t: (n, t, 0, 0)),
        scratch_shapes=scratch_shapes,
        compiler_params=pltpu.CompilerParams(
            dimension_semantics=("parallel", "parallel"),
            vmem_limit_bytes=int(vmem_limit)),
    )


def pallas_conv(x, w, b, *, pad, act, skip=None, tile_rows=None):
    """Stride-1 conv (`pad` symmetric spatial padding then VALID) on NHWC.

    x: (N, H, W, Cin); w: (KH, KW, Cin, Cout) HWIO; b: (Cout,);
    skip (optional): (N, HO, WO, Cout) added to the conv output in-kernel.
    Returns (N, HO, WO, Cout) bfloat16.
    """
    N, H, W, Cin = x.shape
    KH, KW, _, Cout = w.shape
    Hp, Wp = H + 2 * pad, W + 2 * pad
    HO, WO = Hp - KH + 1, Wp - KW + 1

    split_dy = (KW * Cin) >= 256            # big-Cin layers: per-dy accumulation
    has_skip = skip is not None
    if tile_rows:
        TH = int(tile_rows)
    else:
        TH = _pick_tile_rows(N, HO, Wp, WO, Cin, Cout, KH, KW,
                             has_skip, split_dy)
    TH = max(1, min(TH, HO))
    n_t = -(-HO // TH)
    HOp = n_t * TH
    TB = TH + KH - 1

    # conv padding + uniform-band bottom padding folded into one jnp.pad.
    pad_b = pad + (HOp - HO)
    xb = x.astype(jnp.bfloat16)
    if pad or pad_b:
        xb = jnp.pad(xb, ((0, 0), (pad, pad_b), (pad, pad), (0, 0)))

    if n_t == 1:
        bands = xb                                          # (N, TB, Wp, Cin)
    else:
        # Halo rows duplicated once wrapper-side so BlockSpec tiles stay
        # rectangular / non-overlapping ((KH-1) rows of overhead per tile).
        bands = jnp.stack([xb[:, t * TH:t * TH + TB] for t in range(n_t)],
                          axis=1).reshape(N * n_t, TB, Wp, Cin)

    wb = w.astype(jnp.bfloat16)
    wf = wb.reshape(KH, KW * Cin, Cout) if split_dy else wb.reshape(KH * KW * Cin, Cout)
    bf = b.astype(jnp.float32).reshape(1, Cout)

    args = [bands, wf, bf]
    if has_skip:
        s = skip.astype(jnp.bfloat16)
        if HOp != HO:
            s = jnp.pad(s, ((0, 0), (0, HOp - HO), (0, 0), (0, 0)))
        args.append(s)

    _, vmem_limit, _ = _tpu_vmem_config()
    fn = _conv_call(N, n_t, TH, Wp, Cin, Cout, KH, KW, bool(act), has_skip,
                    split_dy, vmem_limit)
    y = fn(*args)
    return y[:, :HO] if HOp != HO else y


# ----------------------------------------------------------------------------
# Conv2d / ConvTranspose2d wrappers (stride-2 + deconv use phase decomposition)
# ----------------------------------------------------------------------------
def _xla_conv(x, w, b, *, stride, pad, act, skip):
    """XLA fallback for channel-starved layers (Cin<8 or Cout<8)."""
    y = lax.conv_general_dilated(
        x.astype(jnp.bfloat16), w.astype(jnp.bfloat16),
        window_strides=(stride, stride), padding=((pad, pad), (pad, pad)),
        dimension_numbers=('NHWC', 'HWIO', 'NHWC'),
        preferred_element_type=jnp.float32)
    y = y + b.astype(jnp.float32)
    if act:
        y = jnp.maximum(y, 0.0)
    if skip is not None:
        y = y + skip.astype(jnp.float32)
    return y.astype(jnp.bfloat16)


def _stride2_weight(w):
    """5x5 weight -> equivalent 3x3 weight over the 4 stride-2 input phases."""
    KH, KW, Cin, Cout = w.shape
    wz = jnp.pad(w, ((0, 1), (0, 1), (0, 0), (0, 0)))        # (6, 6, Cin, Cout)
    wr = wz.reshape(3, 2, 3, 2, Cin, Cout)                   # [qy, pa, qx, pb]
    wr = jnp.transpose(wr, (0, 2, 1, 3, 4, 5))               # [qy, qx, pa, pb]
    return wr.reshape(3, 3, 4 * Cin, Cout)


def conv2d(x, w, b, *, stride=1, act=False, skip=None, tile_rows=None):
    """nn.Conv2d(k, padding=(k-1)//2, stride) equivalent on NHWC input."""
    KH, KW, Cin, Cout = w.shape
    pad = (KH - 1) // 2
    if min(Cin, Cout) < 8:
        # RGB-in / RGB-out layers: Pallas only adds masked-store + 3/256-lane
        # MXU overhead; let XLA handle them.
        return _xla_conv(x, w, b, stride=stride, pad=pad, act=act, skip=skip)
    if stride == 1:
        return pallas_conv(x, w, b, pad=pad, act=act, skip=skip,
                           tile_rows=tile_rows)
    assert stride == 2 and KH == 5
    # Phase decomposition: 4 input phases on the channel axis + equivalent 3x3
    # weight, so only the required outputs are computed.
    # TODO(synk): the pa/pb phase split is still a wrapper-side relayout;
    # strided in-kernel reads from the full-res band would save an HBM pass.
    H, W = x.shape[1], x.shape[2]
    xp = jnp.pad(x, ((0, 0),
                     (pad, pad + (H + 2 * pad) % 2),
                     (pad, pad + (W + 2 * pad) % 2),
                     (0, 0)))
    phases = [xp[:, pa::2, pb::2, :] for pa in (0, 1) for pb in (0, 1)]
    xph = jnp.concatenate(phases, axis=-1)          # (N, ~H/2, ~W/2, 4*Cin)
    wq = _stride2_weight(w)
    return pallas_conv(xph, wq, b, pad=0, act=act, skip=skip,
                       tile_rows=tile_rows)


def _deconv_weight(w, b):
    """3x3 transposed-conv weight -> (2, 2, Cin, 4*Cout) phase-combined weight."""
    Cin, Cout = w.shape[2], w.shape[3]
    z = jnp.zeros((Cin, Cout), w.dtype)
    taps = lambda a, bb, c, d: jnp.stack(
        [jnp.stack([a, bb], axis=0), jnp.stack([c, d], axis=0)], axis=0)
    g00 = taps(w[1, 1], z, z, z)                     # out[2a,   2b  ]
    g01 = taps(w[1, 0], w[1, 2], z, z)               # out[2a,   2b+1]
    g10 = taps(w[0, 1], z, w[2, 1], z)               # out[2a+1, 2b  ]
    g11 = taps(w[0, 0], w[0, 2], w[2, 0], w[2, 2])   # out[2a+1, 2b+1]
    wc = jnp.concatenate([g00, g01, g10, g11], axis=-1)
    return wc, jnp.tile(b, 4)


def deconv2d(x, w, b, *, act=True, tile_rows=None):
    """nn.ConvTranspose2d(k=3, stride=2, padding=1, output_padding=1) equiv.

    Sub-pixel decomposition: one 2x2 conv producing the 4 output phases as
    channel groups, interleaved back to (2H, 2W) in the wrapper.
    TODO(synk): loading real PyTorch ConvTranspose2d weights would need an
    explicit flip + IO-transpose into this convention (synthetic init matches).
    TODO(synk): the phase interleave is a wrapper-side relayout; keeping
    activations phase-grouped into the next conv would save an HBM pass."""
    N, H, W, Cin = x.shape
    Cout = w.shape[-1]
    xq = jnp.pad(x, ((0, 0), (0, 1), (0, 1), (0, 0)))        # bottom/right halo
    wq, bq = _deconv_weight(w, b)
    y = pallas_conv(xq, wq, bq, pad=0, act=act, tile_rows=tile_rows)
    y = y.reshape(N, H, W, 2, 2, Cout)
    y = jnp.transpose(y, (0, 1, 3, 2, 4, 5)).reshape(N, 2 * H, 2 * W, Cout)
    return y


# ----------------------------------------------------------------------------
# Block application (Conv / ResidualBlock / Deconv stacks)
# ----------------------------------------------------------------------------
def apply_rb(p, x):
    y = conv2d(x, p['c1']['w'], p['c1']['b'], act=True)
    return conv2d(y, p['c2']['w'], p['c2']['b'], act=False, skip=x)  # fused x + y


def apply_head_block(p, x, stride=1):
    y = conv2d(x, p['head']['w'], p['head']['b'], stride=stride, act=True)
    for rb in p['rbs']:
        y = apply_rb(rb, y)
    return y


def apply_dec_block(p, x):
    for rb in p['rbs']:
        x = apply_rb(rb, x)
    return deconv2d(x, p['deconv']['w'], p['deconv']['b'], act=True)


def apply_rbs(p, x):
    for rb in p['rbs']:
        x = apply_rb(rb, x)
    return x


# ----------------------------------------------------------------------------
# Wiener deblur (plain JAX glue: FFT, median pool) — no Pallas FFT primitive.
# ----------------------------------------------------------------------------
def _median3x3_reflect(x):          # x: (N, C, H, W)
    xp = jnp.pad(x, ((0, 0), (0, 0), (1, 1), (1, 1)), mode='reflect')
    H, W = x.shape[-2:]
    patches = jnp.stack([xp[..., i:i + H, j:j + W]
                         for i in range(3) for j in range(3)], axis=-1)
    return jnp.median(patches, axis=-1)


def wiener_filter_para(y):          # y: (N, C, H, W) -> NSR (N, C, 1, 1)
    med = _median3x3_reflect(y)
    diff = med - y
    num = y.shape[2] * y.shape[3]
    mean_n = jnp.sum(diff, axis=(2, 3), keepdims=True) / num
    var_n = jnp.sum((diff - mean_n) ** 2, axis=(2, 3), keepdims=True) / (num - 1)
    mean_i = jnp.sum(y, axis=(2, 3), keepdims=True) / num
    var_s2 = (jnp.sum((y - mean_i) ** 2, axis=(2, 3), keepdims=True) / (num - 1)) ** 0.5
    return var_n / var_s2 * 8.0 / 3.0 / 10.0


def p2o(psf, shape):
    kh, kw = psf.shape[-2], psf.shape[-1]
    otf = jnp.zeros(psf.shape[:-2] + tuple(shape), psf.dtype)
    otf = otf.at[..., :kh, :kw].set(psf)
    otf = jnp.roll(otf, shift=(-(kh // 2), -(kw // 2)), axis=(-2, -1))
    # TODO(synk): original p2o zeroes tiny imaginary FFT parts below an
    # n_ops*eps threshold; omitted (numerically negligible).
    return jnp.fft.fft2(otf)


def wiener_deblur(inputs, kernel):
    """inputs: (N, C, H, W); kernel: (N, 1, kh, kw)."""
    H, W = inputs.shape[-2:]
    fk = p2o(kernel, (H, W))
    fk2 = jnp.abs(fk) ** 2
    snr = wiener_filter_para(inputs)
    fy = jnp.fft.fft2(inputs)
    out = jnp.fft.ifft2(jnp.conj(fk) * fy / (fk2 + snr))
    return jnp.real(out)


# ----------------------------------------------------------------------------
# Torch-style bicubic interpolation (a = -0.75), via precomputed matrices
# ----------------------------------------------------------------------------
@functools.lru_cache(maxsize=None)
def _interp_matrix(in_size, out_size, align_corners):
    A = -0.75

    def W1(x):
        return ((A + 2) * x - (A + 3)) * x * x + 1

    def W2(x):
        return ((A * x - 5 * A) * x + 8 * A) * x - 4 * A

    i = np.arange(out_size, dtype=np.float64)
    if align_corners:
        src = i * (in_size - 1) / (out_size - 1) if out_size > 1 else np.zeros_like(i)
    else:
        src = (i + 0.5) * (in_size / out_size) - 0.5
    i0 = np.floor(src).astype(np.int64)
    t = src - i0
    ws = np.stack([W2(t + 1), W1(t), W1(1 - t), W2(2 - t)], axis=1)  # (out, 4)
    M = np.zeros((out_size, in_size), dtype=np.float64)
    for o in range(out_size):
        for j, off in enumerate((-1, 0, 1, 2)):
            idx = min(max(int(i0[o]) + off, 0), in_size - 1)
            M[o, idx] += ws[o, j]
    return jnp.asarray(M, jnp.float32)


def bicubic_resize(x, hi, wi, align_corners):     # x: NHWC, returns f32
    x = x.astype(jnp.float32)
    _, H, W, _ = x.shape
    Mh = _interp_matrix(H, hi, align_corners)
    Mw = _interp_matrix(W, wi, align_corners)
    y = jnp.einsum('oh,nhwc->nowc', Mh, x)
    y = jnp.einsum('pw,nowc->nopc', Mw, y)
    return y


# ----------------------------------------------------------------------------
# Parameter init (deterministic, synthetic)
# ----------------------------------------------------------------------------
def make_conv(key, cin, cout, k):
    kw_, kb_ = jax.random.split(key)
    w = jax.random.normal(kw_, (k, k, cin, cout), jnp.float32) / np.sqrt(k * k * cin)
    b = jax.random.normal(kb_, (cout,), jnp.float32) * 0.01
    return {'w': w, 'b': b}


def make_rb(key, c, k=5):
    k1, k2 = jax.random.split(key)
    return {'c1': make_conv(k1, c, c, k), 'c2': make_conv(k2, c, c, k)}


def make_head(key, cin, cout, k=5):
    ks = jax.random.split(key, 4)
    return {'head': make_conv(ks[0], cin, cout, k),
            'rbs': [make_rb(kk, cout, k) for kk in ks[1:]]}


def make_dec(key, cin, cout):
    ks = jax.random.split(key, 4)
    return {'rbs': [make_rb(kk, cin, 5) for kk in ks[:3]],
            'deconv': make_conv(ks[3], cin, cout, 3)}


def make_rbs(key, c, n):
    ks = jax.random.split(key, n)
    return {'rbs': [make_rb(kk, c, 5) for kk in ks]}


def init_params(key, in_channels, out_channels):
    nf1, nf = 16, 32
    keys = iter(jax.random.split(key, 64))
    nk = lambda: next(keys)
    P = {'feature': make_head(nk(), in_channels, nf1)}
    for c in ('1', '2'):
        P[f'in_block_cascaded_{c}_1'] = make_head(nk(), nf1, nf)
        P[f'in_block_cascaded_{c}_2'] = make_head(nk(), nf1 + nf, nf)
        P[f'encoder_first_cascaded_{c}'] = make_head(nk(), nf, nf * 2)
        P[f'encoder_second_cascaded_{c}'] = make_head(nk(), nf * 2, nf * 4)
        P[f'encoder_third_cascaded_{c}'] = make_head(nk(), nf * 4, nf * 8)
        P[f'decoder_third_cascaded_{c}'] = make_dec(nk(), nf * 8, nf * 4)
        P[f'decoder_second_cascaded_{c}'] = make_dec(nk(), nf * 4, nf * 2)
        P[f'decoder_first_cascaded_{c}'] = make_dec(nk(), nf * 2, nf)
        P[f'out_block_cascaded_{c}'] = make_rbs(nk(), nf, 3)
        P[f'out_block_cascaded_{c}_1'] = make_conv(nk(), nf, nf1, 5)
        P[f'out_block_cascaded_{c}_2'] = make_conv(nk(), nf, nf1 + nf, 5)
    P['inBlock1'] = make_head(nk(), nf1, nf)
    P['inBlock2'] = make_head(nk(), nf1 + nf, nf)
    P['encoder_first'] = make_head(nk(), nf, nf * 2)
    P['encoder_second'] = make_head(nk(), nf * 2, nf * 4)
    P['decoder_second'] = make_dec(nk(), nf * 4, nf * 2)
    P['decoder_first'] = make_dec(nk(), nf * 2, nf)
    P['OutBlock'] = make_rbs(nk(), nf, 3)
    P['OutBlock2'] = make_conv(nk(), nf, out_channels, 5)
    return P


# ----------------------------------------------------------------------------
# DWDN+ forward
# ----------------------------------------------------------------------------
def _cascade(P, casc, level_key, inp_all, hi, wi):
    fs_in = apply_head_block(P[f'in_block_cascaded_{casc}_{level_key}'], inp_all)
    e1 = apply_head_block(P[f'encoder_first_cascaded_{casc}'], fs_in, stride=2)
    e2 = apply_head_block(P[f'encoder_second_cascaded_{casc}'], e1, stride=2)
    e3 = apply_head_block(P[f'encoder_third_cascaded_{casc}'], e2, stride=2)
    d3 = apply_dec_block(P[f'decoder_third_cascaded_{casc}'], e3)
    d3 = d3[:, :e2.shape[1], :e2.shape[2], :]
    d2 = apply_dec_block(P[f'decoder_second_cascaded_{casc}'], d3 + e2)
    d2 = d2[:, :e1.shape[1], :e1.shape[2], :]
    d1 = apply_dec_block(P[f'decoder_first_cascaded_{casc}'], d2 + e1)
    d1 = d1[:, :hi, :wi, :]
    o1 = apply_rbs(P[f'out_block_cascaded_{casc}'], d1 + fs_in)
    pout = P[f'out_block_cascaded_{casc}_{level_key}']
    # fused: inp_all + conv(o1)
    return conv2d(o1, pout['w'], pout['b'], act=False, skip=inp_all)


def dwdn_plus_forward(P, x_nchw, k):
    N, C, H, W = x_nchw.shape
    kh, kw = k.shape[2], k.shape[3]

    x = jnp.transpose(x_nchw, (0, 2, 3, 1))                 # NHWC
    x_feature = apply_head_block(P['feature'], x)           # (N,H,W,16) bf16

    # Wiener deblurring of the feature channels (NCHW, f32 FFT).  The padding
    # / crop axis ordering intentionally mirrors the PyTorch reference,
    # including its kh/kw convention.
    xf = jnp.transpose(x_feature.astype(jnp.float32), (0, 3, 1, 2))
    xf_pad = jnp.pad(xf, ((0, 0), (0, 0), (kw, kw), (kh, kh)), mode='edge')
    clear = wiener_deblur(xf_pad, k)
    clear = clear[:, :, kw:-kw, kh:-kh]
    clear_features = jnp.transpose(clear, (0, 2, 3, 1))     # NHWC, f32

    n_levels, scale = 2, 0.5
    input_pre, out = None, None
    for level in range(n_levels):
        per = scale ** (n_levels - level - 1)
        hi, wi = int(round(H * per)), int(round(W * per))
        input_clear = bicubic_resize(clear_features, hi, wi, align_corners=True)
        if level == 0:
            inp_all = input_clear.astype(jnp.bfloat16)
            lvl_key, inblock_key = '1', 'inBlock1'
        else:
            input_pred = bicubic_resize(input_pre, hi, wi, align_corners=False)
            inp_all = jnp.concatenate([input_clear, input_pred],
                                      axis=-1).astype(jnp.bfloat16)
            lvl_key, inblock_key = '2', 'inBlock2'

        fs1 = _cascade(P, '1', lvl_key, inp_all, hi, wi)
        fs2 = _cascade(P, '2', lvl_key, fs1, hi, wi)

        init_input = apply_head_block(P[inblock_key], fs2)
        fe1 = apply_head_block(P['encoder_first'], init_input, stride=2)
        fe2 = apply_head_block(P['encoder_second'], fe1, stride=2)
        fd2 = apply_dec_block(P['decoder_second'], fe2)
        fd2 = fd2[:, :fe1.shape[1], :fe1.shape[2], :]
        fd1 = apply_dec_block(P['decoder_first'], fd2 + fe1)
        fd1 = fd1[:, :hi, :wi, :]
        input_pre = apply_rbs(P['OutBlock'], fd1 + init_input)
        out = conv2d(input_pre, P['OutBlock2']['w'], P['OutBlock2']['b'], act=False)

    return jnp.transpose(out, (0, 3, 1, 2)).astype(jnp.float32)   # NCHW, f32


# ----------------------------------------------------------------------------
# XLA references for the self-checks
# ----------------------------------------------------------------------------
def _conv_ref(x, w, b, *, stride=1, act=False, skip=None):
    pad = (w.shape[0] - 1) // 2
    y = lax.conv_general_dilated(
        x.astype(jnp.float32), w.astype(jnp.float32),
        window_strides=(stride, stride), padding=((pad, pad), (pad, pad)),
        dimension_numbers=('NHWC', 'HWIO', 'NHWC'),
        precision=lax.Precision.HIGHEST)
    y = y + b.astype(jnp.float32)
    if act:
        y = jnp.maximum(y, 0.0)
    if skip is not None:
        y = y + skip.astype(jnp.float32)
    return y


def _deconv_ref(x, w, b, act=True):
    N, H, W, C = x.shape
    up = jnp.zeros((N, 2 * H - 1, 2 * W - 1, C), jnp.float32)
    up = up.at[:, ::2, ::2, :].set(x.astype(jnp.float32))
    upp = jnp.pad(up, ((0, 0), (1, 2), (1, 2), (0, 0)))
    y = lax.conv_general_dilated(upp, w.astype(jnp.float32), (1, 1), 'VALID',
                                 dimension_numbers=('NHWC', 'HWIO', 'NHWC'),
                                 precision=lax.Precision.HIGHEST)
    y = y + b.astype(jnp.float32)
    if act:
        y = jnp.maximum(y, 0.0)
    return y


def _assert_close(got, want, name):
    got = jnp.asarray(got, jnp.float32)
    want = jnp.asarray(want, jnp.float32)
    err = float(jnp.max(jnp.abs(got - want)))
    tol = 0.05 * (1.0 + float(jnp.max(jnp.abs(want))))
    assert err < tol, f"{name}: max|err|={err:.4f} tol={tol:.4f}"


# ----------------------------------------------------------------------------
if __name__ == "__main__":
    # ---- self-check the Pallas conv paths against XLA (bf16 tolerance) ----
    ck = jax.random.split(jax.random.PRNGKey(1), 12)
    xs = jax.random.normal(ck[0], (2, 20, 20, 16), jnp.float32)
    w1 = jax.random.normal(ck[1], (5, 5, 16, 32), jnp.float32) / np.sqrt(25 * 16)
    b1 = jax.random.normal(ck[2], (32,), jnp.float32) * 0.01
    sk = jax.random.normal(ck[3], (2, 20, 20, 32), jnp.float32)
    _assert_close(conv2d(xs, w1, b1, act=False, skip=sk, tile_rows=8),
                  _conv_ref(xs, w1, b1, act=False, skip=sk),
                  "5x5 conv + fused skip (row-tiled, big-K path)")
    _assert_close(conv2d(xs, w1, b1, stride=2, act=True),
                  _conv_ref(xs, w1, b1, stride=2, act=True),
                  "5x5 stride-2 conv (phase-decomposed)")
    x2 = jax.random.normal(ck[4], (2, 12, 12, 64), jnp.float32)
    w2 = jax.random.normal(ck[5], (5, 5, 64, 64), jnp.float32) / np.sqrt(25 * 64)
    b2 = jax.random.normal(ck[6], (64,), jnp.float32) * 0.01
    _assert_close(conv2d(x2, w2, b2, act=True, tile_rows=4),
                  _conv_ref(x2, w2, b2, act=True),
                  "5x5 conv, large Cin (dy-split path, row-tiled)")
    xd = jax.random.normal(ck[7], (2, 10, 10, 32), jnp.float32)
    wd = jax.random.normal(ck[8], (3, 3, 32, 16), jnp.float32) / np.sqrt(9 * 32)
    bd = jax.random.normal(ck[9], (16,), jnp.float32) * 0.01
    _assert_close(deconv2d(xd, wd, bd, act=True),
                  _deconv_ref(xd, wd, bd, act=True),
                  "3x3 s2 transposed conv (sub-pixel)")

    # ---- full DWDN+ forward under a single jax.jit ----
    key = jax.random.PRNGKey(0)
    k1, k2, k3 = jax.random.split(key, 3)
    N, C, H, W = 2, 3, 16, 16
    x = jax.random.normal(k1, (N, C, H, W), jnp.float32)
    blur_k = jax.random.uniform(k2, (N, 1, 5, 5), jnp.float32) + 0.1
    blur_k = blur_k / jnp.sum(blur_k, axis=(2, 3), keepdims=True)
    params = init_params(k3, C, C)

    forward = jax.jit(dwdn_plus_forward)
    out = jax.block_until_ready(forward(params, x, blur_k))
    assert out.shape == (N, C, H, W), out.shape
    assert bool(jnp.all(jnp.isfinite(out)))
    print("KERNEL_OK")
</pallas_src>

<mosaic_0001>
module attributes {stable_mosaic.version = 11 : i64} {
  func.func @kernel(%arg0: i32, %arg1: i32, %arg2: memref<1x12x24x16xbf16, #tpu.memory_space<vmem>>, %arg3: memref<400x32xbf16, #tpu.memory_space<vmem>>, %arg4: memref<1x32xf32, #tpu.memory_space<vmem>>, %arg5: memref<1x8x20x32xbf16, #tpu.memory_space<vmem>>, %arg6: memref<1x8x20x32xbf16, #tpu.memory_space<vmem>>, %arg7: memref<160x400xbf16, #tpu.memory_space<vmem>>) attributes {dimension_semantics = [#tpu.dimension_semantics<parallel>, #tpu.dimension_semantics<parallel>], iteration_bounds = array<i64: 2, 3>, scalar_prefetch = 0 : i64, scratch_operands = 1 : i64, tpu.core_type = #tpu.core_type<tc>, window_params = [{transform_indices = @transform_0, window_bounds = array<i64: 1, 12, 24, 16>}, {pipeline_mode = #tpu.pipeline_mode<synchronous>, transform_indices = @transform_1, window_bounds = array<i64: 400, 32>}, {pipeline_mode = #tpu.pipeline_mode<synchronous>, transform_indices = @transform_2, window_bounds = array<i64: 1, 32>}, {transform_indices = @transform_3, window_bounds = array<i64: 1, 8, 20, 32>}, {transform_indices = @transform_4, window_bounds = array<i64: 1, 8, 20, 32>}]} {
    %c0 = arith.constant 0 : index
    %c0_0 = arith.constant 0 : index
    %c0_1 = arith.constant 0 : index
    %c0_2 = arith.constant 0 : index
    %0 = vector.load %arg2[%c0, %c0_0, %c0_1, %c0_2] : memref<1x12x24x16xbf16, #tpu.memory_space<vmem>>, vector<1x8x20x16xbf16>
    %1 = vector.shape_cast %0 : vector<1x8x20x16xbf16> to vector<8x20x16xbf16>
    %2 = vector.shape_cast %1 : vector<8x20x16xbf16> to vector<160x16xbf16>
    %c0_3 = arith.constant 0 : index
    %c0_4 = arith.constant 0 : index
    %3 = vector.load %arg7[%c0_3, %c0_4] : memref<160x400xbf16, #tpu.memory_space<vmem>>, vector<160x16xbf16>
    tpu.vector_store %arg7[%c0_3, %c0_4], %2 {strides = array<i32>} : memref<160x400xbf16, #tpu.memory_space<vmem>>, vector<160x16xbf16>,
    %c0_5 = arith.constant 0 : index
    %c0_6 = arith.constant 0 : index
    %c1 = arith.constant 1 : index
    %c0_7 = arith.constant 0 : index
    %4 = vector.load %arg2[%c0_5, %c0_6, %c1, %c0_7] : memref<1x12x24x16xbf16, #tpu.memory_space<vmem>>, vector<1x8x20x16xbf16>
    %5 = vector.shape_cast %4 : vector<1x8x20x16xbf16> to vector<8x20x16xbf16>
    %6 = vector.shape_cast %5 : vector<8x20x16xbf16> to vector<160x16xbf16>
    %c0_8 = arith.constant 0 : index
    %c16 = arith.constant 16 : index
    %7 = vector.load %arg7[%c0_8, %c16] : memref<160x400xbf16, #tpu.memory_space<vmem>>, vector<160x16xbf16>
    tpu.vector_store %arg7[%c0_8, %c16], %6 {strides = array<i32>} : memref<160x400xbf16, #tpu.memory_space<vmem>>, vector<160x16xbf16>,
    %c0_9 = arith.constant 0 : index
    %c0_10 = arith.constant 0 : index
    %c2 = arith.constant 2 : index
    %c0_11 = arith.constant 0 : index
    %8 = vector.load %arg2[%c0_9, %c0_10, %c2, %c0_11] : memref<1x12x24x16xbf16, #tpu.memory_space<vmem>>, vector<1x8x20x16xbf16>
    %9 = vector.shape_cast %8 : vector<1x8x20x16xbf16> to vector<8x20x16xbf16>
    %10 = vector.shape_cast %9 : vector<8x20x16xbf16> to vector<160x16xbf16>
    %c0_12 = arith.constant 0 : index
    %c32 = arith.constant 32 : index
    %11 = vector.load %arg7[%c0_12, %c32] : memref<160x400xbf16, #tpu.memory_space<vmem>>, vector<160x16xbf16>
    tpu.vector_store %arg7[%c0_12, %c32], %10 {strides = array<i32>} : memref<160x400xbf16, #tpu.memory_space<vmem>>, vector<160x16xbf16>,
    %c0_13 = arith.constant 0 : index
    %c0_14 = arith.constant 0 : index
    %c3 = arith.constant 3 : index
    %c0_15 = arith.constant 0 : index
    %12 = vector.load %arg2[%c0_13, %c0_14, %c3, %c0_15] : memref<1x12x24x16xbf16, #tpu.memory_space<vmem>>, vector<1x8x20x16xbf16>
    %13 = vector.shape_cast %12 : vector<1x8x20x16xbf16> to vector<8x20x16xbf16>
    %14 = vector.shape_cast %13 : vector<8x20x16xbf16> to vector<160x16xbf16>
    %c0_16 = arith.constant 0 : index
    %c48 = arith.constant 48 : index
    %15 = vector.load %arg7[%c0_16, %c48] : memref<160x400xbf16, #tpu.memory_space<vmem>>, vector<160x16xbf16>
    tpu.vector_store %arg7[%c0_16, %c48], %14 {strides = array<i32>} : memref<160x400xbf16, #tpu.memory_space<vmem>>, vector<160x16xbf16>,
    %c0_17 = arith.constant 0 : index
    %c0_18 = arith.constant 0 : index
    %c4 = arith.constant 4 : index
    %c0_19 = arith.constant 0 : index
    %16 = vector.load %arg2[%c0_17, %c0_18, %c4, %c0_19] : memref<1x12x24x16xbf16, #tpu.memory_space<vmem>>, vector<1x8x20x16xbf16>
    %17 = vector.shape_cast %16 : vector<1x8x20x16xbf16> to vector<8x20x16xbf16>
    %18 = vector.shape_cast %17 : vector<8x20x16xbf16> to vector<160x16xbf16>
    %c0_20 = arith.constant 0 : index
    %c64 = arith.constant 64 : index
    %19 = vector.load %arg7[%c0_20, %c64] : memref<160x400xbf16, #tpu.memory_space<vmem>>, vector<160x16xbf16>
    tpu.vector_store %arg7[%c0_20, %c64], %18 {strides = array<i32>} : memref<160x400xbf16, #tpu.memory_space<vmem>>, vector<160x16xbf16>,
    %c0_21 = arith.constant 0 : index
    %c1_22 = arith.constant 1 : index
    %c0_23 = arith.constant 0 : index
    %c0_24 = arith.constant 0 : index
    %20 = vector.load %arg2[%c0_21, %c1_22, %c0_23, %c0_24] : memref<1x12x24x16xbf16, #tpu.memory_space<vmem>>, vector<1x8x20x16xbf16>
    %21 = vector.shape_cast %20 : vector<1x8x20x16xbf16> to vector<8x20x16xbf16>
    %22 = vector.shape_cast %21 : vector<8x20x16xbf16> to vector<160x16xbf16>
    %c0_25 = arith.constant 0 : index
    %c80 = arith.constant 80 : index
    %23 = vector.load %arg7[%c0_25, %c80] : memref<160x400xbf16, #tpu.memory_space<vmem>>, vector<160x16xbf16>
    tpu.vector_store %arg7[%c0_25, %c80], %22 {strides = array<i32>} : memref<160x400xbf16, #tpu.memory_space<vmem>>, vector<160x16xbf16>,
    %c0_26 = arith.constant 0 : index
    %c1_27 = arith.constant 1 : index
    %c1_28 = arith.constant 1 : index
    %c0_29 = arith.constant 0 : index
    %24 = vector.load %arg2[%c0_26, %c1_27, %c1_28, %c0_29] : memref<1x12x24x16xbf16, #tpu.memory_space<vmem>>, vector<1x8x20x16xbf16>
    %25 = vector.shape_cast %24 : vector<1x8x20x16xbf16> to vector<8x20x16xbf16>
    %26 = vector.shape_cast %25 : vector<8x20x16xbf16> to vector<160x16xbf16>
    %c0_30 = arith.constant 0 : index
    %c96 = arith.constant 96 : index
    %27 = vector.load %arg7[%c0_30, %c96] : memref<160x400xbf16, #tpu.memory_space<vmem>>, vector<160x16xbf16>
    tpu.vector_store %arg7[%c0_30, %c96], %26 {strides = array<i32>} : memref<160x400xbf16, #tpu.memory_space<vmem>>, vector<160x16xbf16>,
    %c0_31 = arith.constant 0 : index
    %c1_32 = arith.constant 1 : index
    %c2_33 = arith.constant 2 : index
    %c0_34 = arith.constant 0 : index
    %28 = vector.load %arg2[%c0_31, %c1_32, %c2_33, %c0_34] : memref<1x12x24x16xbf16, #tpu.memory_space<vmem>>, vector<1x8x20x16xbf16>
    %29 = vector.shape_cast %28 : vector<1x8x20x16xbf16> to vector<8x20x16xbf16>
    %30 = vector.shape_cast %29 : vector<8x20x16xbf16> to vector<160x16xbf16>
    %c0_35 = arith.constant 0 : index
    %c112 = arith.constant 112 : index
    %31 = vector.load %arg7[%c0_35, %c112] : memref<160x400xbf16, #tpu.memory_space<vmem>>, vector<160x16xbf16>
    tpu.vector_store %arg7[%c0_35, %c112], %30 {strides = array<i32>} : memref<160x400xbf16, #tpu.memory_space<vmem>>, vector<160x16xbf16>,
    %c0_36 = arith.constant 0 : index
    %c1_37 = arith.constant 1 : index
    %c3_38 = arith.constant 3 : index
    %c0_39 = arith.constant 0 : index
    %32 = vector.load %arg2[%c0_36, %c1_37, %c3_38, %c0_39] : memref<1x12x24x16xbf16, #tpu.memory_space<vmem>>, vector<1x8x20x16xbf16>
    %33 = vector.shape_cast %32 : vector<1x8x20x16xbf16> to vector<8x20x16xbf16>
    %34 = vector.shape_cast %33 : vector<8x20x16xbf16> to vector<160x16xbf16>
    %c0_40 = arith.constant 0 : index
    %c128 = arith.constant 128 : index
    %35 = vector.load %arg7[%c0_40, %c128] : memref<160x400xbf16, #tpu.memory_space<vmem>>, vector<160x16xbf16>
    tpu.vector_store %arg7[%c0_40, %c128], %34 {strides = array<i32>} : memref<160x400xbf16, #tpu.memory_space<vmem>>, vector<160x16xbf16>,
    %c0_41 = arith.constant 0 : index
    %c1_42 = arith.constant 1 : index
    %c4_43 = arith.constant 4 : index
    %c0_44 = arith.constant 0 : index
    %36 = vector.load %arg2[%c0_41, %c1_42, %c4_43, %c0_44] : memref<1x12x24x16xbf16, #tpu.memory_space<vmem>>, vector<1x8x20x16xbf16>
    %37 = vector.shape_cast %36 : vector<1x8x20x16xbf16> to vector<8x20x16xbf16>
    %38 = vector.shape_cast %37 : vector<8x20x16xbf16> to vector<160x16xbf16>
    %c0_45 = arith.constant 0 : index
    %c144 = arith.constant 144 : index
    %39 = vector.load %arg7[%c0_45, %c144] : memref<160x400xbf16, #tpu.memory_space<vmem>>, vector<160x16xbf16>
    tpu.vector_store %arg7[%c0_45, %c144], %38 {strides = array<i32>} : memref<160x400xbf16, #tpu.memory_space<vmem>>, vector<160x16xbf16>,
    %c0_46 = arith.constant 0 : index
    %c2_47 = arith.constant 2 : index
    %c0_48 = arith.constant 0 : index
    %c0_49 = arith.constant 0 : index
    %40 = vector.load %arg2[%c0_46, %c2_47, %c0_48, %c0_49] : memref<1x12x24x16xbf16, #tpu.memory_space<vmem>>, vector<1x8x20x16xbf16>
    %41 = vector.shape_cast %40 : vector<1x8x20x16xbf16> to vector<8x20x16xbf16>
    %42 = vector.shape_cast %41 : vector<8x20x16xbf16> to vector<160x16xbf16>
    %c0_50 = arith.constant 0 : index
    %c160 = arith.constant 160 : index
    %43 = vector.load %arg7[%c0_50, %c160] : memref<160x400xbf16, #tpu.memory_space<vmem>>, vector<160x16xbf16>
    tpu.vector_store %arg7[%c0_50, %c160], %42 {strides = array<i32>} : memref<160x400xbf16, #tpu.memory_space<vmem>>, vector<160x16xbf16>,
    %c0_51 = arith.constant 0 : index
    %c2_52 = arith.constant 2 : index
    %c1_53 = arith.constant 1 : index
    %c0_54 = arith.constant 0 : index
    %44 = vector.load %arg2[%c0_51, %c2_52, %c1_53, %c0_54] : memref<1x12x24x16xbf16, #tpu.memory_space<vmem>>, vector<1x8x20x16xbf16>
    %45 = vector.shape_cast %44 : vector<1x8x20x16xbf16> to vector<8x20x16xbf16>
    %46 = vector.shape_cast %45 : vector<8x20x16xbf16> to vector<160x16xbf16>
    %c0_55 = arith.constant 0 : index
    %c176 = arith.constant 176 : index
    %47 = vector.load %arg7[%c0_55, %c176] : memref<160x400xbf16, #tpu.memory_space<vmem>>, vector<160x16xbf16>
    tpu.vector_store %arg7[%c0_55, %c176], %46 {strides = array<i32>} : memref<160x400xbf16, #tpu.memory_space<vmem>>, vector<160x16xbf16>,
    %c0_56 = arith.constant 0 : index
    %c2_57 = arith.constant 2 : index
    %c2_58 = arith.constant 2 : index
    %c0_59 = arith.constant 0 : index
    %48 = vector.load %arg2[%c0_56, %c2_57, %c2_58, %c0_59] : memref<1x12x24x16xbf16, #tpu.memory_space<vmem>>, vector<1x8x20x16xbf16>
    %49 = vector.shape_cast %48 : vector<1x8x20x16xbf16> to vector<8x20x16xbf16>
    %50 = vector.shape_cast %49 : vector<8x20x16xbf16> to vector<160x16xbf16>
    %c0_60 = arith.constant 0 : index
    %c192 = arith.constant 192 : index
    %51 = vector.load %arg7[%c0_60, %c192] : memref<160x400xbf16, #tpu.memory_space<vmem>>, vector<160x16xbf16>
    tpu.vector_store %arg7[%c0_60, %c192], %50 {strides = array<i32>} : memref<160x400xbf16, #tpu.memory_space<vmem>>, vector<160x16xbf16>,
    %c0_61 = arith.constant 0 : index
    %c2_62 = arith.constant 2 : index
    %c3_63 = arith.constant 3 : index
    %c0_64 = arith.constant 0 : index
    %52 = vector.load %arg2[%c0_61, %c2_62, %c3_63, %c0_64] : memref<1x12x24x16xbf16, #tpu.memory_space<vmem>>, vector<1x8x20x16xbf16>
    %53 = vector.shape_cast %52 : vector<1x8x20x16xbf16> to vector<8x20x16xbf16>
    %54 = vector.shape_cast %53 : vector<8x20x16xbf16> to vector<160x16xbf16>
    %c0_65 = arith.constant 0 : index
    %c208 = arith.constant 208 : index
    %55 = vector.load %arg7[%c0_65, %c208] : memref<160x400xbf16, #tpu.memory_space<vmem>>, vector<160x16xbf16>
    tpu.vector_store %arg7[%c0_65, %c208], %54 {strides = array<i32>} : memref<160x400xbf16, #tpu.memory_space<vmem>>, vector<160x16xbf16>,
    %c0_66 = arith.constant 0 : index
    %c2_67 = arith.constant 2 : index
    %c4_68 = arith.constant 4 : index
    %c0_69 = arith.constant 0 : index
    %56 = vector.load %arg2[%c0_66, %c2_67, %c4_68, %c0_69] : memref<1x12x24x16xbf16, #tpu.memory_space<vmem>>, vector<1x8x20x16xbf16>
    %57 = vector.shape_cast %56 : vector<1x8x20x16xbf16> to vector<8x20x16xbf16>
    %58 = vector.shape_cast %57 : vector<8x20x16xbf16> to vector<160x16xbf16>
    %c0_70 = arith.constant 0 : index
    %c224 = arith.constant 224 : index
    %59 = vector.load %arg7[%c0_70, %c224] : memref<160x400xbf16, #tpu.memory_space<vmem>>, vector<160x16xbf16>
    tpu.vector_store %arg7[%c0_70, %c224], %58 {strides = array<i32>} : memref<160x400xbf16, #tpu.memory_space<vmem>>, vector<160x16xbf16>,
    %c0_71 = arith.constant 0 : index
    %c3_72 = arith.constant 3 : index
    %c0_73 = arith.constant 0 : index
    %c0_74 = arith.constant 0 : index
    %60 = vector.load %arg2[%c0_71, %c3_72, %c0_73, %c0_74] : memref<1x12x24x16xbf16, #tpu.memory_space<vmem>>, vector<1x8x20x16xbf16>
    %61 = vector.shape_cast %60 : vector<1x8x20x16xbf16> to vector<8x20x16xbf16>
    %62 = vector.shape_cast %61 : vector<8x20x16xbf16> to vector<160x16xbf16>
    %c0_75 = arith.constant 0 : index
    %c240 = arith.constant 240 : index
    %63 = vector.load %arg7[%c0_75, %c240] : memref<160x400xbf16, #tpu.memory_space<vmem>>, vector<160x16xbf16>
    tpu.vector_store %arg7[%c0_75, %c240], %62 {strides = array<i32>} : memref<160x400xbf16, #tpu.memory_space<vmem>>, vector<160x16xbf16>,
    %c0_76 = arith.constant 0 : index
    %c3_77 = arith.constant 3 : index
    %c1_78 = arith.constant 1 : index
    %c0_79 = arith.constant 0 : index
    %64 = vector.load %arg2[%c0_76, %c3_77, %c1_78, %c0_79] : memref<1x12x24x16xbf16, #tpu.memory_space<vmem>>, vector<1x8x20x16xbf16>
    %65 = vector.shape_cast %64 : vector<1x8x20x16xbf16> to vector<8x20x16xbf16>
    %66 = vector.shape_cast %65 : vector<8x20x16xbf16> to vector<160x16xbf16>
    %c0_80 = arith.constant 0 : index
    %c256 = arith.constant 256 : index
    %67 = vector.load %arg7[%c0_80, %c256] : memref<160x400xbf16, #tpu.memory_space<vmem>>, vector<160x16xbf16>
    tpu.vector_store %arg7[%c0_80, %c256], %66 {strides = array<i32>} : memref<160x400xbf16, #tpu.memory_space<vmem>>, vector<160x16xbf16>,
    %c0_81 = arith.constant 0 : index
    %c3_82 = arith.constant 3 : index
    %c2_83 = arith.constant 2 : index
    %c0_84 = arith.constant 0 : index
    %68 = vector.load %arg2[%c0_81, %c3_82, %c2_83, %c0_84] : memref<1x12x24x16xbf16, #tpu.memory_space<vmem>>, vector<1x8x20x16xbf16>
    %69 = vector.shape_cast %68 : vector<1x8x20x16xbf16> to vector<8x20x16xbf16>
    %70 = vector.shape_cast %69 : vector<8x20x16xbf16> to vector<160x16xbf16>
    %c0_85 = arith.constant 0 : index
    %c272 = arith.constant 272 : index
    %71 = vector.load %arg7[%c0_85, %c272] : memref<160x400xbf16, #tpu.memory_space<vmem>>, vector<160x16xbf16>
    tpu.vector_store %arg7[%c0_85, %c272], %70 {strides = array<i32>} : memref<160x400xbf16, #tpu.memory_space<vmem>>, vector<160x16xbf16>,
    %c0_86 = arith.constant 0 : index
    %c3_87 = arith.constant 3 : index
    %c3_88 = arith.constant 3 : index
    %c0_89 = arith.constant 0 : index
    %72 = vector.load %arg2[%c0_86, %c3_87, %c3_88, %c0_89] : memref<1x12x24x16xbf16, #tpu.memory_space<vmem>>, vector<1x8x20x16xbf16>
    %73 = vector.shape_cast %72 : vector<1x8x20x16xbf16> to vector<8x20x16xbf16>
    %74 = vector.shape_cast %73 : vector<8x20x16xbf16> to vector<160x16xbf16>
    %c0_90 = arith.constant 0 : index
    %c288 = arith.constant 288 : index
    %75 = vector.load %arg7[%c0_90, %c288] : memref<160x400xbf16, #tpu.memory_space<vmem>>, vector<160x16xbf16>
    tpu.vector_store %arg7[%c0_90, %c288], %74 {strides = array<i32>} : memref<160x400xbf16, #tpu.memory_space<vmem>>, vector<160x16xbf16>,
    %c0_91 = arith.constant 0 : index
    %c3_92 = arith.constant 3 : index
    %c4_93 = arith.constant 4 : index
    %c0_94 = arith.constant 0 : index
    %76 = vector.load %arg2[%c0_91, %c3_92, %c4_93, %c0_94] : memref<1x12x24x16xbf16, #tpu.memory_space<vmem>>, vector<1x8x20x16xbf16>
    %77 = vector.shape_cast %76 : vector<1x8x20x16xbf16> to vector<8x20x16xbf16>
    %78 = vector.shape_cast %77 : vector<8x20x16xbf16> to vector<160x16xbf16>
    %c0_95 = arith.constant 0 : index
    %c304 = arith.constant 304 : index
    %79 = vector.load %arg7[%c0_95, %c304] : memref<160x400xbf16, #tpu.memory_space<vmem>>, vector<160x16xbf16>
    tpu.vector_store %arg7[%c0_95, %c304], %78 {strides = array<i32>} : memref<160x400xbf16, #tpu.memory_space<vmem>>, vector<160x16xbf16>,
    %c0_96 = arith.constant 0 : index
    %c4_97 = arith.constant 4 : index
    %c0_98 = arith.constant 0 : index
    %c0_99 = arith.constant 0 : index
    %80 = vector.load %arg2[%c0_96, %c4_97, %c0_98, %c0_99] : memref<1x12x24x16xbf16, #tpu.memory_space<vmem>>, vector<1x8x20x16xbf16>
    %81 = vector.shape_cast %80 : vector<1x8x20x16xbf16> to vector<8x20x16xbf16>
    %82 = vector.shape_cast %81 : vector<8x20x16xbf16> to vector<160x16xbf16>
    %c0_100 = arith.constant 0 : index
    %c320 = arith.constant 320 : index
    %83 = vector.load %arg7[%c0_100, %c320] : memref<160x400xbf16, #tpu.memory_space<vmem>>, vector<160x16xbf16>
    tpu.vector_store %arg7[%c0_100, %c320], %82 {strides = array<i32>} : memref<160x400xbf16, #tpu.memory_space<vmem>>, vector<160x16xbf16>,
    %c0_101 = arith.constant 0 : index
    %c4_102 = arith.constant 4 : index
    %c1_103 = arith.constant 1 : index
    %c0_104 = arith.constant 0 : index
    %84 = vector.load %arg2[%c0_101, %c4_102, %c1_103, %c0_104] : memref<1x12x24x16xbf16, #tpu.memory_space<vmem>>, vector<1x8x20x16xbf16>
    %85 = vector.shape_cast %84 : vector<1x8x20x16xbf16> to vector<8x20x16xbf16>
    %86 = vector.shape_cast %85 : vector<8x20x16xbf16> to vector<160x16xbf16>
    %c0_105 = arith.constant 0 : index
    %c336 = arith.constant 336 : index
    %87 = vector.load %arg7[%c0_105, %c336] : memref<160x400xbf16, #tpu.memory_space<vmem>>, vector<160x16xbf16>
    tpu.vector_store %arg7[%c0_105, %c336], %86 {strides = array<i32>} : memref<160x400xbf16, #tpu.memory_space<vmem>>, vector<160x16xbf16>,
    %c0_106 = arith.constant 0 : index
    %c4_107 = arith.constant 4 : index
    %c2_108 = arith.constant 2 : index
    %c0_109 = arith.constant 0 : index
    %88 = vector.load %arg2[%c0_106, %c4_107, %c2_108, %c0_109] : memref<1x12x24x16xbf16, #tpu.memory_space<vmem>>, vector<1x8x20x16xbf16>
    %89 = vector.shape_cast %88 : vector<1x8x20x16xbf16> to vector<8x20x16xbf16>
    %90 = vector.shape_cast %89 : vector<8x20x16xbf16> to vector<160x16xbf16>
    %c0_110 = arith.constant 0 : index
    %c352 = arith.constant 352 : index
    %91 = vector.load %arg7[%c0_110, %c352] : memref<160x400xbf16, #tpu.memory_space<vmem>>, vector<160x16xbf16>
    tpu.vector_store %arg7[%c0_110, %c352], %90 {strides = array<i32>} : memref<160x400xbf16, #tpu.memory_space<vmem>>, vector<160x16xbf16>,
    %c0_111 = arith.constant 0 : index
    %c4_112 = arith.constant 4 : index
    %c3_113 = arith.constant 3 : index
    %c0_114 = arith.constant 0 : index
    %92 = vector.load %arg2[%c0_111, %c4_112, %c3_113, %c0_114] : memref<1x12x24x16xbf16, #tpu.memory_space<vmem>>, vector<1x8x20x16xbf16>
    %93 = vector.shape_cast %92 : vector<1x8x20x16xbf16> to vector<8x20x16xbf16>
    %94 = vector.shape_cast %93 : vector<8x20x16xbf16> to vector<160x16xbf16>
    %c0_115 = arith.constant 0 : index
    %c368 = arith.constant 368 : index
    %95 = vector.load %arg7[%c0_115, %c368] : memref<160x400xbf16, #tpu.memory_space<vmem>>, vector<160x16xbf16>
    tpu.vector_store %arg7[%c0_115, %c368], %94 {strides = array<i32>} : memref<160x400xbf16, #tpu.memory_space<vmem>>, vector<160x16xbf16>,
    %c0_116 = arith.constant 0 : index
    %c4_117 = arith.constant 4 : index
    %c4_118 = arith.constant 4 : index
    %c0_119 = arith.constant 0 : index
    %96 = vector.load %arg2[%c0_116, %c4_117, %c4_118, %c0_119] : memref<1x12x24x16xbf16, #tpu.memory_space<vmem>>, vector<1x8x20x16xbf16>
    %97 = vector.shape_cast %96 : vector<1x8x20x16xbf16> to vector<8x20x16xbf16>
    %98 = vector.shape_cast %97 : vector<8x20x16xbf16> to vector<160x16xbf16>
    %c0_120 = arith.constant 0 : index
    %c384 = arith.constant 384 : index
    %99 = vector.load %arg7[%c0_120, %c384] : memref<160x400xbf16, #tpu.memory_space<vmem>>, vector<160x16xbf16>
    tpu.vector_store %arg7[%c0_120, %c384], %98 {strides = array<i32>} : memref<160x400xbf16, #tpu.memory_space<vmem>>, vector<160x16xbf16>,
    %c0_121 = arith.constant 0 : index
    %c0_122 = arith.constant 0 : index
    %100 = vector.load %arg7[%c0_121, %c0_122] : memref<160x400xbf16, #tpu.memory_space<vmem>>, vector<160x400xbf16>
    %c0_123 = arith.constant 0 : index
    %c0_124 = arith.constant 0 : index
    %101 = vector.load %arg3[%c0_123, %c0_124] : memref<400x32xbf16, #tpu.memory_space<vmem>>, vector<400x32xbf16>
    %cst = arith.constant dense<0.000000e+00> : vector<160x32xf32>
    %102 = tpu.matmul %100, %101, %cst {dimension_numbers = #tpu.dot_dimension_numbers<[1], [0], [0], [1], [0, 0, 1, 1], [], []>} : vector<160x400xbf16>, vector<400x32xbf16>, vector<160x32xf32> -> vector<160x32xf32>
    %c0_125 = arith.constant 0 : index
    %c0_126 = arith.constant 0 : index
    %103 = vector.load %arg4[%c0_125, %c0_126] : memref<1x32xf32, #tpu.memory_space<vmem>>, vector<1x32xf32>
    %104 = vector.broadcast %103 : vector<1x32xf32> to vector<160x32xf32>
    %105 = arith.addf %102, %104 : vector<160x32xf32>
    %106 = vector.shape_cast %105 : vector<160x32xf32> to vector<8x20x32xf32>
    %c0_127 = arith.constant 0 : index
    %c0_128 = arith.constant 0 : index
    %c0_129 = arith.constant 0 : index
    %c0_130 = arith.constant 0 : index
    %107 = vector.load %arg5[%c0_127, %c0_128, %c0_129, %c0_130] : memref<1x8x20x32xbf16, #tpu.memory_space<vmem>>, vector<1x8x20x32xbf16>
    %108 = vector.shape_cast %107 : vector<1x8x20x32xbf16> to vector<8x20x32xbf16>
    %109 = arith.extf %108 : vector<8x20x32xbf16> to vector<8x20x32xf32>
    %110 = arith.addf %106, %109 : vector<8x20x32xf32>
    %111 = arith.truncf %110 : vector<8x20x32xf32> to vector<8x20x32xbf16>
    %c0_131 = arith.constant 0 : index
    %c0_132 = arith.constant 0 : index
    %c0_133 = arith.constant 0 : index
    %c0_134 = arith.constant 0 : index
    %112 = vector.load %arg6[%c0_131, %c0_132, %c0_133, %c0_134] : memref<1x8x20x32xbf16, #tpu.memory_space<vmem>>, vector<1x8x20x32xbf16>
    %113 = vector.shape_cast %112 : vector<1x8x20x32xbf16> to vector<8x20x32xbf16>
    %114 = vector.shape_cast %111 : vector<8x20x32xbf16> to vector<1x8x20x32xbf16>
    tpu.vector_store %arg6[%c0_131, %c0_132, %c0_133, %c0_134], %114 {strides = array<i32>} : memref<1x8x20x32xbf16, #tpu.memory_space<vmem>>, vector<1x8x20x32xbf16>,
    return
  }
  func.func @transform_0(%arg0: i32, %arg1: i32) -> (i32, i32, i32, i32) {
    %c3_i32 = arith.constant 3 : i32
    %0 = arith.muli %arg0, %c3_i32 : i32
    %1 = arith.addi %0, %arg1 : i32
    %c0_i32 = arith.constant 0 : i32
    %c0_i32_0 = arith.constant 0 : i32
    %c0_i32_1 = arith.constant 0 : i32
    %c0_i32_2 = arith.constant 0 : i32
    return %1, %c0_i32, %c0_i32_0, %c0_i32_1 : i32, i32, i32, i32
  }
  func.func @transform_1(%arg0: i32, %arg1: i32) -> (i32, i32) {
    %c0_i32 = arith.constant 0 : i32
    %c0_i32_0 = arith.constant 0 : i32
    %c0_i32_1 = arith.constant 0 : i32
    return %c0_i32, %c0_i32_0 : i32, i32
  }
  func.func @transform_2(%arg0: i32, %arg1: i32) -> (i32, i32) {
    %c0_i32 = arith.constant 0 : i32
    %c0_i32_0 = arith.constant 0 : i32
    %c0_i32_1 = arith.constant 0 : i32
    return %c0_i32, %c0_i32_0 : i32, i32
  }
  func.func @transform_3(%arg0: i32, %arg1: i32) -> (i32, i32, i32, i32) {
    %c0_i32 = arith.constant 0 : i32
    %c0_i32_0 = arith.constant 0 : i32
    %c0_i32_1 = arith.constant 0 : i32
    return %arg0, %arg1, %c0_i32, %c0_i32_0 : i32, i32, i32, i32
  }
  func.func @transform_4(%arg0: i32, %arg1: i32) -> (i32, i32, i32, i32) {
    %c0_i32 = arith.constant 0 : i32
    %c0_i32_0 = arith.constant 0 : i32
    %c0_i32_1 = arith.constant 0 : i32
    return %arg0, %arg1, %c0_i32, %c0_i32_0 : i32, i32, i32, i32
  }
}

</mosaic_0001>

<bundles_post_ra>
// kernel: tpu_custom_call.1
= control target key start
LH: loop header
LB: loop body
LE: loop exit
PB: predicated region body
PF: predicated region fallthrough
CT: control target
= control target key end

     0   :  { %s18749_s15 = smov 0   ;;  %s18751_s16 = smov 0   ;;  %s24854_s0 = inlined_call_operand.vmem [shape: bf16[6,12,24,16], index: 0, kind: input, shape index: {}]   ;;  %s24855_s1 = inlined_call_operand.vmem [shape: bf16[400,32], index: 1, kind: input, shape index: {}]   ;;  %s24856_s2 = inlined_call_operand.vmem [shape: f32[1,32], index: 2, kind: input, shape index: {}]   ;;  %s24857_s3 = inlined_call_operand.vmem [shape: bf16[2,24,20,32], index: 3, kind: input, shape index: {}]   ;;  %s24858_s4 = inlined_call_operand.vmem [shape: bf16[2,24,20,32], index: 4, kind: output, shape index: {}]  }
   0x1   :  { %s18753_s17 = smov 0   ;;  %s18755_s18 = smov 0  }
   0x2   :  { %s18757_s19 = smov 0  }
   0x3 LB: > { %s23_s20 = sadd.s32 1, %s18705_s17  ;;  %s26_s21 = sadd.s32 1, %s18709_s18  ;;  %s18713_s19 = sphi %s18757_s19, %s14_s19   ;;  %s18709_s18 = sphi %s18755_s18, %s25251_s18   ;;  %s18705_s17 = sphi %s18753_s17, %s25250_s17   ;;  %s18701_s16 = sphi %s18751_s16, %s25249_s16   ;;  %s18697_s15 = sphi %s18749_s15, %s25248_s15  }
   0x4   : > { %p24_p0 = scmp.ge.s32.totalorder %s23_s20, 3  ;;  %p17208_p1 = scmp.ge.s32.totalorder %s18713_s19, 1 }
   0x5   : > { %p202_p2 = scmp.lt.s32.totalorder %s18713_s19, 7 }
   0x6   : > { %s25253_s20 = smov (%p24_p0, %s23_s20), 0  ;;  %s25255_s21 = smov (!%p24_p0, %s26_s21), %s18709_s18 }
   0x7   : > { %p203_p3 = pnand %p17208_p1, %p202_p2  ;;  %p28_p4 = scmp.ge.s32.totalorder %s25255_s21, 2 }
   0x9   : > { %s25257_s21 = smov (%p28_p4, %s25255_s21), 0  ;;  %206 = sbr.rel (%p203_p3) target bundleno = 1427 (0x593), region = 36 }
  0x10   : > { %s245_s22 = smul.u32 3, %s18701_s16  ;;  %vm1830_vm0 = vcmask 1040384   ;;  %vm1831_vm1 = vcmask 1042434   ;;  %v514_v0 = vlaneseq  ;;  %vm1833_vm3 = vcmask 1044484   ;;  %s18716_s28 = smov 32  }
  0x11   : > { %vm1832_vm2 = vmor %vm1830_vm0, %vm1831_vm1  ;;  %v18715_v1 = vmov 1983009808   ;;  %vm1835_vm4 = vcmask 1046534   ;;  %vm940_vm7 = vsmask.f32 1280  ;;  %s18717_s29 = smov 16  }
  0x12   : > { %s246_s23 = sadd.s32 %s18697_s15, %s245_s22  ;;  %v512_v2 = vunpack.c.l.s4 %v18715_v1  ;;  %v515_v3 = vshrl.u32 %v514_v0, 7  ;;  %vm1834_vm5 = vmor %vm1832_vm2, %vm1833_vm3  ;;  %vm941_vm8 = vsmask.f32 3336  ;;  %vm943_vm9 = vsmask.f32 5392  ;;  %s18718_s30 = smov 48  }
  0x13   : > { %p247_p5 = scmp.lt.s32.totalorder %s246_s23, 5  ;;  %vm18803_vm6 = vmor %vm1834_vm5, %vm1835_vm4  ;;  %vm945_vm10 = vsmask.f32 7448  ;;  %vm2416_vm14 = vsmask.f32 256  ;;  %s18719_s5 = smov 64  }
  0x14   : > { %v513_v4 = vunpack.c.0.s8 %v512_v2  ;;  %vm942_vm11 = vmor %vm940_vm7, %vm941_vm8  ;;  %vm2417_vm15 = vsmask.f32 2312  ;;  %vm2419_vm1 = vsmask.f32 4368  ;;  %vm2421_vm2 = vsmask.f32 6424 }
  0x15   : > { %s25259_s23 = smov (!%p247_p5, %s246_s23), 5  ;;  %vm944_vm12 = vmor %vm942_vm11, %vm943_vm9  ;;  %s18720_s6 = smov 80   ;;  %vm689_vm5 = vcmask 130048   ;;  %vm1579_vm7 = vcmask 261248   ;;  %vm2165_vm8 = vcmask 392448   ;;  %vm3015_vm9 = vcmask 523648  }
  0x16   : > { %s18575_s24 = smul.u32 144, %s25259_s23  ;;  %v18814_v19 = vsub.s32 %v513_v4, %v515_v3  ;;  %vm18975_vm13 = vmor %vm944_vm12, %vm945_vm10  ;;  %s18721_s7 = smov 96   ;;  %vm3466_vm10 = vcmask 654848   ;;  %vm3910_vm11 = vcmask 786048   ;;  %vm4793_vm12 = vcmask 917248  }
  0x17   : > { %vm2418_vm0 = vmor %vm2416_vm14, %vm2417_vm15  ;;  %s18722_s8 = smov 112   ;;  %vm5372_vm14 = vcmask 1048448   ;;  %s17210_s22 = sshll.u32 %s18697_s15, 3  ;;  %vm17070_vm15 = vcmask 254976  }
  0x18   : > { %s18788_s27 = scalar_lea.vmem %s24854_s0, %s18575_s24  ;;  %vm19304_vm3 = vmor %vm2418_vm0, %vm2419_vm1  ;;  %p255_p6 = scmp.lt.s32.totalorder %s18701_s16, 1 }
  0x19   : > { %v18791_v5 = vld.sshfl [vmem:[%s18788_s27 + $0x8] sm:$0x13 pattern:$0x76325410]  ;;  %vm19323_vm4 = vmor %vm19304_vm3, %vm2421_vm2  ;;  %p24298_p7 = scmp.lt.s32.totalorder %s17210_s22, 23 }
  0x1a   : > { %v17265_v6 = vld.sshfl [vmem:[%s18788_s27 + $0xc] sm:$0x32 pattern:$0x76325410]  ;;  %v18796_v7 = vcombine.high %v18791_v5, %v18791_v5  ;;  %v1848_v8 = vrot.slane %v18791_v5, 7  ;;  %v987_v9 = vshll.u32 %v18791_v5, 16 }
  0x1b   : > { %v18801_v10 = vld.sshfl [vmem:[%s18788_s27 + $0x10] sm:$0x33 pattern:$0x76325410]  ;;  %v1669_v11 = vcombine.high %v17265_v6, %v17265_v6  ;;  %v17287_v13 = vrot.slane %v17265_v6, 9  ;;  %v991_v14 = vshrl.u32 %v18791_v5, 16 }
  0x1c   : > { %v18810_v15 = vcombine.high %v18801_v10, %v18801_v10  ;;  %v1850_v16 = vrot.slane %v1848_v8, 2  ;;  %v1851_v17 = vrot.slane %v18796_v7, 7  ;;  %v1858_v18 = vrot.slane %v18801_v10, 7  ;;  %s25261_s16 = smov (!%p255_p6, %s18701_s16), 1  ;;  %s25263_s22 = smov (!%p24298_p7, %s17210_s22), 23 }
  0x1d   : > { %v1855_v20 = vrot.slane %v1669_v11, 7  ;;  %v17262_v21 = vld.sshfl [vmem:[%s18788_s27] sm:$0x32 pattern:$0x76325410]  ;;  %v18817_v22 = vrot.slane %v987_v9, 7 }
  0x1e   : > { %v1852_v23 = vsel %vm18803_vm6, %v1850_v16, %v1851_v17  ;;  %v1860_v24 = vrot.slane %v1858_v18, 2  ;;  %v1861_v25 = vrot.slane %v18810_v15, 7  ;;  %v18823_v26 = vld.sshfl [vmem:[%s18788_s27 + $0x4] sm:$0x33 pattern:$0x76325410]  ;;  %v1645_v27 = vcombine.high %v17262_v21, %v17262_v21 }
  0x1f   : > { %v1856_v28 = vsel %vm18803_vm6, %v17287_v13, %v1855_v20  ;;  %v1857_v29 = vrot.slane %v1855_v20, 2  ;;  %v18829_v30 = vcombine.high %v18823_v26, %v18823_v26  ;;  %v17286_v31 = vrot.slane %v17262_v21, 9  ;;  %v18832_v32 = vld.sshfl [vmem:[%s18788_s27 + $0x1c] sm:$0x33 pattern:$0x76325410] }
  0x20   : > { %v1862_v33 = vsel %vm18803_vm6, %v1860_v24, %v1861_v25  ;;  %v1863_v34 = vrot.slane %v1861_v25, 2  ;;  %v1982_v35 = vcombine.low %v1852_v23, %v1856_v28  ;;  %v1839_v36 = vrot.slane %v1645_v27, 7  ;;  %v18837_v37 = vld.sshfl [vmem:[%s18788_s27 + $0x20] sm:$0x13 pattern:$0x76325410] }
  0x21   : > { %v1859_v38 = vsel %vm18803_vm6, %v1857_v29, %v1858_v18  ;;  %v1842_v39 = vrot.slane %v18823_v26, 7  ;;  %v1845_v40 = vrot.slane %v18829_v30, 7  ;;  %v17271_v41 = vld.sshfl [vmem:[%s18788_s27 + $0x24] sm:$0x32 pattern:$0x76325410]  ;;  %v18846_v42 = vcombine.high %v18832_v32, %v18832_v32 }
  0x22   : > { %v1983_v43 = vcombine.low %v1859_v38, %v1862_v33  ;;  %v1990_v44 = vrot.slane %v1982_v35, %v18814_v19  ;;  %v1840_v45 = vsel %vm18803_vm6, %v17286_v31, %v1839_v36  ;;  %v1841_v46 = vrot.slane %v1839_v36, 2  ;;  %v18866_v59 = vld.sshfl [vmem:[%s18788_s27 + $0x14] sm:$0x13 pattern:$0x76325410]  ;;  %s18577_s15 = smul.u32 72, %s25261_s16 }
  0x23   : > { %v1844_v47 = vrot.slane %v1842_v39, 2  ;;  %v1847_v48 = vrot.slane %v1845_v40, 2  ;;  %v18853_v49 = vcombine.high %v18837_v37, %v18837_v37  ;;  %v1717_v50 = vcombine.high %v17271_v41, %v17271_v41  ;;  %v17268_v0 = vld.sshfl [vmem:[%s18788_s27 + $0x18] sm:$0x32 pattern:$0x76325410] }
  0x24   : > { %v1997_v51 = vrot.slane %v1983_v43, %v18814_v19  ;;  %v1843_v52 = vsel %vm18803_vm6, %v1841_v46, %v1842_v39  ;;  %v1874_v53 = vrot.slane %v18832_v32, 7  ;;  %v1877_v54 = vrot.slane %v18846_v42, 7  ;;  %v17274_v13 = vld.sshfl [vmem:[%s18788_s27 + $0x30] sm:$0x32 pattern:$0x76325410] }
  0x25   : > { %v1846_v55 = vsel %vm18803_vm6, %v1844_v47, %v1845_v40  ;;  %v1849_v56 = vsel %vm18803_vm6, %v1847_v48, %v1848_v8  ;;  %v1965_v57 = vcombine.low %v1840_v45, %v1843_v52  ;;  %v1880_v58 = vrot.slane %v18837_v37, 7  ;;  %v18887_v21 = vld.sshfl [vmem:[%s18788_s27 + $0x34] sm:$0x33 pattern:$0x76325410] }
  0x26   : > { %v1998_v60 = vcombine.low %v1990_v44, %v1997_v51  ;;  %v1966_v61 = vcombine.low %v1846_v55, %v1849_v56  ;;  %v1876_v62 = vrot.slane %v1874_v53, 2  ;;  %v1879_v63 = vrot.slane %v1877_v54, 2  ;;  %v18896_v35 = vld.sshfl [vmem:[%s18788_s27 + $0x38] sm:$0x13 pattern:$0x76325410] }
  0x27   : > { %v1973_v1 = vrot.slane %v1965_v57, %v18814_v19  ;;  %v1882_v2 = vrot.slane %v1880_v58, 2  ;;  %v1883_v3 = vrot.slane %v18853_v49, 7  ;;  %v17289_v4 = vrot.slane %v17271_v41, 9 }
  0x28   : > { %2137 = vrot.lane.b32.xlu1 %v1998_v60, %s18716_s28  ;;  %v1980_v6 = vrot.slane %v1966_v61, %v18814_v19  ;;  %v1878_v8 = vsel %vm18803_vm6, %v1876_v62, %v1877_v54  ;;  %v1881_v9 = vsel %vm18803_vm6, %v1879_v63, %v1880_v58  ;;  %v18877_v11 = vrot.slane %v1717_v50, 7  ;;  %v18906_v41 = vld.sshfl [vmem:[%s18788_s27 + $0x28] sm:$0x33 pattern:$0x76325410] }
  0x29   : > { %v1884_v16 = vsel %vm18803_vm6, %v1882_v2, %v1883_v3  ;;  %v2016_v17 = vcombine.low %v1878_v8, %v1881_v9  ;;  %v18884_v18 = vcombine.high %v18866_v59, %v18866_v59  ;;  %v1693_v20 = vcombine.high %v17268_v0, %v17268_v0  ;;  %v18912_v47 = vld.sshfl [vmem:[%s18788_s27 + $0x2c] sm:$0x13 pattern:$0x76325410] }
  0x2a   : > { %v1981_v23 = vcombine.low %v1973_v1, %v1980_v6  ;;  %v1888_v24 = vsel %vm18803_vm6, %v17289_v4, %v18877_v11  ;;  %v1864_v25 = vrot.slane %v18866_v59, 7  ;;  %v17288_v27 = vrot.slane %v17268_v0, 9 }
  0x2b   : > { %v2017_v28 = vcombine.low %v1884_v16, %v1888_v24  ;;  %v2024_v29 = vrot.slane %v2016_v17, %v18814_v19  ;;  %v1867_v31 = vrot.slane %v18884_v18, 7  ;;  %v1871_v33 = vrot.slane %v1693_v20, 7  ;;  %v17244_v16 = vld.sshfl [vmem:[%s18788_s27 + $0x18] sm:$0x33 pattern:$0x76325410] }
  0x2c   : > { %2135 = vrot.lane.b32.xlu0 %v1981_v23, %s18716_s28  ;;  %v1865_v36 = vsel %vm18803_vm6, %v1863_v34, %v1864_v25  ;;  %v1866_v38 = vrot.slane %v1864_v25, 2  ;;  %v1741_v39 = vcombine.high %v17274_v13, %v17274_v13  ;;  %v18903_v40 = vcombine.high %v18887_v21, %v18887_v21 }
  0x2d   : > { %v2031_v43 = vrot.slane %v2017_v28, %v18814_v19  ;;  %v1872_v44 = vsel %vm18803_vm6, %v17288_v27, %v1871_v33  ;;  %v1873_v45 = vrot.slane %v1871_v33, 2  ;;  %v17290_v46 = vrot.slane %v17274_v13, 9 }
  0x2e   : > { %v1868_v34 = vsel %vm18803_vm6, %v1866_v38, %v1867_v31  ;;  %v1903_v48 = vrot.slane %v1741_v39, 7  ;;  %v1906_v50 = vrot.slane %v18887_v21, 7  ;;  %v1909_v51 = vrot.slane %v18903_v40, 7 }
  0x2f   : > { %v2032_v52 = vcombine.low %v2024_v29, %v2031_v43  ;;  %v1875_v54 = vsel %vm18803_vm6, %v1873_v45, %v1874_v53  ;;  %v1999_v55 = vcombine.low %v1865_v36, %v1868_v34  ;;  %v1912_v56 = vrot.slane %v18896_v35, 7 }
  0x30   : > { %v2000_v57 = vcombine.low %v1872_v44, %v1875_v54  ;;  %v1904_v58 = vsel %vm18803_vm6, %v17290_v46, %v1903_v48  ;;  %v1905_v60 = vrot.slane %v1903_v48, 2  ;;  %v1908_v61 = vrot.slane %v1906_v50, 2 }
  0x31   : > { %2141 = vrot.lane.b32.xlu1 %v2032_v52, %s18716_s28  ;;  %v2007_v62 = vrot.slane %v1999_v55, %v18814_v19  ;;  %v1911_v63 = vrot.slane %v1909_v51, 2  ;;  %v18927_v0 = vcombine.high %v18906_v41, %v18906_v41  ;;  %v18931_v53 = vcombine.high %v18912_v47, %v18912_v47 }
  0x32   : > { %v2014_v1 = vrot.slane %v2000_v57, %v18814_v19  ;;  %v1907_v2 = vsel %vm18803_vm6, %v1905_v60, %v1906_v50  ;;  %v1910_v3 = vsel %vm18803_vm6, %v1908_v61, %v1909_v51  ;;  %v1889_v4 = vrot.slane %v18877_v11, 2 }
  0x33   : > { %v1913_v6 = vsel %vm18803_vm6, %v1911_v63, %v1912_v56  ;;  %v2050_v8 = vcombine.low %v1904_v58, %v1907_v2  ;;  %v1890_v9 = vrot.slane %v18906_v41, 7  ;;  %v1893_v13 = vrot.slane %v18927_v0, 7 }
  0x34   : > { %v2015_v17 = vcombine.low %v2007_v62, %v2014_v1  ;;  %v2051_v20 = vcombine.low %v1910_v3, %v1913_v6  ;;  %v1896_v23 = vrot.slane %v18912_v47, 7  ;;  %v1899_v24 = vrot.slane %v18931_v53, 7  ;;  %v17238_v1 = vld.sshfl [vmem:[%s18788_s27] sm:$0x33 pattern:$0x76325410] }
  0x35   : > { %v2058_v25 = vrot.slane %v2050_v8, %v18814_v19  ;;  %v1891_v11 = vsel %vm18803_vm6, %v1889_v4, %v1890_v9  ;;  %v1892_v27 = vrot.slane %v1890_v9, 2  ;;  %v1895_v28 = vrot.slane %v1893_v13, 2 }
  0x36   : > { %2139 = vrot.lane.b32.xlu0 %v2015_v17, %s18716_s28  ;;  %v2065_v29 = vrot.slane %v2051_v20, %v18814_v19  ;;  %v1898_v31 = vrot.slane %v1896_v23, 2  ;;  %v803_v33 = vcombine.high %v17244_v16, %v17244_v16  ;;  %v1031_v36 = vshll.u32 %v18810_v15, 16 }
  0x37   : > { %v1894_v38 = vsel %vm18803_vm6, %v1892_v27, %v1893_v13  ;;  %v1897_v39 = vsel %vm18803_vm6, %v1895_v28, %v1896_v23  ;;  %v1035_v43 = vshrl.u32 %v18810_v15, 16  ;;  %v1041_v44 = vshll.u32 %v18866_v59, 16 }
  0x38   : > { %v2066_v45 = vcombine.low %v2058_v25, %v2065_v29  ;;  %v1900_v46 = vsel %vm18803_vm6, %v1898_v31, %v1899_v24  ;;  %v2033_v34 = vcombine.low %v1891_v11, %v1894_v38  ;;  %v18964_v48 = vrot.slane %v1031_v36, 7 }
  0x39   : > { %v2034_v50 = vcombine.low %v1897_v39, %v1900_v46  ;;  %v1037_v51 = vrot.slane %v1035_v43, 6  ;;  %v1043_v52 = vrot.slane %v1041_v44, 7  ;;  %v1045_v54 = vshrl.u32 %v18866_v59, 16 }
  0x3a   : > { %2145 = vrot.lane.b32.xlu1 %v2066_v45, %s18716_s28  ;;  %v2041_v15 = vrot.slane %v2033_v34, %v18814_v19  ;;  %v1051_v55 = vshll.u32 %v18884_v18, 16  ;;  %v1056_v57 = vshrl.u32 %v17244_v16, 16  ;;  %v1059_v58 = vshll.u32 %v17244_v16, 16 }
  0x3b   : > { %v2048_v60 = vrot.slane %v2034_v50, %v18814_v19  ;;  %v1038_v61 = vor.u32 %v1037_v51, %v18964_v48  ;;  %v1047_v62 = vrot.slane %v1045_v54, 6  ;;  %v1065_v63 = vshll.u32 %v803_v33, 16 }
  0x3c   : > { %v1053_v59 = vrot.slane %v1051_v55, 7  ;;  %v1058_v3 = vrot.slane %v1056_v57, 6  ;;  %v1061_v4 = vrot.slane %v1059_v58, 7  ;;  %v1069_v6 = vshrl.u32 %v803_v33, 16 }
  0x3d   : > { %v2049_v8 = vcombine.low %v2041_v15, %v2048_v60  ;;  %v1039_v18 = vrot.slane %v1038_v61, 2  ;;  %v1048_v9 = vor.u32 %v1047_v62, %v1043_v52  ;;  %v1067_v13 = vrot.slane %v1065_v63, 7 }
  0x3e   : > { %v1062_v16 = vor.u32 %v1061_v4, %v1058_v3  ;;  %v1071_v17 = vrot.slane %v1069_v6, 6  ;;  %v1075_v20 = vshll.u32 %v18832_v32, 16  ;;  %v755_v23 = vcombine.high %v17238_v1, %v17238_v1 }
  0x3f   : > { %2143 = vrot.lane.b32.xlu0 %v2049_v8, %s18716_s28  ;;  %v1044_v24 = vsel %vm18975_vm13, %v1039_v18, %v1043_v52  ;;  %v1049_v25 = vrot.slane %v1048_v9, 2  ;;  %v948_v11 = vshrl.u32 %v17238_v1, 16  ;;  %v951_v27 = vshll.u32 %v17238_v1, 16 }
  0x40   : > { %v1063_v28 = vrot.slane %v1062_v16, 2  ;;  %v1072_v29 = vor.u32 %v1071_v17, %v1067_v13  ;;  %v1077_v31 = vrot.slane %v1075_v20, 7  ;;  %v957_v33 = vshll.u32 %v755_v23, 16 }
  0x41   : > { %v1054_v36 = vsel %vm18975_vm13, %v1049_v25, %v1053_v59  ;;  %v950_v38 = vrot.slane %v948_v11, 6  ;;  %v953_v39 = vrot.slane %v951_v27, 7  ;;  %v961_v43 = vshrl.u32 %v755_v23, 16 }
  0x42   : > { %v1068_v44 = vsel %vm18975_vm13, %v1063_v28, %v1067_v13  ;;  %v1073_v45 = vrot.slane %v1072_v29, 2  ;;  %v1413_v46 = vcombine.low %v1044_v24, %v1054_v36  ;;  %v959_v34 = vrot.slane %v957_v33, 7  ;;  %v17247_v1 = vld.sshfl [vmem:[%s18788_s27 + $0x24] sm:$0x33 pattern:$0x76325410] }
  0x43   : > { %v954_v50 = vor.u32 %v953_v39, %v950_v38  ;;  %v963_v51 = vrot.slane %v961_v43, 6  ;;  %v967_v52 = vshll.u32 %v18823_v26, 16  ;;  %v971_v54 = vshrl.u32 %v18823_v26, 16 }
  0x44   : > { %v1078_v15 = vsel %vm18975_vm13, %v1073_v45, %v1077_v31  ;;  %v1421_v55 = vrot.slane %v1413_v46, %v18814_v19  ;;  %v977_v57 = vshll.u32 %v18829_v30, 16  ;;  %v981_v58 = vshrl.u32 %v18829_v30, 16 }
  0x45   : > { %v1414_v60 = vcombine.low %v1068_v44, %v1078_v15  ;;  %v955_v61 = vrot.slane %v954_v50, 2  ;;  %v964_v62 = vor.u32 %v963_v51, %v959_v34  ;;  %v969_v63 = vrot.slane %v967_v52, 7 }
  0x46   : > { %v973_v59 = vrot.slane %v971_v54, 6  ;;  %v979_v3 = vrot.slane %v977_v57, 7  ;;  %v983_v4 = vrot.slane %v981_v58, 6  ;;  %v18995_v6 = vcombine.high %v17247_v1, %v17247_v1 }
  0x47   : > { %v1428_v26 = vrot.slane %v1414_v60, %v18814_v19  ;;  %v960_v8 = vsel %vm18975_vm13, %v955_v61, %v959_v34  ;;  %v965_v18 = vrot.slane %v964_v62, 2  ;;  %v1079_v9 = vshrl.u32 %v18832_v32, 16 }
  0x48   : > { %v974_v13 = vor.u32 %v973_v59, %v969_v63  ;;  %v984_v30 = vor.u32 %v983_v4, %v979_v3  ;;  %v1085_v16 = vshll.u32 %v18846_v42, 16  ;;  %v1089_v17 = vshrl.u32 %v18846_v42, 16 }
  0x49   : > { %v1429_v20 = vcombine.low %v1421_v55, %v1428_v26  ;;  %v970_v23 = vsel %vm18975_vm13, %v965_v18, %v969_v63  ;;  %v1081_v24 = vrot.slane %v1079_v9, 6  ;;  %v1095_v25 = vshll.u32 %v18837_v37, 16 }
  0x4a   : > { %v975_v11 = vrot.slane %v974_v13, 2  ;;  %v985_v27 = vrot.slane %v984_v30, 2  ;;  %v1379_v28 = vcombine.low %v960_v8, %v970_v23  ;;  %v1087_v29 = vrot.slane %v1085_v16, 7 }
  0x4b   : > { %1553 = vrot.lane.b32.xlu1 %v1429_v20, %s18717_s29  ;;  %v1082_v32 = vor.u32 %v1081_v24, %v1077_v31  ;;  %v1091_v33 = vrot.slane %v1089_v17, 6  ;;  %v1097_v36 = vrot.slane %v1095_v25, 7  ;;  %v1099_v42 = vshrl.u32 %v18837_v37, 16 }
  0x4c   : > { %v980_v38 = vsel %vm18975_vm13, %v975_v11, %v979_v3  ;;  %v990_v39 = vsel %vm18975_vm13, %v985_v27, %v18817_v22  ;;  %v1387_v43 = vrot.slane %v1379_v28, %v18814_v19  ;;  %v1105_v44 = vshll.u32 %v18853_v49, 16  ;;  %v17241_v31 = vld.sshfl [vmem:[%s18788_s27 + $0xc] sm:$0x33 pattern:$0x76325410] }
  0x4d   : > { %v1380_v45 = vcombine.low %v980_v38, %v990_v39  ;;  %v1083_v46 = vrot.slane %v1082_v32, 2  ;;  %v1092_v34 = vor.u32 %v1091_v33, %v1087_v29  ;;  %v1101_v50 = vrot.slane %v1099_v42, 6  ;;  %v17250_v17 = vld.sshfl [vmem:[%s18788_s27 + $0x30] sm:$0x33 pattern:$0x76325410] }
  0x4e   : > { %v1107_v51 = vrot.slane %v1105_v44, 7  ;;  %v1110_v52 = vshrl.u32 %v17247_v1, 16  ;;  %v1113_v54 = vshll.u32 %v17247_v1, 16  ;;  %v1119_v37 = vshll.u32 %v18995_v6, 16 }
  0x4f   : > { %v1394_v15 = vrot.slane %v1380_v45, %v18814_v19  ;;  %v1088_v55 = vsel %vm18975_vm13, %v1083_v46, %v1087_v29  ;;  %v1093_v57 = vrot.slane %v1092_v34, 2  ;;  %v1102_v58 = vor.u32 %v1101_v50, %v1097_v36 }
  0x50   : > { %v1112_v60 = vrot.slane %v1110_v52, 6  ;;  %v1115_v61 = vrot.slane %v1113_v54, 7  ;;  %v19020_v49 = vrot.slane %v1119_v37, 7  ;;  %v779_v62 = vcombine.high %v17241_v31, %v17241_v31 }
  0x51   : > { %v1395_v63 = vcombine.low %v1387_v43, %v1394_v15  ;;  %v1098_v59 = vsel %vm18975_vm13, %v1093_v57, %v1097_v36  ;;  %v1103_v1 = vrot.slane %v1102_v58, 2  ;;  %v993_v3 = vrot.slane %v991_v14, 6 }
  0x52   : > { %v1116_v4 = vor.u32 %v1115_v61, %v1112_v60  ;;  %v1430_v26 = vcombine.low %v1088_v55, %v1098_v59  ;;  %v997_v8 = vshll.u32 %v18796_v7, 16  ;;  %v1002_v18 = vshrl.u32 %v17241_v31, 16 }
  0x53   : > { %1549 = vrot.lane.b32.xlu0 %v1395_v63, %s18717_s29  ;;  %v1108_v9 = vsel %vm18975_vm13, %v1103_v1, %v1107_v51  ;;  %v994_v13 = vor.u32 %v993_v3, %v18817_v22  ;;  %v1005_v30 = vshll.u32 %v17241_v31, 16  ;;  %v1011_v16 = vshll.u32 %v779_v62, 16 }
  0x54   : > { %v1117_v20 = vrot.slane %v1116_v4, 2  ;;  %v1438_v23 = vrot.slane %v1430_v26, %v18814_v19  ;;  %v999_v5 = vrot.slane %v997_v8, 7  ;;  %v1004_v14 = vrot.slane %v1002_v18, 6 }
  0x55   : > { %v995_v24 = vrot.slane %v994_v13, 2  ;;  %v1007_v25 = vrot.slane %v1005_v30, 7  ;;  %v1013_v11 = vrot.slane %v1011_v16, 7  ;;  %v1015_v7 = vshrl.u32 %v779_v62, 16 }
  0x56   : > { %v1122_v27 = vsel %vm18975_vm13, %v1117_v20, %v19020_v49  ;;  %v1021_v28 = vshll.u32 %v18801_v10, 16  ;;  %v1025_v22 = vshrl.u32 %v18801_v10, 16  ;;  %v851_v29 = vcombine.high %v17250_v17, %v17250_v17 }
  0x57   : > { %v1431_v32 = vcombine.low %v1108_v9, %v1122_v27  ;;  %v1000_v33 = vsel %vm18975_vm13, %v995_v24, %v999_v5  ;;  %v1008_v36 = vor.u32 %v1007_v25, %v1004_v14  ;;  %v1017_v42 = vrot.slane %v1015_v7, 6 }
  0x58   : > { %v1023_v38 = vrot.slane %v1021_v28, 7  ;;  %v1027_v39 = vrot.slane %v1025_v22, 6  ;;  %v1164_v43 = vshrl.u32 %v17250_v17, 16  ;;  %v1167_v44 = vshll.u32 %v17250_v17, 16 }
  0x59   : > { %v1445_v45 = vrot.slane %v1431_v32, %v18814_v19  ;;  %v1009_v46 = vrot.slane %v1008_v36, 2  ;;  %v1018_v34 = vor.u32 %v1017_v42, %v1013_v11  ;;  %v1173_v50 = vshll.u32 %v851_v29, 16 }
  0x5a   : > { %v1028_v31 = vor.u32 %v1027_v39, %v1023_v38  ;;  %v1166_v51 = vrot.slane %v1164_v43, 6  ;;  %v1169_v52 = vrot.slane %v1167_v44, 7  ;;  %v1177_v10 = vshrl.u32 %v851_v29, 16 }
  0x5b   : > { %v1446_v54 = vcombine.low %v1438_v23, %v1445_v45  ;;  %v1014_v37 = vsel %vm18975_vm13, %v1009_v46, %v1013_v11  ;;  %v1019_v15 = vrot.slane %v1018_v34, 2  ;;  %v1175_v55 = vrot.slane %v1173_v50, 7  ;;  %v19066_v29 = vld.sshfl [vmem:[%s18788_s27 + $0x40] sm:$0x33 pattern:$0x76325410] }
  0x5c   : > { %v1029_v57 = vrot.slane %v1028_v31, 2  ;;  %v1396_v58 = vcombine.low %v1000_v33, %v1014_v37  ;;  %v1170_v60 = vor.u32 %v1169_v52, %v1166_v51  ;;  %v1179_v61 = vrot.slane %v1177_v10, 6  ;;  %v17256_v43 = vld.sshfl [vmem:[%s18788_s27 + $0x48] sm:$0x33 pattern:$0x76325410] }
  0x5d   : > { %1555 = vrot.lane.b32.xlu1 %v1446_v54, %s18717_s29  ;;  %v1024_v62 = vsel %vm18975_vm13, %v1019_v15, %v1023_v38  ;;  %v1183_v63 = vshll.u32 %v18887_v21, 16  ;;  %v1187_v59 = vshrl.u32 %v18887_v21, 16  ;;  %v1193_v1 = vshll.u32 %v18903_v40, 16 }
  0x5e   : > { %v1034_v3 = vsel %vm18975_vm13, %v1029_v57, %v18964_v48  ;;  %v1404_v4 = vrot.slane %v1396_v58, %v18814_v19  ;;  %v1171_v26 = vrot.slane %v1170_v60, 2  ;;  %v1180_v8 = vor.u32 %v1179_v61, %v1175_v55  ;;  %v19083_v37 = vld.sshfl [vmem:[%s18788_s27 + $0x44] sm:$0x13 pattern:$0x76325410] }
  0x5f   : > { %v1397_v18 = vcombine.low %v1024_v62, %v1034_v3  ;;  %v1185_v9 = vrot.slane %v1183_v63, 7  ;;  %v1189_v13 = vrot.slane %v1187_v59, 6  ;;  %v1195_v30 = vrot.slane %v1193_v1, 7 }
  0x60   : > { %v1176_v16 = vsel %vm18975_vm13, %v1171_v26, %v1175_v55  ;;  %v1181_v17 = vrot.slane %v1180_v8, 2  ;;  %v1197_v21 = vshrl.u32 %v18903_v40, 16  ;;  %v1203_v20 = vshll.u32 %v18896_v35, 16 }
  0x61   : > { %v1411_v23 = vrot.slane %v1397_v18, %v18814_v19  ;;  %v1190_v48 = vor.u32 %v1189_v13, %v1185_v9  ;;  %v1123_v5 = vshrl.u32 %v18995_v6, 16  ;;  %v1129_v14 = vshll.u32 %v18906_v41, 16 }
  0x62   : > { %v1186_v24 = vsel %vm18975_vm13, %v1181_v17, %v1185_v9  ;;  %v1199_v25 = vrot.slane %v1197_v21, 6  ;;  %v19062_v11 = vrot.slane %v1203_v20, 7  ;;  %v1133_v7 = vshrl.u32 %v18906_v41, 16 }
  0x63   : > { %v1412_v27 = vcombine.low %v1404_v4, %v1411_v23  ;;  %v1191_v40 = vrot.slane %v1190_v48, 2  ;;  %v1464_v28 = vcombine.low %v1176_v16, %v1186_v24  ;;  %v1125_v22 = vrot.slane %v1123_v5, 6 }
  0x64   : > { %v1200_v32 = vor.u32 %v1199_v25, %v1195_v30  ;;  %v1131_v33 = vrot.slane %v1129_v14, 7  ;;  %v1135_v6 = vrot.slane %v1133_v7, 6  ;;  %v1139_v36 = vshll.u32 %v18927_v0, 16 }
  0x65   : > { %1551 = vrot.lane.b32.xlu0 %v1412_v27, %s18717_s29  ;;  %v1196_v42 = vsel %vm18975_vm13, %v1191_v40, %v1195_v30  ;;  %v1472_v38 = vrot.slane %v1464_v28, %v18814_v19  ;;  %v1126_v41 = vor.u32 %v1125_v22, %v19020_v49  ;;  %v1143_v39 = vshrl.u32 %v18927_v0, 16  ;;  %v19112_v25 = vld.sshfl [vmem:[%s18788_s27 + $0x4c] sm:$0x33 pattern:$0x76325410] }
  0x66   : > { %v1201_v44 = vrot.slane %v1200_v32, 2  ;;  %v1136_v45 = vor.u32 %v1135_v6, %v1131_v33  ;;  %v1141_v46 = vrot.slane %v1139_v36, 7  ;;  %v1149_v34 = vshll.u32 %v18912_v47, 16 }
  0x67   : > { %v1127_v50 = vrot.slane %v1126_v41, 2  ;;  %v1145_v31 = vrot.slane %v1143_v39, 6  ;;  %v1153_v51 = vshrl.u32 %v18912_v47, 16  ;;  %v1159_v52 = vshll.u32 %v18931_v53, 16 }
  0x68   : > { %v1206_v10 = vsel %vm18975_vm13, %v1201_v44, %v19062_v11  ;;  %v1137_v54 = vrot.slane %v1136_v45, 2  ;;  %v1151_v49 = vrot.slane %v1149_v34, 7  ;;  %v19087_v0 = vcombine.high %v19066_v29, %v19066_v29  ;;  %v17253_v28 = vld.sshfl [vmem:[%s18788_s27 + $0x3c] sm:$0x33 pattern:$0x76325410] }
  0x69   : > { %v1465_v15 = vcombine.low %v1196_v42, %v1206_v10  ;;  %v1132_v55 = vsel %vm18975_vm13, %v1127_v50, %v1131_v33  ;;  %v1146_v57 = vor.u32 %v1145_v31, %v1141_v46  ;;  %v1155_v47 = vrot.slane %v1153_v51, 6 }
  0x6a   : > { %v1142_v53 = vsel %vm18975_vm13, %v1137_v54, %v1141_v46  ;;  %v1161_v58 = vrot.slane %v1159_v52, 7  ;;  %v19095_v60 = vcombine.high %v19083_v37, %v19083_v37  ;;  %v899_v61 = vcombine.high %v17256_v43, %v17256_v43 }
  0x6b   : > { %v1479_v62 = vrot.slane %v1465_v15, %v18814_v19  ;;  %v1147_v63 = vrot.slane %v1146_v57, 2  ;;  %v1156_v59 = vor.u32 %v1155_v47, %v1151_v49  ;;  %v1447_v1 = vcombine.low %v1132_v55, %v1142_v53  ;;  %v19132_v47 = vld.sshfl [vmem:[%s18788_s27 + $0x54] sm:$0x33 pattern:$0x76325410] }
  0x6c   : > { %v1247_v3 = vshll.u32 %v19087_v0, 16  ;;  %v1251_v4 = vshrl.u32 %v19087_v0, 16  ;;  %v1257_v26 = vshll.u32 %v19083_v37, 16  ;;  %v1261_v8 = vshrl.u32 %v19083_v37, 16 }
  0x6d   : > { %v1480_v18 = vcombine.low %v1472_v38, %v1479_v62  ;;  %v1152_v9 = vsel %vm18975_vm13, %v1147_v63, %v1151_v49  ;;  %v1157_v13 = vrot.slane %v1156_v59, 2  ;;  %v1455_v30 = vrot.slane %v1447_v1, %v18814_v19  ;;  %v19138_v63 = vld.sshfl [vmem:[%s18788_s27 + $0x58] sm:$0x33 pattern:$0x76325410] }
  0x6e   : > { %v19105_v16 = vrot.slane %v1247_v3, 7  ;;  %v1253_v17 = vrot.slane %v1251_v4, 6  ;;  %v1259_v21 = vrot.slane %v1257_v26, 7  ;;  %v1263_v20 = vrot.slane %v1261_v8, 6 }
  0x6f   : > { %1559 = vrot.lane.b32.xlu1 %v1480_v18, %s18717_s29  ;;  %v1162_v23 = vsel %vm18975_vm13, %v1157_v13, %v1161_v58  ;;  %v1267_v48 = vshll.u32 %v19095_v60, 16  ;;  %v1272_v5 = vshrl.u32 %v17256_v43, 16  ;;  %v1275_v14 = vshll.u32 %v17256_v43, 16 }
  0x70   : > { %v1448_v24 = vcombine.low %v1152_v9, %v1162_v23  ;;  %v1254_v7 = vor.u32 %v1253_v17, %v19105_v16  ;;  %v1264_v27 = vor.u32 %v1263_v20, %v1259_v21  ;;  %v1281_v40 = vshll.u32 %v899_v61, 16 }
  0x71   : > { %v1269_v22 = vrot.slane %v1267_v48, 7  ;;  %v1274_v32 = vrot.slane %v1272_v5, 6  ;;  %v1277_v33 = vrot.slane %v1275_v14, 7  ;;  %v1285_v6 = vshrl.u32 %v899_v61, 16 }
  0x72   : > { %v1462_v36 = vrot.slane %v1448_v24, %v18814_v19  ;;  %v1255_v42 = vrot.slane %v1254_v7, 2  ;;  %v1265_v38 = vrot.slane %v1264_v27, 2  ;;  %v1283_v41 = vrot.slane %v1281_v40, 7 }
  0x73   : > { %v1278_v39 = vor.u32 %v1277_v33, %v1274_v32  ;;  %v1287_v44 = vrot.slane %v1285_v6, 6  ;;  %v1291_v43 = vshll.u32 %v19112_v25, 16  ;;  %v19120_v45 = vcombine.high %v18896_v35, %v18896_v35  ;;  %v19147_v48 = vld.sshfl [vmem:[%s18788_s27 + $0x5c] sm:$0x13 pattern:$0x76325410] }
  0x74   : > { %v1463_v46 = vcombine.low %v1455_v30, %v1462_v36  ;;  %v1260_v34 = vsel %vm18975_vm13, %v1255_v42, %v1259_v21  ;;  %v1270_v50 = vsel %vm18975_vm13, %v1265_v38, %v1269_v22  ;;  %v875_v31 = vcombine.high %v17253_v28, %v17253_v28 }
  0x75   : > { %v1279_v51 = vrot.slane %v1278_v39, 2  ;;  %v1288_v52 = vor.u32 %v1287_v44, %v1283_v41  ;;  %v19126_v10 = vrot.slane %v1291_v43, 7  ;;  %v1498_v54 = vcombine.low %v1260_v34, %v1270_v50 }
  0x76   : > { %1557 = vrot.lane.b32.xlu0 %v1463_v46, %s18717_s29  ;;  %v1207_v49 = vshrl.u32 %v18896_v35, 16  ;;  %v1213_v15 = vshll.u32 %v19120_v45, 16  ;;  %v1218_v55 = vshrl.u32 %v17253_v28, 16  ;;  %v1221_v57 = vshll.u32 %v17253_v28, 16 }
  0x77   : > { %v1284_v53 = vsel %vm18975_vm13, %v1279_v51, %v1283_v41  ;;  %v1289_v58 = vrot.slane %v1288_v52, 2  ;;  %v1506_v61 = vrot.slane %v1498_v54, %v18814_v19  ;;  %v1227_v62 = vshll.u32 %v875_v31, 16 }
  0x78   : > { %v1209_v59 = vrot.slane %v1207_v49, 6  ;;  %v1215_v1 = vrot.slane %v1213_v15, 7  ;;  %v1220_v3 = vrot.slane %v1218_v55, 6  ;;  %v1223_v4 = vrot.slane %v1221_v57, 7 }
  0x79   : > { %v1294_v26 = vsel %vm18975_vm13, %v1289_v58, %v19126_v10  ;;  %v1229_v8 = vrot.slane %v1227_v62, 7  ;;  %v1231_v18 = vshrl.u32 %v875_v31, 16  ;;  %v1237_v9 = vshll.u32 %v19066_v29, 16 }
  0x7a   : > { %v1499_v13 = vcombine.low %v1284_v53, %v1294_v26  ;;  %v1210_v30 = vor.u32 %v1209_v59, %v19062_v11  ;;  %v1224_v17 = vor.u32 %v1223_v4, %v1220_v3  ;;  %v1241_v21 = vshrl.u32 %v19066_v29, 16 }
  0x7b   : > { %v1233_v20 = vrot.slane %v1231_v18, 6  ;;  %v1239_v23 = vrot.slane %v1237_v9, 7  ;;  %v923_v5 = vcombine.high %v19132_v47, %v19132_v47  ;;  %v19153_v14 = vcombine.high %v19138_v63, %v19138_v63  ;;  %v19189_v9 = vld.sshfl [vmem:[%s18788_s27 + $0x50] sm:$0x13 pattern:$0x76325410] }
  0x7c   : > { %v1513_v24 = vrot.slane %v1499_v13, %v18814_v19  ;;  %v1211_v7 = vrot.slane %v1210_v30, 2  ;;  %v1225_v27 = vrot.slane %v1224_v17, 2  ;;  %v1243_v40 = vrot.slane %v1241_v21, 6 }
  0x7d   : > { %v1234_v11 = vor.u32 %v1233_v20, %v1229_v8  ;;  %v19158_v28 = vcombine.high %v19147_v48, %v19147_v48  ;;  %v1335_v22 = vshll.u32 %v923_v5, 16  ;;  %v1339_v32 = vshrl.u32 %v923_v5, 16 }
  0x7e   : > { %v1514_v33 = vcombine.low %v1506_v61, %v1513_v24  ;;  %v1216_v6 = vsel %vm18975_vm13, %v1211_v7, %v1215_v1  ;;  %v1230_v36 = vsel %vm18975_vm13, %v1225_v27, %v1229_v8  ;;  %v1244_v42 = vor.u32 %v1243_v40, %v1239_v23 }
  0x7f   : > { %v1235_v38 = vrot.slane %v1234_v11, 2  ;;  %v1481_v41 = vcombine.low %v1216_v6, %v1230_v36  ;;  %v19164_v39 = vrot.slane %v1335_v22, 7  ;;  %v1341_v44 = vrot.slane %v1339_v32, 6 }
  0x80   : > { %1563 = vrot.lane.b32.xlu1 %v1514_v33, %s18717_s29  ;;  %v1245_v43 = vrot.slane %v1244_v42, 2  ;;  %v1345_v46 = vshll.u32 %v19138_v63, 16  ;;  %v1349_v34 = vshrl.u32 %v19138_v63, 16  ;;  %v1355_v50 = vshll.u32 %v19153_v14, 16 }
  0x81   : > { %v1240_v31 = vsel %vm18975_vm13, %v1235_v38, %v1239_v23  ;;  %v1489_v51 = vrot.slane %v1481_v41, %v18814_v19  ;;  %v1342_v52 = vor.u32 %v1341_v44, %v19164_v39  ;;  %v1359_v54 = vshrl.u32 %v19153_v14, 16 }
  0x82   : > { %v1250_v49 = vsel %vm18975_vm13, %v1245_v43, %v19105_v16  ;;  %v1347_v15 = vrot.slane %v1345_v46, 7  ;;  %v1351_v55 = vrot.slane %v1349_v34, 6  ;;  %v1357_v57 = vrot.slane %v1355_v50, 7 }
  0x83   : > { %v1482_v53 = vcombine.low %v1240_v31, %v1250_v49  ;;  %v1343_v58 = vrot.slane %v1342_v52, 2  ;;  %v1361_v61 = vrot.slane %v1359_v54, 6  ;;  %v1365_v62 = vshll.u32 %v19147_v48, 16 }
  0x84   : > { %v1352_v59 = vor.u32 %v1351_v55, %v1347_v15  ;;  %v1369_v1 = vshrl.u32 %v19147_v48, 16  ;;  %v1375_v3 = vshll.u32 %v19158_v28, 16  ;;  %v19183_v4 = vcombine.high %v19112_v25, %v19112_v25  ;;  %v17280_v50 = vld.sshfl [vmem:[%s18788_s27 + $0x48] sm:$0x32 pattern:$0x76325410] }
  0x85   : > { %v1496_v16 = vrot.slane %v1482_v53, %v18814_v19  ;;  %v1348_v26 = vsel %vm18975_vm13, %v1343_v58, %v1347_v15  ;;  %v1362_v8 = vor.u32 %v1361_v61, %v1357_v57  ;;  %v1367_v18 = vrot.slane %v1365_v62, 7 }
  0x86   : > { %v1353_v13 = vrot.slane %v1352_v59, 2  ;;  %v1371_v30 = vrot.slane %v1369_v1, 6  ;;  %v1377_v17 = vrot.slane %v1375_v3, 7  ;;  %v19193_v21 = vcombine.high %v19189_v9, %v19189_v9 }
  0x87   : > { %v1497_v20 = vcombine.low %v1489_v51, %v1496_v16  ;;  %v1363_v23 = vrot.slane %v1362_v8, 2  ;;  %v1295_v5 = vshrl.u32 %v19112_v25, 16  ;;  %v1301_v24 = vshll.u32 %v19183_v4, 16 }
  0x88   : > { %v1358_v7 = vsel %vm18975_vm13, %v1353_v13, %v1357_v57  ;;  %v1372_v27 = vor.u32 %v1371_v30, %v1367_v18  ;;  %v1305_v40 = vshrl.u32 %v19183_v4, 16  ;;  %v1311_v11 = vshll.u32 %v19189_v9, 16 }
  0x89   : > { %1561 = vrot.lane.b32.xlu0 %v1497_v20, %s18717_s29  ;;  %v1368_v22 = vsel %vm18975_vm13, %v1363_v23, %v1367_v18  ;;  %v1532_v32 = vcombine.low %v1348_v26, %v1358_v7  ;;  %v1297_v33 = vrot.slane %v1295_v5, 6  ;;  %v1303_v6 = vrot.slane %v1301_v24, 7  ;;  %v17277_v20 = vld.sshfl [vmem:[%s18788_s27 + $0x3c] sm:$0x32 pattern:$0x76325410] }
  0x8a   : > { %v1373_v36 = vrot.slane %v1372_v27, 2  ;;  %v1307_v42 = vrot.slane %v1305_v40, 6  ;;  %v1313_v38 = vrot.slane %v1311_v11, 7  ;;  %v1315_v41 = vshrl.u32 %v19189_v9, 16 }
  0x8b   : > { %v1540_v44 = vrot.slane %v1532_v32, %v18814_v19  ;;  %v1298_v43 = vor.u32 %v1297_v33, %v19126_v10  ;;  %v1321_v46 = vshll.u32 %v19193_v21, 16  ;;  %v1326_v34 = vshrl.u32 %v19132_v47, 16 }
  0x8c   : > { %v1378_v31 = vsel %vm18975_vm13, %v1373_v36, %v1377_v17  ;;  %v1308_v51 = vor.u32 %v1307_v42, %v1303_v6  ;;  %v1317_v52 = vrot.slane %v1315_v41, 6  ;;  %v1329_v54 = vshll.u32 %v19132_v47, 16 }
  0x8d   : > { %v1533_v49 = vcombine.low %v1368_v22, %v1378_v31  ;;  %v1299_v15 = vrot.slane %v1298_v43, 2  ;;  %v1323_v55 = vrot.slane %v1321_v46, 7  ;;  %v1328_v57 = vrot.slane %v1326_v34, 6 }
  0x8e   : > { %v1309_v53 = vrot.slane %v1308_v51, 2  ;;  %v1318_v58 = vor.u32 %v1317_v52, %v1313_v38  ;;  %v1331_v10 = vrot.slane %v1329_v54, 7  ;;  %v1789_v61 = vcombine.high %v17280_v50, %v17280_v50 }
  0x8f   : > { %v1547_v62 = vrot.slane %v1533_v49, %v18814_v19  ;;  %v1304_v59 = vsel %vm18975_vm13, %v1299_v15, %v1303_v6  ;;  %v1925_v1 = vrot.slane %v19087_v0, 7  ;;  %v1928_v3 = vrot.slane %v19083_v37, 7 }
  0x90   : > { %v1314_v47 = vsel %vm18975_vm13, %v1309_v53, %v1313_v38  ;;  %v1319_v16 = vrot.slane %v1318_v58, 2  ;;  %v1332_v26 = vor.u32 %v1331_v10, %v1328_v57  ;;  %v1931_v8 = vrot.slane %v19095_v60, 7  ;;  %v17283_v38 = vld.sshfl [vmem:[%s18788_s27 + $0x54] sm:$0x32 pattern:$0x76325410] }
  0x91   : > { %v1548_v18 = vcombine.low %v1540_v44, %v1547_v62  ;;  %v1515_v13 = vcombine.low %v1304_v59, %v1314_v47  ;;  %v1927_v30 = vrot.slane %v1925_v1, 2  ;;  %v1930_v17 = vrot.slane %v1928_v3, 2 }
  0x92   : > { %v1324_v23 = vsel %vm18975_vm13, %v1319_v16, %v1323_v55  ;;  %v1333_v5 = vrot.slane %v1332_v26, 2  ;;  %v17292_v0 = vrot.slane %v17280_v50, 9  ;;  %v1935_v24 = vrot.slane %v1789_v61, 7 }
  0x93   : > { %1567 = vrot.lane.b32.xlu1 %v1548_v18, %s18717_s29  ;;  %v1523_v37 = vrot.slane %v1515_v13, %v18814_v19  ;;  %v1929_v7 = vsel %vm18803_vm6, %v1927_v30, %v1928_v3  ;;  %v1932_v60 = vsel %vm18803_vm6, %v1930_v17, %v1931_v8  ;;  %v1938_v27 = vrot.slane %v19112_v25, 7  ;;  %v19274_v30 = vld.sshfl [vmem:[%s18788_s27 + $0xc] sm:$0x32 pattern:$0x76325410] }
  0x94   : > { %v1338_v40 = vsel %vm18975_vm13, %v1333_v5, %v19164_v39  ;;  %v1936_v11 = vsel %vm18803_vm6, %v17292_v0, %v1935_v24  ;;  %v1937_v22 = vrot.slane %v1935_v24, 2  ;;  %v2084_v32 = vcombine.low %v1929_v7, %v1932_v60 }
  0x95   : > { %v1516_v33 = vcombine.low %v1324_v23, %v1338_v40  ;;  %v1765_v6 = vcombine.high %v17277_v20, %v17277_v20  ;;  %v1914_v36 = vrot.slane %v1912_v56, 2  ;;  %v1915_v42 = vrot.slane %v19120_v45, 7 }
  0x96   : > { %v1939_v25 = vsel %vm18803_vm6, %v1937_v22, %v1938_v27  ;;  %v2092_v41 = vrot.slane %v2084_v32, %v18814_v19  ;;  %v17291_v44 = vrot.slane %v17277_v20, 9  ;;  %v1922_v39 = vrot.slane %v19066_v29, 7 }
  0x97   : > { %v1530_v43 = vrot.slane %v1516_v33, %v18814_v19  ;;  %v2085_v46 = vcombine.low %v1936_v11, %v1939_v25  ;;  %v1916_v34 = vsel %vm18803_vm6, %v1914_v36, %v1915_v42  ;;  %v1919_v50 = vrot.slane %v1765_v6, 7 }
  0x98   : > { %v1924_v35 = vrot.slane %v1922_v39, 2  ;;  %v1813_v56 = vcombine.high %v17283_v38, %v17283_v38  ;;  %v1954_v45 = vrot.slane %v19138_v63, 7  ;;  %v1957_v31 = vrot.slane %v19153_v14, 7 }
  0x99   : > { %v1531_v51 = vcombine.low %v1523_v37, %v1530_v43  ;;  %v2099_v52 = vrot.slane %v2085_v46, %v18814_v19  ;;  %v1920_v29 = vsel %vm18803_vm6, %v17291_v44, %v1919_v50  ;;  %v1921_v54 = vrot.slane %v1919_v50, 2 }
  0x9a   : > { %v1926_v49 = vsel %vm18803_vm6, %v1924_v35, %v1925_v1  ;;  %v2067_v15 = vcombine.low %v1916_v34, %v1920_v29  ;;  %v1951_v55 = vrot.slane %v1813_v56, 7  ;;  %v1956_v57 = vrot.slane %v1954_v45, 2  ;;  %v19262_v1 = vld.sshfl [vmem:[%s18788_s27 + $0x8] sm:$0x33 pattern:$0x76325410] }
  0x9b   : > { %1565 = vrot.lane.b32.xlu0 %v1531_v51, %s18717_s29  ;;  %v2100_v53 = vcombine.low %v2092_v41, %v2099_v52  ;;  %v1923_v63 = vsel %vm18803_vm6, %v1921_v54, %v1922_v39  ;;  %v1959_v14 = vrot.slane %v1957_v31, 2  ;;  %v1960_v58 = vrot.slane %v19147_v48, 7  ;;  %v17294_v39 = vld.sshfl [vmem:[%s18788_s27] sm:$0x32 pattern:$0x76325410] }
  0x9c   : > { %v2068_v10 = vcombine.low %v1923_v63, %v1926_v49  ;;  %v2075_v61 = vrot.slane %v2067_v15, %v18814_v19  ;;  %v1953_v62 = vrot.slane %v1951_v55, 2  ;;  %v1958_v59 = vsel %vm18803_vm6, %v1956_v57, %v1957_v31  ;;  %v19316_v35 = vld.sshfl [vmem:[%s18788_s27 + $0x4] sm:$0x33 pattern:$0x76325410] }
  0x9d   : > { %2149 = vrot.lane.b32.xlu1 %v2100_v53, %s18716_s28  ;;  %v1961_v3 = vsel %vm18803_vm6, %v1959_v14, %v1960_v58  ;;  %v1962_v47 = vrot.slane %v1960_v58, 2  ;;  %v1963_v16 = vrot.slane %v19158_v28, 7  ;;  %v1940_v26 = vrot.slane %v1938_v27, 2 }
  0x9e   : > { %v2082_v48 = vrot.slane %v2068_v10, %v18814_v19  ;;  %v1955_v8 = vsel %vm18803_vm6, %v1953_v62, %v1954_v45  ;;  %v1941_v18 = vrot.slane %v19183_v4, 7  ;;  %v1944_v13 = vrot.slane %v19189_v9, 7  ;;  %v19280_v28 = vld.sshfl [vmem:[%s18788_s27 + $0x10] sm:$0x33 pattern:$0x76325410] }
  0x9f   : > { %v1964_v17 = vsel %vm18803_vm6, %v1962_v47, %v1963_v16  ;;  %v2118_v20 = vcombine.low %v1955_v8, %v1958_v59  ;;  %v1947_v23 = vrot.slane %v19193_v21, 7  ;;  %v17293_v5 = vrot.slane %v17283_v38, 9 }
  0xa0   : > { %v2083_v0 = vcombine.low %v2075_v61, %v2082_v48  ;;  %v2119_v24 = vcombine.low %v1961_v3, %v1964_v17  ;;  %v1942_v37 = vsel %vm18803_vm6, %v1940_v26, %v1941_v18  ;;  %v1943_v7 = vrot.slane %v1941_v18, 2 }
  0xa1   : > { %v2126_v4 = vrot.slane %v2118_v20, %v18814_v19  ;;  %v1946_v9 = vrot.slane %v1944_v13, 2  ;;  %v1952_v60 = vsel %vm18803_vm6, %v17293_v5, %v1951_v55  ;;  %v2247_v27 = vcombine.high %v19262_v1, %v19262_v1 }
  0xa2   : > { %2147 = vrot.lane.b32.xlu0 %v2083_v0, %s18716_s28  ;;  %v2133_v21 = vrot.slane %v2119_v24, %v18814_v19  ;;  %v1945_v40 = vsel %vm18803_vm6, %v1943_v7, %v1944_v13  ;;  %v19295_v11 = vcombine.high %v19274_v30, %v19274_v30  ;;  %v19299_v22 = vcombine.high %v19280_v28, %v19280_v28 }
  0xa3   : > { %v1948_v32 = vsel %vm18803_vm6, %v1946_v9, %v1947_v23  ;;  %v2101_v33 = vcombine.low %v1942_v37, %v1945_v40  ;;  %v2456_v25 = vshrl.u32 %v19262_v1, 16  ;;  %v2465_v41 = vshrl.u32 %v2247_v27, 16  ;;  %v19353_v23 = vld.sshfl [vmem:[%s18788_s27 + $0x1c] sm:$0x33 pattern:$0x76325410] }
  0xa4   : > { %v2134_v6 = vcombine.low %v2126_v4, %v2133_v21  ;;  %v2102_v36 = vcombine.low %v1948_v32, %v1952_v60  ;;  %v2468_v44 = vshll.u32 %v2247_v27, 16  ;;  %v2473_v46 = vshrl.u32 %v19274_v30, 16  ;;  %v19361_v27 = vld.sshfl [vmem:[%s18788_s27 + $0x20] sm:$0x33 pattern:$0x76325410] }
  0xa5   : > { %v2109_v42 = vrot.slane %v2101_v33, %v18814_v19  ;;  %v2478_v34 = vshrl.u32 %v19295_v11, 16  ;;  %v2481_v50 = vshll.u32 %v19295_v11, 16  ;;  %v2458_v56 = vrot.slane %v2456_v25, 7 }
  0xa6   : > { %2153 = vrot.lane.b32.xlu1 %v2134_v6, %s18716_s28  ;;  %v2116_v43 = vrot.slane %v2102_v36, %v18814_v19  ;;  %v2467_v45 = vrot.slane %v2465_v41, 7  ;;  %v2487_v31 = vshrl.u32 %v19280_v28, 16  ;;  %v2490_v51 = vshll.u32 %v19280_v28, 16 }
  0xa7   : > { %v17319_v54 = vrot.slane %v2473_v46, 9  ;;  %v2480_v49 = vrot.slane %v2478_v34, 7  ;;  %v2496_v15 = vshrl.u32 %v19299_v22, 16  ;;  %v2463_v55 = vrot.slane %v2458_v56, 2 }
  0xa8   : > { %v2117_v52 = vcombine.low %v2109_v42, %v2116_v43  ;;  %v2470_v57 = vor.u32 %v2468_v44, %v2467_v45  ;;  %v2489_v53 = vrot.slane %v2487_v31, 7  ;;  %v2499_v63 = vshll.u32 %v19299_v22, 16  ;;  %v19367_v25 = vld.sshfl [vmem:[%s18788_s27 + $0x24] sm:$0x32 pattern:$0x76325410] }
  0xa9   : > { %v2483_v14 = vor.u32 %v2481_v50, %v2480_v49  ;;  %v2485_v58 = vrot.slane %v2480_v49, 2  ;;  %v19334_v10 = vrot.slane %v2496_v15, 7  ;;  %v2231_v61 = vcombine.high %v17294_v39, %v17294_v39 }
  0xaa   : > { %2151 = vrot.lane.b32.xlu0 %v2117_v52, %s18716_s28  ;;  %v2471_v62 = vsel %vm19323_vm4, %v2463_v55, %v2470_v57  ;;  %v2492_v59 = vor.u32 %v2490_v51, %v2489_v53  ;;  %v2494_v3 = vrot.slane %v2489_v53, 2  ;;  %v19342_v47 = vcombine.high %v19316_v35, %v19316_v35 }
  0xab   : > { %v2484_v16 = vsel %vm19323_vm4, %v17319_v54, %v2483_v14  ;;  %v2501_v26 = vor.u32 %v2499_v63, %v19334_v10  ;;  %v2424_v48 = vshrl.u32 %v17294_v39, 16  ;;  %v2429_v8 = vshrl.u32 %v2231_v61, 16 }
  0xac   : > { %v2493_v18 = vsel %vm19323_vm4, %v2485_v58, %v2492_v59  ;;  %v2832_v13 = vcombine.low %v2471_v62, %v2484_v16  ;;  %v2432_v17 = vshll.u32 %v2231_v61, 16  ;;  %v2438_v20 = vshrl.u32 %v19316_v35, 16 }
  0xad   : > { %v2502_v5 = vsel %vm19323_vm4, %v2494_v3, %v2501_v26  ;;  %v17318_v0 = vrot.slane %v2424_v48, 9  ;;  %v2431_v24 = vrot.slane %v2429_v8, 7  ;;  %v2441_v37 = vshll.u32 %v19316_v35, 16 }
  0xae   : > { %v2833_v7 = vcombine.low %v2493_v18, %v2502_v5  ;;  %v2840_v4 = vrot.slane %v2832_v13, %v18814_v19  ;;  %v2440_v9 = vrot.slane %v2438_v20, 7  ;;  %v2447_v60 = vshrl.u32 %v19342_v47, 16  ;;  %v19398_v3 = vld.sshfl [vmem:[%s18788_s27 + $0x14] sm:$0x33 pattern:$0x76325410] }
  0xaf   : > { %v2434_v21 = vor.u32 %v2432_v17, %v2431_v24  ;;  %v2436_v40 = vrot.slane %v2431_v24, 2  ;;  %v2450_v32 = vshll.u32 %v19342_v47, 16  ;;  %v2459_v33 = vshll.u32 %v19262_v1, 16 }
  0xb0   : > { %v2847_v6 = vrot.slane %v2833_v7, %v18814_v19  ;;  %v2443_v36 = vor.u32 %v2441_v37, %v2440_v9  ;;  %v2445_v42 = vrot.slane %v2440_v9, 2  ;;  %v2449_v38 = vrot.slane %v2447_v60, 7  ;;  %v19405_v5 = vld.sshfl [vmem:[%s18788_s27 + $0x18] sm:$0x32 pattern:$0x76325410] }
  0xb1   : > { %v2435_v41 = vsel %vm19323_vm4, %v17318_v0, %v2434_v21  ;;  %v2461_v44 = vor.u32 %v2459_v33, %v2458_v56  ;;  %v19373_v39 = vcombine.high %v19353_v23, %v19353_v23  ;;  %v2295_v43 = vcombine.high %v19361_v27, %v19361_v27 }
  0xb2   : > { %v2848_v46 = vcombine.low %v2840_v4, %v2847_v6  ;;  %v2444_v34 = vsel %vm19323_vm4, %v2436_v40, %v2443_v36  ;;  %v2452_v50 = vor.u32 %v2450_v32, %v2449_v38  ;;  %v2454_v45 = vrot.slane %v2449_v38, 2 }
  0xb3   : > { %v2815_v52 = vcombine.low %v2435_v41, %v2444_v34  ;;  %v19381_v54 = vcombine.high %v19367_v25, %v19367_v25  ;;  %v2536_v56 = vshrl.u32 %v19353_v23, 16  ;;  %v2545_v49 = vshrl.u32 %v19373_v39, 16 }
  0xb4   : > { %2987 = vrot.lane.b32.xlu1 %v2848_v46, %s18718_s30  ;;  %v2453_v55 = vsel %vm19323_vm4, %v2445_v42, %v2452_v50  ;;  %v2462_v57 = vsel %vm19323_vm4, %v2454_v45, %v2461_v44  ;;  %v2548_v53 = vshll.u32 %v19373_v39, 16  ;;  %v2554_v14 = vshrl.u32 %v19361_v27, 16  ;;  %v19423_v44 = vld.sshfl [vmem:[%s18788_s27 + $0x18] sm:$0x33 pattern:$0x76325410] }
  0xb5   : > { %v2816_v58 = vcombine.low %v2453_v55, %v2462_v57  ;;  %v2823_v61 = vrot.slane %v2815_v52, %v18814_v19  ;;  %v2538_v62 = vrot.slane %v2536_v56, 7  ;;  %v2547_v59 = vrot.slane %v2545_v49, 7 }
  0xb6   : > { %v2556_v16 = vrot.slane %v2554_v14, 7  ;;  %v2557_v26 = vshll.u32 %v19361_v27, 16  ;;  %v2563_v48 = vshrl.u32 %v2295_v43, 16  ;;  %v2566_v8 = vshll.u32 %v2295_v43, 16 }
  0xb7   : > { %v2830_v18 = vrot.slane %v2816_v58, %v18814_v19  ;;  %v2543_v13 = vrot.slane %v2538_v62, 2  ;;  %v2550_v17 = vor.u32 %v2548_v53, %v2547_v59  ;;  %v2552_v20 = vrot.slane %v2547_v59, 2 }
  0xb8   : > { %v2559_v0 = vor.u32 %v2557_v26, %v2556_v16  ;;  %v2561_v24 = vrot.slane %v2556_v16, 2  ;;  %v2565_v37 = vrot.slane %v2563_v48, 7  ;;  %v2571_v7 = vshrl.u32 %v19367_v25, 16 }
  0xb9   : > { %v2831_v4 = vcombine.low %v2823_v61, %v2830_v18  ;;  %v2551_v9 = vsel %vm19323_vm4, %v2543_v13, %v2550_v17  ;;  %v2576_v60 = vshrl.u32 %v19381_v54, 16  ;;  %v2579_v21 = vshll.u32 %v19381_v54, 16 }
  0xba   : > { %v2560_v40 = vsel %vm19323_vm4, %v2552_v20, %v2559_v0  ;;  %v2568_v32 = vor.u32 %v2566_v8, %v2565_v37  ;;  %v17321_v33 = vrot.slane %v2571_v7, 9  ;;  %v2271_v6 = vcombine.high %v19398_v3, %v19398_v3  ;;  %v19444_v8 = vld.sshfl [vmem:[%s18788_s27 + $0xc] sm:$0x30 pattern:$0x76325410] }
  0xbb   : > { %2985 = vrot.lane.b32.xlu0 %v2831_v4, %s18718_s30  ;;  %v19417_v36 = vrot.slane %v2576_v60, 7  ;;  %v2866_v42 = vcombine.low %v2551_v9, %v2560_v40  ;;  %v2279_v38 = vcombine.high %v19405_v5, %v19405_v5  ;;  %v2503_v41 = vrot.slane %v19334_v10, 2 }
  0xbc   : > { %v19427_v43 = vsel %vm19323_vm4, %v2561_v24, %v2568_v32  ;;  %v2505_v46 = vshrl.u32 %v19398_v3, 16  ;;  %v2508_v34 = vshll.u32 %v19398_v3, 16  ;;  %v2514_v50 = vshrl.u32 %v2271_v6, 16 }
  0xbd   : > { %24989 = vst [vmem:[#allocation3_spill] sm:$0xff] %v19417_v36  ;;  %v2581_v45 = vor.u32 %v2579_v21, %v19417_v36  ;;  %v19433_v52 = vrot.slane %v2866_v42, %v18814_v19  ;;  %v2517_v55 = vshll.u32 %v2271_v6, 16  ;;  %v2522_v10 = vshrl.u32 %v19405_v5, 16 }
  0xbe   : > { %v2507_v57 = vrot.slane %v2505_v46, 7  ;;  %v2516_v14 = vrot.slane %v2514_v50, 7  ;;  %v2527_v58 = vshrl.u32 %v2279_v38, 16  ;;  %v2530_v61 = vshll.u32 %v2279_v38, 16 }
  0xbf   : > { %v19438_v59 = vsel %vm19323_vm4, %v17321_v33, %v2581_v45  ;;  %v17320_v16 = vrot.slane %v2522_v10, 9  ;;  %v2539_v26 = vshll.u32 %v19353_v23, 16  ;;  %v6711_v48 = vcombine.high %v19423_v44, %v19423_v44 }
  0xc0   : > { %v2867_v18 = vcombine.low %v19427_v43, %v19438_v59  ;;  %v2510_v13 = vor.u32 %v2508_v34, %v2507_v57  ;;  %v2512_v17 = vrot.slane %v2507_v57, 2  ;;  %v2519_v20 = vor.u32 %v2517_v55, %v2516_v14 }
  0xc1   : > { %v2529_v0 = vrot.slane %v2527_v58, 7  ;;  %v2541_v24 = vor.u32 %v2539_v26, %v2538_v62  ;;  %v6888_v37 = vcombine.low %v19423_v44, %v6711_v48  ;;  %v6889_v7 = vcombine.low %v19353_v23, %v19373_v39 }
  0xc2   : > { %v2881_v4 = vrot.slane %v2867_v18, %v18814_v19  ;;  %v2511_v9 = vsel %vm19323_vm4, %v2503_v41, %v2510_v13  ;;  %v2520_v60 = vsel %vm19323_vm4, %v2512_v17, %v2519_v20  ;;  %v6260_v21 = vcombine.high %v19444_v8, %v19444_v8 }
  0xc3   : > { %v2532_v40 = vor.u32 %v2530_v61, %v2529_v0  ;;  %v2534_v32 = vrot.slane %v2529_v0, 2  ;;  %v2849_v62 = vcombine.low %v2511_v9, %v2520_v60  ;;  %v6896_v33 = vrot.slane %v6888_v37, %v18814_v19  ;;  %v19477_v61 = vld.sshfl [vmem:[%s18788_s27 + $0x20] sm:$0x13 pattern:$0x76325410] }
  0xc4   : > { %v2882_v6 = vcombine.low %v19433_v52, %v2881_v4  ;;  %v19461_v42 = vrot.slane %v6889_v7, %v18814_v19  ;;  %v6445_v46 = vcombine.low %v6260_v21, %v19280_v28  ;;  %v6446_v41 = vcombine.low %v19299_v22, %v19398_v3 }
  0xc5   : > { %v2533_v34 = vsel %vm19323_vm4, %v17320_v16, %v2532_v40  ;;  %v2542_v50 = vsel %vm19323_vm4, %v2534_v32, %v2541_v24  ;;  %v2857_v45 = vrot.slane %v2849_v62, %v18814_v19  ;;  %v17758_v55 = vrot.slane %v19405_v5, 9 }
  0xc6   : > { %2991 = vrot.lane.b32.xlu1 %v2882_v6, %s18718_s30  ;;  %v2850_v10 = vcombine.low %v2533_v34, %v2542_v50  ;;  %v6904_v57 = vcombine.low %v6896_v33, %v19461_v42  ;;  %v6453_v14 = vrot.slane %v6445_v46, %v18814_v19  ;;  %v6460_v58 = vrot.slane %v6446_v41, %v18814_v19  ;;  %v17326_v50 = vld.sshfl [vmem:[%s18788_s27] sm:$0x30 pattern:$0x76325410] }
  0xc7   : > { %v8222_v18 = vrot.slane %v2279_v38, 7  ;;  %v8225_v16 = vrot.slane %v19353_v23, 7  ;;  %v8228_v13 = vrot.slane %v19373_v39, 7  ;;  %v8231_v17 = vrot.slane %v19477_v61, 7 }
  0xc8   : > { %v19483_v5 = vrot.slane %v2850_v10, %v18814_v19  ;;  %v6461_v20 = vcombine.low %v6453_v14, %v6460_v58  ;;  %v7339_v0 = vshrl.u32 %v19423_v44, 16  ;;  %v7342_v24 = vshll.u32 %v19423_v44, 16 }
  0xc9   : > { %v8223_v37 = vsel %vm18803_vm6, %v17758_v55, %v8222_v18  ;;  %v8224_v7 = vrot.slane %v8222_v18, 2  ;;  %v8227_v4 = vrot.slane %v8225_v16, 2  ;;  %v8230_v38 = vrot.slane %v8228_v13, 2 }
  0xca   : > { %v2865_v9 = vcombine.low %v2857_v45, %v19483_v5  ;;  %7058 = vrot.lane.b32.xlu1 %v6904_v57, %s18716_s28  ;;  %v7341_v60 = vrot.slane %v7339_v0, 6  ;;  %v7344_v21 = vrot.slane %v7342_v24, 7  ;;  %v7348_v40 = vshll.u32 %v6711_v48, 16 }
  0xcb   : > { %v8226_v32 = vsel %vm18803_vm6, %v8224_v7, %v8225_v16  ;;  %v8229_v44 = vsel %vm18803_vm6, %v8227_v4, %v8228_v13  ;;  %v8232_v62 = vsel %vm18803_vm6, %v8230_v38, %v8231_v17  ;;  %v7352_v33 = vshrl.u32 %v6711_v48, 16  ;;  %v17378_v4 = vld.sshfl [vmem:[%s18788_s27 + $0xc] sm:$0x33 pattern:$0x76325410] }
  0xcc   : > { %2989 = vrot.lane.b32.xlu0 %v2865_v9, %s18718_s30  ;;  %v8348_v6 = vcombine.low %v8223_v37, %v8226_v32  ;;  %v8349_v46 = vcombine.low %v8229_v44, %v8232_v62  ;;  %v7345_v41 = vor.u32 %v7344_v21, %v7341_v60  ;;  %v7350_v34 = vrot.slane %v7348_v40, 7  ;;  %v19535_v62 = vld.sshfl [vmem:[%s18788_s27 + $0x24] sm:$0x33 pattern:$0x76325410] }
  0xcd   : > { %v7354_v45 = vrot.slane %v7352_v33, 6  ;;  %v7360_v55 = vrot.slane %v2539_v26, 7  ;;  %v7364_v10 = vrot.slane %v2536_v56, 6  ;;  %v7370_v57 = vrot.slane %v2548_v53, 7 }
  0xce   : > { %v8356_v14 = vrot.slane %v8348_v6, %v18814_v19  ;;  %v8363_v48 = vrot.slane %v8349_v46, %v18814_v19  ;;  %v7346_v58 = vrot.slane %v7345_v41, 2  ;;  %v7374_v18 = vrot.slane %v2545_v49, 6  ;;  %v19513_v56 = vld.sshfl [vmem:[%s18788_s27 + $0x18] sm:$0x30 pattern:$0x76325410] }
  0xcf   : > { %v7355_v16 = vor.u32 %v7354_v45, %v7350_v34  ;;  %v7365_v13 = vor.u32 %v7364_v10, %v7360_v55  ;;  %v7378_v0 = vshll.u32 %v19477_v61, 16  ;;  %v9206_v26 = vcombine.low %v19483_v5, %v19433_v52  ;;  %v19543_v46 = vld.sshfl [vmem:[%s18788_s27 + $0x28] sm:$0x33 pattern:$0x76325410] }
  0xd0   : > { %6615 = vrot.lane.b32.xlu0 %v6461_v20, %s18717_s29  ;;  %v8364_v53 = vcombine.low %v8356_v14, %v8363_v48  ;;  %v7351_v24 = vsel %vm18975_vm13, %v7346_v58, %v7350_v34  ;;  %v7375_v37 = vor.u32 %v7374_v18, %v7370_v57  ;;  %v3081_v7 = vcombine.high %v17326_v50, %v17326_v50 }
  0xd1   : > { %v7356_v49 = vrot.slane %v7355_v16, 2  ;;  %v7366_v38 = vrot.slane %v7365_v13, 2  ;;  %v19519_v9 = vrot.slane %v7378_v0, 7  ;;  %v3267_v60 = vcombine.low %v19342_v47, %v19262_v1 }
  0xd2   : > { %8518 = vrot.lane.b32.xlu1 %v8364_v53, %s18719_s5  ;;  %v7376_v52 = vrot.slane %v7375_v37, 2  ;;  %v3266_v5 = vcombine.low %v3081_v7, %v19316_v35  ;;  %v9455_v20 = vcombine.high %v19513_v56, %v19513_v56  ;;  %v9641_v21 = vcombine.low %v19373_v39, %v19361_v27  ;;  %v19567_v7 = vld.sshfl [vmem:[%s18788_s27 + $0x14] sm:$0x13 pattern:$0x76325410] }
  0xd3   : > { %v7361_v40 = vsel %vm18975_vm13, %v7356_v49, %v7360_v55  ;;  %v7371_v32 = vsel %vm18975_vm13, %v7366_v38, %v7370_v57  ;;  %v3281_v47 = vrot.slane %v3267_v60, %v18814_v19  ;;  %v3533_v44 = vcombine.high %v17378_v4, %v17378_v4 }
  0xd4   : > { %v7381_v35 = vsel %vm18975_vm13, %v7376_v52, %v19519_v9  ;;  %v7770_v33 = vcombine.low %v7351_v24, %v7361_v40  ;;  %v3274_v6 = vrot.slane %v3266_v5, %v18814_v19  ;;  %v9640_v39 = vcombine.low %v9455_v20, %v19353_v23 }
  0xd5   : > { %v7771_v41 = vcombine.low %v7371_v32, %v7381_v35  ;;  %v9655_v34 = vrot.slane %v9641_v21, %v18814_v19  ;;  %v3710_v50 = vcombine.low %v17378_v4, %v3533_v44  ;;  %v3711_v45 = vcombine.low %v19280_v28, %v19299_v22 }
  0xd6   : > { %v7778_v55 = vrot.slane %v7770_v33, %v18814_v19  ;;  %9360 = vrot.lane.b32.xlu1 %v9206_v26, %s18720_s6  ;;  %v3282_v10 = vcombine.low %v3274_v6, %v3281_v47  ;;  %v9648_v57 = vrot.slane %v9640_v39, %v18814_v19  ;;  %v19553_v23 = vcombine.high %v19535_v62, %v19535_v62 }
  0xd7   : > { %v7785_v14 = vrot.slane %v7771_v41, %v18814_v19  ;;  %v3718_v48 = vrot.slane %v3710_v50, %v18814_v19  ;;  %v3725_v58 = vrot.slane %v3711_v45, %v18814_v19  ;;  %v19560_v18 = vcombine.high %v19543_v46, %v19543_v46 }
  0xd8   : > { %v9656_v16 = vcombine.low %v9648_v57, %v9655_v34  ;;  %v10083_v13 = vcombine.low %v19535_v62, %v19553_v23  ;;  %v4162_v0 = vshrl.u32 %v17378_v4, 16  ;;  %v4165_v26 = vshll.u32 %v17378_v4, 16 }
  0xd9   : > { %v7786_v53 = vcombine.low %v7778_v55, %v7785_v14  ;;  %v3726_v24 = vcombine.low %v3718_v48, %v3725_v58  ;;  %v10084_v37 = vcombine.low %v19543_v46, %v19560_v18  ;;  %v4171_v49 = vshll.u32 %v3533_v44, 16 }
  0xda   : > { %9810 = vrot.lane.b32.xlu1 %v9656_v16, %s18721_s7  ;;  %v10091_v38 = vrot.slane %v10083_v13, %v18814_v19  ;;  %v4164_v60 = vrot.slane %v4162_v0, 6  ;;  %v4167_v52 = vrot.slane %v4165_v26, 7  ;;  %v4175_v5 = vshrl.u32 %v3533_v44, 16 }
  0xdb   : > { %7940 = vrot.lane.b32.xlu0 %v7786_v53, %s18718_s30  ;;  %v19573_v4 = vrot.slane %v10084_v37, %v18814_v19  ;;  %v4173_v20 = vrot.slane %v4171_v49, 7  ;;  %v4183_v21 = vrot.slane %v2490_v51, 7  ;;  %v4187_v40 = vrot.slane %v2487_v31, 6 }
  0xdc   : > { %v4168_v32 = vor.u32 %v4167_v52, %v4164_v60  ;;  %v4177_v47 = vrot.slane %v4175_v5, 6  ;;  %v4193_v35 = vrot.slane %v2499_v63, 7  ;;  %v4197_v44 = vrot.slane %v2496_v15, 6 }
  0xdd   : > { %v10099_v33 = vcombine.low %v10091_v38, %v19573_v4  ;;  %v4188_v6 = vor.u32 %v4187_v40, %v4183_v21  ;;  %v4201_v39 = vshll.u32 %v19567_v7, 16  ;;  %v17498_v41 = vrot.slane %v19274_v30, 9  ;;  %v19616_v52 = vld.sshfl [vmem:[%s18788_s27 + $0x2c] sm:$0x13 pattern:$0x76325410] }
  0xde   : > { %v4169_v34 = vrot.slane %v4168_v32, 2  ;;  %v4178_v51 = vor.u32 %v4177_v47, %v4173_v20  ;;  %v4198_v50 = vor.u32 %v4197_v44, %v4193_v35  ;;  %v5046_v31 = vrot.slane %v19295_v11, 7 }
  0xdf   : > { %3436 = vrot.lane.b32.xlu0 %v3282_v10, %s18719_s5  ;;  %10253 = vrot.lane.b32.xlu1 %v10099_v33, %s18722_s8  ;;  %v4189_v63 = vrot.slane %v4188_v6, 2  ;;  %v19589_v45 = vrot.slane %v4201_v39, 7  ;;  %v5049_v15 = vrot.slane %v19280_v28, 7  ;;  %v5052_v55 = vrot.slane %v19299_v22, 7 }
  0xe0   : > { %v4174_v30 = vsel %vm18975_vm13, %v4169_v34, %v4173_v20  ;;  %v4179_v57 = vrot.slane %v4178_v51, 2  ;;  %v4199_v14 = vrot.slane %v4198_v50, 2  ;;  %v5047_v11 = vsel %vm18803_vm6, %v17498_v41, %v5046_v31  ;;  %v19643_v50 = vld.sshfl [vmem:[%s18788_s27 + $0x2c] sm:$0x33 pattern:$0x76325410] }
  0xe1   : > { %v4194_v10 = vsel %vm18975_vm13, %v4189_v63, %v4193_v35  ;;  %v5048_v48 = vrot.slane %v5046_v31, 2  ;;  %v5051_v58 = vrot.slane %v5049_v15, 2  ;;  %v5054_v16 = vrot.slane %v5052_v55, 2 }
  0xe2   : > { %v4184_v28 = vsel %vm18975_vm13, %v4179_v57, %v4183_v21  ;;  %v4204_v22 = vsel %vm18975_vm13, %v4199_v14, %v19589_v45  ;;  %v24866_v13 = vrot.slane %v19567_v7, 7  ;;  %v18018_v0 = vrot.slane %v19367_v25, 9 }
  0xe3   : > { %3880 = vrot.lane.b32.xlu0 %v3726_v24, %s18720_s6  ;;  %v4593_v26 = vcombine.low %v4174_v30, %v4184_v28  ;;  %v4594_v53 = vcombine.low %v4194_v10, %v4204_v22  ;;  %v5050_v37 = vsel %vm18803_vm6, %v5048_v48, %v5049_v15  ;;  %v5053_v49 = vsel %vm18803_vm6, %v5051_v58, %v5052_v55 }
  0xe4   : > { %v5056_v38 = vsel %vm18803_vm6, %v5054_v16, %v24866_v13  ;;  %v5172_v60 = vcombine.low %v5047_v11, %v5050_v37  ;;  %v11397_v25 = vrot.slane %v19381_v54, 7  ;;  %v11400_v24 = vrot.slane %v19543_v46, 7  ;;  %v17640_v11 = vld.sshfl [vmem:[%s18788_s27 + $0x20] sm:$0x3 pattern:$0x76325410] }
  0xe5   : > { %v4601_v5 = vrot.slane %v4593_v26, %v18814_v19  ;;  %v4608_v20 = vrot.slane %v4594_v53, %v18814_v19  ;;  %v5173_v21 = vcombine.low %v5053_v49, %v5056_v38  ;;  %v11403_v40 = vrot.slane %v19560_v18, 7  ;;  %v19672_v53 = vld.sshfl [vmem:[%s18788_s27 + $0x24] sm:$0x30 pattern:$0x76325410] }
  0xe6   : > { %v5180_v32 = vrot.slane %v5172_v60, %v18814_v19  ;;  %v19626_v47 = vsel %vm18803_vm6, %v18018_v0, %v11397_v25  ;;  %v11399_v35 = vrot.slane %v11397_v25, 2  ;;  %v11402_v44 = vrot.slane %v11400_v24, 2 }
  0xe7   : > { %v4609_v33 = vcombine.low %v4601_v5, %v4608_v20  ;;  %v5187_v54 = vrot.slane %v5173_v21, %v18814_v19  ;;  %v19629_v6 = vrot.slane %v11403_v40, 2  ;;  %v24864_v39 = vrot.slane %v19616_v52, 7 }
  0xe8   : > { %v19634_v41 = vsel %vm18803_vm6, %v11399_v35, %v11400_v24  ;;  %v19638_v34 = vsel %vm18803_vm6, %v11402_v44, %v11403_v40  ;;  %v17610_v51 = vcombine.high %v19398_v3, %v19513_v56  ;;  %v24859_v31 = vrot.slane %v19417_v36, 2 }
  0xe9   : > { %4763 = vrot.lane.b32.xlu0 %v4609_v33, %s18721_s7  ;;  %v5188_v63 = vcombine.low %v5180_v32, %v5187_v54  ;;  %v11407_v15 = vsel %vm18803_vm6, %v19629_v6, %v24864_v39  ;;  %v11523_v55 = vcombine.low %v19626_v47, %v19634_v41  ;;  %v11988_v30 = vshrl.u32 %v19543_v46, 16 }
  0xea   : > { %v11524_v3 = vcombine.low %v19638_v34, %v11407_v15  ;;  %v6470_v56 = vrot.slane %v17610_v51, %v18814_v19  ;;  %v11991_v57 = vshll.u32 %v19543_v46, 16  ;;  %v24863_v14 = vshrl.u32 %v19560_v18, 16 }
  0xeb   : > { %5342 = vrot.lane.b32.xlu1 %v5188_v63, %s18722_s8  ;;  %v11531_v10 = vrot.slane %v11523_v55, %v18814_v19  ;;  %v11990_v48 = vrot.slane %v11988_v30, 7  ;;  %v12000_v58 = vshll.u32 %v19560_v18, 16  ;;  %v12006_v16 = vshrl.u32 %v19643_v50, 16 }
  0xec   : > { %v11538_v28 = vrot.slane %v11524_v3, %v18814_v19  ;;  %v6478_v22 = vcombine.low %v6470_v56, %v19461_v42  ;;  %v19668_v0 = vrot.slane %v24863_v14, 7  ;;  %v12009_v26 = vshll.u32 %v19643_v50, 16 }
  0xed   : > { %v19674_v37 = vor.u32 %v11991_v57, %v11990_v48  ;;  %v11995_v49 = vrot.slane %v11990_v48, 2  ;;  %v19676_v38 = vrot.slane %v12006_v16, 7  ;;  %v6905_v60 = vcombine.low %v17640_v11, %v19535_v62 }
  0xee   : > { %v11539_v25 = vcombine.low %v11531_v10, %v11538_v28  ;;  %v12002_v24 = vor.u32 %v12000_v58, %v19668_v0  ;;  %v24860_v42 = vrot.slane %v19668_v0, 2  ;;  %v6906_v5 = vcombine.low %v19553_v23, %v19543_v46  ;;  %v19718_v28 = vld.sshfl [vmem:[%s18788_s27 + $0x30] sm:$0x33 pattern:$0x76325410] }
  0xef   : > { %6617 = vrot.lane.b32.xlu1 %v6478_v22, %s18717_s29  ;;  %v11994_v20 = vsel %vm19323_vm4, %v24859_v31, %v19674_v37  ;;  %v12011_v21 = vor.u32 %v12009_v26, %v19676_v38  ;;  %v6913_v40 = vrot.slane %v6905_v60, %v18814_v19  ;;  %v12630_v32 = vcombine.high %v19672_v53, %v19672_v53 }
  0xf0   : > { %11693 = vrot.lane.b32.xlu0 %v11539_v25, %s18717_s29  ;;  %v19696_v35 = vsel %vm19323_vm4, %v11995_v49, %v12002_v24  ;;  %v12365_v44 = vcombine.low %v19438_v59, %v11994_v20  ;;  %v6920_v33 = vrot.slane %v6906_v5, %v18814_v19  ;;  %v12816_v54 = vcombine.low %v19560_v18, %v19643_v50 }
  0xf1   : > { %v12012_v51 = vsel %vm19323_vm4, %v24860_v42, %v12011_v21  ;;  %v12815_v63 = vcombine.low %v12630_v32, %v19543_v46  ;;  %v7169_v15 = vcombine.high %v19477_v61, %v19477_v61  ;;  %v7382_v55 = vshrl.u32 %v19477_v61, 16  ;;  %v19728_v21 = vld.sshfl [vmem:[%s18788_s27 + $0x34] sm:$0x33 pattern:$0x76325410] }
  0xf2   : > { %v12366_v3 = vcombine.low %v19696_v35, %v12012_v51  ;;  %v12373_v59 = vrot.slane %v12365_v44, %v18814_v19  ;;  %v6921_v56 = vcombine.low %v6913_v40, %v6920_v33  ;;  %v12830_v11 = vrot.slane %v12816_v54, %v18814_v19 }
  0xf3   : > { %v19714_v10 = vrot.slane %v12815_v63, %v18814_v19  ;;  %v7384_v48 = vrot.slane %v7382_v55, 6  ;;  %v7388_v16 = vshll.u32 %v7169_v15, 16  ;;  %v7393_v46 = vshrl.u32 %v19535_v62, 16 }
  0xf4   : > { %v12380_v22 = vrot.slane %v12366_v3, %v18814_v19  ;;  %7060 = vrot.lane.b32.xlu1 %v6921_v56, %s18716_s28  ;;  %v7396_v26 = vshll.u32 %v19535_v62, 16  ;;  %v7402_v49 = vshll.u32 %v19553_v23, 16  ;;  %v7406_v60 = vshrl.u32 %v19553_v23, 16 }
  0xf5   : > { %v12831_v25 = vcombine.low %v19714_v10, %v12830_v11  ;;  %v7385_v24 = vor.u32 %v7384_v48, %v19519_v9  ;;  %v7390_v5 = vrot.slane %v7388_v16, 7  ;;  %v7395_v20 = vrot.slane %v7393_v46, 6 }
  0xf6   : > { %v12381_v40 = vcombine.low %v12373_v59, %v12380_v22  ;;  %v7398_v32 = vrot.slane %v7396_v26, 7  ;;  %v7404_v44 = vrot.slane %v7402_v49, 7  ;;  %v7408_v33 = vrot.slane %v7406_v60, 6 }
  0xf7   : > { %v7386_v54 = vrot.slane %v7385_v24, 2  ;;  %v7414_v51 = vrot.slane %v11991_v57, 7  ;;  %v7418_v63 = vrot.slane %v11988_v30, 6  ;;  %v19733_v23 = vcombine.high %v19718_v28, %v19718_v28 }
  0xf8   : > { %12535 = vrot.lane.b32.xlu0 %v12381_v40, %s18716_s28  ;;  %v7399_v62 = vor.u32 %v7398_v32, %v7395_v20  ;;  %v7409_v55 = vor.u32 %v7408_v33, %v7404_v44  ;;  %v19737_v9 = vcombine.high %v19728_v21, %v19728_v21  ;;  %v19741_v56 = vrot.slane %v12000_v58, 7 }
  0xf9   : > { %v7391_v3 = vsel %vm18975_vm13, %v7386_v54, %v7390_v5  ;;  %v7419_v59 = vor.u32 %v7418_v63, %v7414_v51  ;;  %v8233_v30 = vrot.slane %v8231_v17, 2  ;;  %v13258_v48 = vcombine.low %v19718_v28, %v19733_v23 }
  0xfa   : > { %v7400_v57 = vrot.slane %v7399_v62, 2  ;;  %v7410_v11 = vrot.slane %v7409_v55, 2  ;;  %v13259_v16 = vcombine.low %v19728_v21, %v19737_v9  ;;  %v8234_v22 = vrot.slane %v7169_v15, 7 }
  0xfb   : > { %v7420_v46 = vrot.slane %v7419_v59, 2  ;;  %v19755_v61 = vrot.slane %v13258_v48, %v18814_v19  ;;  %v13709_v40 = vshrl.u32 %v19718_v28, 16  ;;  %v13712_v32 = vshll.u32 %v19718_v28, 16 }
  0xfc   : > { %12985 = vrot.lane.b32.xlu0 %v12831_v25, %s18718_s30  ;;  %v7405_v26 = vsel %vm18975_vm13, %v7400_v57, %v7404_v44  ;;  %v7415_v58 = vsel %vm18975_vm13, %v7410_v11, %v7414_v51  ;;  %v19758_v17 = vrot.slane %v13259_v16, %v18814_v19  ;;  %v8235_v60 = vsel %vm18803_vm6, %v8233_v30, %v8234_v22  ;;  %v18254_v11 = vld.sshfl [vmem:[%s18788_s27 + $0x30] sm:$0x32 pattern:$0x76325410] }
  0xfd   : > { %v7425_v49 = vsel %vm18975_vm13, %v7420_v46, %v19741_v56  ;;  %v7787_v15 = vcombine.low %v7391_v3, %v7405_v26  ;;  %v8365_v20 = vcombine.low %v8235_v60, %v19626_v47  ;;  %v13718_v33 = vshll.u32 %v19733_v23, 16  ;;  %v19779_v47 = vld.sshfl [vmem:[%s18788_s27 + $0x38] sm:$0x13 pattern:$0x76325410] }
  0xfe   : > { %v7788_v25 = vcombine.low %v7415_v58, %v7425_v49  ;;  %v13274_v24 = vcombine.low %v19755_v61, %v19758_v17  ;;  %v13722_v54 = vshrl.u32 %v19733_v23, 16  ;;  %v8366_v51 = vcombine.low %v19634_v41, %v19638_v34  ;;  %v19787_v41 = vld.sshfl [vmem:[%s18788_s27 + $0x10] sm:$0x33 pattern:$0x76325410] }
  0xff   : > { %v7795_v5 = vrot.slane %v7787_v15, %v18814_v19  ;;  %v8373_v63 = vrot.slane %v8365_v20, %v18814_v19  ;;  %v13711_v62 = vrot.slane %v13709_v40, 6  ;;  %v13714_v55 = vrot.slane %v13712_v32, 7 }
 0x100   : > { %v7802_v44 = vrot.slane %v7788_v25, %v18814_v19  ;;  %13428 = vrot.lane.b32.xlu0 %v13274_v24, %s18719_s5  ;;  %v13720_v59 = vrot.slane %v13718_v33, 7  ;;  %v13724_v30 = vrot.slane %v13722_v54, 6  ;;  %v13728_v57 = vshll.u32 %v19728_v21, 16 }
 0x101   : > { %v8380_v48 = vrot.slane %v8366_v51, %v18814_v19  ;;  %v13715_v16 = vor.u32 %v13714_v55, %v13711_v62  ;;  %v13732_v46 = vshrl.u32 %v19728_v21, 16  ;;  %v13738_v22 = vshll.u32 %v19737_v9, 16 }
 0x102   : > { %v7803_v3 = vcombine.low %v7795_v5, %v7802_v44  ;;  %v13725_v34 = vor.u32 %v13724_v30, %v13720_v59  ;;  %v19792_v26 = vrot.slane %v13728_v57, 7  ;;  %v13742_v58 = vshrl.u32 %v19737_v9, 16 }
 0x103   : > { %v13748_v49 = vshll.u32 %v19779_v47, 16  ;;  %v8381_v15 = vcombine.low %v8373_v63, %v8380_v48  ;;  %v13716_v60 = vrot.slane %v13715_v16, 2  ;;  %v13734_v25 = vrot.slane %v13732_v46, 6 }
 0x104   : > { %7942 = vrot.lane.b32.xlu1 %v7803_v3, %s18718_s30  ;;  %24990 = vst [vmem:[#allocation4_spill] sm:$0xff] %v19792_v26  ;;  %v13740_v24 = vrot.slane %v13738_v22, 7  ;;  %v13726_v5 = vrot.slane %v13725_v34, 2  ;;  %v13744_v20 = vrot.slane %v13742_v58, 6  ;;  %v19802_v32 = vcombine.high %v19787_v41, %v19787_v41 }
 0x105   : > { %v19798_v40 = vrot.slane %v13748_v49, 7  ;;  %v13721_v44 = vsel %vm18975_vm13, %v13716_v60, %v13720_v59  ;;  %v13735_v33 = vor.u32 %v13734_v25, %v19792_v26  ;;  %v17350_v54 = vcombine.high %v19262_v1, %v19444_v8 }
 0x106   : > { %v14405_v51 = vcombine.high %v18254_v11, %v18254_v11  ;;  %v13731_v63 = vsel %vm18975_vm13, %v13726_v5, %v19792_v26  ;;  %v13745_v62 = vor.u32 %v13744_v20, %v13740_v24  ;;  %v3284_v55 = vcombine.low %v19787_v41, %v19802_v32 }
 0x107   : > { %v18278_v3 = vrot.slane %v18254_v11, 9  ;;  %v13736_v30 = vrot.slane %v13735_v33, 2  ;;  %v14140_v48 = vcombine.low %v13721_v44, %v13731_v63  ;;  %v3291_v59 = vrot.slane %v17350_v54, %v18814_v19 }
 0x108   : > { %8520 = vrot.lane.b32.xlu1 %v8381_v15, %s18719_s5  ;;  %v14592_v16 = vrot.slane %v14405_v51, 7  ;;  %v13746_v34 = vrot.slane %v13745_v62, 2  ;;  %v3298_v1 = vrot.slane %v3284_v55, %v18814_v19  ;;  %v14595_v8 = vrot.slane %v19728_v21, 7 }
 0x109   : > { %v14598_v49 = vrot.slane %v19737_v9, 7  ;;  %v13741_v15 = vsel %vm18975_vm13, %v13736_v30, %v13740_v24  ;;  %v19822_v60 = vrot.slane %v14140_v48, %v18814_v19  ;;  %v24862_v62 = vrot.slane %v19779_v47, 7 }
 0x10a   : > { %v19826_v25 = vsel %vm18803_vm6, %v18278_v3, %v14592_v16  ;;  %v14594_v5 = vrot.slane %v14592_v16, 2  ;;  %v13751_v20 = vsel %vm18975_vm13, %v13746_v34, %v19798_v40  ;;  %v3299_v44 = vcombine.low %v3291_v59, %v3298_v1  ;;  %v19855_v34 = vld.sshfl [vmem:[%s18788_s27 + $0x38] sm:$0x33 pattern:$0x76325410] }
 0x10b   : > { %v19831_v33 = vrot.slane %v14595_v8, 2  ;;  %v19833_v54 = vrot.slane %v14598_v49, 2  ;;  %v14141_v63 = vcombine.low %v13741_v15, %v13751_v20  ;;  %v15169_v55 = vshrl.u32 %v18254_v11, 16 }
 0x10c   : > { %v19837_v24 = vsel %vm18803_vm6, %v14594_v5, %v14595_v8  ;;  %3438 = vrot.lane.b32.xlu1 %v3299_v44, %s18719_s5  ;;  %v15174_v48 = vshrl.u32 %v14405_v51, 16  ;;  %v15177_v59 = vshll.u32 %v14405_v51, 16  ;;  %v15185_v8 = vrot.slane %v13732_v46, 7 }
 0x10d   : > { %24991 = vst [vmem:[#allocation5_spill] sm:$0xff] %v19831_v33  ;;  %v19844_v3 = vsel %vm18803_vm6, %v19831_v33, %v14598_v49  ;;  %v14718_v30 = vcombine.low %v19826_v25, %v19837_v24  ;;  %v14155_v16 = vrot.slane %v14141_v63, %v18814_v19  ;;  %v14602_v11 = vsel %vm18803_vm6, %v19833_v54, %v24862_v62  ;;  %v17793_v51 = vld.sshfl [vmem:[%s18788_s27 + $0x24] sm:$0x32 pattern:$0x76325410] }
 0x10e   : > { %v18334_v1 = vrot.slane %v15169_v55, 9  ;;  %v14719_v49 = vcombine.low %v19844_v3, %v14602_v11  ;;  %v19861_v5 = vrot.slane %v15174_v48, 7  ;;  %v15188_v44 = vor.u32 %v15185_v8, %v13728_v57 }
 0x10f   : > { %v19859_v15 = vrot.slane %v14718_v30, %v18814_v19  ;;  %v14156_v20 = vcombine.low %v19822_v60, %v14155_v16  ;;  %v15190_v63 = vrot.slane %v15185_v8, 2  ;;  %v19870_v11 = vrot.slane %v13742_v58, 7  ;;  %v19890_v8 = vld.sshfl [vmem:[%s18788_s27 + $0x18] sm:$0x33 pattern:$0x76325410] }
 0x110   : > { %v14733_v31 = vrot.slane %v14719_v49, %v18814_v19  ;;  %v15179_v55 = vor.u32 %v15177_v59, %v19861_v5  ;;  %v24861_v46 = vrot.slane %v19861_v5, 2  ;;  %v15201_v30 = vshrl.u32 %v19855_v34, 16 }
 0x111   : > { %24992 = vst [vmem:[#allocation6_spill] sm:$0xff] %v19870_v11  ;;  %14310 = vrot.lane.b32.xlu0 %v14156_v20, %s18720_s6  ;;  %v15204_v48 = vshll.u32 %v19855_v34, 16  ;;  %v8637_v42 = vcombine.high %v17793_v51, %v17793_v51  ;;  %v15197_v59 = vor.u32 %v19870_v11, %v13738_v22  ;;  %v24865_v49 = vrot.slane %v19870_v11, 2 }
 0x112   : > { %v14734_v16 = vcombine.low %v19859_v15, %v14733_v31  ;;  %v19878_v57 = vsel %vm19323_vm4, %v18334_v1, %v15179_v55  ;;  %v19884_v58 = vsel %vm19323_vm4, %v24861_v46, %v15188_v44  ;;  %v19893_v20 = vrot.slane %v15201_v30, 7  ;;  %v19905_v30 = vld.sshfl [vmem:[%s18788_s27 + $0x14] sm:$0x3 pattern:$0x76325410] }
 0x113   : > { %v15560_v31 = vcombine.low %v19878_v57, %v19884_v58  ;;  %v19899_v1 = vsel %vm19323_vm4, %v15190_v63, %v15197_v59  ;;  %v8848_v44 = vshrl.u32 %v17793_v51, 16  ;;  %v8853_v55 = vshrl.u32 %v8637_v42, 16  ;;  %v19919_v59 = vld.sshfl [vmem:[%s18788_s27 + $0x1c] sm:$0x33 pattern:$0x76325410] }
 0x114   : > { %v15206_v9 = vor.u32 %v15204_v48, %v19893_v20  ;;  %v8856_v46 = vshll.u32 %v8637_v42, 16  ;;  %v17870_v51 = vcombine.high %v19361_v27, %v19672_v53  ;;  %v19915_v48 = vcombine.high %v19890_v8, %v19890_v8 }
 0x115   : > { %14888 = vrot.lane.b32.xlu0 %v14734_v16, %s18721_s7  ;;  %v15568_v22 = vrot.slane %v15560_v31, %v18814_v19  ;;  %v17815_v62 = vrot.slane %v8848_v44, 9  ;;  %v8855_v63 = vrot.slane %v8853_v55, 7  ;;  %v3727_v42 = vcombine.low %v19905_v30, %v19890_v8  ;;  %v19927_v55 = vld.sshfl [vmem:[%s18788_s27 + $0x2c] sm:$0x3 pattern:$0x76325410] }
 0x116   : > { %v15207_v14 = vsel %vm19323_vm4, %v24865_v49, %v15206_v9  ;;  %v9665_v39 = vrot.slane %v17870_v51, %v18814_v19  ;;  %v3728_v9 = vcombine.low %v19915_v48, %v19919_v59  ;;  %v4239_v33 = vshrl.u32 %v19919_v59, 16 }
 0x117   : > { %v15561_v16 = vcombine.low %v19899_v1, %v15207_v14  ;;  %v8858_v31 = vor.u32 %v8856_v46, %v8855_v63  ;;  %v8860_v44 = vrot.slane %v8855_v63, 2  ;;  %v3735_v53 = vrot.slane %v3727_v42, %v18814_v19 }
 0x118   : > { %v9673_v46 = vcombine.low %v9665_v39, %v19573_v4  ;;  %v3742_v63 = vrot.slane %v3728_v9, %v18814_v19  ;;  %v4229_v9 = vshrl.u32 %v19915_v48, 16 }
 0x119   : > { %v15575_v27 = vrot.slane %v15561_v16, %v18814_v19  ;;  %v8859_v14 = vsel %vm19323_vm4, %v17815_v62, %v8858_v31  ;;  %v8868_v49 = vsel %vm19323_vm4, %v8860_v44, %v19674_v37  ;;  %v10100_v16 = vcombine.low %v19927_v55, %v19718_v28 }
 0x11a   : > { %v9207_v13 = vcombine.low %v19427_v43, %v8859_v14  ;;  %v9208_v42 = vcombine.low %v8868_v49, %v19696_v35  ;;  %v3743_v36 = vcombine.low %v3735_v53, %v3742_v63  ;;  %v10101_v62 = vcombine.low %v19733_v23, %v19728_v21 }
 0x11b   : > { %v15576_v51 = vcombine.low %v15568_v22, %v15575_v27  ;;  %v3992_v37 = vcombine.high %v19567_v7, %v19567_v7  ;;  %v10108_v39 = vrot.slane %v10100_v16, %v18814_v19  ;;  %v19951_v43 = vcombine.high %v19919_v59, %v19919_v59  ;;  %v17477_v22 = vld.sshfl [vmem:[%s18788_s27 + $0x18] sm:$0x32 pattern:$0x76325410] }
 0x11c   : > { %v9215_v4 = vrot.slane %v9207_v13, %v18814_v19  ;;  %v4205_v28 = vshrl.u32 %v19567_v7, 16  ;;  %v9222_v35 = vrot.slane %v9208_v42, %v18814_v19  ;;  %v10115_v49 = vrot.slane %v10101_v62, %v18814_v19 }
 0x11d   : > { %15730 = vrot.lane.b32.xlu1 %v15576_v51, %s18722_s8  ;;  %v4211_v21 = vshll.u32 %v3992_v37, 16  ;;  %v4216_v23 = vshrl.u32 %v19890_v8, 16  ;;  %v4219_v44 = vshll.u32 %v19890_v8, 16  ;;  %v4225_v13 = vshll.u32 %v19915_v48, 16 }
 0x11e   : > { %v4207_v31 = vrot.slane %v4205_v28, 6  ;;  %v9223_v27 = vcombine.low %v9215_v4, %v9222_v35  ;;  %v10116_v53 = vcombine.low %v10108_v39, %v10115_v49  ;;  %v4231_v62 = vrot.slane %v4229_v9, 6 }
 0x11f   : > { %v4213_v14 = vrot.slane %v4211_v21, 7  ;;  %v4218_v63 = vrot.slane %v4216_v23, 6  ;;  %v4221_v16 = vrot.slane %v4219_v44, 7  ;;  %v4227_v42 = vrot.slane %v4225_v13, 7 }
 0x120   : > { %v4208_v51 = vor.u32 %v4207_v31, %v19589_v45  ;;  %9362 = vrot.lane.b32.xlu0 %v9223_v27, %s18720_s6  ;;  %v4235_v28 = vshll.u32 %v19919_v59, 16  ;;  %v4245_v26 = vshll.u32 %v19951_v43, 16  ;;  %v4883_v11 = vcombine.high %v17477_v22, %v17477_v22 }
 0x121   : > { %9812 = vrot.lane.b32.xlu1 %v9673_v46, %s18721_s7  ;;  %v4222_v39 = vor.u32 %v4221_v16, %v4218_v63  ;;  %v4232_v35 = vor.u32 %v4231_v62, %v4227_v42  ;;  %v24993_v49 = vrot.slane %v19567_v7, 7  ;;  %v4241_v45 = vrot.slane %v4239_v33, 6  ;;  %v17591_v62 = vld.sshfl [vmem:[%s18788_s27 + $0x20] sm:$0x33 pattern:$0x76325410] }
 0x122   : > { %v4209_v4 = vrot.slane %v4208_v51, 2  ;;  %v4237_v21 = vrot.slane %v4235_v28, 7  ;;  %v19969_v23 = vrot.slane %v4245_v26, 7  ;;  %v5058_v31 = vrot.slane %v3992_v37, 7 }
 0x123   : > { %v5057_v46 = vrot.slane %v24993_v49, 2  ;;  %v4223_v13 = vrot.slane %v4222_v39, 2  ;;  %v4233_v9 = vrot.slane %v4232_v35, 2  ;;  %v17499_v27 = vrot.slane %v17477_v22, 9 }
 0x124   : > { %v4214_v44 = vsel %vm18975_vm13, %v4209_v4, %v4213_v14  ;;  %3882 = vrot.lane.b32.xlu0 %v3743_v36, %s18720_s6  ;;  %v4242_v63 = vor.u32 %v4241_v45, %v4237_v21  ;;  %v5062_v51 = vrot.slane %v4883_v11, 7  ;;  %v5065_v26 = vrot.slane %v19919_v59, 7 }
 0x125   : > { %10255 = vrot.lane.b32.xlu1 %v10116_v53, %s18722_s8  ;;  %v5059_v7 = vsel %vm18803_vm6, %v5057_v46, %v5058_v31  ;;  %v4228_v33 = vsel %vm18975_vm13, %v4223_v13, %v4227_v42  ;;  %v4238_v37 = vsel %vm18975_vm13, %v4233_v9, %v4237_v21  ;;  %v24871_v53 = vrot.slane %v19951_v43, 7  ;;  %v20006_v9 = vpop.permute.xlu0 %2135 }
 0x126   : > { %v19985_v22 = vcombine.high %v19616_v52, %v19616_v52  ;;  %v4243_v36 = vrot.slane %v4242_v63, 2  ;;  %v4610_v14 = vcombine.low %v4214_v44, %v4228_v33  ;;  %v5063_v16 = vsel %vm18803_vm6, %v17499_v27, %v5062_v51  ;;  %v18627_v27 = vld [vmem:[%s24855_s1 + $0x40] sm:$0xff]  }
 0x127   : > { %v5064_v11 = vrot.slane %v5062_v51, 2  ;;  %v5067_v28 = vrot.slane %v5065_v26, 2  ;;  %v5189_v4 = vcombine.low %v5059_v7, %v5063_v16  ;;  %v24994_v42 = vrot.slane %v19616_v52, 7  ;;  %v18628_v63 = vld [vmem:[%s24855_s1] sm:$0xff]   ;;  %18499 = vmatprep.subr.bf16.mxu0 %v18627_v27 }
 0x128   : > { %v11409_v35 = vrot.slane %v19985_v22, 7  ;;  %v4248_v49 = vsel %vm18975_vm13, %v4243_v36, %v19969_v23  ;;  %v4618_v46 = vrot.slane %v4610_v14, %v18814_v19  ;;  %v11804_v36 = vcombine.high %v19643_v50, %v19643_v50  ;;  %18500 = vmatpush3.bf16.msra.mxu0 %v18628_v63 }
 0x129   : > { %v11408_v39 = vrot.slane %v24994_v42, 2  ;;  %v5066_v21 = vsel %vm18803_vm6, %v5064_v11, %v5065_v26  ;;  %v4611_v45 = vcombine.low %v4238_v37, %v4248_v49  ;;  %v5069_v31 = vsel %vm18803_vm6, %v5067_v28, %v24871_v53 }
 0x12a   : > { %v5197_v44 = vrot.slane %v5189_v4, %v18814_v19  ;;  %v5190_v7 = vcombine.low %v5066_v21, %v5069_v31  ;;  %v6300_v26 = vcombine.high %v17591_v62, %v17591_v62  ;;  %v11541_v37 = vcombine.low %v19837_v24, %v19844_v3  ;;  %v20026_v3 = vld.sshfl [vmem:[%s18788_s27 + $0x30] sm:$0x30 pattern:$0x76325410]  ;;  %v20029_v21 = vpop.permute.xlu0 %2139 }
 0x12b   : > { %v11410_v13 = vsel %vm18803_vm6, %v11408_v39, %v11409_v35  ;;  %v4625_v33 = vrot.slane %v4611_v45, %v18814_v19  ;;  %v12013_v14 = vrot.slane %v19676_v38, 2  ;;  %v12015_v42 = vshrl.u32 %v11804_v36, 16 }
 0x12c   : > { %v11540_v51 = vcombine.low %v11410_v13, %v19826_v25  ;;  %v5204_v16 = vrot.slane %v5190_v7, %v18814_v19  ;;  %v6479_v28 = vcombine.low %v17591_v62, %v6300_v26  ;;  %v11555_v4 = vrot.slane %v11541_v37, %v18814_v19  ;;  %v18629_v26 = vld [vmem:[%s24855_s1 + $0x48] sm:$0xff]  }
 0x12d   : > { %v4626_v25 = vcombine.low %v4618_v46, %v4625_v33  ;;  %v12018_v39 = vshll.u32 %v11804_v36, 16  ;;  %v12017_v49 = vrot.slane %v12015_v42, 7  ;;  %v20033_v46 = vpop.permute.xlu1 %2137  ;;  %v18130_v31 = vcombine.high %v19643_v50, %v20026_v3  ;;  %18501 = vmatprep.subr.bf16.mxu0 %v18629_v26 }
 0x12e   : > { %v11548_v11 = vrot.slane %v11540_v51, %v18814_v19  ;;  %v5205_v35 = vcombine.low %v5197_v44, %v5204_v16  ;;  %v6487_v24 = vrot.slane %v6479_v28, %v18814_v19  ;;  %v7432_v13 = vshll.u32 %v19616_v52, 16  ;;  %v20049_v51 = vld.sshfl [vmem:[%s18788_s27 + $0x3c] sm:$0x33 pattern:$0x76325410]  ;;  %v20057_v16 = vpop.permute.xlu0 %2143 }
 0x12f   : > { %4765 = vrot.lane.b32.xlu0 %v4626_v25, %s18721_s7  ;;  %v12020_v45 = vor.u32 %v12018_v39, %v12017_v49  ;;  %v12840_v63 = vrot.slane %v18130_v31, %v18814_v19  ;;  %v24995_v7 = vshrl.u32 %v19560_v18, 16  ;;  %v7436_v37 = vshrl.u32 %v19616_v52, 16  ;;  %v20068_v52 = vld.sshfl [vmem:[%s18788_s27 + $0x38] sm:$0x3 pattern:$0x76325410] }
 0x130   : > { %v11556_v38 = vcombine.low %v11548_v11, %v11555_v4  ;;  %5344 = vrot.lane.b32.xlu1 %v5205_v35, %s18722_s8  ;;  %v6495_v62 = vcombine.low %v6487_v24, %v19714_v10  ;;  %v6922_v10 = vcombine.low %v19560_v18, %v19927_v55  ;;  %v7434_v33 = vrot.slane %v7432_v13, 7  ;;  %v18630_v11 = vld [vmem:[%s24855_s1 + $0x8] sm:$0xff]  }
 0x131   : > { %v12021_v44 = vsel %vm19323_vm4, %v12013_v14, %v12020_v45  ;;  %v7428_v50 = vrot.slane %v24995_v7, 6  ;;  %v7442_v36 = vshll.u32 %v19985_v22, 16  ;;  %v17739_v14 = vld.sshfl [vmem:[%s18788_s27 + $0x2c] sm:$0x13 pattern:$0x76325410]  ;;  %v12383_v28 = vcombine.low %v19884_v58, %v19899_v1  ;;  %v20070_v22 = vpop.permute.xlu1 %2141  ;;  %18502 = vmatpush3.bf16.msra.mxu0 %v18630_v11 }
 0x132   : > { %v12382_v27 = vcombine.low %v12021_v44, %v19878_v57  ;;  %v6930_v4 = vrot.slane %v6922_v10, %v18814_v19  ;;  %v12848_v42 = vcombine.low %v12840_v63, %v19758_v17  ;;  %v7438_v35 = vrot.slane %v7436_v37, 6  ;;  %v20092_v10 = vpop.permute.xlu0 %1549 }
 0x133   : > { %11695 = vrot.lane.b32.xlu0 %v11556_v38, %s18717_s29  ;;  %v7429_v39 = vor.u32 %v7428_v50, %v19741_v56  ;;  %v7444_v24 = vrot.slane %v7442_v36, 7  ;;  %v12397_v38 = vrot.slane %v12383_v28, %v18814_v19  ;;  %v20077_v1 = vcombine.high %v20049_v51, %v20049_v51 }
 0x134   : > { %6619 = vrot.lane.b32.xlu1 %v6495_v62, %s18717_s29  ;;  %v12390_v25 = vrot.slane %v12382_v27, %v18814_v19  ;;  %v6938_v58 = vcombine.low %v6930_v4, %v19755_v61  ;;  %v7439_v17 = vor.u32 %v7438_v35, %v7434_v33  ;;  %v20080_v62 = vld.sshfl [vmem:[%s18788_s27 + $0x40] sm:$0x33 pattern:$0x76325410]  ;;  %v13275_v45 = vcombine.low %v20068_v52, %v20049_v51 }
 0x135   : > { %v7430_v49 = vrot.slane %v7429_v39, 2  ;;  %v13276_v56 = vcombine.low %v20077_v1, %v20080_v62  ;;  %v8075_v44 = vcombine.high %v17739_v14, %v17739_v14  ;;  %v8247_v7 = vrot.slane %v17739_v14, 7  ;;  %v20096_v50 = vpop.permute.xlu1 %2145 }
 0x136   : > { %v12398_v31 = vcombine.low %v12390_v25, %v12397_v38  ;;  %v7440_v13 = vrot.slane %v7439_v17, 2  ;;  %v20090_v27 = vrot.slane %v13275_v45, %v18814_v19  ;;  %v20106_v36 = vcombine.high %v20080_v62, %v20080_v62  ;;  %v20123_v45 = vpop.permute.xlu0 %1551 }
 0x137   : > { %v7435_v61 = vsel %vm18975_vm13, %v7430_v49, %v7434_v33  ;;  %v13290_v63 = vrot.slane %v13276_v56, %v18814_v19  ;;  %v8250_v37 = vrot.slane %v8075_v44, 7  ;;  %v20102_v33 = vcombine.high %v19779_v47, %v19779_v47 }
 0x138   : > { %7062 = vrot.lane.b32.xlu1 %v6938_v58, %s18716_s28  ;;  %24996 = vst [vmem:[#allocation7_spill] sm:$0xff] %v20090_v27  ;;  %12537 = vrot.lane.b32.xlu0 %v12398_v31, %s18716_s28  ;;  %v7445_v26 = vsel %vm18975_vm13, %v7440_v13, %v7444_v24  ;;  %v8248_v14 = vsel %vm18803_vm6, %v19629_v6, %v8247_v7  ;;  %v8249_v25 = vrot.slane %v8247_v7, 2  ;;  %v13752_v4 = vshrl.u32 %v19779_v47, 16  ;;  %v18631_v13 = vld [vmem:[%s24855_s1 + $0x50] sm:$0xff]  }
 0x139   : > { %v7804_v11 = vcombine.low %v7435_v61, %v7445_v26  ;;  %v20109_v28 = vcombine.low %v20090_v27, %v13290_v63  ;;  %v13758_v39 = vshll.u32 %v20102_v33, 16  ;;  %v13763_v35 = vshrl.u32 %v20049_v51, 16  ;;  %v20125_v61 = vpop.permute.xlu1 %1553  ;;  %v18632_v63 = vld [vmem:[%s24855_s1 + $0x10] sm:$0xff]   ;;  %18503 = vmatprep.subr.bf16.mxu0 %v18631_v13 }
 0x13a   : > { %v13766_v38 = vshll.u32 %v20049_v51, 16  ;;  %v13772_v58 = vshll.u32 %v20077_v1, 16  ;;  %v8251_v6 = vsel %vm18803_vm6, %v8249_v25, %v8250_v37  ;;  %v13754_v49 = vrot.slane %v13752_v4, 6  ;;  %18504 = vmatpush3.bf16.msra.mxu0 %v18632_v63 }
 0x13b   : > { %v7812_v24 = vrot.slane %v7804_v11, %v18814_v19  ;;  %v13760_v17 = vrot.slane %v13758_v39, 7  ;;  %v8382_v31 = vcombine.low %v8248_v14, %v8251_v6  ;;  %v13765_v56 = vrot.slane %v13763_v35, 6  ;;  %v17331_v11 = vld.sshfl [vmem:[%s18788_s27 + $0x14] sm:$0x33 pattern:$0x76325410] }
 0x13c   : > { %12987 = vrot.lane.b32.xlu0 %v12848_v42, %s18718_s30  ;;  %v13768_v44 = vrot.slane %v13766_v38, 7  ;;  %v13774_v42 = vrot.slane %v13772_v58, 7  ;;  %v13755_v7 = vor.u32 %v13754_v49, %v19798_v40  ;;  %v13776_v26 = vshrl.u32 %v20077_v1, 16  ;;  %696 = vst.msk [vmem:[#allocation2 + $0xc0] sm:$0xff] %vm689_vm5, %v20109_v28 }
 0x13d   : > { %v24874_v37 = vshll.u32 %v20080_v62, 16  ;;  %v20138_v14 = vld.sshfl [vmem:[%s18788_s27 + $0x3c] sm:$0x32 pattern:$0x76325410]  ;;  %v8390_v25 = vrot.slane %v8382_v31, %v18814_v19  ;;  %v24876_v39 = vshrl.u32 %v20080_v62, 16  ;;  %v7820_v40 = vcombine.low %v7812_v24, %v19822_v60 }
 0x13e   : > { %v13769_v4 = vor.u32 %v13768_v44, %v13765_v56  ;;  %v24873_v35 = vshll.u32 %v20106_v36, 16  ;;  %v17332_v38 = vld.sshfl [vmem:[%s18788_s27 + $0x18] sm:$0x30 pattern:$0x76325410]  ;;  %v13756_v58 = vrot.slane %v13755_v7, 2  ;;  %v3121_v13 = vcombine.high %v17331_v11, %v17331_v11  ;;  %v20165_v7 = vpop.permute.xlu0 %1557 }
 0x13f   : > { %v13778_v6 = vrot.slane %v13776_v26, 6  ;;  %v13784_v49 = vrot.slane %v24874_v37, 7  ;;  %v8398_v53 = vcombine.low %v8390_v25, %v19859_v15  ;;  %v13788_v31 = vrot.slane %v24876_v39, 6  ;;  %v18633_v60 = vld [vmem:[%s24855_s1 + $0x58] sm:$0xff]   ;;  %7944 = vrot.lane.b32.xlu1 %v7820_v40, %s18718_s30  ;;  %v20177_v37 = vpop.permute.xlu1 %1555 }
 0x140   : > { %13430 = vrot.lane.b32.xlu0 %v20109_v28, %s18719_s5  ;;  %v13770_v27 = vrot.slane %v13769_v4, 2  ;;  %v20154_v56 = vrot.slane %v24873_v35, 7  ;;  %v18634_v24 = vld [vmem:[%s24855_s1 + $0x18] sm:$0xff]   ;;  %v13761_v15 = vsel %vm18975_vm13, %v13756_v58, %v13760_v17  ;;  %v3129_v63 = vcombine.high %v17332_v38, %v17332_v38  ;;  %18505 = vmatprep.subr.bf16.mxu0 %v18633_v60  ;;  %v18635_v28 = vld [vmem:[%s24855_s1 + $0x60] sm:$0xff]  }
 0x141   : > { %v13779_v44 = vor.u32 %v13778_v6, %v13774_v42  ;;  %v13789_v25 = vor.u32 %v13788_v31, %v13784_v49  ;;  %v20173_v4 = vcombine.high %v20138_v14, %v20138_v14  ;;  %v24999_v35 = vrot.slane %v19779_v47, 7  ;;  %18506 = vmatpush3.bf16.msra.mxu0 %v18634_v24 }
 0x142   : > { %24997 = vst [vmem:[#allocation8_spill] sm:$0xff] %v20154_v56  ;;  %v20169_v26 = vsel %vm18975_vm13, %v13770_v27, %v13774_v42  ;;  %v3300_v58 = vcombine.low %v17331_v11, %v3121_v13  ;;  %v3301_v27 = vcombine.low %v3129_v63, %v19919_v59  ;;  %v14604_v6 = vrot.slane %v20102_v33, 7  ;;  %18507 = vmatprep.subr.bf16.mxu0 %v18635_v28 }
 0x143   : > { %24998 = vst [vmem:[#allocation9_spill] sm:$0xff] %v20169_v26  ;;  %v14603_v40 = vrot.slane %v24999_v35, 2  ;;  %v20179_v17 = vrot.slane %v13779_v44, 2  ;;  %v14157_v38 = vcombine.low %v13761_v15, %v20169_v26  ;;  %v13790_v42 = vrot.slane %v13789_v25, 2  ;;  %8522 = vrot.lane.b32.xlu1 %v8398_v53, %s18719_s5 }
 0x144   : > { %v18279_v31 = vrot.slane %v20138_v14, 9  ;;  %v14608_v47 = vrot.slane %v20173_v4, 7  ;;  %v3308_v60 = vrot.slane %v3300_v58, %v18814_v19  ;;  %v3315_v24 = vrot.slane %v3301_v27, %v18814_v19  ;;  %v17215_v58 = vld.sshfl [vmem:[%s18788_s27 + $0x4] sm:$0x33 pattern:$0x76325410]  ;;  %v1562_v27 = vpop.permute.xlu0 %1561 }
 0x145   : > { %25000 = vst [vmem:[#allocation10_spill] sm:$0xff] %v20179_v17  ;;  %v13785_v35 = vsel %vm18975_vm13, %v20179_v17, %v13784_v49  ;;  %v14165_v11 = vrot.slane %v14157_v38, %v18814_v19  ;;  %v13795_v33 = vsel %vm18975_vm13, %v13790_v42, %v20154_v56  ;;  %v14605_v15 = vsel %vm18803_vm6, %v14603_v40, %v14604_v6  ;;  %v17214_v49 = vld.sshfl [vmem:[%s18788_s27] sm:$0x33 pattern:$0x76325410]  ;;  %v20211_v6 = vpop.permute.xlu1 %1559 }
 0x146   : > { %v20200_v53 = vsel %vm18803_vm6, %v18279_v31, %v14608_v47  ;;  %v20202_v44 = vrot.slane %v14608_v47, 2  ;;  %v14158_v13 = vcombine.low %v13785_v35, %v13795_v33  ;;  %v3316_v63 = vcombine.low %v3308_v60, %v3315_v24  ;;  %1586 = vst.msk [vmem:[#allocation2 + $0xc0] sm:$0xff] %vm1579_vm7, %v1562_v27 }
 0x147   : > { %v14611_v25 = vrot.slane %v20080_v62, 7  ;;  %v24875_v38 = vrot.slane %v20106_v36, 7  ;;  %v14735_v42 = vcombine.low %v14605_v15, %v20200_v53  ;;  %v543_v40 = vcombine.low %v19802_v32, %v19905_v30 }
 0x148   : > { %25001 = vst [vmem:[#allocation11_spill] sm:$0xff] %v20202_v44  ;;  %v14172_v31 = vrot.slane %v14158_v13, %v18814_v19  ;;  %3440 = vrot.lane.b32.xlu1 %v3316_v63, %s18719_s5  ;;  %v544_v60 = vcombine.low %v19890_v8, %v19915_v48  ;;  %v332_v24 = vcombine.high %v17214_v49, %v17214_v49 }
 0x149   : > { %v20218_v47 = vsel %vm18803_vm6, %v20202_v44, %v14611_v25  ;;  %v20220_v35 = vrot.slane %v14611_v25, 2  ;;  %v14743_v32 = vrot.slane %v14735_v42, %v18814_v19  ;;  %v551_v30 = vrot.slane %v543_v40, %v18814_v19 }
 0x14a   : > { %v340_v33 = vcombine.high %v17215_v58, %v17215_v58  ;;  %v14173_v15 = vcombine.low %v14165_v11, %v14172_v31  ;;  %v558_v8 = vrot.slane %v544_v60, %v18814_v19  ;;  %v14999_v48 = vcombine.high %v19855_v34, %v19855_v34  ;;  %v18636_v11 = vld [vmem:[%s24855_s1 + $0x20] sm:$0xff]  }
 0x14b   : > { %25002 = vst [vmem:[#allocation12_spill] sm:$0xff] %v20220_v35  ;;  %v14615_v13 = vsel %vm18803_vm6, %v20220_v35, %v24875_v38  ;;  %v509_v25 = vcombine.low %v17214_v49, %v332_v24  ;;  %v15208_v42 = vrot.slane %v19893_v20, 2  ;;  %v15218_v60 = vshrl.u32 %v20138_v14, 16  ;;  %v20256_v20 = vpop.permute.xlu0 %1565  ;;  %18508 = vmatpush3.bf16.msra.mxu0 %v18636_v11 }
 0x14c   : > { %v14736_v63 = vcombine.low %v20218_v47, %v14615_v13  ;;  %v510_v27 = vcombine.low %v17215_v58, %v340_v33  ;;  %14312 = vrot.lane.b32.xlu0 %v14173_v15, %s18720_s6  ;;  %v559_v40 = vcombine.low %v551_v30, %v558_v8  ;;  %v15210_v31 = vshrl.u32 %v14999_v48, 16  ;;  %v20252_v49 = vld.sshfl [vmem:[%s18788_s27 + $0x2c] sm:$0x33 pattern:$0x76325410]  ;;  %v20254_v58 = vpop.permute.xlu1 %1563 }
 0x14d   : > { %v15213_v34 = vshll.u32 %v14999_v48, 16  ;;  %v517_v39 = vrot.slane %v509_v25, %v18814_v19  ;;  %v15223_v13 = vshrl.u32 %v20173_v4, 16  ;;  %v18335_v30 = vrot.slane %v15218_v60, 9 }
 0x14e   : > { %v14750_v38 = vrot.slane %v14736_v63, %v18814_v19  ;;  %v524_v44 = vrot.slane %v510_v27, %v18814_v19  ;;  %692 = vst.msk [vmem:[#allocation2 + $0x40] sm:$0xff] %vm689_vm5, %v559_v40  ;;  %v15212_v14 = vrot.slane %v15210_v31, 7  ;;  %v15226_v24 = vshll.u32 %v20173_v4, 16 }
 0x14f   : > { %v25003_v33 = vshrl.u32 %v20080_v62, 16  ;;  %1582 = vst.msk [vmem:[#allocation2 + $0x40] sm:$0xff] %vm1579_vm7, %v20125_v61  ;;  %v15225_v28 = vrot.slane %v15223_v13, 7  ;;  %v24878_v63 = vshrl.u32 %v20106_v36, 16  ;;  %v25005_v11 = vshll.u32 %v20080_v62, 16  ;;  %v18637_v13 = vld [vmem:[%s24855_s1 + $0x68] sm:$0xff]  }
 0x150   : > { %v14751_v8 = vcombine.low %v14743_v32, %v14750_v38  ;;  %v525_v48 = vcombine.low %v517_v39, %v524_v44  ;;  %v15215_v25 = vor.u32 %v15213_v34, %v15212_v14  ;;  %v20272_v4 = vld.sshfl [vmem:[%s18788_s27 + $0x34] sm:$0x33 pattern:$0x76325410]  ;;  %v20276_v31 = vcombine.high %v20252_v49, %v20252_v49  ;;  %v18638_v14 = vld [vmem:[%s24855_s1 + $0x28] sm:$0xff]   ;;  %18509 = vmatprep.subr.bf16.mxu0 %v18637_v13 }
 0x151   : > { %v20262_v15 = vrot.slane %v25003_v33, 7  ;;  %v15228_v61 = vor.u32 %v15226_v24, %v15225_v28  ;;  %v15230_v39 = vrot.slane %v15225_v28, 2  ;;  %v20282_v44 = vrot.slane %v24878_v63, 7  ;;  %18510 = vmatpush3.bf16.msra.mxu0 %v18638_v14  ;;  %2168 = vst.msk [vmem:[#allocation2 + $0x40] sm:$0xff] %vm2165_vm8, %v20029_v21 }
 0x152   : > { %14890 = vrot.lane.b32.xlu0 %v14751_v8, %s18721_s7  ;;  %690 = vst.msk [vmem:[#allocation2] sm:$0xff] %vm689_vm5, %v525_v48  ;;  %v15216_v38 = vsel %vm19323_vm4, %v15208_v42, %v15215_v25  ;;  %v8880_v32 = vshrl.u32 %v20252_v49, 16  ;;  %v8883_v34 = vshll.u32 %v20252_v49, 16  ;;  %v8889_v60 = vshrl.u32 %v20276_v31, 16  ;;  %v20311_v25 = vpop.permute.xlu1 %1567 }
 0x153   : > { %25004 = vst [vmem:[#allocation13_spill] sm:$0xff] %v20262_v15  ;;  %v15237_v27 = vor.u32 %v20262_v15, %v25005_v11  ;;  %v24883_v40 = vrot.slane %v20262_v15, 2  ;;  %25006 = vst [vmem:[#allocation14_spill] sm:$0xff] %v20282_v44  ;;  %v25007_v24 = vshll.u32 %v20106_v36, 16  ;;  %v8892_v8 = vshll.u32 %v20276_v31, 16  ;;  %v20313_v11 = vpop.permute.xlu0 %2147 }
 0x154   : > { %1580 = vst.msk [vmem:[#allocation2] sm:$0xff] %vm1579_vm7, %v20092_v10  ;;  %v20299_v10 = vsel %vm19323_vm4, %v18335_v30, %v15228_v61  ;;  %v17222_v48 = vld.sshfl [vmem:[%s18788_s27 + $0x20] sm:$0x3 pattern:$0x76325410]  ;;  %v8882_v61 = vrot.slane %v8880_v32, 7  ;;  %v560_v15 = vcombine.low %v19919_v59, %v19951_v43 }
 0x155   : > { %v20303_v42 = vsel %vm19323_vm4, %v15230_v39, %v15237_v27  ;;  %v15246_v33 = vor.u32 %v20282_v44, %v25007_v24  ;;  %v17217_v28 = vld.sshfl [vmem:[%s18788_s27 + $0xc] sm:$0x33 pattern:$0x76325410]  ;;  %v15577_v30 = vcombine.low %v15216_v38, %v20299_v10  ;;  %v8891_v63 = vrot.slane %v8889_v60, 7  ;;  %2166 = vst.msk [vmem:[#allocation2] sm:$0xff] %vm2165_vm8, %v20006_v9 }
 0x156   : > { %v8911_v39 = vshrl.u32 %v20272_v4, 16  ;;  %v8914_v24 = vshll.u32 %v20272_v4, 16  ;;  %v8885_v44 = vor.u32 %v8883_v34, %v8882_v61  ;;  %v8887_v38 = vrot.slane %v8882_v61, 2  ;;  %2172 = vst.msk [vmem:[#allocation2 + $0xc0] sm:$0xff] %vm2165_vm8, %v20313_v11 }
 0x157   : > { %v15247_v27 = vsel %vm19323_vm4, %v24883_v40, %v15246_v33  ;;  %v15585_v35 = vrot.slane %v15577_v30, %v18814_v19  ;;  %v8894_v32 = vor.u32 %v8892_v8, %v8891_v63  ;;  %v20327_v13 = vld.sshfl [vmem:[%s18788_s27 + $0x24] sm:$0x33 pattern:$0x76325410]  ;;  %v25009_v40 = vrot.slane %v19668_v0, 2  ;;  %v20343_v59 = vpop.permute.xlu0 %2151 }
 0x158   : > { %v15578_v17 = vcombine.low %v20303_v42, %v15247_v27  ;;  %v20324_v60 = vrot.slane %v8911_v39, 7  ;;  %v561_v30 = vcombine.low %v17222_v48, %v20327_v13  ;;  %v17216_v34 = vld.sshfl [vmem:[%s18788_s27 + $0x8] sm:$0x3 pattern:$0x76325410]  ;;  %v355_v61 = vcombine.high %v17217_v28, %v17217_v28  ;;  %v20341_v27 = vpop.permute.xlu1 %2149 }
 0x159   : > { %v8886_v14 = vsel %vm19323_vm4, %v25009_v40, %v8885_v44  ;;  %v8895_v63 = vsel %vm19323_vm4, %v8887_v38, %v8894_v32  ;;  %v568_v0 = vrot.slane %v560_v15, %v18814_v19  ;;  %v25010_v40 = vrot.slane %v19861_v5, 2 }
 0x15a   : > { %25008 = vst [vmem:[#allocation15_spill] sm:$0xff] %v20324_v60  ;;  %v15592_v33 = vrot.slane %v15578_v17, %v18814_v19  ;;  %v8916_v8 = vor.u32 %v8914_v24, %v20324_v60  ;;  %v9224_v39 = vcombine.low %v8886_v14, %v8895_v63  ;;  %v575_v56 = vrot.slane %v561_v30, %v18814_v19  ;;  %v17226_v24 = vld.sshfl [vmem:[%s18788_s27 + $0x30] sm:$0x33 pattern:$0x76325410] }
 0x15b   : > { %v526_v26 = vcombine.low %v17216_v34, %v17217_v28  ;;  %v527_v38 = vcombine.low %v355_v61, %v19787_v41  ;;  %v9503_v15 = vcombine.high %v20026_v3, %v20026_v3  ;;  %v9674_v28 = vcombine.low %v20252_v49, %v20276_v31  ;;  %v20371_v61 = vld.sshfl [vmem:[%s18788_s27 + $0x28] sm:$0x33 pattern:$0x76325410] }
 0x15c   : > { %v15593_v17 = vcombine.low %v15585_v35, %v15592_v33  ;;  %v8917_v44 = vsel %vm19323_vm4, %v25010_v40, %v8916_v8  ;;  %v9232_v35 = vrot.slane %v9224_v39, %v18814_v19  ;;  %v576_v33 = vcombine.low %v568_v0, %v575_v56  ;;  %25011 = vst [vmem:[#allocation16_spill] sm:$0xff] %v20371_v61 }
 0x15d   : > { %v9225_v32 = vcombine.low %v19878_v57, %v8917_v44  ;;  %v534_v5 = vrot.slane %v526_v26, %v18814_v19  ;;  %v541_v14 = vrot.slane %v527_v38, %v18814_v19  ;;  %v20364_v41 = vcombine.high %v20327_v13, %v20327_v13 }
 0x15e   : > { %15732 = vrot.lane.b32.xlu1 %v15593_v17, %s18722_s8  ;;  %693 = vst.msk [vmem:[#allocation2 + $0x60] sm:$0xff] %vm689_vm5, %v576_v33  ;;  %v9675_v57 = vcombine.low %v9503_v15, %v20272_v4  ;;  %v3744_v56 = vcombine.low %v19951_v43, %v17222_v48  ;;  %v424_v34 = vcombine.high %v17226_v24, %v17226_v24  ;;  %v20382_v17 = vpop.permute.xlu1 %2153  ;;  %v20384_v48 = vpop.permute.xlu0 %2985  ;;  %v18640_v33 = vld [vmem:[%s24855_s1 + $0x70] sm:$0xff]  }
 0x15f   : > { %v9239_v30 = vrot.slane %v9225_v32, %v18814_v19  ;;  %1583 = vst.msk [vmem:[#allocation2 + $0x60] sm:$0xff] %vm1579_vm7, %v20177_v37  ;;  %v542_v26 = vcombine.low %v534_v5, %v541_v14  ;;  %v9682_v31 = vrot.slane %v9674_v28, %v18814_v19  ;;  %v3745_v63 = vcombine.low %v20327_v13, %v20364_v41  ;;  %v20415_v28 = vld.sshfl [vmem:[%s18788_s27 + $0x20] sm:$0x13 pattern:$0x76325410] }
 0x160   : > { %v20380_v8 = vcombine.high %v20272_v4, %v20272_v4  ;;  %v9689_v0 = vrot.slane %v9675_v57, %v18814_v19  ;;  %v3752_v37 = vrot.slane %v3744_v56, %v18814_v19  ;;  %v594_v40 = vcombine.low %v17226_v24, %v424_v34  ;;  %18511 = vmatprep.subr.bf16.mxu0 %v18640_v33 }
 0x161   : > { %v9240_v39 = vcombine.low %v9232_v35, %v9239_v30  ;;  %691 = vst.msk [vmem:[#allocation2 + $0x20] sm:$0xff] %vm689_vm5, %v542_v26  ;;  %v3759_v44 = vrot.slane %v3745_v63, %v18814_v19  ;;  %v20394_v32 = vcombine.high %v20371_v61, %v20371_v61  ;;  %v577_v35 = vcombine.low %v20364_v41, %v20371_v61  ;;  %v18641_v30 = vld [vmem:[%s24855_s1 + $0x30] sm:$0xff]  }
 0x162   : > { %25012 = vst [vmem:[#allocation17_spill] sm:$0xff] %v20380_v8  ;;  %v595_v38 = vcombine.low %v20272_v4, %v20380_v8  ;;  %1581 = vst.msk [vmem:[#allocation2 + $0x20] sm:$0xff] %vm1579_vm7, %v20123_v45  ;;  %v9690_v24 = vcombine.low %v9682_v31, %v9689_v0  ;;  %v602_v15 = vrot.slane %v594_v40, %v18814_v19  ;;  %v20406_v4 = vld.sshfl [vmem:[%s18788_s27 + $0x34] sm:$0x33 pattern:$0x76325410]  ;;  %18512 = vmatpush3.bf16.msra.mxu0 %v18641_v30  ;;  %v20445_v40 = vpop.permute.xlu1 %2987 }
 0x163   : > { %25013 = vst [vmem:[#allocation18_spill] sm:$0xff] %v20394_v32  ;;  %9364 = vrot.lane.b32.xlu0 %v9240_v39, %s18720_s6  ;;  %v20410_v5 = vcombine.high %v20406_v4, %v20406_v4  ;;  %v10118_v14 = vcombine.low %v20049_v51, %v20077_v1  ;;  %v3760_v45 = vcombine.low %v3752_v37, %v3759_v44  ;;  %v4249_v31 = vshrl.u32 %v19951_v43, 16  ;;  %v20440_v37 = vld.sshfl [vmem:[%s18788_s27 + $0x44] sm:$0x3 pattern:$0x76325410]  ;;  %v20447_v44 = vpop.permute.xlu0 %2989 }
 0x164   : > { %v20421_v57 = vrot.slane %v595_v38, %v18814_v19  ;;  %v578_v56 = vcombine.low %v20394_v32, %v19927_v55  ;;  %v585_v34 = vrot.slane %v577_v35, %v18814_v19  ;;  %9814 = vrot.lane.b32.xlu1 %v9690_v24, %s18721_s7  ;;  %v20432_v26 = vcombine.high %v20415_v28, %v20415_v28 }
 0x165   : > { %v10117_v51 = vcombine.low %v20410_v5, %v20068_v52  ;;  %v10132_v1 = vrot.slane %v10118_v14, %v18814_v19  ;;  %v4255_v39 = vshll.u32 %v20415_v28, 16  ;;  %v4259_v0 = vshrl.u32 %v20415_v28, 16  ;;  %25014 = vst [vmem:[#allocation19_spill] sm:$0xff] %v20440_v37  ;;  %25015 = vst [vmem:[#allocation20_spill] sm:$0xff] %v20447_v44 }
 0x166   : > { %v610_v63 = vcombine.low %v602_v15, %v20421_v57  ;;  %v592_v55 = vrot.slane %v578_v56, %v18814_v19  ;;  %v20443_v52 = vld.sshfl [vmem:[%s18788_s27 + $0x48] sm:$0x33 pattern:$0x76325410]  ;;  %v4251_v35 = vrot.slane %v4249_v31, 6  ;;  %v4265_v33 = vshll.u32 %v20432_v26, 16 }
 0x167   : > { %3884 = vrot.lane.b32.xlu0 %v3760_v45, %s18720_s6  ;;  %v10125_v38 = vrot.slane %v10117_v51, %v18814_v19  ;;  %v4270_v24 = vshrl.u32 %v20327_v13, 16  ;;  %v4257_v14 = vrot.slane %v4255_v39, 7  ;;  %v4261_v30 = vrot.slane %v4259_v0, 6  ;;  %2167 = vst.msk [vmem:[#allocation2 + $0x20] sm:$0xff] %vm2165_vm8, %v20033_v46  ;;  %2169 = vst.msk [vmem:[#allocation2 + $0x60] sm:$0xff] %vm2165_vm8, %v20070_v22 }
 0x168   : > { %695 = vst.msk [vmem:[#allocation2 + $0xa0] sm:$0xff] %vm689_vm5, %v610_v63  ;;  %v593_v15 = vcombine.low %v585_v34, %v592_v55  ;;  %v4273_v56 = vshll.u32 %v20327_v13, 16  ;;  %v4252_v45 = vor.u32 %v4251_v35, %v19969_v23  ;;  %v4267_v8 = vrot.slane %v4265_v33, 7  ;;  %v18643_v55 = vld [vmem:[%s24855_s1 + $0x78] sm:$0xff]  }
 0x169   : > { %1585 = vst.msk [vmem:[#allocation2 + $0xa0] sm:$0xff] %vm1579_vm7, %v20211_v6  ;;  %v10133_v32 = vcombine.low %v10125_v38, %v10132_v1  ;;  %v4272_v51 = vrot.slane %v4270_v24, 6  ;;  %v17480_v31 = vld.sshfl [vmem:[%s18788_s27 + $0x24] sm:$0x32 pattern:$0x76325410]  ;;  %v4262_v60 = vor.u32 %v4261_v30, %v4257_v14  ;;  %v20468_v23 = vcombine.high %v20443_v52, %v20443_v52  ;;  %v20475_v38 = vpop.permute.xlu1 %2991  ;;  %18513 = vmatprep.subr.bf16.mxu0 %v18643_v55 }
 0x16a   : > { %694 = vst.msk [vmem:[#allocation2 + $0x80] sm:$0xff] %vm689_vm5, %v593_v15  ;;  %v4275_v44 = vrot.slane %v4273_v56, 7  ;;  %v4279_v63 = vshll.u32 %v20364_v41, 16  ;;  %v4283_v34 = vshrl.u32 %v20364_v41, 16  ;;  %v4253_v6 = vrot.slane %v4252_v45, 2  ;;  %v18644_v35 = vld [vmem:[%s24855_s1 + $0x38] sm:$0xff]  }
 0x16b   : > { %1584 = vst.msk [vmem:[#allocation2 + $0x80] sm:$0xff] %vm1579_vm7, %v20165_v7  ;;  %10257 = vrot.lane.b32.xlu1 %v10133_v32, %s18722_s8  ;;  %v4289_v13 = vshll.u32 %v20371_v61, 16  ;;  %25016 = vst [vmem:[#allocation21_spill] sm:$0xff] %v20468_v23  ;;  %v628_v1 = vcombine.low %v20106_v36, %v20440_v37  ;;  %v4263_v41 = vrot.slane %v4262_v60, 2  ;;  %v20477_v32 = vpop.permute.xlu0 %6615  ;;  %v629_v60 = vcombine.low %v20443_v52, %v20468_v23 }
 0x16c   : > { %v4276_v39 = vor.u32 %v4275_v44, %v4272_v51  ;;  %v4281_v0 = vrot.slane %v4279_v63, 7  ;;  %v4285_v7 = vrot.slane %v4283_v34, 6  ;;  %v4258_v33 = vsel %vm18975_vm13, %v4253_v6, %v4257_v14  ;;  %18514 = vmatpush3.bf16.msra.mxu0 %v18644_v35  ;;  %2170 = vst.msk [vmem:[#allocation2 + $0x80] sm:$0xff] %vm2165_vm8, %v20057_v16  ;;  %2171 = vst.msk [vmem:[#allocation2 + $0xa0] sm:$0xff] %vm2165_vm8, %v20096_v50 }
 0x16d   : > { %v20484_v24 = vrot.slane %v4289_v13, 7  ;;  %v636_v44 = vrot.slane %v628_v1, %v18814_v19  ;;  %v4268_v15 = vsel %vm18975_vm13, %v4263_v41, %v4267_v8  ;;  %v4907_v45 = vcombine.high %v17480_v31, %v17480_v31  ;;  %v20496_v13 = vld.sshfl [vmem:[%s18788_s27 + $0x38] sm:$0x13 pattern:$0x76325410]  ;;  %3017 = vst.msk [vmem:[#allocation2 + $0x20] sm:$0xff] %vm3015_vm9, %v20445_v40 }
 0x16e   : > { %v4277_v30 = vrot.slane %v4276_v39, 2  ;;  %v4286_v56 = vor.u32 %v4285_v7, %v4281_v0  ;;  %v4627_v51 = vcombine.low %v4258_v33, %v4268_v15  ;;  %v643_v63 = vrot.slane %v629_v60, %v18814_v19  ;;  %v20515_v60 = vpop.permute.xlu1 %7058  ;;  %3016 = vst.msk [vmem:[#allocation2] sm:$0xff] %vm3015_vm9, %v20384_v48  ;;  %3019 = vst.msk [vmem:[#allocation2 + $0x60] sm:$0xff] %vm3015_vm9, %v20475_v38 }
 0x16f   : > { %25017 = vst [vmem:[#allocation22_spill] sm:$0xff] %v20484_v24  ;;  %v25018_v14 = vrot.slane %v19951_v43, 7  ;;  %v5071_v6 = vrot.slane %v20415_v28, 7  ;;  %v5074_v8 = vrot.slane %v20432_v26, 7  ;;  %v17500_v41 = vrot.slane %v17480_v31, 9 }
 0x170   : > { %v4282_v1 = vsel %vm18975_vm13, %v4277_v30, %v4281_v0  ;;  %v4287_v55 = vrot.slane %v4286_v56, 2  ;;  %v4635_v39 = vrot.slane %v4627_v51, %v18814_v19  ;;  %v20502_v7 = vcombine.low %v636_v44, %v643_v63  ;;  %v17235_v31 = vld.sshfl [vmem:[%s18788_s27 + $0x54] sm:$0x33 pattern:$0x76325410]  ;;  %v20517_v44 = vpop.permute.xlu0 %7940 }
 0x171   : > { %v5070_v34 = vrot.slane %v25018_v14, 2  ;;  %v5073_v35 = vrot.slane %v5071_v6, 2  ;;  %v5078_v33 = vrot.slane %v4907_v45, 7  ;;  %v24895_v0 = vrot.slane %v20371_v61, 7  ;;  %25019 = vst [vmem:[#allocation23_spill] sm:$0xff] %v20517_v44 }
 0x172   : > { %v4292_v28 = vsel %vm18975_vm13, %v4287_v55, %v20484_v24  ;;  %v20512_v26 = vcombine.high %v20496_v13, %v20496_v13  ;;  %697 = vst.msk [vmem:[#allocation2 + $0xe0] sm:$0xff] %vm689_vm5, %v20502_v7  ;;  %v20524_v56 = vrot.slane %v20496_v13, 7  ;;  %v17236_v45 = vld.sshfl [vmem:[%s18788_s27 + $0x58] sm:$0x33 pattern:$0x76325410] }
 0x173   : > { %v5072_v43 = vsel %vm18803_vm6, %v5070_v34, %v5071_v6  ;;  %v4628_v15 = vcombine.low %v4282_v1, %v4292_v28  ;;  %v5075_v30 = vsel %vm18803_vm6, %v5073_v35, %v5074_v8  ;;  %1587 = vst.msk [vmem:[#allocation2 + $0xe0] sm:$0xff] %vm1579_vm7, %v20254_v58  ;;  %v5079_v51 = vsel %vm18803_vm6, %v17500_v41, %v5078_v33  ;;  %v17237_v6 = vld.sshfl [vmem:[%s18788_s27 + $0x5c] sm:$0x3 pattern:$0x76325410] }
 0x174   : > { %v5080_v63 = vrot.slane %v5078_v33, 2  ;;  %v5206_v14 = vcombine.low %v5072_v43, %v5075_v30  ;;  %v11425_v34 = vrot.slane %v20512_v26, 7  ;;  %v11423_v55 = vsel %vm18803_vm6, %v19833_v54, %v20524_v56  ;;  %v20542_v35 = vld.sshfl [vmem:[%s18788_s27 + $0x4c] sm:$0x33 pattern:$0x76325410] }
 0x175   : > { %v4642_v1 = vrot.slane %v4628_v15, %v18814_v19  ;;  %v11424_v8 = vrot.slane %v20524_v56, 2  ;;  %v11558_v58 = vcombine.low %v20200_v53, %v20218_v47  ;;  %25020 = vst [vmem:[#allocation24_spill] sm:$0xff] %v20542_v35  ;;  %v493_v28 = vcombine.high %v17235_v31, %v17235_v31  ;;  %v17234_v15 = vld.sshfl [vmem:[%s18788_s27 + $0x50] sm:$0x3 pattern:$0x76325410] }
 0x176   : > { %v5082_v41 = vsel %vm18803_vm6, %v5080_v63, %v24895_v0  ;;  %v5214_v43 = vrot.slane %v5206_v14, %v18814_v19  ;;  %v501_v33 = vcombine.high %v17236_v45, %v17236_v45  ;;  %v20558_v63 = vcombine.high %v20542_v35, %v20542_v35  ;;  %v20560_v14 = vpop.permute.xlu1 %8518  ;;  %v20562_v0 = vpop.permute.xlu0 %3436  ;;  %2173 = vst.msk [vmem:[#allocation2 + $0xe0] sm:$0xff] %vm2165_vm8, %v20341_v27  ;;  %v25023_v27 = vld [vmem:[#allocation6_spill] sm:$0xff] }
 0x177   : > { %v4643_v30 = vcombine.low %v4635_v39, %v4642_v1  ;;  %v5207_v54 = vcombine.low %v5079_v51, %v5082_v41  ;;  %v20552_v24 = vsel %vm18803_vm6, %v11424_v8, %v11425_v34  ;;  %v11572_v47 = vrot.slane %v11558_v58, %v18814_v19  ;;  %3467 = vst.msk [vmem:[#allocation2] sm:$0xff] %vm3466_vm10, %v20562_v0 }
 0x178   : > { %v11557_v37 = vcombine.low %v11423_v55, %v20552_v24  ;;  %v662_v61 = vcombine.low %v493_v28, %v17236_v45  ;;  %v663_v44 = vcombine.low %v501_v33, %v17237_v6  ;;  %25021 = vst [vmem:[#allocation25_spill] sm:$0xff] %v20558_v63  ;;  %v646_v51 = vcombine.low %v17234_v15, %v17235_v31  ;;  %v20571_v6 = vld.sshfl [vmem:[%s18788_s27 + $0x38] sm:$0x33 pattern:$0x76325410] }
 0x179   : > { %4767 = vrot.lane.b32.xlu0 %v4643_v30, %s18721_s7  ;;  %v5221_v39 = vrot.slane %v5207_v54, %v18814_v19  ;;  %v6496_v34 = vcombine.low %v19560_v18, %v20252_v49  ;;  %v17611_v45 = vcombine.high %v20252_v49, %v20026_v3  ;;  %v645_v58 = vcombine.low %v20542_v35, %v20558_v63 }
 0x17a   : > { %v11565_v1 = vrot.slane %v11557_v37, %v18814_v19  ;;  %v670_v55 = vrot.slane %v662_v61, %v18814_v19  ;;  %v677_v8 = vrot.slane %v663_v44, %v18814_v19  ;;  %v660_v31 = vrot.slane %v646_v51, %v18814_v19  ;;  %v20585_v61 = vld.sshfl [vmem:[%s18788_s27 + $0x3c] sm:$0x30 pattern:$0x76325410]  ;;  %v20594_v51 = vpop.permute.xlu0 %3880 }
 0x17b   : > { %v5222_v41 = vcombine.low %v5214_v43, %v5221_v39  ;;  %v6504_v28 = vrot.slane %v6496_v34, %v18814_v19  ;;  %v6511_v18 = vrot.slane %v17611_v45, %v18814_v19  ;;  %v653_v49 = vrot.slane %v645_v58, %v18814_v19  ;;  %v20592_v39 = vpop.permute.xlu1 %9360  ;;  %3911 = vst.msk [vmem:[#allocation2] sm:$0xff] %vm3910_vm11, %v20594_v51  ;;  %v25045_v51 = vld [vmem:[#allocation18_spill] sm:$0xff] }
 0x17c   : > { %v11573_v33 = vcombine.low %v11565_v1, %v11572_v47  ;;  %v678_v3 = vcombine.low %v670_v55, %v677_v8  ;;  %v11828_v37 = vcombine.high %v20571_v6, %v20571_v6  ;;  %v12055_v43 = vshrl.u32 %v20571_v6, 16 }
 0x17d   : > { %5346 = vrot.lane.b32.xlu1 %v5222_v41, %s18722_s8  ;;  %v6512_v44 = vcombine.low %v6504_v28, %v6511_v18  ;;  %v12058_v15 = vshll.u32 %v20571_v6, 16  ;;  %v661_v30 = vcombine.low %v653_v49, %v660_v31  ;;  %v12678_v46 = vcombine.high %v20585_v61, %v20585_v61 }
 0x17e   : > { %11697 = vrot.lane.b32.xlu0 %v11573_v33, %s18717_s29  ;;  %699 = vst.msk [vmem:[#allocation2 + $0x120] sm:$0xff] %vm689_vm5, %v678_v3  ;;  %v12064_v54 = vshrl.u32 %v11828_v37, 16  ;;  %v12067_v47 = vshll.u32 %v11828_v37, 16  ;;  %v12057_v34 = vrot.slane %v12055_v43, 7  ;;  %v12849_v22 = vcombine.low %v20571_v6, %v11828_v37  ;;  %v25025_v43 = vld [vmem:[#allocation4_spill] sm:$0xff] }
 0x17f   : > { %1589 = vst.msk [vmem:[#allocation2 + $0x120] sm:$0xff] %vm1579_vm7, %v20311_v25  ;;  %v25022_v25 = vld [vmem:[#allocation7_spill] sm:$0xff]  ;;  %v12850_v11 = vcombine.low %v12678_v46, %v20080_v62  ;;  %v7470_v1 = vshrl.u32 %v20406_v4, 16  ;;  %v7476_v55 = vshll.u32 %v20410_v5, 16  ;;  %v20643_v58 = vpop.permute.xlu1 %9810  ;;  %v12400_v31 = vcombine.low %v20299_v10, %v20303_v42 }
 0x180   : > { %698 = vst.msk [vmem:[#allocation2 + $0x100] sm:$0xff] %vm689_vm5, %v661_v30  ;;  %v12066_v45 = vrot.slane %v12064_v54, 7  ;;  %v6955_v9 = vcombine.low %v20421_v57, %v25022_v25  ;;  %v20624_v21 = vor.u32 %v12058_v15, %v12057_v34  ;;  %v12062_v16 = vrot.slane %v12057_v34, 2 }
 0x181   : > { %2175 = vst.msk [vmem:[#allocation2 + $0x120] sm:$0xff] %vm2165_vm8, %v20382_v17  ;;  %6621 = vrot.lane.b32.xlu1 %v6512_v44, %s18717_s29  ;;  %v25024_v57 = vrot.slane %v25023_v27, 2  ;;  %v12864_v62 = vrot.slane %v12850_v11, %v18814_v19  ;;  %v7472_v4 = vrot.slane %v7470_v1, 6  ;;  %v7478_v28 = vrot.slane %v7476_v55, 7  ;;  %v25027_v27 = vld [vmem:[#allocation5_spill] sm:$0xff] }
 0x182   : > { %1588 = vst.msk [vmem:[#allocation2 + $0x100] sm:$0xff] %vm1579_vm7, %v20256_v20  ;;  %v12069_v50 = vor.u32 %v12067_v47, %v12066_v45  ;;  %v12857_v20 = vrot.slane %v12849_v22, %v18814_v19  ;;  %v7480_v33 = vshrl.u32 %v20410_v5, 16  ;;  %v7486_v3 = vshll.u32 %v20496_v13, 16 }
 0x183   : > { %2174 = vst.msk [vmem:[#allocation2 + $0x100] sm:$0xff] %vm2165_vm8, %v20343_v59  ;;  %v12061_v17 = vsel %vm19323_vm4, %v25024_v57, %v20624_v21  ;;  %v20645_v59 = vpop.permute.xlu0 %4763  ;;  %v7490_v49 = vshrl.u32 %v20496_v13, 16  ;;  %v12414_v44 = vrot.slane %v12400_v31, %v18814_v19  ;;  %v7473_v15 = vor.u32 %v25025_v43, %v7472_v4  ;;  %v20663_v13 = vld.sshfl [vmem:[%s18788_s27 + $0x44] sm:$0x13 pattern:$0x76325410]  ;;  %v20669_v46 = vpop.permute.xlu1 %10253 }
 0x184   : > { %v20640_v8 = vsel %vm19323_vm4, %v12062_v16, %v12069_v50  ;;  %v12865_v18 = vcombine.low %v12857_v20, %v12864_v62  ;;  %v7496_v10 = vshll.u32 %v20512_v26, 16  ;;  %v7482_v42 = vrot.slane %v7480_v33, 6  ;;  %v25026_v26 = vld [vmem:[#allocation20_spill] sm:$0xff]  ;;  %v25029_v31 = vld [vmem:[#allocation9_spill] sm:$0xff]  ;;  %4794 = vst.msk [vmem:[#allocation2] sm:$0xff] %vm4793_vm12, %v20645_v59 }
 0x185   : > { %v12399_v41 = vcombine.low %v12061_v17, %v20640_v8  ;;  %7064 = vrot.lane.b32.xlu1 %v6955_v9, %s18716_s28  ;;  %v7488_v30 = vrot.slane %v7486_v3, 7  ;;  %v7492_v54 = vrot.slane %v7490_v49, 6  ;;  %v7474_v34 = vrot.slane %v7473_v15, 2  ;;  %3018 = vst.msk [vmem:[#allocation2 + $0x40] sm:$0xff] %vm3015_vm9, %v25026_v26  ;;  %v25030_v49 = vld [vmem:[#allocation8_spill] sm:$0xff] }
 0x186   : > { %v7498_v45 = vrot.slane %v7496_v10, 7  ;;  %v7483_v25 = vor.u32 %v7482_v42, %v7478_v28  ;;  %v8260_v22 = vrot.slane %v20410_v5, 7  ;;  %v8400_v48 = vcombine.low %v20552_v24, %v20200_v53  ;;  %v17335_v26 = vld.sshfl [vmem:[%s18788_s27 + $0x24] sm:$0x30 pattern:$0x76325410] }
 0x187   : > { %v12407_v37 = vrot.slane %v12399_v41, %v18814_v19  ;;  %v7493_v9 = vor.u32 %v7492_v54, %v7488_v30  ;;  %v20671_v16 = vpop.permute.xlu0 %11693  ;;  %v7479_v40 = vsel %vm18975_vm13, %v7474_v34, %v7478_v28  ;;  %v20681_v38 = vcombine.high %v20663_v13, %v20663_v13  ;;  %v20702_v15 = vpop.permute.xlu1 %5342  ;;  %v17334_v54 = vld.sshfl [vmem:[%s18788_s27 + $0x20] sm:$0x33 pattern:$0x76325410] }
 0x188   : > { %v7484_v50 = vrot.slane %v7483_v25, 2  ;;  %v8261_v57 = vsel %vm18803_vm6, %v25027_v27, %v8260_v22  ;;  %v8262_v17 = vrot.slane %v8260_v22, 2  ;;  %v8414_v20 = vrot.slane %v8400_v48, %v18814_v19  ;;  %5373 = vst.msk [vmem:[#allocation2] sm:$0xff] %vm5372_vm14, %v20702_v15 }
 0x189   : > { %v12415_v47 = vcombine.low %v12407_v37, %v12414_v44  ;;  %v7494_v11 = vrot.slane %v7493_v9, 2  ;;  %v13802_v1 = vshll.u32 %v20663_v13, 16  ;;  %v25028_v24 = vshrl.u32 %v20106_v36, 16 }
 0x18a   : > { %v7489_v5 = vsel %vm18975_vm13, %v7484_v50, %v7488_v30  ;;  %v13806_v62 = vshrl.u32 %v20663_v13, 16  ;;  %v8264_v28 = vsel %vm18803_vm6, %v8262_v17, %v20524_v56  ;;  %v13812_v43 = vshll.u32 %v20681_v38, 16 }
 0x18b   : > { %12539 = vrot.lane.b32.xlu0 %v12415_v47, %s18716_s28  ;;  %v7499_v53 = vsel %vm18975_vm13, %v7494_v11, %v7498_v45  ;;  %v13798_v55 = vrot.slane %v25028_v24, 6  ;;  %v7821_v41 = vcombine.low %v7479_v40, %v7489_v5  ;;  %v13804_v33 = vrot.slane %v13802_v1, 7  ;;  %v20704_v10 = vpop.permute.xlu0 %12535  ;;  %v20712_v47 = vld.sshfl [vmem:[%s18788_s27 + $0x48] sm:$0x32 pattern:$0x76325410] }
 0x18c   : > { %v7822_v4 = vcombine.low %v7499_v53, %v25029_v31  ;;  %v8399_v3 = vcombine.low %v8261_v57, %v8264_v28  ;;  %v13808_v44 = vrot.slane %v13806_v62, 6  ;;  %v13817_v30 = vshrl.u32 %v20443_v52, 16  ;;  %v18653_v24 = vld.sshfl [vmem:[%s18788_s27 + $0x1c] sm:$0x33 pattern:$0x76325410]  ;;  %v20731_v31 = vpop.permute.xlu1 %6617 }
 0x18d   : > { %v13799_v37 = vor.u32 %v13798_v55, %v25030_v49  ;;  %v13820_v56 = vshll.u32 %v20443_v52, 16  ;;  %v13814_v9 = vrot.slane %v13812_v43, 7  ;;  %v13826_v50 = vshll.u32 %v20468_v23, 16 }
 0x18e   : > { %v7836_v42 = vrot.slane %v7822_v4, %v18814_v19  ;;  %v8407_v34 = vrot.slane %v8399_v3, %v18814_v19  ;;  %v13809_v25 = vor.u32 %v13808_v44, %v13804_v33  ;;  %v13819_v22 = vrot.slane %v13817_v30, 6  ;;  %v17530_v30 = vld.sshfl [vmem:[%s18788_s27 + $0xc] sm:$0x32 pattern:$0x76325410] }
 0x18f   : > { %12989 = vrot.lane.b32.xlu0 %v12865_v18, %s18718_s30  ;;  %v7829_v18 = vrot.slane %v7821_v41, %v18814_v19  ;;  %v13800_v45 = vrot.slane %v13799_v37, 2  ;;  %v13822_v48 = vrot.slane %v13820_v56, 7  ;;  %v13830_v17 = vshrl.u32 %v20468_v23, 16  ;;  %v20733_v4 = vpop.permute.xlu0 %12985  ;;  %v25037_v23 = vld [vmem:[#allocation15_spill] sm:$0xff] }
 0x190   : > { %v8415_v11 = vcombine.low %v8407_v34, %v8414_v20  ;;  %v13810_v57 = vrot.slane %v13809_v25, 2  ;;  %v13828_v5 = vrot.slane %v13826_v50, 7  ;;  %v24896_v53 = vshll.u32 %v20542_v35, 16 }
 0x191   : > { %v7837_v40 = vcombine.low %v7829_v18, %v7836_v42  ;;  %v13805_v27 = vsel %vm18975_vm13, %v13800_v45, %v13804_v33  ;;  %v13823_v1 = vor.u32 %v13822_v48, %v13819_v22  ;;  %v13832_v62 = vrot.slane %v13830_v17, 6  ;;  %v17531_v25 = vld.sshfl [vmem:[%s18788_s27 + $0x10] sm:$0x33 pattern:$0x76325410]  ;;  %v20768_v17 = vpop.permute.xlu1 %7060 }
 0x192   : > { %v13815_v55 = vsel %vm18975_vm13, %v13810_v57, %v13814_v9  ;;  %v17351_v20 = vcombine.high %v17334_v54, %v17335_v26  ;;  %v20729_v41 = vcombine.high %v20712_v47, %v20712_v47  ;;  %v20737_v33 = vrot.slane %v24896_v53, 7 }
 0x193   : > { %13432 = vrot.lane.b32.xlu0 %v20502_v7, %s18719_s5  ;;  %7946 = vrot.lane.b32.xlu1 %v7837_v40, %s18718_s30  ;;  %v3137_v7 = vcombine.high %v18653_v24, %v18653_v24  ;;  %v13824_v28 = vrot.slane %v13823_v1, 2  ;;  %v14174_v3 = vcombine.low %v13805_v27, %v13815_v55  ;;  %v13833_v37 = vor.u32 %v13832_v62, %v13828_v5  ;;  %v20770_v1 = vpop.permute.xlu0 %13428 }
 0x194   : > { %25031 = vst [vmem:[#allocation7_spill] sm:$0xff] %v20737_v33  ;;  %v3332_v44 = vrot.slane %v17351_v20, %v18814_v19  ;;  %v25032_v43 = vrot.slane %v20106_v36, 7  ;;  %v20743_v42 = vrot.slane %v20663_v13, 7  ;;  %v18280_v26 = vrot.slane %v20712_v47, 9 }
 0x195   : > { %v3317_v49 = vcombine.low %v3137_v7, %v17334_v54  ;;  %v13829_v56 = vsel %vm18975_vm13, %v13824_v28, %v13828_v5  ;;  %v14182_v34 = vrot.slane %v14174_v3, %v18814_v19  ;;  %v14620_v54 = vrot.slane %v20681_v38, 7 }
 0x196   : > { %v14616_v18 = vrot.slane %v25032_v43, 2  ;;  %v13834_v9 = vrot.slane %v13833_v37, 2  ;;  %v14619_v13 = vrot.slane %v20743_v42, 2  ;;  %v14624_v22 = vrot.slane %v20729_v41, 7 }
 0x197   : > { %8524 = vrot.lane.b32.xlu1 %v8415_v11, %s18719_s5  ;;  %v3325_v45 = vrot.slane %v3317_v49, %v18814_v19  ;;  %v14627_v48 = vrot.slane %v20542_v35, 7  ;;  %v5438_v27 = vcombine.high %v17530_v30, %v17530_v30  ;;  %v5446_v57 = vcombine.high %v17531_v25, %v17531_v25 }
 0x198   : > { %v14618_v36 = vsel %vm18803_vm6, %v14616_v18, %v20743_v42  ;;  %v13839_v38 = vsel %vm18975_vm13, %v13834_v9, %v20737_v33  ;;  %v20766_v11 = vsel %vm18803_vm6, %v14619_v13, %v14620_v54  ;;  %v20775_v24 = vsel %vm18803_vm6, %v18280_v26, %v14624_v22 }
 0x199   : > { %v3333_v40 = vcombine.low %v3325_v45, %v3332_v44  ;;  %v14175_v5 = vcombine.low %v13829_v56, %v13839_v38  ;;  %v20777_v7 = vrot.slane %v14624_v22, 2  ;;  %v20779_v55 = vrot.slane %v14627_v48, 2  ;;  %v20787_v44 = vld.sshfl [vmem:[%s18788_s27 + $0x14] sm:$0x33 pattern:$0x76325410] }
 0x19a   : > { %v14752_v62 = vcombine.low %v14618_v36, %v20766_v11  ;;  %v5624_v20 = vshrl.u32 %v17530_v30, 16  ;;  %v5629_v28 = vshrl.u32 %v5438_v27, 16  ;;  %v5632_v3 = vshll.u32 %v5438_v27, 16 }
 0x19b   : > { %3442 = vrot.lane.b32.xlu1 %v3333_v40, %s18719_s5  ;;  %25033 = vst [vmem:[#allocation6_spill] sm:$0xff] %v20777_v7  ;;  %25034 = vst [vmem:[#allocation4_spill] sm:$0xff] %v20779_v55  ;;  %v14189_v49 = vrot.slane %v14175_v5, %v18814_v19  ;;  %v14628_v37 = vsel %vm18803_vm6, %v20777_v7, %v14627_v48  ;;  %v5638_v43 = vshrl.u32 %v17531_v25, 16  ;;  %v5641_v18 = vshll.u32 %v17531_v25, 16  ;;  %v20796_v5 = vpop.permute.xlu1 %7942  ;;  %v20798_v25 = vpop.permute.xlu0 %14310 }
 0x19c   : > { %v14753_v56 = vcombine.low %v20775_v24, %v14628_v37  ;;  %v14760_v45 = vrot.slane %v14752_v62, %v18814_v19  ;;  %v17554_v54 = vrot.slane %v5624_v20, 9  ;;  %v5631_v9 = vrot.slane %v5629_v28, 7  ;;  %v20792_v36 = vld.sshfl [vmem:[%s18788_s27 + $0x44] sm:$0x33 pattern:$0x76325410] }
 0x19d   : > { %v14190_v30 = vcombine.low %v14182_v34, %v14189_v49  ;;  %v5640_v13 = vrot.slane %v5638_v43, 7  ;;  %v5647_v26 = vshrl.u32 %v5446_v57, 16  ;;  %v5650_v40 = vshll.u32 %v5446_v57, 16 }
 0x19e   : > { %v14767_v22 = vrot.slane %v14753_v56, %v18814_v19  ;;  %v5634_v38 = vor.u32 %v5632_v3, %v5631_v9  ;;  %v5636_v48 = vrot.slane %v5631_v9, 2  ;;  %v5656_v27 = vshrl.u32 %v20787_v44, 16 }
 0x19f   : > { %14314 = vrot.lane.b32.xlu0 %v14190_v30, %s18720_s6  ;;  %v5643_v62 = vor.u32 %v5641_v18, %v5640_v13  ;;  %v5645_v20 = vrot.slane %v5640_v13, 2  ;;  %v5649_v28 = vrot.slane %v5647_v26, 7  ;;  %v5659_v34 = vshll.u32 %v20787_v44, 16  ;;  %v25035_v18 = vld [vmem:[#allocation14_spill] sm:$0xff] }
 0x1a0   : > { %v14768_v49 = vcombine.low %v14760_v45, %v14767_v22  ;;  %v5635_v57 = vsel %vm19323_vm4, %v17554_v54, %v5634_v38  ;;  %v20804_v37 = vrot.slane %v5656_v27, 7  ;;  %v15023_v3 = vcombine.high %v20792_v36, %v20792_v36 }
 0x1a1   : > { %v5644_v43 = vsel %vm19323_vm4, %v5636_v48, %v5643_v62  ;;  %v5652_v56 = vor.u32 %v5650_v40, %v5649_v28  ;;  %v5654_v9 = vrot.slane %v5649_v28, 2  ;;  %v15248_v30 = vrot.slane %v25035_v18, 2  ;;  %v20825_v18 = vpop.permute.xlu0 %14888 }
 0x1a2   : > { %v5661_v13 = vor.u32 %v5659_v34, %v20804_v37  ;;  %v6015_v26 = vcombine.low %v5635_v57, %v5644_v43  ;;  %v15250_v45 = vshrl.u32 %v20792_v36, 16  ;;  %v15253_v54 = vshll.u32 %v20792_v36, 16  ;;  %v17799_v57 = vld.sshfl [vmem:[%s18788_s27 + $0x3c] sm:$0x32 pattern:$0x76325410]  ;;  %v20823_v43 = vpop.permute.xlu1 %8520 }
 0x1a3   : > { %14892 = vrot.lane.b32.xlu0 %v14768_v49, %s18721_s7  ;;  %v5653_v22 = vsel %vm19323_vm4, %v5645_v20, %v5652_v56  ;;  %v15259_v38 = vshrl.u32 %v15023_v3, 16  ;;  %v15262_v27 = vshll.u32 %v15023_v3, 16  ;;  %v15267_v40 = vshrl.u32 %v20712_v47, 16 }
 0x1a4   : > { %v5662_v48 = vsel %vm19323_vm4, %v5654_v9, %v5661_v13  ;;  %v6023_v62 = vrot.slane %v6015_v26, %v18814_v19  ;;  %v15252_v28 = vrot.slane %v15250_v45, 7  ;;  %v15272_v34 = vshrl.u32 %v20729_v41, 16 }
 0x1a5   : > { %v6016_v49 = vcombine.low %v5653_v22, %v5662_v48  ;;  %v15261_v50 = vrot.slane %v15259_v38, 7  ;;  %v18336_v20 = vrot.slane %v15267_v40, 9  ;;  %v15275_v3 = vshll.u32 %v20729_v41, 16 }
 0x1a6   : > { %v20828_v56 = vor.u32 %v15253_v54, %v15252_v28  ;;  %v15257_v47 = vrot.slane %v15252_v28, 2  ;;  %v20830_v53 = vrot.slane %v15272_v34, 7  ;;  %v24899_v9 = vshrl.u32 %v20542_v35, 16 }
 0x1a7   : > { %v6030_v13 = vrot.slane %v6016_v49, %v18814_v19  ;;  %v15264_v26 = vor.u32 %v15262_v27, %v15261_v50  ;;  %v8685_v45 = vcombine.high %v17799_v57, %v17799_v57  ;;  %v8918_v7 = vrot.slane %v25037_v23, 2  ;;  %v25039_v50 = vld [vmem:[#allocation17_spill] sm:$0xff] }
 0x1a8   : > { %25036 = vst [vmem:[#allocation20_spill] sm:$0xff] %v20830_v53  ;;  %v15256_v22 = vsel %vm19323_vm4, %v15248_v30, %v20828_v56  ;;  %v15277_v41 = vor.u32 %v15275_v3, %v20830_v53  ;;  %v24902_v54 = vrot.slane %v20830_v53, 2  ;;  %v20842_v38 = vrot.slane %v24899_v9, 7 }
 0x1a9   : > { %v6031_v40 = vcombine.low %v6023_v62, %v6030_v13  ;;  %v20846_v48 = vsel %vm19323_vm4, %v15257_v47, %v15264_v26  ;;  %v8920_v27 = vshrl.u32 %v25039_v50, 16  ;;  %v8923_v23 = vshll.u32 %v25039_v50, 16  ;;  %v20859_v3 = vld.sshfl [vmem:[%s18788_s27 + $0x28] sm:$0x33 pattern:$0x76325410]  ;;  %v3439_v47 = vpop.permute.xlu1 %3438  ;;  %v20861_v13 = vpop.permute.xlu0 %9362 }
 0x1aa   : > { %25038 = vst [vmem:[#allocation5_spill] sm:$0xff] %v20842_v38  ;;  %v20852_v30 = vsel %vm19323_vm4, %v18336_v20, %v15277_v41  ;;  %v25040_v28 = vshll.u32 %v20542_v35, 16  ;;  %v15594_v49 = vcombine.low %v15256_v22, %v20846_v48  ;;  %v8946_v62 = vshrl.u32 %v17799_v57, 16  ;;  %3468 = vst.msk [vmem:[#allocation2 + $0x20] sm:$0xff] %vm3466_vm10, %v3439_v47  ;;  %v25044_v47 = vld [vmem:[#allocation16_spill] sm:$0xff] }
 0x1ab   : > { %6195 = vst.msk [vmem:[#allocation2 + $0x8] sm:$0xff] %vm689_vm5, %v6031_v40  ;;  %v8922_v26 = vrot.slane %v8920_v27, 7  ;;  %v8951_v9 = vshrl.u32 %v8685_v45, 16  ;;  %v8954_v20 = vshll.u32 %v8685_v45, 16 }
 0x1ac   : > { %v15286_v34 = vor.u32 %v20842_v38, %v25040_v28  ;;  %6645 = vst.msk [vmem:[#allocation2 + $0x8] sm:$0xff] %vm1579_vm7, %v20477_v32  ;;  %v15602_v57 = vrot.slane %v15594_v49, %v18814_v19  ;;  %v17817_v41 = vrot.slane %v8946_v62, 9  ;;  %v17871_v28 = vcombine.high %v20571_v6, %v20585_v61  ;;  %v20874_v38 = vld.sshfl [vmem:[%s18788_s27 + $0x30] sm:$0x33 pattern:$0x76325410] }
 0x1ad   : > { %7088 = vst.msk [vmem:[#allocation2 + $0x8] sm:$0xff] %vm2165_vm8, %v20515_v60  ;;  %v8925_v40 = vor.u32 %v8923_v23, %v8922_v26  ;;  %v8927_v32 = vrot.slane %v8922_v26, 2  ;;  %v20879_v27 = vrot.slane %v8951_v9, 7  ;;  %v9691_v49 = vcombine.low %v25039_v50, %v20571_v6  ;;  %v3883_v55 = vpop.permute.xlu0 %3882 }
 0x1ae   : > { %v15287_v22 = vsel %vm19323_vm4, %v24902_v54, %v15286_v34  ;;  %v17386_v53 = vld.sshfl [vmem:[%s18788_s27 + $0x2c] sm:$0x3 pattern:$0x76325410]  ;;  %v25042_v34 = vld [vmem:[#allocation23_spill] sm:$0xff]  ;;  %v9706_v61 = vrot.slane %v17871_v28, %v18814_v19  ;;  %v20889_v62 = vcombine.high %v20859_v3, %v20859_v3  ;;  %v20893_v60 = vcombine.high %v20874_v38, %v20874_v38  ;;  %3912 = vst.msk [vmem:[#allocation2 + $0x20] sm:$0xff] %vm3910_vm11, %v3883_v55 }
 0x1af   : > { %v15595_v45 = vcombine.low %v20852_v30, %v15287_v22  ;;  %25041 = vst [vmem:[#allocation9_spill] sm:$0xff] %v20879_v27  ;;  %7970 = vst.msk [vmem:[#allocation2 + $0x8] sm:$0xff] %vm3015_vm9, %v25042_v34  ;;  %v8926_v23 = vsel %vm19323_vm4, %v8918_v7, %v8925_v40  ;;  %v8935_v6 = vsel %vm19323_vm4, %v8927_v32, %v20624_v21  ;;  %v20907_v54 = vld.sshfl [vmem:[%s18788_s27 + $0x40] sm:$0x33 pattern:$0x76325410] }
 0x1b0   : > { %v8956_v50 = vor.u32 %v8954_v20, %v20879_v27  ;;  %v9241_v26 = vcombine.low %v8926_v23, %v8935_v6  ;;  %v9699_v22 = vrot.slane %v9691_v49, %v18814_v19  ;;  %v3761_v28 = vcombine.low %v20859_v3, %v20889_v62  ;;  %v20914_v21 = vld.sshfl [vmem:[%s18788_s27 + $0x2c] sm:$0x13 pattern:$0x76325410]  ;;  %8548 = vst.msk [vmem:[#allocation2 + $0x8] sm:$0xff] %vm3466_vm10, %v20560_v14 }
 0x1b1   : > { %v15609_v9 = vrot.slane %v15595_v45, %v18814_v19  ;;  %v3762_v34 = vcombine.low %v17386_v53, %v20874_v38  ;;  %v20909_v45 = vpop.permute.xlu1 %15730  ;;  %9390 = vst.msk [vmem:[#allocation2 + $0x8] sm:$0xff] %vm3910_vm11, %v20592_v39  ;;  %v20940_v14 = vcombine.high %v20914_v21, %v20914_v21  ;;  %v4293_v39 = vshrl.u32 %v25044_v47, 16 }
 0x1b2   : > { %v8957_v40 = vsel %vm19323_vm4, %v17817_v41, %v8956_v50  ;;  %v9249_v32 = vrot.slane %v9241_v26, %v18814_v19  ;;  %v9707_v49 = vcombine.low %v9699_v22, %v9706_v61  ;;  %v3769_v53 = vrot.slane %v3761_v28, %v18814_v19  ;;  %v25043_v41 = vld [vmem:[#allocation19_spill] sm:$0xff]  ;;  %9840 = vst.msk [vmem:[#allocation2 + $0x8] sm:$0xff] %vm4793_vm12, %v20643_v58 }
 0x1b3   : > { %v15610_v7 = vcombine.low %v15602_v57, %v15609_v9  ;;  %v9242_v20 = vcombine.low %v20640_v8, %v8957_v40  ;;  %v3776_v57 = vrot.slane %v3762_v34, %v18814_v19  ;;  %v20930_v8 = vcombine.high %v20907_v54, %v20907_v54  ;;  %10283 = vst.msk [vmem:[#allocation2 + $0x8] sm:$0xff] %vm5372_vm14, %v20669_v46 }
 0x1b4   : > { %v10135_v61 = vcombine.low %v25043_v41, %v20443_v52  ;;  %v4309_v9 = vshll.u32 %v20914_v21, 16  ;;  %v4299_v50 = vshll.u32 %v25045_v51, 16  ;;  %v4295_v26 = vrot.slane %v4293_v39, 6 }
 0x1b5   : > { %15734 = vrot.lane.b32.xlu1 %v15610_v7, %s18722_s8  ;;  %v9256_v0 = vrot.slane %v9242_v20, %v18814_v19  ;;  %v3777_v23 = vcombine.low %v3769_v53, %v3776_v57  ;;  %v10134_v52 = vcombine.low %v20907_v54, %v20930_v8  ;;  %v4303_v22 = vshrl.u32 %v25045_v51, 16  ;;  %v20951_v34 = vpop.permute.xlu1 %9812  ;;  %v17483_v57 = vld.sshfl [vmem:[%s18788_s27 + $0x30] sm:$0x32 pattern:$0x76325410] }
 0x1b6   : > { %v10149_v6 = vrot.slane %v10135_v61, %v18814_v19  ;;  %v20949_v28 = vrot.slane %v4309_v9, 7  ;;  %25046 = vst [vmem:[#allocation8_spill] sm:$0xff] %v20951_v34  ;;  %v4301_v40 = vrot.slane %v4299_v50, 7  ;;  %v4313_v20 = vshrl.u32 %v20914_v21, 16  ;;  %v4766_v50 = vpop.permute.xlu0 %4765 }
 0x1b7   : > { %v9257_v55 = vcombine.low %v9249_v32, %v9256_v0  ;;  %v10142_v7 = vrot.slane %v10134_v52, %v18814_v19  ;;  %v4319_v53 = vshll.u32 %v20940_v14, 16  ;;  %v25047_v32 = vld [vmem:[#allocation22_spill] sm:$0xff]  ;;  %v4305_v61 = vrot.slane %v4303_v22, 6  ;;  %4795 = vst.msk [vmem:[#allocation2 + $0x20] sm:$0xff] %vm4793_vm12, %v4766_v50 }
 0x1b8   : > { %v4296_v41 = vor.u32 %v4295_v26, %v25047_v32  ;;  %v4324_v0 = vshrl.u32 %v20874_v38, 16  ;;  %v4327_v39 = vshll.u32 %v20874_v38, 16  ;;  %v4315_v27 = vrot.slane %v4313_v20, 6 }
 0x1b9   : > { %9816 = vrot.lane.b32.xlu1 %v9707_v49, %s18721_s7  ;;  %9366 = vrot.lane.b32.xlu0 %v9257_v55, %s18720_s6  ;;  %v10150_v9 = vcombine.low %v10142_v7, %v10149_v6  ;;  %v4321_v49 = vrot.slane %v4319_v53, 7  ;;  %v4333_v52 = vshll.u32 %v20893_v60, 16  ;;  %v4306_v33 = vor.u32 %v4305_v61, %v4301_v40  ;;  %v20973_v53 = vpop.permute.xlu1 %10255 }
 0x1ba   : > { %v4297_v63 = vrot.slane %v4296_v41, 2  ;;  %v4326_v35 = vrot.slane %v4324_v0, 6  ;;  %v4329_v34 = vrot.slane %v4327_v39, 7  ;;  %v4316_v55 = vor.u32 %v4315_v27, %v20949_v28 }
 0x1bb   : > { %v4335_v26 = vrot.slane %v4333_v52, 7  ;;  %v4337_v22 = vshrl.u32 %v20893_v60, 16  ;;  %v4307_v6 = vrot.slane %v4306_v33, 2  ;;  %v4931_v20 = vcombine.high %v17483_v57, %v17483_v57 }
 0x1bc   : > { %v4302_v38 = vsel %vm18975_vm13, %v4297_v63, %v4301_v40  ;;  %v4330_v7 = vor.u32 %v4329_v34, %v4326_v35  ;;  %v4317_v27 = vrot.slane %v4316_v55, 2  ;;  %v5084_v63 = vrot.slane %v25045_v51, 7 }
 0x1bd   : > { %10259 = vrot.lane.b32.xlu1 %v10150_v9, %s18722_s8  ;;  %3886 = vrot.lane.b32.xlu0 %v3777_v23, %s18720_s6  ;;  %v4339_v32 = vrot.slane %v4337_v22, 6  ;;  %v25048_v23 = vrot.slane %v25044_v47, 7  ;;  %v4312_v35 = vsel %vm18975_vm13, %v4307_v6, %v20949_v28  ;;  %v5087_v33 = vrot.slane %v20914_v21, 7 }
 0x1be   : > { %v4331_v58 = vrot.slane %v4330_v7, 2  ;;  %v5090_v59 = vrot.slane %v20940_v14, 7  ;;  %v4322_v34 = vsel %vm18975_vm13, %v4317_v27, %v4321_v49  ;;  %v4644_v61 = vcombine.low %v4302_v38, %v4312_v35  ;;  %v18654_v22 = vld.sshfl [vmem:[%s18788_s27 + $0x40] sm:$0x33 pattern:$0x76325410] }
 0x1bf   : > { %v5083_v41 = vrot.slane %v25048_v23, 2  ;;  %v4340_v40 = vor.u32 %v4339_v32, %v4335_v26  ;;  %v5086_v0 = vrot.slane %v5084_v63, 2  ;;  %v5089_v39 = vrot.slane %v5087_v33, 2  ;;  %v18639_v32 = vld [vmem:[%s24855_s1 + $0x80] sm:$0xff]  }
 0x1c0   : > { %v4336_v51 = vsel %vm18975_vm13, %v4331_v58, %v4335_v26  ;;  %v17501_v9 = vrot.slane %v17483_v57, 9  ;;  %v4652_v14 = vrot.slane %v4644_v61, %v18814_v19  ;;  %v20993_v50 = vrot.slane %v4931_v20, 7  ;;  %v21003_v26 = vld.sshfl [vmem:[%s18788_s27 + $0x34] sm:$0x33 pattern:$0x76325410]  ;;  %v5345_v57 = vpop.permute.xlu1 %5344 }
 0x1c1   : > { %v5085_v47 = vsel %vm18803_vm6, %v5083_v41, %v5084_v63  ;;  %v20990_v21 = vrot.slane %v4340_v40, 2  ;;  %v4645_v52 = vcombine.low %v4322_v34, %v4336_v51  ;;  %v5088_v49 = vsel %vm18803_vm6, %v5086_v0, %v5087_v33  ;;  %v17597_v23 = vld.sshfl [vmem:[%s18788_s27 + $0x38] sm:$0x33 pattern:$0x76325410]  ;;  %5374 = vst.msk [vmem:[#allocation2 + $0x20] sm:$0xff] %vm5372_vm14, %v5345_v57 }
 0x1c2   : > { %v5091_v55 = vsel %vm18803_vm6, %v5089_v39, %v5090_v59  ;;  %v21000_v38 = vcombine.high %v18654_v22, %v18654_v22  ;;  %v5095_v7 = vsel %vm18803_vm6, %v17501_v9, %v20993_v50  ;;  %v5223_v27 = vcombine.low %v5085_v47, %v5088_v49  ;;  %v25049_v34 = vld [vmem:[#allocation12_spill] sm:$0xff]  ;;  %v17946_v0 = vld.sshfl [vmem:[%s18788_s27 + $0x24] sm:$0x33 pattern:$0x76325410] }
 0x1c3   : > { %v4659_v6 = vrot.slane %v4645_v52, %v18814_v19  ;;  %v5224_v41 = vcombine.low %v5091_v55, %v5095_v7  ;;  %v21020_v33 = vcombine.high %v21003_v26, %v21003_v26  ;;  %v18723_v47 = vmov 0   ;;  %v18642_v39 = vld [vmem:[%s24855_s1 + $0x88] sm:$0xff]  }
 0x1c4   : > { %v11435_v63 = vrot.slane %v21000_v38, 7  ;;  %v5231_v58 = vrot.slane %v5223_v27, %v18814_v19  ;;  %16590 = vmatprep.subr.bf16.mxu1 %v18723_v47  ;;  %v11575_v46 = vcombine.low %v20766_v11, %v20775_v24  ;;  %v6348_v51 = vcombine.high %v17597_v23, %v17597_v23 }
 0x1c5   : > { %v4660_v35 = vcombine.low %v4652_v14, %v4659_v6  ;;  %v5238_v59 = vrot.slane %v5224_v41, %v18814_v19  ;;  %16591 = vmatpush1.bf16.msra.mxu1 %v18639_v32  ;;  %v6513_v15 = vcombine.low %v21003_v26, %v21020_v33  ;;  %v12095_v14 = vshrl.u32 %v21000_v38, 16 }
 0x1c6   : > { %v11436_v40 = vsel %vm18803_vm6, %v25049_v34, %v11435_v63  ;;  %v11437_v61 = vrot.slane %v11435_v63, 2  ;;  %v12098_v49 = vshll.u32 %v21000_v38, 16  ;;  %16592 = vmatprep.subr.bf16.mxu1 %v18723_v47  ;;  %v11589_v24 = vrot.slane %v11575_v46, %v18814_v19 }
 0x1c7   : > { %4769 = vrot.lane.b32.xlu0 %v4660_v35, %s18721_s7  ;;  %v5239_v9 = vcombine.low %v5231_v58, %v5238_v59  ;;  %v6514_v55 = vcombine.low %v17597_v23, %v6348_v51  ;;  %v6521_v22 = vrot.slane %v6513_v15, %v18814_v19  ;;  %v12097_v57 = vrot.slane %v12095_v14, 7  ;;  %v18645_v23 = vld [vmem:[%s24855_s1 + $0x90] sm:$0xff]   ;;  %v16201_v58 = vld [vmem:[#allocation2 + $0x8] sm:$0xff]  ;;  %v16200_v59 = vld [vmem:[#allocation2] sm:$0xff] }
 0x1c8   : > { %v11439_v52 = vsel %vm18803_vm6, %v11437_v61, %v20743_v42  ;;  %v10348_v6 = vcombine.high %v17946_v0, %v17946_v0  ;;  %v10534_v27 = vshrl.u32 %v17946_v0, 16  ;;  %v10537_v32 = vshll.u32 %v17946_v0, 16  ;;  %16509 = vmatprep.mubr.bf16.mxu0 %v16201_v58  ;;  %v25050_v51 = vld [vmem:[#allocation13_spill] sm:$0xff] }
 0x1c9   : > { %v11574_v11 = vcombine.low %v11436_v40, %v11439_v52  ;;  %5348 = vrot.lane.b32.xlu1 %v5239_v9, %s18722_s8  ;;  %v6528_v42 = vrot.slane %v6514_v55, %v18814_v19  ;;  %16593 = vmatpush1.bf16.msra.mxu1 %v18642_v39  ;;  %v12100_v41 = vor.u32 %v12098_v49, %v12097_v57  ;;  %v12102_v63 = vrot.slane %v12097_v57, 2 }
 0x1ca   : > { %v10543_v35 = vshll.u32 %v10348_v6, 16  ;;  %16594 = vmatprep.subr.bf16.mxu1 %v18723_v47  ;;  %v10536_v61 = vrot.slane %v10534_v27, 6  ;;  %v10539_v46 = vrot.slane %v10537_v32, 7  ;;  %v25051_v15 = vrot.slane %v25050_v51, 2  ;;  %16510 = vmatmul.mubr.bf16.vlgmr.msra.gmra.mrb[0].mxu0 %v16200_v59 }
 0x1cb   : > { %v11582_v7 = vrot.slane %v11574_v11, %v18814_v19  ;;  %v6529_v40 = vcombine.low %v6521_v22, %v6528_v42  ;;  %v12110_v39 = vsel %vm19323_vm4, %v12102_v63, %v20828_v56  ;;  %v10547_v49 = vshrl.u32 %v10348_v6, 16  ;;  %v18646_v56 = vld [vmem:[%s24855_s1 + $0x98] sm:$0xff]   ;;  %v18115_v32 = vld.sshfl [vmem:[%s18788_s27 + $0x48] sm:$0x30 pattern:$0x76325410] }
 0x1cc   : > { %v12101_v0 = vsel %vm19323_vm4, %v25051_v15, %v12100_v41  ;;  %v10545_v9 = vrot.slane %v10543_v35, 7  ;;  %v10540_v14 = vor.u32 %v10539_v46, %v10536_v61  ;;  %v10553_v11 = vshll.u32 %v20859_v3, 16  ;;  %v18655_v59 = vld.sshfl [vmem:[%s18788_s27 + $0x3c] sm:$0x33 pattern:$0x76325410] }
 0x1cd   : > { %v11590_v34 = vcombine.low %v11582_v7, %v11589_v24  ;;  %6623 = vrot.lane.b32.xlu1 %v6529_v40, %s18717_s29  ;;  %v12416_v52 = vcombine.low %v12101_v0, %v12110_v39  ;;  %v17649_v24 = vld.sshfl [vmem:[%s18788_s27 + $0x44] sm:$0x3 pattern:$0x76325410]  ;;  %v10557_v55 = vshrl.u32 %v20859_v3, 16  ;;  %v10563_v22 = vshll.u32 %v20889_v62, 16  ;;  %16595 = vmatpush1.bf16.msra.mxu1 %v18645_v23 }
 0x1ce   : > { %v10567_v57 = vshrl.u32 %v20889_v62, 16  ;;  %v12417_v7 = vcombine.low %v20846_v48, %v20852_v30  ;;  %v10541_v42 = vrot.slane %v10540_v14, 2  ;;  %v10549_v27 = vrot.slane %v10547_v49, 6  ;;  %16596 = vmatprep.subr.bf16.mxu1 %v18723_v47  ;;  %v18647_v15 = vld [vmem:[%s24855_s1 + $0xa0] sm:$0xff]  }
 0x1cf   : > { %11699 = vrot.lane.b32.xlu0 %v11590_v34, %s18717_s29  ;;  %v12424_v6 = vrot.slane %v12416_v52, %v18814_v19  ;;  %v10555_v41 = vrot.slane %v10553_v11, 7  ;;  %v10559_v63 = vrot.slane %v10557_v55, 6  ;;  %v10565_v35 = vrot.slane %v10563_v22, 7  ;;  %v25053_v3 = vld [vmem:[#allocation3_spill] sm:$0xff] }
 0x1d0   : > { %v10569_v23 = vrot.slane %v10567_v57, 6  ;;  %v12431_v48 = vrot.slane %v12417_v7, %v18814_v19  ;;  %v10546_v30 = vsel %vm18975_vm13, %v10541_v42, %v10545_v9  ;;  %v10550_v58 = vor.u32 %v10549_v27, %v10545_v9  ;;  %v17533_v14 = vld.sshfl [vmem:[%s18788_s27 + $0x18] sm:$0x32 pattern:$0x76325410] }
 0x1d1   : > { %v6780_v34 = vcombine.high %v18655_v59, %v18655_v59  ;;  %v10560_v40 = vor.u32 %v10559_v63, %v10555_v41  ;;  %v6957_v46 = vcombine.low %v20930_v8, %v17649_v24  ;;  %v12866_v51 = vcombine.low %v21000_v38, %v20792_v36  ;;  %16597 = vmatpush1.bf16.msra.mxu1 %v18646_v56  ;;  %v17534_v56 = vld.sshfl [vmem:[%s18788_s27 + $0x1c] sm:$0x33 pattern:$0x76325410] }
 0x1d2   : > { %v10570_v61 = vor.u32 %v10569_v23, %v10565_v35  ;;  %v12432_v0 = vcombine.low %v12424_v6, %v12431_v48  ;;  %v10551_v39 = vrot.slane %v10550_v58, 2  ;;  %v18131_v9 = vcombine.high %v20792_v36, %v18115_v32  ;;  %16598 = vmatprep.subr.bf16.mxu1 %v18723_v47  ;;  %v21108_v32 = vpop.permute.xlu0 %11695 }
 0x1d3   : > { %v6956_v52 = vcombine.low %v6780_v34, %v20907_v54  ;;  %v10561_v49 = vrot.slane %v10560_v40, 2  ;;  %v6971_v24 = vrot.slane %v6957_v46, %v18814_v19  ;;  %v12874_v38 = vrot.slane %v12866_v51, %v18814_v19 }
 0x1d4   : > { %v10571_v7 = vrot.slane %v10570_v61, 2  ;;  %12541 = vrot.lane.b32.xlu0 %v12432_v0, %s18716_s28  ;;  %v10556_v6 = vsel %vm18975_vm13, %v10551_v39, %v10555_v41  ;;  %v12881_v27 = vrot.slane %v18131_v9, %v18814_v19  ;;  %v5454_v36 = vcombine.high %v20787_v44, %v20787_v44  ;;  %v18648_v41 = vld [vmem:[%s24855_s1 + $0xa8] sm:$0xff]   ;;  %v21119_v61 = vpop.permute.xlu1 %6619  ;;  %v21127_v9 = vld.sshfl [vmem:[%s18788_s27 + $0x44] sm:$0x13 pattern:$0x76325410] }
 0x1d5   : > { %v6964_v42 = vrot.slane %v6956_v52, %v18814_v19  ;;  %v10566_v63 = vsel %vm18975_vm13, %v10561_v49, %v10565_v35  ;;  %v10965_v48 = vcombine.low %v10546_v30, %v10556_v6  ;;  %v5462_v58 = vcombine.high %v17533_v14, %v17533_v14  ;;  %16599 = vmatpush1.bf16.msra.mxu1 %v18647_v15 }
 0x1d6   : > { %v10576_v23 = vsel %vm18975_vm13, %v10571_v7, %v20949_v28  ;;  %v12882_v44 = vcombine.low %v12874_v38, %v12881_v27  ;;  %v5470_v40 = vcombine.high %v17534_v56, %v17534_v56  ;;  %16600 = vmatprep.subr.bf16.mxu1 %v18723_v47  ;;  %v5663_v46 = vrot.slane %v20804_v37, 2  ;;  %v18649_v37 = vld [vmem:[%s24855_s1 + $0xb0] sm:$0xff]  }
 0x1d7   : > { %v10966_v59 = vcombine.low %v10566_v63, %v10576_v23  ;;  %v6972_v34 = vcombine.low %v6964_v42, %v6971_v24  ;;  %v10973_v35 = vrot.slane %v10965_v48, %v18814_v19  ;;  %v5665_v30 = vshrl.u32 %v5454_v36, 16 }
 0x1d8   : > { %v5668_v51 = vshll.u32 %v5454_v36, 16  ;;  %12991 = vrot.lane.b32.xlu0 %v12882_v44, %s18718_s30  ;;  %v5673_v0 = vshrl.u32 %v17533_v14, 16  ;;  %v5678_v39 = vshrl.u32 %v5462_v58, 16  ;;  %v5681_v52 = vshll.u32 %v5462_v58, 16  ;;  %v21133_v14 = vpop.permute.xlu0 %12537 }
 0x1d9   : > { %v10980_v15 = vrot.slane %v10966_v59, %v18814_v19  ;;  %7066 = vrot.lane.b32.xlu1 %v6972_v34, %s18716_s28  ;;  %v5667_v49 = vrot.slane %v5665_v30, 7  ;;  %v5687_v7 = vshrl.u32 %v17534_v56, 16  ;;  %v5690_v24 = vshll.u32 %v17534_v56, 16  ;;  %16601 = vmatpush1.bf16.msra.mxu1 %v18648_v41  ;;  %v21143_v34 = vpop.permute.xlu1 %7062 }
 0x1da   : > { %v5696_v38 = vshrl.u32 %v5470_v40, 16  ;;  %v17555_v42 = vrot.slane %v5673_v0, 9  ;;  %v5680_v27 = vrot.slane %v5678_v39, 7  ;;  %v5699_v36 = vshll.u32 %v5470_v40, 16  ;;  %16602 = vmatprep.subr.bf16.mxu1 %v18723_v47 }
 0x1db   : > { %v10981_v6 = vcombine.low %v10973_v35, %v10980_v15  ;;  %v5670_v63 = vor.u32 %v5668_v51, %v5667_v49  ;;  %v5689_v23 = vrot.slane %v5687_v7, 7  ;;  %v21139_v56 = vcombine.high %v21127_v9, %v21127_v9  ;;  %v18650_v51 = vld [vmem:[%s24855_s1 + $0xb8] sm:$0xff]  }
 0x1dc   : > { %v21135_v48 = vrot.slane %v5696_v38, 7  ;;  %v5683_v58 = vor.u32 %v5681_v52, %v5680_v27  ;;  %v5685_v41 = vrot.slane %v5680_v27, 2  ;;  %v7520_v59 = vshll.u32 %v20907_v54, 16 }
 0x1dd   : > { %11145 = vst.msk [vmem:[#allocation2 + $0x10] sm:$0xff] %vm689_vm5, %v10981_v6  ;;  %v5671_v44 = vsel %vm19323_vm4, %v5663_v46, %v5670_v63  ;;  %v5692_v40 = vor.u32 %v5690_v24, %v5689_v23  ;;  %v5694_v35 = vrot.slane %v5689_v23, 2  ;;  %16603 = vmatpush1.bf16.msra.mxu1 %v18649_v37  ;;  %v7524_v46 = vshrl.u32 %v20907_v54, 16  ;;  %v21176_v37 = vpop.permute.xlu0 %12987 }
 0x1de   : > { %11723 = vst.msk [vmem:[#allocation2 + $0x10] sm:$0xff] %vm1579_vm7, %v20671_v16  ;;  %v5701_v30 = vor.u32 %v5699_v36, %v21135_v48  ;;  %v5684_v15 = vsel %vm19323_vm4, %v17555_v42, %v5683_v58  ;;  %v7522_v16 = vrot.slane %v7520_v59, 7  ;;  %16604 = vmatprep.subr.bf16.mxu1 %v18723_v47  ;;  %v24908_v49 = vshll.u32 %v20930_v8, 16 }
 0x1df   : > { %12565 = vst.msk [vmem:[#allocation2 + $0x10] sm:$0xff] %vm2165_vm8, %v20704_v10  ;;  %v5693_v0 = vsel %vm19323_vm4, %v5685_v41, %v5692_v40  ;;  %v6032_v52 = vcombine.low %v5671_v44, %v5684_v15  ;;  %v7526_v7 = vrot.slane %v7524_v46, 6  ;;  %v7534_v24 = vshrl.u32 %v20930_v8, 16  ;;  %v25052_v15 = vld [vmem:[#allocation10_spill] sm:$0xff] }
 0x1e0   : > { %v5702_v39 = vsel %vm19323_vm4, %v5694_v35, %v5701_v30  ;;  %13015 = vst.msk [vmem:[#allocation2 + $0x10] sm:$0xff] %vm3015_vm9, %v20733_v4  ;;  %v21172_v38 = vld.sshfl [vmem:[%s18788_s27 + $0x4c] sm:$0x33 pattern:$0x76325410]  ;;  %v7532_v42 = vrot.slane %v24908_v49, 7 }
 0x1e1   : > { %v6033_v10 = vcombine.low %v5693_v0, %v5702_v39  ;;  %13458 = vst.msk [vmem:[#allocation2 + $0x10] sm:$0xff] %vm3466_vm10, %v20770_v1  ;;  %v6040_v6 = vrot.slane %v6032_v52, %v18814_v19  ;;  %v7540_v4 = vshll.u32 %v21127_v9, 16  ;;  %v7544_v27 = vshrl.u32 %v21127_v9, 16  ;;  %16605 = vmatpush1.bf16.msra.mxu1 %v18650_v51  ;;  %v18651_v1 = vld [vmem:[%s24855_s1 + $0xc0] sm:$0xff]   ;;  %v25061_v49 = vld [vmem:[#allocation4_spill] sm:$0xff] }
 0x1e2   : > { %v21184_v36 = vld.sshfl [vmem:[%s18788_s27 + $0x2c] sm:$0x33 pattern:$0x76325410]  ;;  %14340 = vst.msk [vmem:[#allocation2 + $0x10] sm:$0xff] %vm3910_vm11, %v20798_v25  ;;  %v7527_v23 = vor.u32 %v7526_v7, %v7522_v16  ;;  %v7536_v58 = vrot.slane %v7534_v24, 6  ;;  %16606 = vmatprep.subr.bf16.mxu1 %v18723_v47  ;;  %v21200_v25 = vpop.permute.xlu1 %7944  ;;  %v21205_v30 = vcombine.high %v21172_v38, %v21172_v38 }
 0x1e3   : > { %v6047_v63 = vrot.slane %v6033_v10, %v18814_v19  ;;  %v21195_v41 = vld.sshfl [vmem:[%s18788_s27 + $0x50] sm:$0x3 pattern:$0x76325410]  ;;  %14918 = vst.msk [vmem:[#allocation2 + $0x10] sm:$0xff] %vm4793_vm12, %v20825_v18  ;;  %v7542_v44 = vrot.slane %v7540_v4, 7  ;;  %v7523_v18 = vsel %vm18975_vm13, %v25052_v15, %v7522_v16 }
 0x1e4   : > { %v7546_v40 = vrot.slane %v7544_v27, 6  ;;  %v7550_v35 = vshll.u32 %v21139_v56, 16  ;;  %15760 = vst.msk [vmem:[#allocation2 + $0x10] sm:$0xff] %vm5372_vm14, %v20909_v45  ;;  %v7528_v0 = vrot.slane %v7527_v23, 2  ;;  %v7537_v47 = vor.u32 %v7536_v58, %v7532_v42 }
 0x1e5   : > { %v6048_v51 = vcombine.low %v6040_v6, %v6047_v63  ;;  %v21213_v39 = vld.sshfl [vmem:[%s18788_s27 + $0x54] sm:$0x33 pattern:$0x76325410]  ;;  %v13309_v4 = vcombine.low %v21172_v38, %v21205_v30  ;;  %16607 = vmatpush1.bf16.msra.mxu1 %v18651_v1  ;;  %v21228_v27 = vcombine.high %v21184_v36, %v21184_v36  ;;  %v21230_v63 = vpop.permute.xlu0 %13430 }
 0x1e6   : > { %v7547_v52 = vor.u32 %v7546_v40, %v7542_v44  ;;  %v7552_v10 = vrot.slane %v7550_v35, 7  ;;  %v21217_v7 = vcombine.high %v21213_v39, %v21213_v39  ;;  %v7533_v45 = vsel %vm18975_vm13, %v7528_v0, %v7532_v42 }
 0x1e7   : > { %6196 = vst.msk [vmem:[#allocation2 + $0x28] sm:$0xff] %vm689_vm5, %v6048_v51  ;;  %v7538_v16 = vrot.slane %v7537_v47, 2  ;;  %v13310_v6 = vcombine.low %v21195_v41, %v21213_v39  ;;  %v7838_v1 = vcombine.low %v7523_v18, %v7533_v45  ;;  %v21235_v58 = vrot.slane %v13309_v4, %v18814_v19  ;;  %v21244_v51 = vpop.permute.xlu1 %8522  ;;  %v18656_v45 = vld.sshfl [vmem:[%s18788_s27 + $0x4c] sm:$0x33 pattern:$0x76325410] }
 0x1e8   : > { %6646 = vst.msk [vmem:[#allocation2 + $0x28] sm:$0xff] %vm1579_vm7, %v20731_v31  ;;  %v7548_v23 = vrot.slane %v7547_v52, 2  ;;  %v2587_v35 = vrot.slane %v10557_v55, 7  ;;  %v2603_v18 = vshrl.u32 %v21184_v36, 16  ;;  %v2596_v47 = vrot.slane %v10567_v57, 7 }
 0x1e9   : > { %v7543_v42 = vsel %vm18975_vm13, %v7538_v16, %v7542_v44  ;;  %v13324_v40 = vrot.slane %v13310_v6, %v18814_v19  ;;  %7089 = vst.msk [vmem:[#allocation2 + $0x28] sm:$0xff] %vm2165_vm8, %v20768_v17  ;;  %v7846_v15 = vrot.slane %v7838_v1, %v18814_v19  ;;  %v2612_v4 = vshrl.u32 %v21228_v27, 16  ;;  %v25055_v6 = vld [vmem:[#allocation8_spill] sm:$0xff] }
 0x1ea   : > { %v7553_v31 = vsel %vm18975_vm13, %v7548_v23, %v7552_v10  ;;  %7971 = vst.msk [vmem:[#allocation2 + $0x28] sm:$0xff] %vm3015_vm9, %v20796_v5  ;;  %v2590_v17 = vor.u32 %v10553_v11, %v2587_v35  ;;  %v2592_v55 = vrot.slane %v2587_v35, 2  ;;  %v2605_v52 = vrot.slane %v2603_v18, 7  ;;  %v21273_v23 = vpop.permute.xlu0 %14312 }
 0x1eb   : > { %v7839_v44 = vcombine.low %v7543_v42, %v7553_v31  ;;  %v13325_v0 = vcombine.low %v21235_v58, %v13324_v40  ;;  %8549 = vst.msk [vmem:[#allocation2 + $0x28] sm:$0xff] %vm3466_vm10, %v20823_v43  ;;  %v2606_v10 = vshll.u32 %v21184_v36, 16  ;;  %v25054_v11 = vrot.slane %v25053_v3, 2  ;;  %v3441_v1 = vpop.permute.xlu1 %3440 }
 0x1ec   : > { %9391 = vst.msk [vmem:[#allocation2 + $0x28] sm:$0xff] %vm3910_vm11, %v20861_v13  ;;  %v2615_v57 = vshll.u32 %v21228_v27, 16  ;;  %v13579_v16 = vcombine.high %v18656_v45, %v18656_v45  ;;  %v2599_v13 = vor.u32 %v10563_v22, %v2596_v47  ;;  %v2601_v42 = vrot.slane %v2596_v47, 2 }
 0x1ed   : > { %v7853_v5 = vrot.slane %v7839_v44, %v18814_v19  ;;  %13434 = vrot.lane.b32.xlu0 %v13325_v0, %s18719_s5  ;;  %v2591_v43 = vsel %vm19323_vm4, %v25054_v11, %v2590_v17  ;;  %9841 = vst.msk [vmem:[#allocation2 + $0x28] sm:$0xff] %vm4793_vm12, %v25055_v6  ;;  %v2608_v40 = vor.u32 %v2606_v10, %v2605_v52  ;;  %v2610_v35 = vrot.slane %v2605_v52, 2  ;;  %v18214_v31 = vld.sshfl [vmem:[%s18788_s27 + $0x50] sm:$0x13 pattern:$0x76325410] }
 0x1ee   : > { %10284 = vst.msk [vmem:[#allocation2 + $0x28] sm:$0xff] %vm5372_vm14, %v20973_v53  ;;  %v2614_v44 = vrot.slane %v2612_v4, 7  ;;  %v21281_v0 = vcombine.high %v18214_v31, %v18214_v31  ;;  %v25056_v17 = vld [vmem:[#allocation24_spill] sm:$0xff]  ;;  %v2600_v62 = vsel %vm19323_vm4, %v2592_v55, %v2599_v13  ;;  %v13846_v47 = vshll.u32 %v13579_v16, 16 }
 0x1ef   : > { %3469 = vst.msk [vmem:[#allocation2 + $0x40] sm:$0xff] %vm3466_vm10, %v3441_v1  ;;  %v7854_v18 = vcombine.low %v7846_v15, %v7853_v5  ;;  %v25057_v3 = vshrl.u32 %v25056_v17, 16  ;;  %v2609_v22 = vsel %vm19323_vm4, %v2601_v42, %v2608_v40  ;;  %v13850_v52 = vshrl.u32 %v13579_v16, 16  ;;  %v25058_v15 = vld [vmem:[#allocation7_spill] sm:$0xff] }
 0x1f0   : > { %v2617_v53 = vor.u32 %v2615_v57, %v2614_v44  ;;  %v2883_v10 = vcombine.low %v2591_v43, %v2600_v62  ;;  %v13856_v5 = vshll.u32 %v18214_v31, 16  ;;  %v13848_v45 = vrot.slane %v13846_v47, 7  ;;  %v21296_v16 = vld.sshfl [vmem:[%s18788_s27 + $0x54] sm:$0x32 pattern:$0x76325410] }
 0x1f1   : > { %v13842_v11 = vrot.slane %v25057_v3, 6  ;;  %7948 = vrot.lane.b32.xlu1 %v7854_v18, %s18718_s30  ;;  %v13852_v6 = vrot.slane %v13850_v52, 6  ;;  %v13860_v1 = vshrl.u32 %v18214_v31, 16  ;;  %v13866_v17 = vshll.u32 %v21281_v0, 16  ;;  %v21298_v18 = vpop.permute.xlu0 %14890 }
 0x1f2   : > { %v2618_v55 = vsel %vm19323_vm4, %v2610_v35, %v2617_v53  ;;  %v2891_v13 = vrot.slane %v2883_v10, %v18814_v19  ;;  %v13858_v40 = vrot.slane %v13856_v5, 7  ;;  %v13871_v47 = vshrl.u32 %v21213_v39, 16 }
 0x1f3   : > { %v13843_v4 = vor.u32 %v13842_v11, %v25058_v15  ;;  %v2884_v43 = vcombine.low %v2609_v22, %v2618_v55  ;;  %v13853_v57 = vor.u32 %v13852_v6, %v13848_v45  ;;  %v13862_v44 = vrot.slane %v13860_v1, 6  ;;  %v16204_v11 = vld [vmem:[#allocation2 + $0x20] sm:$0xff] }
 0x1f4   : > { %v13868_v3 = vrot.slane %v13866_v17, 7  ;;  %v13874_v35 = vshll.u32 %v21213_v39, 16  ;;  %v13880_v52 = vshll.u32 %v21217_v7, 16  ;;  %v13884_v22 = vshrl.u32 %v21217_v7, 16 }
 0x1f5   : > { %v13844_v42 = vrot.slane %v13843_v4, 2  ;;  %v16205_v53 = vld [vmem:[#allocation2 + $0x28] sm:$0xff]  ;;  %v2898_v10 = vrot.slane %v2884_v43, %v18814_v19  ;;  %v13854_v15 = vrot.slane %v13853_v57, 2  ;;  %v13863_v4 = vor.u32 %v13862_v44, %v13858_v40  ;;  %v25059_v44 = vld [vmem:[#allocation25_spill] sm:$0xff] }
 0x1f6   : > { %16517 = vmatprep.mubr.bf16.mxu0 %v16205_v53  ;;  %v13873_v5 = vrot.slane %v13871_v47, 6  ;;  %v13876_v6 = vrot.slane %v13874_v35, 7  ;;  %v13882_v1 = vrot.slane %v13880_v52, 7  ;;  %v25060_v20 = vrot.slane %v25059_v44, 7  ;;  %v21320_v53 = vpop.permute.xlu0 %9364 }
 0x1f7   : > { %v13849_v62 = vsel %vm18975_vm13, %v13844_v42, %v13848_v45  ;;  %v21309_v45 = vcombine.high %v21296_v16, %v21296_v16  ;;  %16518 = vmatmul.mubr.bf16.gmra.mrb[4].mxu0 %v16204_v11  ;;  %v2899_v17 = vcombine.low %v2891_v13, %v2898_v10  ;;  %v13859_v39 = vsel %vm18975_vm13, %v13854_v15, %v13858_v40 }
 0x1f8   : > { %v13864_v55 = vrot.slane %v13863_v4, 2  ;;  %v13886_v42 = vrot.slane %v13884_v22, 6  ;;  %v13877_v43 = vor.u32 %v13876_v6, %v13873_v5  ;;  %v14191_v57 = vcombine.low %v13849_v62, %v13859_v39  ;;  %v21346_v39 = vld.sshfl [vmem:[%s18788_s27 + $0x44] sm:$0x33 pattern:$0x76325410] }
 0x1f9   : > { %v14631_v47 = vsel %vm18803_vm6, %v25061_v49, %v25060_v20  ;;  %v25062_v35 = vmov %v25060_v20  ;;  %2993 = vrot.lane.b32.xlu1 %v2899_v17, %s18718_s30  ;;  %v21325_v11 = vrot.slane %v18214_v31, 7  ;;  %v14636_v62 = vrot.slane %v21281_v0, 7 }
 0x1fa   : > { %v14632_v52 = vrot.slane %v25062_v35, 2  ;;  %v13869_v13 = vsel %vm18975_vm13, %v13864_v55, %v13868_v3  ;;  %v13887_v40 = vor.u32 %v13886_v42, %v13882_v1  ;;  %v13878_v10 = vrot.slane %v13877_v43, 2  ;;  %v21348_v55 = vpop.permute.xlu1 %15732  ;;  %v3885_v42 = vpop.permute.xlu0 %3884  ;;  %v25063_v35 = vld [vmem:[#allocation11_spill] sm:$0xff] }
 0x1fb   : > { %v14199_v15 = vrot.slane %v14191_v57, %v18814_v19  ;;  %v18281_v20 = vrot.slane %v21296_v16, 9  ;;  %v24909_v49 = vrot.slane %v21309_v45, 7  ;;  %v14635_v3 = vrot.slane %v21325_v11, 2  ;;  %3913 = vst.msk [vmem:[#allocation2 + $0x40] sm:$0xff] %vm3910_vm11, %v3885_v42  ;;  %v25064_v42 = vld [vmem:[#allocation9_spill] sm:$0xff] }
 0x1fc   : > { %v21331_v4 = vrot.slane %v13887_v40, 2  ;;  %v14634_v22 = vsel %vm18803_vm6, %v14632_v52, %v21325_v11  ;;  %v8273_v31 = vrot.slane %v20907_v54, 7  ;;  %v13883_v0 = vsel %vm18975_vm13, %v13878_v10, %v13882_v1 }
 0x1fd   : > { %v14641_v5 = vsel %vm18803_vm6, %v18281_v20, %v24909_v49  ;;  %v14769_v6 = vcombine.low %v14631_v47, %v14634_v22  ;;  %v8276_v17 = vrot.slane %v20930_v8, 7  ;;  %v14192_v43 = vcombine.low %v13869_v13, %v13883_v0  ;;  %v21379_v49 = vld.sshfl [vmem:[%s18788_s27 + $0x28] sm:$0x33 pattern:$0x76325410] }
 0x1fe   : > { %v21352_v57 = vsel %vm18803_vm6, %v14635_v3, %v14636_v62  ;;  %v8274_v1 = vsel %vm18803_vm6, %v25063_v35, %v8273_v31  ;;  %v8275_v52 = vrot.slane %v8273_v31, 2  ;;  %v8279_v20 = vrot.slane %v21127_v9, 7 }
 0x1ff   : > { %v14770_v47 = vcombine.low %v21352_v57, %v14641_v5  ;;  %v14777_v40 = vrot.slane %v14769_v6, %v18814_v19  ;;  %v8278_v10 = vrot.slane %v8276_v17, 2  ;;  %v14206_v13 = vrot.slane %v14192_v43, %v18814_v19 }
 0x200   : > { %v8277_v62 = vsel %vm18803_vm6, %v8275_v52, %v8276_v17  ;;  %v8282_v22 = vrot.slane %v21139_v56, 7  ;;  %v21367_v3 = vcombine.high %v21346_v39, %v21346_v39  ;;  %v8281_v5 = vrot.slane %v8279_v20, 2 }
 0x201   : > { %v14784_v31 = vrot.slane %v14770_v47, %v18814_v19  ;;  %v8280_v0 = vsel %vm18803_vm6, %v8278_v10, %v8279_v20  ;;  %v8416_v6 = vcombine.low %v8274_v1, %v8277_v62  ;;  %v14207_v9 = vcombine.low %v14199_v15, %v14206_v13  ;;  %v21381_v47 = vpop.permute.xlu1 %9814 }
 0x202   : > { %v8958_v43 = vrot.slane %v25064_v42, 2  ;;  %v8962_v17 = vrot.slane %v7524_v46, 7  ;;  %v8283_v56 = vsel %vm18803_vm6, %v8281_v5, %v8282_v22  ;;  %v8971_v46 = vrot.slane %v7534_v24, 7 }
 0x203   : > { %v14785_v35 = vcombine.low %v14777_v40, %v14784_v31  ;;  %v8424_v52 = vrot.slane %v8416_v6, %v18814_v19  ;;  %14316 = vrot.lane.b32.xlu0 %v14207_v9, %s18720_s6  ;;  %v8417_v10 = vcombine.low %v8280_v0, %v8283_v56  ;;  %v17389_v40 = vld.sshfl [vmem:[%s18788_s27 + $0x38] sm:$0x3 pattern:$0x76325410]  ;;  %v8978_v20 = vshrl.u32 %v21346_v39, 16 }
 0x204   : > { %v8965_v15 = vor.u32 %v8962_v17, %v7520_v59  ;;  %v8967_v1 = vrot.slane %v8962_v17, 2  ;;  %v8981_v13 = vshll.u32 %v21346_v39, 16  ;;  %v8987_v62 = vshrl.u32 %v21367_v3, 16 }
 0x205   : > { %14894 = vrot.lane.b32.xlu1 %v14785_v35, %s18721_s7  ;;  %v8990_v22 = vshll.u32 %v21367_v3, 16  ;;  %v8431_v31 = vrot.slane %v8417_v10, %v18814_v19  ;;  %v25065_v59 = vshll.u32 %v20930_v8, 16  ;;  %v8976_v0 = vrot.slane %v8971_v46, 2 }
 0x206   : > { %v8966_v54 = vsel %vm19323_vm4, %v8958_v43, %v8965_v15  ;;  %v8980_v5 = vrot.slane %v8978_v20, 7  ;;  %v8989_v6 = vrot.slane %v8987_v62, 7  ;;  %v3161_v9 = vcombine.high %v21379_v49, %v21379_v49  ;;  %v21409_v8 = vld.sshfl [vmem:[%s18788_s27 + $0x50] sm:$0x33 pattern:$0x76325410]  ;;  %v21411_v62 = vpop.permute.xlu1 %10257 }
 0x207   : > { %v8974_v24 = vor.u32 %v8971_v46, %v25065_v59  ;;  %v3335_v42 = vcombine.low %v21184_v36, %v21228_v27  ;;  %v8432_v17 = vcombine.low %v8424_v52, %v8431_v31  ;;  %v3778_v56 = vcombine.low %v20893_v60, %v21003_v26  ;;  %v4768_v59 = vpop.permute.xlu0 %4767 }
 0x208   : > { %v3779_v43 = vcombine.low %v21020_v33, %v17389_v40  ;;  %v8983_v10 = vor.u32 %v8981_v13, %v8980_v5  ;;  %v8985_v15 = vrot.slane %v8980_v5, 2  ;;  %v8992_v46 = vor.u32 %v8990_v22, %v8989_v6  ;;  %4796 = vst.msk [vmem:[#allocation2 + $0x40] sm:$0xff] %vm4793_vm12, %v4768_v59  ;;  %v25066_v5 = vld [vmem:[#allocation5_spill] sm:$0xff] }
 0x209   : > { %v8975_v35 = vsel %vm19323_vm4, %v8967_v1, %v8974_v24  ;;  %8526 = vrot.lane.b32.xlu0 %v8432_v17, %s18719_s5  ;;  %v3334_v36 = vcombine.low %v21379_v49, %v3161_v9  ;;  %v3349_v27 = vrot.slane %v3335_v42, %v18814_v19  ;;  %v3786_v52 = vrot.slane %v3778_v56, %v18814_v19 }
 0x20a   : > { %v9258_v20 = vcombine.low %v8966_v54, %v8975_v35  ;;  %v3793_v60 = vrot.slane %v3779_v43, %v18814_v19  ;;  %v8984_v1 = vsel %vm19323_vm4, %v8976_v0, %v8983_v10  ;;  %v8993_v40 = vsel %vm19323_vm4, %v8985_v15, %v8992_v46  ;;  %v21438_v15 = vld.sshfl [vmem:[%s18788_s27 + $0x38] sm:$0x13 pattern:$0x76325410] }
 0x20b   : > { %v21426_v22 = vcombine.high %v21409_v8, %v21409_v8  ;;  %v9259_v31 = vcombine.low %v8984_v1, %v8993_v40  ;;  %v3342_v54 = vrot.slane %v3334_v36, %v18814_v19  ;;  %v15288_v6 = vrot.slane %v25066_v5, 2 }
 0x20c   : > { %v9266_v13 = vrot.slane %v9258_v20, %v18814_v19  ;;  %v3794_v24 = vcombine.low %v3786_v52, %v3793_v60  ;;  %v15290_v9 = vshrl.u32 %v25059_v44, 16  ;;  %v15293_v0 = vshll.u32 %v25059_v44, 16  ;;  %v5347_v44 = vpop.permute.xlu1 %5346 }
 0x20d   : > { %v15299_v42 = vshrl.u32 %v21409_v8, 16  ;;  %v15302_v17 = vshll.u32 %v21409_v8, 16  ;;  %v9273_v35 = vrot.slane %v9259_v31, %v18814_v19  ;;  %v3350_v56 = vcombine.low %v3342_v54, %v3349_v27  ;;  %5375 = vst.msk [vmem:[#allocation2 + $0x40] sm:$0xff] %vm5372_vm14, %v5347_v44 }
 0x20e   : > { %v15308_v43 = vshrl.u32 %v21426_v22, 16  ;;  %v15311_v10 = vshll.u32 %v21426_v22, 16  ;;  %v15292_v46 = vrot.slane %v15290_v9, 7  ;;  %v15316_v59 = vshrl.u32 %v21296_v16, 16 }
 0x20f   : > { %v15301_v20 = vrot.slane %v15299_v42, 7  ;;  %v15321_v36 = vshrl.u32 %v21309_v45, 16  ;;  %v9274_v52 = vcombine.low %v9266_v13, %v9273_v35  ;;  %3444 = vrot.lane.b32.xlu0 %v3350_v56, %s18719_s5  ;;  %v15324_v1 = vshll.u32 %v21309_v45, 16 }
 0x210   : > { %v15310_v60 = vrot.slane %v15308_v43, 7  ;;  %v21446_v27 = vcombine.high %v21438_v15, %v21438_v15  ;;  %v15295_v40 = vor.u32 %v15293_v0, %v15292_v46  ;;  %v15297_v31 = vrot.slane %v15292_v46, 2 }
 0x211   : > { %v21449_v54 = vor.u32 %v15302_v17, %v15301_v20  ;;  %v15306_v16 = vrot.slane %v15301_v20, 2  ;;  %9368 = vrot.lane.b32.xlu1 %v9274_v52, %s18720_s6  ;;  %v18337_v5 = vrot.slane %v15316_v59, 9  ;;  %v21452_v9 = vrot.slane %v15321_v36, 7 }
 0x212   : > { %v15313_v13 = vor.u32 %v15311_v10, %v15310_v60  ;;  %v4343_v42 = vshll.u32 %v21003_v26, 16  ;;  %v15296_v35 = vsel %vm19323_vm4, %v15288_v6, %v15295_v40  ;;  %v4347_v56 = vshrl.u32 %v21003_v26, 16  ;;  %v21468_v59 = vld.sshfl [vmem:[%s18788_s27 + $0x40] sm:$0x33 pattern:$0x76325410] }
 0x213   : > { %v15305_v0 = vsel %vm19323_vm4, %v15297_v31, %v21449_v54  ;;  %v4353_v17 = vshll.u32 %v21020_v33, 16  ;;  %v15326_v10 = vor.u32 %v15324_v1, %v21452_v9  ;;  %v4357_v44 = vshrl.u32 %v21020_v33, 16 }
 0x214   : > { %v21464_v43 = vsel %vm19323_vm4, %v15306_v16, %v15313_v13  ;;  %v15611_v46 = vcombine.low %v15296_v35, %v15305_v0  ;;  %v4345_v20 = vrot.slane %v4343_v42, 7  ;;  %v4349_v36 = vrot.slane %v4347_v56, 6 }
 0x215   : > { %v4355_v6 = vrot.slane %v4353_v17, 7  ;;  %v4363_v52 = vshll.u32 %v21438_v15, 16  ;;  %3888 = vrot.lane.b32.xlu1 %v3794_v24, %s18720_s6  ;;  %v15327_v26 = vsel %vm19323_vm4, %v18337_v5, %v15326_v10  ;;  %v4367_v40 = vshrl.u32 %v21438_v15, 16 }
 0x216   : > { %v15619_v60 = vrot.slane %v15611_v46, %v18814_v19  ;;  %v4346_v1 = vsel %vm18975_vm13, %v20990_v21, %v4345_v20  ;;  %v15612_v31 = vcombine.low %v21464_v43, %v15327_v26  ;;  %v4350_v16 = vor.u32 %v4349_v36, %v4345_v20  ;;  %v25067_v26 = vld [vmem:[#allocation6_spill] sm:$0xff] }
 0x217   : > { %v4359_v13 = vrot.slane %v4357_v44, 6  ;;  %v4365_v33 = vrot.slane %v4363_v52, 7  ;;  %v4369_v42 = vrot.slane %v4367_v40, 6  ;;  %v4373_v35 = vshll.u32 %v21446_v27, 16 }
 0x218   : > { %v21484_v24 = vcombine.high %v21468_v59, %v21468_v59  ;;  %v9709_v5 = vcombine.low %v21346_v39, %v21367_v3  ;;  %v15626_v0 = vrot.slane %v15612_v31, %v18814_v19  ;;  %v4351_v21 = vrot.slane %v4350_v16, 2 }
 0x219   : > { %v4360_v56 = vor.u32 %v4359_v13, %v4355_v6  ;;  %v11448_v17 = vrot.slane %v21172_v38, 7  ;;  %v4370_v10 = vor.u32 %v4369_v42, %v4365_v33  ;;  %v4375_v46 = vrot.slane %v4373_v35, 7  ;;  %v25068_v35 = vld [vmem:[#allocation21_spill] sm:$0xff] }
 0x21a   : > { %v9708_v20 = vcombine.low %v21468_v59, %v21484_v24  ;;  %v9723_v36 = vrot.slane %v9709_v5, %v18814_v19  ;;  %v15627_v44 = vcombine.low %v15619_v60, %v15626_v0  ;;  %v4356_v52 = vsel %vm18975_vm13, %v4351_v21, %v4355_v6  ;;  %v18366_v0 = vld.sshfl [vmem:[%s18788_s27 + $0x30] sm:$0x30 pattern:$0x76325410] }
 0x21b   : > { %v4361_v3 = vrot.slane %v4360_v56, 2  ;;  %v11449_v40 = vsel %vm18803_vm6, %v25067_v26, %v11448_v17  ;;  %v4371_v31 = vrot.slane %v4370_v10, 2  ;;  %v4661_v16 = vcombine.low %v4346_v1, %v4356_v52  ;;  %v21512_v10 = vld.sshfl [vmem:[%s18788_s27 + $0x34] sm:$0x33 pattern:$0x76325410] }
 0x21c   : > { %v9716_v13 = vrot.slane %v9708_v20, %v18814_v19  ;;  %v11450_v42 = vrot.slane %v11448_v17, 2  ;;  %15736 = vrot.lane.b32.xlu0 %v15627_v44, %s18722_s8  ;;  %v11451_v6 = vrot.slane %v21205_v30, 7  ;;  %v10151_v5 = vcombine.low %v25068_v35, %v21172_v38  ;;  %v21517_v52 = vld.sshfl [vmem:[%s18788_s27 + $0x38] sm:$0x33 pattern:$0x76325410] }
 0x21d   : > { %v4366_v60 = vsel %vm18975_vm13, %v4361_v3, %v4365_v33  ;;  %v4376_v21 = vsel %vm18975_vm13, %v4371_v31, %v4375_v46  ;;  %v4669_v1 = vrot.slane %v4661_v16, %v18814_v19  ;;  %v10152_v17 = vcombine.low %v21205_v30, %v21195_v41  ;;  %v21522_v31 = vld.sshfl [vmem:[%s18788_s27 + $0x3c] sm:$0x30 pattern:$0x76325410] }
 0x21e   : > { %v9724_v56 = vcombine.low %v9716_v13, %v9723_v36  ;;  %v4662_v20 = vcombine.low %v4366_v60, %v4376_v21  ;;  %v11452_v33 = vsel %vm18803_vm6, %v11450_v42, %v11451_v6  ;;  %v11453_v44 = vrot.slane %v11451_v6, 2 }
 0x21f   : > { %v11591_v3 = vcombine.low %v11449_v40, %v11452_v33  ;;  %v10159_v26 = vrot.slane %v10151_v5, %v18814_v19  ;;  %v10166_v46 = vrot.slane %v10152_v17, %v18814_v19  ;;  %v15825_v36 = vcombine.high %v18366_v0, %v18366_v0 }
 0x220   : > { %v4676_v16 = vrot.slane %v4662_v20, %v18814_v19  ;;  %9818 = vrot.lane.b32.xlu0 %v9724_v56, %s18721_s7  ;;  %v11455_v41 = vsel %vm18803_vm6, %v11453_v44, %v21325_v11  ;;  %v21531_v13 = vcombine.high %v21512_v10, %v21512_v10  ;;  %v12135_v11 = vshrl.u32 %v21172_v38, 16 }
 0x221   : > { %v11592_v42 = vcombine.low %v11455_v41, %v21352_v57  ;;  %v11599_v60 = vrot.slane %v11591_v3, %v18814_v19  ;;  %v10167_v6 = vcombine.low %v10159_v26, %v10166_v46  ;;  %v16010_v35 = vcombine.low %v15825_v36, %v21512_v10 }
 0x222   : > { %v4677_v5 = vcombine.low %v4669_v1, %v4676_v16  ;;  %v16011_v0 = vcombine.low %v21531_v13, %v21517_v52  ;;  %v12138_v17 = vshll.u32 %v21172_v38, 16  ;;  %v12144_v20 = vshrl.u32 %v21205_v30, 16 }
 0x223   : > { %v11606_v21 = vrot.slane %v11592_v42, %v18814_v19  ;;  %v16018_v56 = vrot.slane %v16010_v35, %v18814_v19  ;;  %v12137_v1 = vrot.slane %v12135_v11, 7  ;;  %v12147_v33 = vshll.u32 %v21205_v30, 16 }
 0x224   : > { %4771 = vrot.lane.b32.xlu1 %v4677_v5, %s18721_s7  ;;  %10261 = vrot.lane.b32.xlu0 %v10167_v6, %s18722_s8  ;;  %v16025_v57 = vrot.slane %v16011_v0, %v18814_v19  ;;  %v5097_v44 = vrot.slane %v21512_v10, 7  ;;  %v12146_v26 = vrot.slane %v12144_v20, 7  ;;  %v5100_v46 = vrot.slane %v21531_v13, 7  ;;  %v25070_v0 = vld [vmem:[#allocation20_spill] sm:$0xff] }
 0x225   : > { %v11607_v3 = vcombine.low %v11599_v60, %v11606_v21  ;;  %v5103_v38 = vrot.slane %v21438_v15, 7  ;;  %v12140_v16 = vor.u32 %v12138_v17, %v12137_v1  ;;  %v12142_v41 = vrot.slane %v12137_v1, 2  ;;  %v18657_v17 = vld.sshfl [vmem:[%s18788_s27 + $0x2c] sm:$0x13 pattern:$0x76325410] }
 0x226   : > { %v21552_v36 = vcombine.low %v16018_v56, %v16025_v57  ;;  %v25069_v42 = vrot.slane %v20993_v50, 2  ;;  %v12149_v30 = vor.u32 %v12147_v33, %v12146_v26  ;;  %v12151_v35 = vrot.slane %v12146_v26, 2  ;;  %v17949_v56 = vld.sshfl [vmem:[%s18788_s27 + $0x30] sm:$0x33 pattern:$0x76325410] }
 0x227   : > { %v5099_v5 = vrot.slane %v5097_v44, 2  ;;  %v5102_v60 = vrot.slane %v5100_v46, 2  ;;  %v25071_v15 = vrot.slane %v25070_v0, 2  ;;  %v5105_v21 = vrot.slane %v5103_v38, 2 }
 0x228   : > { %v5098_v6 = vsel %vm18803_vm6, %v25069_v42, %v5097_v44  ;;  %11701 = vrot.lane.b32.xlu1 %v11607_v3, %s18717_s29  ;;  %16190 = vst.msk [vmem:[#allocation2 + $0x18] sm:$0xff] %vm689_vm5, %v21552_v36  ;;  %v5106_v50 = vrot.slane %v21446_v27, 7  ;;  %v10364_v20 = vcombine.high %v18657_v17, %v18657_v17  ;;  %v12150_v57 = vsel %vm19323_vm4, %v12142_v41, %v12149_v30 }
 0x229   : > { %v12141_v11 = vsel %vm19323_vm4, %v25071_v15, %v12140_v16  ;;  %v12159_v1 = vsel %vm19323_vm4, %v12151_v35, %v21449_v54  ;;  %v5101_v33 = vsel %vm18803_vm6, %v5099_v5, %v5100_v46  ;;  %v5104_v44 = vsel %vm18803_vm6, %v5102_v60, %v5103_v38 }
 0x22a   : > { %v12433_v3 = vcombine.low %v12141_v11, %v12150_v57  ;;  %v12434_v26 = vcombine.low %v12159_v1, %v21464_v43  ;;  %v5107_v27 = vsel %vm18803_vm6, %v5105_v21, %v5106_v50  ;;  %v5240_v16 = vcombine.low %v5098_v6, %v5101_v33  ;;  %v16202_v11 = vld [vmem:[#allocation2 + $0x10] sm:$0xff]  ;;  %v21584_v1 = vpop.permute.xlu0 %11697 }
 0x22b   : > { %v5241_v42 = vcombine.low %v5104_v44, %v5107_v27  ;;  %v10372_v0 = vcombine.high %v17949_v56, %v17949_v56  ;;  %v10577_v41 = vshrl.u32 %v18657_v17, 16  ;;  %v10583_v30 = vshll.u32 %v10364_v20, 16 }
 0x22c   : > { %v12441_v15 = vrot.slane %v12433_v3, %v18814_v19  ;;  %v12448_v54 = vrot.slane %v12434_v26, %v18814_v19  ;;  %v5248_v46 = vrot.slane %v5240_v16, %v18814_v19  ;;  %v10588_v35 = vshrl.u32 %v17949_v56, 16 }
 0x22d   : > { %v5255_v38 = vrot.slane %v5241_v42, %v18814_v19  ;;  %v10579_v5 = vrot.slane %v10577_v41, 6  ;;  %v10585_v60 = vrot.slane %v10583_v30, 7  ;;  %v10591_v43 = vshll.u32 %v17949_v56, 16 }
 0x22e   : > { %v12449_v57 = vcombine.low %v12441_v15, %v12448_v54  ;;  %v10590_v21 = vrot.slane %v10588_v35, 6  ;;  %v10597_v6 = vshll.u32 %v10372_v0, 16  ;;  %v10601_v50 = vshrl.u32 %v10372_v0, 16  ;;  %v21598_v15 = vpop.permute.xlu1 %6621 }
 0x22f   : > { %v16203_v17 = vld [vmem:[#allocation2 + $0x18] sm:$0xff]  ;;  %v5256_v20 = vcombine.low %v5248_v46, %v5255_v38  ;;  %v10580_v33 = vor.u32 %v10579_v5, %v20949_v28  ;;  %v10593_v44 = vrot.slane %v10591_v43, 7  ;;  %v10607_v3 = vshll.u32 %v21512_v10, 16 }
 0x230   : > { %18420 = vmatprep.mubr.msk.bf16.mxu1 %vm689_vm5, %v16203_v17  ;;  %12543 = vrot.lane.b32.xlu1 %v12449_v57, %s18716_s28  ;;  %v10599_v56 = vrot.slane %v10597_v6, 7  ;;  %v10603_v26 = vrot.slane %v10601_v50, 6  ;;  %v10611_v27 = vshrl.u32 %v21512_v10, 16  ;;  %v10617_v16 = vshll.u32 %v21531_v13, 16  ;;  %v21615_v17 = vpop.permute.xlu0 %12539 }
 0x231   : > { %16623 = vmatmul.mubr.bf16.vlgmr.msra.gmra.mrb[0].mxu1 %v16202_v11  ;;  %5350 = vrot.lane.b32.xlu0 %v5256_v20, %s18722_s8  ;;  %v10581_v42 = vrot.slane %v10580_v33, 2  ;;  %v10594_v0 = vor.u32 %v10593_v44, %v10590_v21  ;;  %v10609_v28 = vrot.slane %v10607_v3, 7  ;;  %v12884_v41 = vcombine.low %v21409_v8, %v21426_v22  ;;  %v17535_v30 = vld.sshfl [vmem:[%s18788_s27 + $0x20] sm:$0x33 pattern:$0x76325410] }
 0x232   : > { %v10604_v54 = vor.u32 %v10603_v26, %v10599_v56  ;;  %v10613_v46 = vrot.slane %v10611_v27, 6  ;;  %v21604_v35 = vrot.slane %v10617_v16, 7  ;;  %v6356_v38 = vcombine.high %v21522_v31, %v21522_v31  ;;  %v17536_v5 = vld.sshfl [vmem:[%s18788_s27 + $0x24] sm:$0x32 pattern:$0x76325410] }
 0x233   : > { %v10586_v43 = vsel %vm18975_vm13, %v10581_v42, %v10585_v60  ;;  %v10595_v11 = vrot.slane %v10594_v0, 2  ;;  %v12898_v8 = vrot.slane %v12884_v41, %v18814_v19  ;;  %v6531_v22 = vcombine.low %v21484_v24, %v21346_v39 }
 0x234   : > { %v10605_v57 = vrot.slane %v10604_v54, 2  ;;  %v10614_v21 = vor.u32 %v10613_v46, %v10609_v28  ;;  %v6530_v6 = vcombine.low %v6356_v38, %v21468_v59  ;;  %v5478_v50 = vcombine.high %v17535_v30, %v17535_v30 }
 0x235   : > { %v10600_v20 = vsel %vm18975_vm13, %v10595_v11, %v10599_v56  ;;  %v12899_v33 = vcombine.low %v21235_v58, %v12898_v8  ;;  %v6545_v60 = vrot.slane %v6531_v22, %v18814_v19  ;;  %v5486_v44 = vcombine.high %v17536_v5, %v17536_v5  ;;  %v21626_v58 = vpop.permute.xlu1 %7064 }
 0x236   : > { %v10610_v26 = vsel %vm18975_vm13, %v10605_v57, %v10609_v28  ;;  %v10615_v39 = vrot.slane %v10614_v21, 2  ;;  %v10982_v24 = vcombine.low %v10586_v43, %v10600_v20  ;;  %v6538_v42 = vrot.slane %v6530_v6, %v18814_v19  ;;  %v21633_v43 = vld.sshfl [vmem:[%s18788_s27 + $0x58] sm:$0x33 pattern:$0x76325410] }
 0x237   : > { %12993 = vrot.lane.b32.xlu1 %v12899_v33, %s18718_s30  ;;  %v5703_v59 = vrot.slane %v21135_v48, 2  ;;  %v5705_v0 = vshrl.u32 %v17535_v30, 16  ;;  %v5708_v41 = vshll.u32 %v17535_v30, 16  ;;  %v5714_v56 = vshrl.u32 %v5478_v50, 16 }
 0x238   : > { %v10620_v54 = vsel %vm18975_vm13, %v10615_v39, %v21604_v35  ;;  %v10990_v28 = vrot.slane %v10982_v24, %v18814_v19  ;;  %v6546_v46 = vcombine.low %v6538_v42, %v6545_v60  ;;  %v5717_v38 = vshll.u32 %v5478_v50, 16  ;;  %v21639_v20 = vld.sshfl [vmem:[%s18788_s27 + $0x48] sm:$0x33 pattern:$0x76325410]  ;;  %v21644_v50 = vpop.permute.xlu0 %12989 }
 0x239   : > { %v10983_v11 = vcombine.low %v10610_v26, %v10620_v54  ;;  %v5707_v48 = vrot.slane %v5705_v0, 7  ;;  %v5716_v8 = vrot.slane %v5714_v56, 7  ;;  %v5722_v30 = vshrl.u32 %v17536_v5, 16 }
 0x23a   : > { %6625 = vrot.lane.b32.xlu0 %v6546_v46, %s18717_s29  ;;  %v5727_v22 = vshrl.u32 %v5486_v44, 16  ;;  %v5730_v57 = vshll.u32 %v5486_v44, 16  ;;  %v5736_v21 = vshrl.u32 %v21379_v49, 16  ;;  %v5739_v6 = vshll.u32 %v21379_v49, 16 }
 0x23b   : > { %v21642_v33 = vld.sshfl [vmem:[%s18788_s27 + $0x4c] sm:$0x33 pattern:$0x76325410]  ;;  %v10997_v60 = vrot.slane %v10983_v11, %v18814_v19  ;;  %v5710_v26 = vor.u32 %v5708_v41, %v5707_v48  ;;  %v5712_v39 = vrot.slane %v5707_v48, 2  ;;  %v5719_v24 = vor.u32 %v5717_v38, %v5716_v8  ;;  %v21660_v38 = vpop.permute.xlu1 %7946 }
 0x23c   : > { %v18169_v5 = vld.sshfl [vmem:[%s18788_s27 + $0x5c] sm:$0x3 pattern:$0x76325410]  ;;  %v17556_v42 = vrot.slane %v5722_v30, 9  ;;  %v5729_v0 = vrot.slane %v5727_v22, 7  ;;  %v21652_v49 = vcombine.high %v21633_v43, %v21633_v43  ;;  %v13326_v41 = vcombine.low %v21217_v7, %v21633_v43 }
 0x23d   : > { %v21648_v56 = vrot.slane %v5736_v21, 7  ;;  %v10998_v44 = vcombine.low %v10990_v28, %v10997_v60  ;;  %v5711_v54 = vsel %vm19323_vm4, %v5703_v59, %v5710_v26  ;;  %v5720_v46 = vsel %vm19323_vm4, %v5712_v39, %v5719_v24  ;;  %v21675_v21 = vld.sshfl [vmem:[%s18788_s27 + $0x5c] sm:$0x13 pattern:$0x76325410]  ;;  %v21688_v39 = vpop.permute.xlu0 %13432 }
 0x23e   : > { %v5732_v11 = vor.u32 %v5730_v57, %v5729_v0  ;;  %v5734_v48 = vrot.slane %v5729_v0, 2  ;;  %v6049_v30 = vcombine.low %v5711_v54, %v5720_v46  ;;  %v13327_v28 = vcombine.low %v21652_v49, %v18169_v5 }
 0x23f   : > { %v5741_v8 = vor.u32 %v5739_v6, %v21648_v56  ;;  %11146 = vst.msk [vmem:[#allocation2 + $0x30] sm:$0xff] %vm689_vm5, %v10998_v44  ;;  %v13334_v22 = vrot.slane %v13326_v41, %v18814_v19  ;;  %v21668_v59 = vcombine.high %v21639_v20, %v21639_v20  ;;  %v21672_v7 = vcombine.high %v21642_v33, %v21642_v33 }
 0x240   : > { %11724 = vst.msk [vmem:[#allocation2 + $0x30] sm:$0xff] %vm1579_vm7, %v21108_v32  ;;  %v5733_v57 = vsel %vm19323_vm4, %v17556_v42, %v5732_v11  ;;  %v6057_v60 = vrot.slane %v6049_v30, %v18814_v19  ;;  %v21686_v26 = vcombine.high %v21675_v21, %v21675_v21  ;;  %v13341_v32 = vrot.slane %v13327_v28, %v18814_v19 }
 0x241   : > { %v5742_v6 = vsel %vm19323_vm4, %v5734_v48, %v5741_v8  ;;  %12566 = vst.msk [vmem:[#allocation2 + $0x30] sm:$0xff] %vm2165_vm8, %v21133_v14  ;;  %v6973_v5 = vcombine.low %v21639_v20, %v21668_v59  ;;  %v6974_v42 = vcombine.low %v21642_v33, %v21672_v7  ;;  %v13890_v0 = vshll.u32 %v21633_v43, 16 }
 0x242   : > { %v6050_v24 = vcombine.low %v5733_v57, %v5742_v6  ;;  %13016 = vst.msk [vmem:[#allocation2 + $0x30] sm:$0xff] %vm3015_vm9, %v21176_v37  ;;  %v13894_v44 = vshrl.u32 %v21633_v43, 16  ;;  %v13900_v54 = vshll.u32 %v21652_v49, 16  ;;  %v13904_v46 = vshrl.u32 %v21652_v49, 16  ;;  %v21710_v37 = vpop.permute.xlu1 %8524 }
 0x243   : > { %v13342_v41 = vcombine.low %v13334_v22, %v13341_v32  ;;  %v6981_v11 = vrot.slane %v6973_v5, %v18814_v19  ;;  %v21706_v48 = vrot.slane %v6974_v42, %v18814_v19  ;;  %13459 = vst.msk [vmem:[#allocation2 + $0x30] sm:$0xff] %vm3466_vm10, %v21230_v63  ;;  %v13892_v8 = vrot.slane %v13890_v0, 7 }
 0x244   : > { %v6064_v14 = vrot.slane %v6050_v24, %v18814_v19  ;;  %v13896_v30 = vrot.slane %v13894_v44, 6  ;;  %v13902_v28 = vrot.slane %v13900_v54, 7  ;;  %v13906_v22 = vrot.slane %v13904_v46, 6  ;;  %14341 = vst.msk [vmem:[#allocation2 + $0x30] sm:$0xff] %vm3910_vm11, %v21273_v23 }
 0x245   : > { %13436 = vrot.lane.b32.xlu1 %v13342_v41, %s18719_s5  ;;  %v6989_v63 = vcombine.low %v6981_v11, %v21706_v48  ;;  %v13910_v6 = vshll.u32 %v21675_v21, 16  ;;  %v13914_v24 = vshrl.u32 %v21675_v21, 16  ;;  %14919 = vst.msk [vmem:[#allocation2 + $0x30] sm:$0xff] %vm4793_vm12, %v21298_v18  ;;  %v13893_v32 = vsel %vm18975_vm13, %v21331_v4, %v13892_v8 }
 0x246   : > { %v6065_v57 = vcombine.low %v6057_v60, %v6064_v14  ;;  %v13897_v5 = vor.u32 %v13896_v30, %v13892_v8  ;;  %v13907_v42 = vor.u32 %v13906_v22, %v13902_v28  ;;  %v13920_v23 = vshll.u32 %v21686_v26, 16  ;;  %15761 = vst.msk [vmem:[#allocation2 + $0x30] sm:$0xff] %vm5372_vm14, %v21348_v55  ;;  %v21734_v60 = vpop.permute.xlu0 %14314  ;;  %v3443_v11 = vpop.permute.xlu1 %3442 }
 0x247   : > { %7068 = vrot.lane.b32.xlu0 %v6989_v63, %s18716_s28  ;;  %v13912_v14 = vrot.slane %v13910_v6, 7  ;;  %v13916_v41 = vrot.slane %v13914_v24, 6  ;;  %v7555_v18 = vshrl.u32 %v21639_v20, 16  ;;  %v7558_v4 = vshll.u32 %v21639_v20, 16  ;;  %3470 = vst.msk [vmem:[#allocation2 + $0x60] sm:$0xff] %vm3466_vm10, %v3443_v11 }
 0x248   : > { %6197 = vst.msk [vmem:[#allocation2 + $0x48] sm:$0xff] %vm689_vm5, %v6065_v57  ;;  %v13898_v8 = vrot.slane %v13897_v5, 2  ;;  %v13908_v30 = vrot.slane %v13907_v42, 2  ;;  %v13922_v55 = vrot.slane %v13920_v23, 7  ;;  %v7564_v22 = vshll.u32 %v21668_v59, 16 }
 0x249   : > { %6647 = vst.msk [vmem:[#allocation2 + $0x48] sm:$0xff] %vm1579_vm7, %v21119_v61  ;;  %v13917_v57 = vor.u32 %v13916_v41, %v13912_v14  ;;  %v7557_v63 = vrot.slane %v7555_v18, 6  ;;  %v7560_v6 = vrot.slane %v7558_v4, 7  ;;  %v7568_v20 = vshrl.u32 %v21668_v59, 16 }
 0x24a   : > { %7090 = vst.msk [vmem:[#allocation2 + $0x48] sm:$0xff] %vm2165_vm8, %v21143_v34  ;;  %v13903_v24 = vsel %vm18975_vm13, %v13898_v8, %v13902_v28  ;;  %v13913_v61 = vsel %vm18975_vm13, %v13908_v30, %v13912_v14  ;;  %v21752_v5 = vld.sshfl [vmem:[%s18788_s27 + $0x50] sm:$0x13 pattern:$0x76325410]  ;;  %v7566_v42 = vrot.slane %v7564_v22, 7 }
 0x24b   : > { %v24912_v23 = vshll.u32 %v21642_v33, 16  ;;  %7972 = vst.msk [vmem:[#allocation2 + $0x48] sm:$0xff] %vm3015_vm9, %v21200_v25  ;;  %v13918_v34 = vrot.slane %v13917_v57, 2  ;;  %v14208_v41 = vcombine.low %v13893_v32, %v13903_v24  ;;  %v7561_v18 = vor.u32 %v7560_v6, %v7557_v63  ;;  %v21769_v25 = vpop.permute.xlu0 %14892 }
 0x24c   : > { %v7570_v4 = vrot.slane %v7568_v20, 6  ;;  %v21758_v11 = vld.sshfl [vmem:[%s18788_s27 + $0x48] sm:$0x32 pattern:$0x76325410]  ;;  %8550 = vst.msk [vmem:[#allocation2 + $0x48] sm:$0xff] %vm3466_vm10, %v21244_v51 }
 0x24d   : > { %v7576_v59 = vrot.slane %v24912_v23, 7  ;;  %v7578_v28 = vshrl.u32 %v21642_v33, 16  ;;  %v24910_v14 = vshll.u32 %v21672_v7, 16  ;;  %v24911_v8 = vshrl.u32 %v21672_v7, 16  ;;  %9392 = vst.msk [vmem:[#allocation2 + $0x48] sm:$0xff] %vm3910_vm11, %v21320_v53 }
 0x24e   : > { %v13923_v32 = vsel %vm18975_vm13, %v13918_v34, %v13922_v55  ;;  %v14216_v30 = vrot.slane %v14208_v41, %v18814_v19  ;;  %v7562_v51 = vrot.slane %v7561_v18, 2  ;;  %v7571_v22 = vor.u32 %v7570_v4, %v7566_v42  ;;  %9842 = vst.msk [vmem:[#allocation2 + $0x48] sm:$0xff] %vm4793_vm12, %v21381_v47 }
 0x24f   : > { %v14209_v57 = vcombine.low %v13913_v61, %v13923_v32  ;;  %v7580_v63 = vrot.slane %v7578_v28, 6  ;;  %v7586_v6 = vrot.slane %v24910_v14, 7  ;;  %v7590_v53 = vrot.slane %v24911_v8, 6  ;;  %10285 = vst.msk [vmem:[#allocation2 + $0x48] sm:$0xff] %vm5372_vm14, %v21411_v62  ;;  %v21800_v23 = vpop.permute.xlu0 %9366 }
 0x250   : > { %v7567_v55 = vsel %vm18975_vm13, %v7562_v51, %v7566_v42  ;;  %v7572_v20 = vrot.slane %v7571_v22, 2  ;;  %v7594_v47 = vshll.u32 %v21752_v5, 16  ;;  %v21789_v24 = vcombine.high %v21758_v11, %v21758_v11  ;;  %v17306_v8 = vld.sshfl [vmem:[%s18788_s27 + $0x30] sm:$0x32 pattern:$0x76325410] }
 0x251   : > { %v14223_v61 = vrot.slane %v14209_v57, %v18814_v19  ;;  %v7581_v34 = vor.u32 %v7580_v63, %v7576_v59  ;;  %v7591_v41 = vor.u32 %v7590_v53, %v7586_v6  ;;  %v17762_v18 = vrot.slane %v21758_v11, 9 }
 0x252   : > { %v7577_v62 = vsel %vm18975_vm13, %v7572_v20, %v7576_v59  ;;  %v21795_v4 = vrot.slane %v7594_v47, 7  ;;  %v8286_v42 = vrot.slane %v21789_v24, 7  ;;  %v8289_v32 = vrot.slane %v21642_v33, 7 }
 0x253   : > { %v14224_v51 = vcombine.low %v14216_v30, %v14223_v61  ;;  %v7582_v22 = vrot.slane %v7581_v34, 2  ;;  %v7592_v40 = vrot.slane %v7591_v41, 2  ;;  %v7855_v14 = vcombine.low %v7567_v55, %v7577_v62  ;;  %v16208_v61 = vld [vmem:[#allocation2 + $0x40] sm:$0xff] }
 0x254   : > { %v8287_v57 = vsel %vm18803_vm6, %v17762_v18, %v8286_v42  ;;  %v8288_v63 = vrot.slane %v8286_v42, 2  ;;  %v8291_v53 = vrot.slane %v8289_v32, 2  ;;  %v8292_v59 = vrot.slane %v21672_v7, 7 }
 0x255   : > { %14318 = vrot.lane.b32.xlu1 %v14224_v51, %s18720_s6  ;;  %v7587_v20 = vsel %vm18975_vm13, %v7582_v22, %v7586_v6  ;;  %v7597_v30 = vsel %vm18975_vm13, %v7592_v40, %v21795_v4  ;;  %v7863_v55 = vrot.slane %v7855_v14, %v18814_v19  ;;  %v24914_v47 = vrot.slane %v21752_v5, 7 }
 0x256   : > { %v7856_v34 = vcombine.low %v7587_v20, %v7597_v30  ;;  %v8290_v41 = vsel %vm18803_vm6, %v8288_v63, %v8289_v32  ;;  %v8293_v18 = vsel %vm18803_vm6, %v8291_v53, %v8292_v59  ;;  %v8294_v62 = vrot.slane %v8292_v59, 2  ;;  %v16209_v42 = vld [vmem:[#allocation2 + $0x48] sm:$0xff]  ;;  %v3887_v30 = vpop.permute.xlu0 %3886 }
 0x257   : > { %v8433_v51 = vcombine.low %v8287_v57, %v8290_v41  ;;  %v2327_v6 = vcombine.high %v17306_v8, %v17306_v8  ;;  %v2620_v22 = vshrl.u32 %v17306_v8, 16  ;;  %v2636_v40 = vrot.slane %v10611_v27, 7  ;;  %16525 = vmatprep.mubr.bf16.mxu0 %v16209_v42  ;;  %v21826_v8 = vpop.permute.xlu1 %15734  ;;  %3914 = vst.msk [vmem:[#allocation2 + $0x60] sm:$0xff] %vm3910_vm11, %v3887_v30 }
 0x258   : > { %v7870_v14 = vrot.slane %v7856_v34, %v18814_v19  ;;  %v8296_v20 = vsel %vm18803_vm6, %v8294_v62, %v24914_v47  ;;  %v24915_v32 = vshrl.u32 %v21531_v13, 16  ;;  %16526 = vmatmul.mubr.bf16.gmra.mrb[8].mxu0 %v16208_v61  ;;  %v25073_v10 = vrot.slane %v21309_v45, 7 }
 0x259   : > { %v8434_v63 = vcombine.low %v8293_v18, %v8296_v20  ;;  %v8441_v53 = vrot.slane %v8433_v51, %v18814_v19  ;;  %v17322_v57 = vrot.slane %v2620_v22, 9  ;;  %v2625_v59 = vshrl.u32 %v2327_v6, 16 }
 0x25a   : > { %v7871_v27 = vcombine.low %v7863_v55, %v7870_v14  ;;  %v2628_v41 = vshll.u32 %v2327_v6, 16  ;;  %v2639_v34 = vor.u32 %v10607_v3, %v2636_v40  ;;  %v2641_v42 = vrot.slane %v2636_v40, 2 }
 0x25b   : > { %v8448_v62 = vrot.slane %v8434_v63, %v18814_v19  ;;  %v21832_v61 = vrot.slane %v2625_v59, 7  ;;  %v2645_v18 = vrot.slane %v24915_v32, 7  ;;  %v2652_v51 = vshrl.u32 %v21517_v52, 16 }
 0x25c   : > { %7950 = vrot.lane.b32.xlu0 %v7871_v27, %s18718_s30  ;;  %v2655_v55 = vshll.u32 %v21517_v52, 16  ;;  %v14642_v3 = vrot.slane %v25073_v10, 2  ;;  %v21842_v6 = vrot.slane %v21633_v43, 7  ;;  %v14646_v22 = vrot.slane %v21652_v49, 7 }
 0x25d   : > { %25072 = vst [vmem:[#allocation14_spill] sm:$0xff] %v21832_v61  ;;  %v8449_v40 = vcombine.low %v8441_v53, %v8448_v62  ;;  %v2630_v14 = vor.u32 %v2628_v41, %v21832_v61  ;;  %v24913_v20 = vrot.slane %v21832_v61, 2  ;;  %v2648_v63 = vor.u32 %v10617_v16, %v2645_v18  ;;  %v21850_v59 = vld.sshfl [vmem:[%s18788_s27 + $0x5c] sm:$0x33 pattern:$0x76325410] }
 0x25e   : > { %v2650_v30 = vrot.slane %v2645_v18, 2  ;;  %v21852_v27 = vrot.slane %v2652_v51, 7  ;;  %v14644_v45 = vsel %vm18803_vm6, %v14642_v3, %v21842_v6  ;;  %v14645_v10 = vrot.slane %v21842_v6, 2  ;;  %v21869_v18 = vpop.permute.xlu1 %9816 }
 0x25f   : > { %8528 = vrot.lane.b32.xlu1 %v8449_v40, %s18719_s5  ;;  %v21861_v53 = vsel %vm19323_vm4, %v17322_v57, %v2630_v14  ;;  %v2640_v16 = vsel %vm19323_vm4, %v24913_v20, %v2639_v34  ;;  %v2649_v41 = vsel %vm19323_vm4, %v2641_v42, %v2648_v63  ;;  %v14648_v62 = vrot.slane %v14646_v22, 2 }
 0x260   : > { %v2657_v51 = vor.u32 %v2655_v55, %v21852_v27  ;;  %v2900_v3 = vcombine.low %v21861_v53, %v2640_v16  ;;  %v21875_v40 = vsel %vm18803_vm6, %v14645_v10, %v14646_v22  ;;  %v14649_v57 = vrot.slane %v21675_v21, 7 }
 0x261   : > { %v14652_v14 = vrot.slane %v21686_v26, 7  ;;  %v14786_v34 = vcombine.low %v14644_v45, %v21875_v40  ;;  %v15071_v42 = vcombine.high %v21850_v59, %v21850_v59  ;;  %v15328_v63 = vrot.slane %v21452_v9, 2 }
 0x262   : > { %v2658_v55 = vsel %vm19323_vm4, %v2650_v30, %v2657_v51  ;;  %v2908_v16 = vrot.slane %v2900_v3, %v18814_v19  ;;  %v21888_v22 = vsel %vm18803_vm6, %v14648_v62, %v14649_v57  ;;  %v21890_v10 = vrot.slane %v14649_v57, 2  ;;  %v21908_v57 = vpop.permute.xlu1 %10259 }
 0x263   : > { %v2901_v21 = vcombine.low %v2649_v41, %v2658_v55  ;;  %3446 = vrot.lane.b32.xlu1 %v21552_v36, %s18719_s5  ;;  %v14794_v26 = vrot.slane %v14786_v34, %v18814_v19  ;;  %v15332_v9 = vrot.slane %v13894_v44, 7  ;;  %v15348_v45 = vshrl.u32 %v21850_v59, 16 }
 0x264   : > { %25074 = vst [vmem:[#allocation15_spill] sm:$0xff] %v21890_v10  ;;  %v14653_v30 = vsel %vm18803_vm6, %v21890_v10, %v14652_v14  ;;  %v15351_v62 = vshll.u32 %v21850_v59, 16  ;;  %v15341_v44 = vrot.slane %v13904_v46, 7  ;;  %v15357_v34 = vshrl.u32 %v15071_v42, 16 }
 0x265   : > { %v2915_v51 = vrot.slane %v2901_v21, %v18814_v19  ;;  %v14787_v41 = vcombine.low %v21888_v22, %v14653_v30  ;;  %v21906_v36 = vor.u32 %v15332_v9, %v13890_v0  ;;  %v15337_v3 = vrot.slane %v15332_v9, 2 }
 0x266   : > { %v21912_v14 = vrot.slane %v15348_v45, 7  ;;  %v15360_v55 = vshll.u32 %v15071_v42, 16  ;;  %v8995_v0 = vshrl.u32 %v21758_v11, 16  ;;  %v15344_v9 = vor.u32 %v15341_v44, %v13900_v54 }
 0x267   : > { %v2916_v20 = vcombine.low %v2908_v16, %v2915_v51  ;;  %v14801_v21 = vrot.slane %v14787_v41, %v18814_v19  ;;  %v15336_v30 = vsel %vm19323_vm4, %v15328_v63, %v21906_v36  ;;  %v15346_v47 = vrot.slane %v15341_v44, 2  ;;  %v21924_v45 = vld.sshfl [vmem:[%s18788_s27 + $0x50] sm:$0x33 pattern:$0x76325410]  ;;  %v4770_v44 = vpop.permute.xlu0 %4769 }
 0x268   : > { %25075 = vst [vmem:[#allocation17_spill] sm:$0xff] %v21912_v14  ;;  %v15353_v32 = vor.u32 %v15351_v62, %v21912_v14  ;;  %v24916_v46 = vrot.slane %v21912_v14, 2  ;;  %25076 = vst [vmem:[#allocation23_spill] sm:$0xff] %v21924_v45  ;;  %v15359_v16 = vrot.slane %v15357_v34, 7  ;;  %v17818_v51 = vrot.slane %v8995_v0, 9 }
 0x269   : > { %2995 = vrot.lane.b32.xlu0 %v2916_v20, %s18718_s30  ;;  %v14802_v42 = vcombine.low %v14794_v26, %v14801_v21  ;;  %v9000_v63 = vshrl.u32 %v21789_v24, 16  ;;  %v21930_v11 = vsel %vm19323_vm4, %v15337_v3, %v15344_v9  ;;  %v9003_v62 = vshll.u32 %v21789_v24, 16  ;;  %v21941_v21 = vld.sshfl [vmem:[%s18788_s27 + $0x48] sm:$0x30 pattern:$0x76325410]  ;;  %v5349_v3 = vpop.permute.xlu1 %5348 }
 0x26a   : > { %v21934_v54 = vsel %vm19323_vm4, %v15346_v47, %v15353_v32  ;;  %v9011_v41 = vrot.slane %v7578_v28, 7  ;;  %v15362_v20 = vor.u32 %v15360_v55, %v15359_v16  ;;  %v15628_v26 = vcombine.low %v15336_v30, %v21930_v11  ;;  %4797 = vst.msk [vmem:[#allocation2 + $0x60] sm:$0xff] %vm4793_vm12, %v4770_v44  ;;  %v17390_v16 = vld.sshfl [vmem:[%s18788_s27 + $0x3c] sm:$0x33 pattern:$0x76325410] }
 0x26b   : > { %v9002_v34 = vrot.slane %v9000_v63, 7  ;;  %v25077_v0 = vshll.u32 %v21642_v33, 16  ;;  %v9027_v24 = vshrl.u32 %v21924_v45, 16  ;;  %5376 = vst.msk [vmem:[#allocation2 + $0x60] sm:$0xff] %vm5372_vm14, %v5349_v3 }
 0x26c   : > { %v9016_v32 = vrot.slane %v9011_v41, 2  ;;  %v15363_v28 = vsel %vm19323_vm4, %v24916_v46, %v15362_v20  ;;  %v15636_v55 = vrot.slane %v15628_v26, %v18814_v19  ;;  %v9726_v26 = vcombine.low %v21672_v7, %v21924_v45  ;;  %v21979_v14 = vld.sshfl [vmem:[%s18788_s27 + $0x54] sm:$0x33 pattern:$0x76325410] }
 0x26d   : > { %v9014_v47 = vor.u32 %v9011_v41, %v25077_v0  ;;  %14896 = vrot.lane.b32.xlu0 %v14802_v42, %s18721_s7  ;;  %v9005_v30 = vor.u32 %v9003_v62, %v9002_v34  ;;  %v9007_v9 = vrot.slane %v9002_v34, 2  ;;  %v15629_v63 = vcombine.low %v21934_v54, %v15363_v28  ;;  %v21970_v34 = vld.sshfl [vmem:[%s18788_s27 + $0x40] sm:$0x33 pattern:$0x76325410] }
 0x26e   : > { %v25078_v41 = vshrl.u32 %v21672_v7, 16  ;;  %v21958_v0 = vrot.slane %v9027_v24, 7  ;;  %v9030_v42 = vshll.u32 %v21924_v45, 16  ;;  %v9551_v62 = vcombine.high %v21941_v21, %v21941_v21 }
 0x26f   : > { %v9006_v3 = vsel %vm19323_vm4, %v17818_v51, %v9005_v30  ;;  %v9015_v20 = vsel %vm19323_vm4, %v9007_v9, %v9014_v47  ;;  %v15643_v28 = vrot.slane %v15629_v63, %v18814_v19  ;;  %v25080_v24 = vshll.u32 %v21672_v7, 16 }
 0x270   : > { %v9020_v44 = vrot.slane %v25078_v41, 7  ;;  %25079 = vst [vmem:[#allocation19_spill] sm:$0xff] %v21958_v0  ;;  %v9032_v61 = vor.u32 %v9030_v42, %v21958_v0  ;;  %v9275_v51 = vcombine.low %v9006_v3, %v9015_v20  ;;  %v9725_v30 = vcombine.low %v9551_v62, %v21642_v33 }
 0x271   : > { %v9740_v47 = vrot.slane %v9726_v26, %v18814_v19  ;;  %v3625_v9 = vcombine.high %v17390_v16, %v17390_v16  ;;  %v15644_v10 = vcombine.low %v15636_v55, %v15643_v28  ;;  %v21987_v7 = vcombine.high %v21970_v34, %v21970_v34 }
 0x272   : > { %v9023_v41 = vor.u32 %v9020_v44, %v25080_v24  ;;  %v9025_v46 = vrot.slane %v9020_v44, 2  ;;  %v9283_v33 = vrot.slane %v9275_v51, %v18814_v19  ;;  %v9733_v42 = vrot.slane %v9725_v30, %v18814_v19 }
 0x273   : > { %25081 = vst [vmem:[#allocation16_spill] sm:$0xff] %v21987_v7  ;;  %v3795_v3 = vcombine.low %v17390_v16, %v3625_v9  ;;  %15738 = vrot.lane.b32.xlu1 %v15644_v10, %s18722_s8  ;;  %v3796_v55 = vcombine.low %v21970_v34, %v21987_v7  ;;  %v4381_v26 = vshll.u32 %v17390_v16, 16  ;;  %v4387_v30 = vshll.u32 %v3625_v9, 16 }
 0x274   : > { %v9024_v45 = vsel %vm19323_vm4, %v9016_v32, %v9023_v41  ;;  %v9033_v63 = vsel %vm19323_vm4, %v9025_v46, %v9032_v61  ;;  %v21996_v32 = vcombine.high %v21979_v14, %v21979_v14  ;;  %v10169_v61 = vcombine.low %v21633_v43, %v21652_v49  ;;  %v22009_v41 = vld.sshfl [vmem:[%s18788_s27 + $0x44] sm:$0x13 pattern:$0x76325410] }
 0x275   : > { %v9276_v44 = vcombine.low %v9024_v45, %v9033_v63  ;;  %v4378_v46 = vshrl.u32 %v17390_v16, 16  ;;  %v9741_v20 = vcombine.low %v9733_v42, %v9740_v47  ;;  %v3803_v62 = vrot.slane %v3795_v3, %v18814_v19  ;;  %v22017_v3 = vld.sshfl [vmem:[%s18788_s27 + $0x3c] sm:$0x32 pattern:$0x76325410] }
 0x276   : > { %v22003_v10 = vrot.slane %v3796_v55, %v18814_v19  ;;  %v10168_v28 = vcombine.low %v21979_v14, %v21996_v32  ;;  %v10183_v24 = vrot.slane %v10169_v61, %v18814_v19  ;;  %v4383_v49 = vrot.slane %v4381_v26, 7 }
 0x277   : > { %v9290_v45 = vrot.slane %v9276_v44, %v18814_v19  ;;  %v4380_v51 = vrot.slane %v4378_v46, 6  ;;  %v4391_v63 = vshrl.u32 %v3625_v9, 16  ;;  %9820 = vrot.lane.b32.xlu1 %v9741_v20, %s18721_s7  ;;  %v24923_v44 = vshll.u32 %v21970_v34, 16 }
 0x278   : > { %25082 = vst [vmem:[#allocation18_spill] sm:$0xff] %v22003_v10  ;;  %v3811_v47 = vcombine.low %v3803_v62, %v22003_v10  ;;  %v10176_v16 = vrot.slane %v10168_v28, %v18814_v19  ;;  %v24924_v42 = vshrl.u32 %v21970_v34, 16  ;;  %v4389_v61 = vrot.slane %v4387_v30, 7 }
 0x279   : > { %v9291_v43 = vcombine.low %v9283_v33, %v9290_v45  ;;  %v4384_v55 = vor.u32 %v4383_v49, %v4380_v51  ;;  %v4393_v33 = vrot.slane %v4391_v63, 6  ;;  %v24921_v46 = vshll.u32 %v21987_v7, 16 }
 0x27a   : > { %v10184_v9 = vcombine.low %v10176_v16, %v10183_v24  ;;  %v22023_v45 = vrot.slane %v24923_v44, 7  ;;  %v4403_v20 = vrot.slane %v24924_v42, 6  ;;  %v24922_v62 = vshrl.u32 %v21987_v7, 16 }
 0x27b   : > { %9370 = vrot.lane.b32.xlu0 %v9291_v43, %s18720_s6  ;;  %v4385_v26 = vrot.slane %v4384_v55, 2  ;;  %v4394_v28 = vor.u32 %v4393_v33, %v4389_v61  ;;  %v4409_v43 = vrot.slane %v24921_v46, 7  ;;  %v4417_v51 = vshll.u32 %v22009_v41, 16 }
 0x27c   : > { %25083 = vst [vmem:[#allocation22_spill] sm:$0xff] %v22023_v45  ;;  %10263 = vrot.lane.b32.xlu1 %v10184_v9, %s18722_s8  ;;  %v4404_v24 = vor.u32 %v4403_v20, %v22023_v45  ;;  %v4413_v49 = vrot.slane %v24922_v62, 6  ;;  %v25084_v30 = vcombine.high %v21517_v52, %v21522_v31  ;;  %v22041_v16 = vcombine.high %v22017_v3, %v22017_v3  ;;  %v22052_v31 = vld.sshfl [vmem:[%s18788_s27 + $0x54] sm:$0x32 pattern:$0x76325410] }
 0x27d   : > { %v4390_v55 = vsel %vm18975_vm13, %v4385_v26, %v4389_v61  ;;  %v4395_v33 = vrot.slane %v4394_v28, 2  ;;  %v22046_v9 = vrot.slane %v4417_v51, 7  ;;  %v17502_v20 = vrot.slane %v22017_v3, 9 }
 0x27e   : > { %v16035_v63 = vrot.slane %v25084_v30, %v18814_v19  ;;  %v4405_v46 = vrot.slane %v4404_v24, 2  ;;  %v4414_v62 = vor.u32 %v4413_v49, %v4409_v43  ;;  %v5110_v52 = vrot.slane %v22041_v16, 7 }
 0x27f   : > { %3890 = vrot.lane.b32.xlu0 %v3811_v47, %s18720_s6  ;;  %25085 = vst [vmem:[#allocation12_spill] sm:$0xff] %v22046_v9  ;;  %v4400_v47 = vsel %vm18975_vm13, %v4395_v33, %v22023_v45  ;;  %v5113_v30 = vrot.slane %v21970_v34, 7  ;;  %v5116_v61 = vrot.slane %v21987_v7, 7  ;;  %v11306_v45 = vcombine.high %v22052_v31, %v22052_v31  ;;  %v16206_v7 = vld [vmem:[#allocation2 + $0x30] sm:$0xff] }
 0x280   : > { %v16043_v44 = vcombine.low %v16035_v63, %v22003_v10  ;;  %v4410_v28 = vsel %vm18975_vm13, %v4405_v46, %v4409_v43  ;;  %v4415_v51 = vrot.slane %v4414_v62, 2  ;;  %v4678_v24 = vcombine.low %v4390_v55, %v4400_v47 }
 0x281   : > { %v5111_v49 = vsel %vm18803_vm6, %v17502_v20, %v5110_v52  ;;  %v5112_v63 = vrot.slane %v5110_v52, 2  ;;  %v5115_v42 = vrot.slane %v5113_v30, 2  ;;  %v5118_v33 = vrot.slane %v5116_v61, 2 }
 0x282   : > { %16191 = vst.msk [vmem:[#allocation2 + $0x38] sm:$0xff] %vm689_vm5, %v16043_v44  ;;  %v4420_v26 = vsel %vm18975_vm13, %v4415_v51, %v22046_v9  ;;  %v22071_v46 = vrot.slane %v4678_v24, %v18814_v19  ;;  %v18022_v62 = vrot.slane %v22052_v31, 9  ;;  %v25086_v20 = vrot.slane %v22009_v41, 7 }
 0x283   : > { %v4679_v44 = vcombine.low %v4410_v28, %v4420_v26  ;;  %v5114_v43 = vsel %vm18803_vm6, %v5112_v63, %v5113_v30  ;;  %v5117_v55 = vsel %vm18803_vm6, %v5115_v42, %v5116_v61  ;;  %v11461_v51 = vrot.slane %v11306_v45, 7  ;;  %v17951_v9 = vld.sshfl [vmem:[%s18788_s27 + $0x38] sm:$0x13 pattern:$0x76325410] }
 0x284   : > { %v5120_v52 = vsel %vm18803_vm6, %v5118_v33, %v25086_v20  ;;  %v5257_v47 = vcombine.low %v5111_v49, %v5114_v43  ;;  %v10388_v0 = vcombine.high %v17951_v9, %v17951_v9  ;;  %v25087_v63 = vshrl.u32 %v21531_v13, 16 }
 0x285   : > { %v5258_v10 = vcombine.low %v5117_v55, %v5120_v52  ;;  %v4693_v24 = vrot.slane %v4679_v44, %v18814_v19  ;;  %v22088_v42 = vsel %vm18803_vm6, %v18022_v62, %v11461_v51  ;;  %v22090_v61 = vrot.slane %v11461_v51, 2 }
 0x286   : > { %v5265_v26 = vrot.slane %v5257_v47, %v18814_v19  ;;  %v10623_v33 = vrot.slane %v25087_v63, 6  ;;  %v10627_v43 = vshll.u32 %v17951_v9, 16  ;;  %v11609_v62 = vcombine.low %v21875_v40, %v21888_v22 }
 0x287   : > { %v5272_v30 = vrot.slane %v5258_v10, %v18814_v19  ;;  %v4694_v28 = vcombine.low %v22071_v46, %v4693_v24  ;;  %v11465_v10 = vsel %vm18803_vm6, %v22090_v61, %v21842_v6  ;;  %v10631_v55 = vshrl.u32 %v17951_v9, 16  ;;  %v22107_v6 = vpop.permute.xlu0 %11699  ;;  %v18658_v9 = vld.sshfl [vmem:[%s18788_s27 + $0x44] sm:$0x33 pattern:$0x76325410] }
 0x288   : > { %v11608_v13 = vcombine.low %v22088_v42, %v11465_v10  ;;  %v10624_v20 = vor.u32 %v10623_v33, %v21604_v35  ;;  %v10629_v52 = vrot.slane %v10627_v43, 7  ;;  %v10637_v47 = vshll.u32 %v10388_v0, 16  ;;  %v22113_v35 = vpop.permute.xlu1 %6623 }
 0x289   : > { %v16207_v49 = vld [vmem:[#allocation2 + $0x38] sm:$0xff]  ;;  %v5273_v44 = vcombine.low %v5265_v26, %v5272_v30  ;;  %4773 = vrot.lane.b32.xlu0 %v4694_v28, %s18721_s7  ;;  %v11623_v51 = vrot.slane %v11609_v62, %v18814_v19  ;;  %v10633_v24 = vrot.slane %v10631_v55, 6  ;;  %v12170_v28 = vshrl.u32 %v22052_v31, 16 }
 0x28a   : > { %18421 = vmatprep.mubr.msk.bf16.mxu1 %vm689_vm5, %v16207_v49  ;;  %v11616_v26 = vrot.slane %v11608_v13, %v18814_v19  ;;  %v10625_v40 = vrot.slane %v10624_v20, 2  ;;  %v10639_v22 = vrot.slane %v10637_v47, 7  ;;  %v12175_v33 = vshrl.u32 %v11306_v45, 16 }
 0x28b   : > { %16631 = vmatmul.mubr.bf16.gmra.mrb[4].mxu1 %v16206_v7  ;;  %5352 = vrot.lane.b32.xlu1 %v5273_v44, %s18722_s8  ;;  %v17612_v7 = vcombine.high %v18658_v9, %v21941_v21  ;;  %v10634_v30 = vor.u32 %v10633_v24, %v10629_v52  ;;  %v18078_v44 = vrot.slane %v12170_v28, 9  ;;  %v12178_v31 = vshll.u32 %v11306_v45, 16  ;;  %v22124_v55 = vpop.permute.xlu0 %12541  ;;  %v17538_v47 = vld.sshfl [vmem:[%s18788_s27 + $0x2c] sm:$0x33 pattern:$0x76325410] }
 0x28c   : > { %v11624_v0 = vcombine.low %v11616_v26, %v11623_v51  ;;  %v10630_v49 = vsel %vm18975_vm13, %v10625_v40, %v10629_v52  ;;  %v22120_v10 = vrot.slane %v12175_v33, 7  ;;  %v18659_v51 = vld.sshfl [vmem:[%s18788_s27 + $0x28] sm:$0x33 pattern:$0x76325410]  ;;  %v22131_v24 = vpop.permute.xlu1 %7066  ;;  %v5502_v9 = vcombine.high %v17538_v47, %v17538_v47 }
 0x28d   : > { %v6555_v63 = vrot.slane %v17612_v7, %v18814_v19  ;;  %v10635_v43 = vrot.slane %v10634_v30, 2  ;;  %v17652_v7 = vld.sshfl [vmem:[%s18788_s27 + $0x50] sm:$0x3 pattern:$0x76325410]  ;;  %v5743_v30 = vrot.slane %v21648_v56, 2 }
 0x28e   : > { %11703 = vrot.lane.b32.xlu0 %v11624_v0, %s18717_s29  ;;  %v12180_v20 = vor.u32 %v12178_v31, %v22120_v10  ;;  %v12182_v52 = vrot.slane %v22120_v10, 2  ;;  %v22148_v33 = vld.sshfl [vmem:[%s18788_s27 + $0x58] sm:$0x33 pattern:$0x76325410]  ;;  %v5757_v31 = vshll.u32 %v17538_v47, 16 }
 0x28f   : > { %v6563_v21 = vcombine.low %v6555_v63, %v21706_v48  ;;  %v10640_v62 = vsel %vm18975_vm13, %v10635_v43, %v10639_v22  ;;  %v5494_v48 = vcombine.high %v18659_v51, %v18659_v51  ;;  %v5754_v63 = vshrl.u32 %v17538_v47, 16  ;;  %v22150_v43 = vpop.permute.xlu0 %12991  ;;  %v22448_v10 = vld.sshfl [vmem:[%s18788_s27 + $0x4c] sm:$0x33 pattern:$0x76325410] }
 0x290   : > { %v10999_v13 = vcombine.low %v10630_v49, %v10640_v62  ;;  %v22136_v26 = vsel %vm19323_vm4, %v18078_v44, %v12180_v20  ;;  %v12190_v40 = vsel %vm19323_vm4, %v12182_v52, %v21906_v36  ;;  %v12451_v36 = vcombine.low %v21930_v11, %v21934_v54  ;;  %v22156_v62 = vld.sshfl [vmem:[%s18788_s27 + $0x54] sm:$0x30 pattern:$0x76325410] }
 0x291   : > { %6627 = vrot.lane.b32.xlu1 %v6563_v21, %s18717_s29  ;;  %v12450_v22 = vcombine.low %v22136_v26, %v12190_v40  ;;  %v5745_v28 = vshrl.u32 %v5494_v48, 16  ;;  %v5748_v0 = vshll.u32 %v5494_v48, 16  ;;  %v5763_v56 = vshrl.u32 %v5502_v9, 16  ;;  %v22159_v48 = vpop.permute.xlu1 %7948 }
 0x292   : > { %v11007_v45 = vrot.slane %v10999_v13, %v18814_v19  ;;  %v5756_v13 = vrot.slane %v5754_v63, 7  ;;  %v5766_v20 = vshll.u32 %v5502_v9, 16  ;;  %v6990_v51 = vcombine.low %v17652_v7, %v21979_v14 }
 0x293   : > { %v12458_v49 = vrot.slane %v12450_v22, %v18814_v19  ;;  %v5747_v21 = vrot.slane %v5745_v28, 7  ;;  %v12465_v40 = vrot.slane %v12451_v36, %v18814_v19  ;;  %v6991_v11 = vcombine.low %v21996_v32, %v22148_v33 }
 0x294   : > { %v11015_v44 = vcombine.low %v11007_v45, %v22071_v46  ;;  %v5759_v54 = vor.u32 %v5757_v31, %v5756_v13  ;;  %v5761_v47 = vrot.slane %v5756_v13, 2  ;;  %v5765_v45 = vrot.slane %v5763_v56, 7 }
 0x295   : > { %v5750_v22 = vor.u32 %v5748_v0, %v5747_v21  ;;  %v5752_v46 = vrot.slane %v5747_v21, 2  ;;  %v6998_v9 = vrot.slane %v6990_v51, %v18814_v19  ;;  %v12466_v7 = vcombine.low %v12458_v49, %v12465_v40  ;;  %v2994_v40 = vpop.permute.xlu1 %2993 }
 0x296   : > { %11147 = vst.msk [vmem:[#allocation2 + $0x50] sm:$0xff] %vm689_vm5, %v11015_v44  ;;  %v7005_v0 = vrot.slane %v6991_v11, %v18814_v19  ;;  %v12726_v63 = vcombine.high %v22156_v62, %v22156_v62  ;;  %v5768_v44 = vor.u32 %v5766_v20, %v5765_v45  ;;  %v22179_v36 = vcombine.high %v22148_v33, %v22148_v33 }
 0x297   : > { %11725 = vst.msk [vmem:[#allocation2 + $0x50] sm:$0xff] %vm1579_vm7, %v21584_v1  ;;  %v5751_v28 = vsel %vm19323_vm4, %v5743_v30, %v5750_v22  ;;  %v5760_v1 = vsel %vm19323_vm4, %v5752_v46, %v5759_v54  ;;  %v22185_v30 = vcombine.high %v21752_v5, %v21752_v5  ;;  %12545 = vrot.lane.b32.xlu0 %v12466_v7, %s18716_s28  ;;  %v7598_v13 = vshrl.u32 %v21752_v5, 16 }
 0x298   : > { %12567 = vst.msk [vmem:[#allocation2 + $0x50] sm:$0xff] %vm2165_vm8, %v21615_v17  ;;  %v22187_v17 = vpop.permute.xlu0 %13434  ;;  %v6066_v49 = vcombine.low %v5751_v28, %v5760_v1  ;;  %v7006_v21 = vcombine.low %v6998_v9, %v7005_v0  ;;  %v12900_v31 = vcombine.low %v12726_v63, %v22148_v33  ;;  %v12901_v56 = vcombine.low %v22179_v36, %v21850_v59  ;;  %v22221_v28 = vld.sshfl [vmem:[%s18788_s27 + $0x64] sm:$0x33 pattern:$0x76325410] }
 0x299   : > { %13017 = vst.msk [vmem:[#allocation2 + $0x50] sm:$0xff] %vm3015_vm9, %v21644_v50  ;;  %v5769_v50 = vsel %vm19323_vm4, %v5761_v47, %v5768_v44  ;;  %v7604_v20 = vshll.u32 %v22185_v30, 16  ;;  %v7609_v51 = vshrl.u32 %v21979_v14, 16  ;;  %v7600_v11 = vrot.slane %v7598_v13, 6  ;;  %3020 = vst.msk [vmem:[#allocation2 + $0x80] sm:$0xff] %vm3015_vm9, %v2994_v40 }
 0x29a   : > { %13460 = vst.msk [vmem:[#allocation2 + $0x50] sm:$0xff] %vm3466_vm10, %v21688_v39  ;;  %v6067_v22 = vcombine.low %v5769_v50, %v21861_v53  ;;  %v6074_v46 = vrot.slane %v6066_v49, %v18814_v19  ;;  %7070 = vrot.lane.b32.xlu1 %v7006_v21, %s18716_s28  ;;  %v12908_v39 = vrot.slane %v12900_v31, %v18814_v19  ;;  %v7612_v47 = vshll.u32 %v21979_v14, 16  ;;  %v22212_v53 = vld.sshfl [vmem:[%s18788_s27 + $0x60] sm:$0x33 pattern:$0x76325410] }
 0x29b   : > { %14342 = vst.msk [vmem:[#allocation2 + $0x50] sm:$0xff] %vm3910_vm11, %v21734_v60  ;;  %v12915_v59 = vrot.slane %v12901_v56, %v18814_v19  ;;  %v7606_v54 = vrot.slane %v7604_v20, 7  ;;  %v7611_v60 = vrot.slane %v7609_v51, 6  ;;  %v7601_v9 = vor.u32 %v7600_v11, %v21795_v4 }
 0x29c   : > { %14920 = vst.msk [vmem:[#allocation2 + $0x50] sm:$0xff] %vm4793_vm12, %v21769_v25  ;;  %v6081_v45 = vrot.slane %v6067_v22, %v18814_v19  ;;  %v7618_v7 = vshll.u32 %v21996_v32, 16  ;;  %v7622_v25 = vshrl.u32 %v21996_v32, 16  ;;  %v7614_v63 = vrot.slane %v7612_v47, 7  ;;  %v22225_v44 = vpop.permute.xlu0 %14316 }
 0x29d   : > { %15762 = vst.msk [vmem:[#allocation2 + $0x50] sm:$0xff] %vm5372_vm14, %v21826_v8  ;;  %v12916_v0 = vcombine.low %v12908_v39, %v12915_v59  ;;  %v7628_v1 = vshll.u32 %v22148_v33, 16  ;;  %v7632_v14 = vshrl.u32 %v22148_v33, 16  ;;  %v7602_v8 = vrot.slane %v7601_v9, 2 }
 0x29e   : > { %v6082_v49 = vcombine.low %v6074_v46, %v6081_v45  ;;  %v7620_v21 = vrot.slane %v7618_v7, 7  ;;  %v7624_v31 = vrot.slane %v7622_v25, 6  ;;  %v7615_v4 = vor.u32 %v7614_v63, %v7611_v60  ;;  %v22251_v11 = vld.sshfl [vmem:[%s18788_s27 + $0x38] sm:$0x33 pattern:$0x76325410] }
 0x29f   : > { %12995 = vrot.lane.b32.xlu0 %v12916_v0, %s18718_s30  ;;  %v7630_v32 = vrot.slane %v7628_v1, 7  ;;  %v7634_v13 = vrot.slane %v7632_v14, 6  ;;  %v7638_v50 = vshll.u32 %v22179_v36, 16  ;;  %v7607_v56 = vsel %vm18975_vm13, %v7602_v8, %v7606_v54 }
 0x2a0   : > { %6198 = vst.msk [vmem:[#allocation2 + $0x68] sm:$0xff] %vm689_vm5, %v6082_v49  ;;  %v7625_v20 = vor.u32 %v7624_v31, %v7620_v21  ;;  %v22238_v51 = vcombine.high %v22212_v53, %v22212_v53  ;;  %v22242_v40 = vcombine.high %v22221_v28, %v22221_v28  ;;  %v7616_v22 = vrot.slane %v7615_v4, 2  ;;  %v22266_v0 = vpop.permute.xlu0 %8526 }
 0x2a1   : > { %6648 = vst.msk [vmem:[#allocation2 + $0x68] sm:$0xff] %vm1579_vm7, %v21598_v15  ;;  %v7635_v46 = vor.u32 %v7634_v13, %v7630_v32  ;;  %v22248_v39 = vrot.slane %v7638_v50, 7  ;;  %v2343_v59 = vcombine.high %v22251_v11, %v22251_v11  ;;  %v2659_v47 = vrot.slane %v21852_v27, 2 }
 0x2a2   : > { %7091 = vst.msk [vmem:[#allocation2 + $0x68] sm:$0xff] %vm2165_vm8, %v21626_v58  ;;  %v7626_v54 = vrot.slane %v7625_v20, 2  ;;  %v13343_v60 = vcombine.low %v22212_v53, %v22238_v51  ;;  %v13344_v15 = vcombine.low %v22221_v28, %v22242_v40  ;;  %v7621_v45 = vsel %vm18975_vm13, %v7616_v22, %v7620_v21 }
 0x2a3   : > { %v7636_v9 = vrot.slane %v7635_v46, 2  ;;  %7973 = vst.msk [vmem:[#allocation2 + $0x68] sm:$0xff] %vm3015_vm9, %v21660_v38  ;;  %v2661_v7 = vshrl.u32 %v2343_v59, 16  ;;  %v2664_v25 = vshll.u32 %v2343_v59, 16  ;;  %v7872_v63 = vcombine.low %v7607_v56, %v7621_v45 }
 0x2a4   : > { %v7631_v58 = vsel %vm18975_vm13, %v7626_v54, %v7630_v32  ;;  %v13351_v49 = vrot.slane %v13343_v60, %v18814_v19  ;;  %v22272_v8 = vrot.slane %v13344_v15, %v18814_v19  ;;  %8551 = vst.msk [vmem:[#allocation2 + $0x68] sm:$0xff] %vm3466_vm10, %v21710_v37  ;;  %v2669_v21 = vshrl.u32 %v22017_v3, 16 }
 0x2a5   : > { %v7641_v38 = vsel %vm18975_vm13, %v7636_v9, %v22248_v39  ;;  %v2663_v27 = vrot.slane %v2661_v7, 7  ;;  %v2674_v31 = vshrl.u32 %v22041_v16, 16  ;;  %9393 = vst.msk [vmem:[#allocation2 + $0x68] sm:$0xff] %vm3910_vm11, %v21800_v23  ;;  %v7880_v32 = vrot.slane %v7872_v63, %v18814_v19  ;;  %v3445_v23 = vpop.permute.xlu0 %3444  ;;  %v25090_v7 = vld [vmem:[#allocation16_spill] sm:$0xff] }
 0x2a6   : > { %v7873_v4 = vcombine.low %v7631_v58, %v7641_v38  ;;  %v13359_v13 = vcombine.low %v13351_v49, %v22272_v8  ;;  %v2677_v56 = vshll.u32 %v22041_v16, 16  ;;  %9843 = vst.msk [vmem:[#allocation2 + $0x68] sm:$0xff] %vm4793_vm12, %v21869_v18  ;;  %v17323_v20 = vrot.slane %v2669_v21, 9  ;;  %v22304_v49 = vpop.permute.xlu1 %14894 }
 0x2a7   : > { %v2666_v37 = vor.u32 %v2664_v25, %v2663_v27  ;;  %v2676_v22 = vrot.slane %v2674_v31, 7  ;;  %v25088_v3 = vshrl.u32 %v21970_v34, 16  ;;  %10286 = vst.msk [vmem:[#allocation2 + $0x68] sm:$0xff] %vm5372_vm14, %v21908_v57  ;;  %v13925_v16 = vshrl.u32 %v22212_v53, 16 }
 0x2a8   : > { %v7887_v59 = vrot.slane %v7873_v4, %v18814_v19  ;;  %13438 = vrot.lane.b32.xlu0 %v13359_v13, %s18719_s5  ;;  %3471 = vst.msk [vmem:[#allocation2 + $0x80] sm:$0xff] %vm3466_vm10, %v3445_v23  ;;  %v25089_v15 = vshll.u32 %v21970_v34, 16  ;;  %v25091_v25 = vshrl.u32 %v25090_v7, 16  ;;  %v13928_v34 = vshll.u32 %v22212_v53, 16  ;;  %v16212_v23 = vld [vmem:[#allocation2 + $0x60] sm:$0xff] }
 0x2a9   : > { %v2685_v46 = vrot.slane %v25088_v3, 7  ;;  %v2667_v18 = vsel %vm19323_vm4, %v2659_v47, %v2666_v37  ;;  %v2679_v54 = vor.u32 %v2677_v56, %v2676_v22  ;;  %v2681_v60 = vrot.slane %v2676_v22, 2  ;;  %v22311_v27 = vld.sshfl [vmem:[%s18788_s27 + $0x68] sm:$0x13 pattern:$0x76325410] }
 0x2aa   : > { %v7888_v57 = vcombine.low %v7880_v32, %v7887_v59  ;;  %v22302_v58 = vrot.slane %v25091_v25, 7  ;;  %v13927_v63 = vrot.slane %v13925_v16, 6  ;;  %v13934_v21 = vshll.u32 %v22238_v51, 16 }
 0x2ab   : > { %v2688_v45 = vor.u32 %v25089_v15, %v2685_v46  ;;  %v2690_v9 = vrot.slane %v2685_v46, 2  ;;  %v2680_v38 = vsel %vm19323_vm4, %v17323_v20, %v2679_v54  ;;  %v25092_v31 = vshll.u32 %v25090_v7, 16  ;;  %v22322_v37 = vld.sshfl [vmem:[%s18788_s27 + $0x60] sm:$0x32 pattern:$0x76325410] }
 0x2ac   : > { %7952 = vrot.lane.b32.xlu1 %v7888_v57, %s18718_s30  ;;  %v2917_v32 = vcombine.low %v2667_v18, %v2680_v38  ;;  %v13938_v13 = vshrl.u32 %v22238_v51, 16  ;;  %v24934_v56 = vshll.u32 %v22221_v28, 16  ;;  %v13930_v20 = vrot.slane %v13928_v34, 7 }
 0x2ad   : > { %v2689_v47 = vsel %vm19323_vm4, %v2681_v60, %v2688_v45  ;;  %v2697_v4 = vor.u32 %v25092_v31, %v22302_v58  ;;  %v13936_v22 = vrot.slane %v13934_v21, 7  ;;  %v24935_v3 = vshrl.u32 %v22221_v28, 16  ;;  %v22341_v21 = vpop.permute.xlu1 %9368 }
 0x2ae   : > { %v24931_v46 = vshll.u32 %v22242_v40, 16  ;;  %v2925_v16 = vrot.slane %v2917_v32, %v18814_v19  ;;  %v13940_v54 = vrot.slane %v13938_v13, 6  ;;  %v13946_v18 = vrot.slane %v24934_v56, 7  ;;  %v16213_v60 = vld [vmem:[#allocation2 + $0x68] sm:$0xff] }
 0x2af   : > { %v2698_v59 = vsel %vm19323_vm4, %v2690_v9, %v2697_v4  ;;  %v13931_v45 = vor.u32 %v13930_v20, %v13927_v63  ;;  %v13950_v57 = vrot.slane %v24935_v3, 6  ;;  %16533 = vmatprep.mubr.bf16.mxu0 %v16213_v60  ;;  %v24933_v38 = vshrl.u32 %v22242_v40, 16 }
 0x2b0   : > { %v2918_v15 = vcombine.low %v2689_v47, %v2698_v59  ;;  %v13956_v7 = vrot.slane %v24931_v46, 7  ;;  %v13941_v25 = vor.u32 %v13940_v54, %v13936_v22  ;;  %v13964_v9 = vshll.u32 %v22311_v27, 16  ;;  %16534 = vmatmul.mubr.bf16.gmra.mrb[12].mxu0 %v16212_v23 }
 0x2b1   : > { %v22339_v34 = vcombine.high %v22322_v37, %v22322_v37  ;;  %v13932_v47 = vrot.slane %v13931_v45, 2  ;;  %v13951_v31 = vor.u32 %v13950_v57, %v13946_v18  ;;  %v18282_v4 = vrot.slane %v22322_v37, 9 }
 0x2b2   : > { %v2932_v63 = vrot.slane %v2918_v15, %v18814_v19  ;;  %v13942_v32 = vrot.slane %v13941_v25, 2  ;;  %v13960_v13 = vrot.slane %v24933_v38, 6  ;;  %v22347_v20 = vrot.slane %v13964_v9, 7 }
 0x2b3   : > { %v14656_v59 = vrot.slane %v22339_v34, 7  ;;  %v13937_v23 = vsel %vm18975_vm13, %v13932_v47, %v13936_v22  ;;  %v13952_v60 = vrot.slane %v13951_v31, 2  ;;  %v14659_v46 = vrot.slane %v22221_v28, 7 }
 0x2b4   : > { %v2933_v54 = vcombine.low %v2925_v16, %v2932_v63  ;;  %v13947_v15 = vsel %vm18975_vm13, %v13942_v32, %v13946_v18  ;;  %v13961_v45 = vor.u32 %v13960_v13, %v13956_v7  ;;  %v14662_v22 = vrot.slane %v22242_v40, 7  ;;  %v3889_v13 = vpop.permute.xlu1 %3888 }
 0x2b5   : > { %v22357_v57 = vsel %vm18803_vm6, %v18282_v4, %v14656_v59  ;;  %v14658_v25 = vrot.slane %v14656_v59, 2  ;;  %v13957_v16 = vsel %vm18975_vm13, %v13952_v60, %v13956_v7  ;;  %v14225_v9 = vcombine.low %v13937_v23, %v13947_v15  ;;  %3915 = vst.msk [vmem:[#allocation2 + $0x80] sm:$0xff] %vm3910_vm11, %v3889_v13 }
 0x2b6   : > { %2997 = vrot.lane.b32.xlu1 %v2933_v54, %s18718_s30  ;;  %v14661_v63 = vrot.slane %v14659_v46, 2  ;;  %v13962_v47 = vrot.slane %v13961_v45, 2  ;;  %v24932_v18 = vrot.slane %v22311_v27, 7  ;;  %v25093_v4 = vrot.slane %v21752_v5, 7 }
 0x2b7   : > { %v22365_v31 = vsel %vm18803_vm6, %v14658_v25, %v14659_v46  ;;  %v14233_v59 = vrot.slane %v14225_v9, %v18814_v19  ;;  %v22375_v54 = vrot.slane %v14662_v22, 2  ;;  %v8298_v5 = vrot.slane %v22185_v30, 7 }
 0x2b8   : > { %v8297_v32 = vrot.slane %v25093_v4, 2  ;;  %v22373_v7 = vsel %vm18803_vm6, %v14661_v63, %v14662_v22  ;;  %v14803_v23 = vcombine.low %v22357_v57, %v22365_v31  ;;  %v13967_v46 = vsel %vm18975_vm13, %v13962_v47, %v22347_v20  ;;  %v25095_v63 = vld [vmem:[#allocation23_spill] sm:$0xff]  ;;  %v4772_v13 = vpop.permute.xlu1 %4771 }
 0x2b9   : > { %25094 = vst [vmem:[#allocation13_spill] sm:$0xff] %v22375_v54  ;;  %v8305_v60 = vrot.slane %v22148_v33, 7  ;;  %v24936_v15 = vrot.slane %v22179_v36, 7  ;;  %v14226_v45 = vcombine.low %v13957_v16, %v13967_v46  ;;  %v14666_v25 = vsel %vm18803_vm6, %v22375_v54, %v24932_v18  ;;  %v25096_v18 = vld [vmem:[#allocation19_spill] sm:$0xff]  ;;  %4798 = vst.msk [vmem:[#allocation2 + $0x80] sm:$0xff] %vm4793_vm12, %v4772_v13 }
 0x2ba   : > { %v14811_v9 = vrot.slane %v14803_v23, %v18814_v19  ;;  %v8725_v22 = vcombine.high %v25095_v63, %v25095_v63  ;;  %v14804_v47 = vcombine.low %v22373_v7, %v14666_v25  ;;  %v8299_v30 = vsel %vm18803_vm6, %v8297_v32, %v8298_v5 }
 0x2bb   : > { %v8306_v16 = vsel %vm18803_vm6, %v22090_v61, %v8305_v60  ;;  %v8307_v4 = vrot.slane %v8305_v60, 2  ;;  %v14240_v46 = vrot.slane %v14226_v45, %v18814_v19  ;;  %v8450_v23 = vcombine.low %v8299_v30, %v22088_v42  ;;  %v17341_v42 = vld.sshfl [vmem:[%s18788_s27 + $0x3c] sm:$0x30 pattern:$0x76325410] }
 0x2bc   : > { %v9034_v38 = vrot.slane %v25096_v18, 2  ;;  %v9036_v63 = vshrl.u32 %v8725_v22, 16  ;;  %v14818_v32 = vrot.slane %v14804_v47, %v18814_v19  ;;  %v9039_v5 = vshll.u32 %v8725_v22, 16 }
 0x2bd   : > { %v8309_v61 = vsel %vm18803_vm6, %v8307_v4, %v24936_v15  ;;  %v14241_v60 = vcombine.low %v14233_v59, %v14240_v46  ;;  %v8458_v45 = vrot.slane %v8450_v23, %v18814_v19  ;;  %v22412_v30 = vld.sshfl [vmem:[%s18788_s27 + $0x48] sm:$0x33 pattern:$0x76325410]  ;;  %v9060_v13 = vrot.slane %v7632_v14, 7  ;;  %v22430_v23 = vpop.permute.xlu0 %15736 }
 0x2be   : > { %v8451_v25 = vcombine.low %v8306_v16, %v8309_v61  ;;  %v9038_v56 = vrot.slane %v9036_v63, 7  ;;  %v14819_v18 = vcombine.low %v14811_v9, %v14818_v32  ;;  %v24938_v4 = vshrl.u32 %v22179_v36, 16  ;;  %v17392_v22 = vld.sshfl [vmem:[%s18788_s27 + $0x44] sm:$0x3 pattern:$0x76325410] }
 0x2bf   : > { %14320 = vrot.lane.b32.xlu0 %v14241_v60, %s18720_s6  ;;  %v9063_v59 = vor.u32 %v9060_v13, %v7628_v1  ;;  %v9065_v16 = vrot.slane %v9060_v13, 2  ;;  %v22438_v1 = vcombine.high %v22412_v30, %v22412_v30  ;;  %v3812_v32 = vcombine.low %v17392_v22, %v22412_v30  ;;  %v22455_v60 = vld.sshfl [vmem:[%s18788_s27 + $0x68] sm:$0x33 pattern:$0x76325410] }
 0x2c0   : > { %v8465_v47 = vrot.slane %v8451_v25, %v18814_v19  ;;  %v9041_v3 = vor.u32 %v9039_v5, %v9038_v56  ;;  %14898 = vrot.lane.b32.xlu1 %v14819_v18, %s18721_s7  ;;  %v22427_v9 = vrot.slane %v24938_v4, 7  ;;  %v17352_v56 = vcombine.high %v22251_v11, %v17341_v42  ;;  %v25098_v42 = vld [vmem:[#allocation18_spill] sm:$0xff] }
 0x2c1   : > { %v9064_v63 = vsel %vm19323_vm4, %v12182_v52, %v9063_v59  ;;  %v15365_v52 = vshrl.u32 %v22322_v37, 16  ;;  %v3813_v61 = vcombine.low %v22438_v1, %v22448_v10  ;;  %v3820_v5 = vrot.slane %v3812_v32, %v18814_v19 }
 0x2c2   : > { %v8466_v46 = vcombine.low %v8458_v45, %v8465_v47  ;;  %v9042_v14 = vsel %vm19323_vm4, %v9034_v38, %v9041_v3  ;;  %25097 = vst [vmem:[#allocation10_spill] sm:$0xff] %v22427_v9  ;;  %v9072_v3 = vor.u32 %v22427_v9, %v7638_v50  ;;  %v3376_v38 = vrot.slane %v17352_v56, %v18814_v19  ;;  %v22469_v56 = vpop.permute.xlu0 %9818 }
 0x2c3   : > { %v9292_v11 = vcombine.low %v9042_v14, %v22136_v26  ;;  %v15370_v25 = vshrl.u32 %v22339_v34, 16  ;;  %v15373_v45 = vshll.u32 %v22339_v34, 16  ;;  %v18338_v13 = vrot.slane %v15365_v52, 9 }
 0x2c4   : > { %8530 = vrot.lane.b32.xlu0 %v8466_v46, %s18719_s5  ;;  %v9073_v26 = vsel %vm19323_vm4, %v9065_v16, %v9072_v3  ;;  %v3384_v18 = vcombine.low %v3376_v38, %v25098_v42  ;;  %v3827_v47 = vrot.slane %v3813_v61, %v18814_v19  ;;  %v25099_v59 = vshrl.u32 %v22221_v28, 16 }
 0x2c5   : > { %v9300_v50 = vrot.slane %v9292_v11, %v18814_v19  ;;  %v9293_v37 = vcombine.low %v9064_v63, %v9073_v26  ;;  %v15372_v22 = vrot.slane %v15370_v25, 7  ;;  %v15397_v14 = vshrl.u32 %v22455_v60, 16 }
 0x2c6   : > { %v15381_v46 = vrot.slane %v25099_v59, 7  ;;  %v15400_v34 = vshll.u32 %v22455_v60, 16  ;;  %v3828_v32 = vcombine.low %v3820_v5, %v3827_v47  ;;  %v25100_v63 = vshll.u32 %v22221_v28, 16 }
 0x2c7   : > { %v9307_v16 = vrot.slane %v9293_v37, %v18814_v19  ;;  %v15375_v3 = vor.u32 %v15373_v45, %v15372_v22  ;;  %v15377_v11 = vrot.slane %v15372_v22, 2  ;;  %v25101_v61 = vshrl.u32 %v22242_v40, 16 }
 0x2c8   : > { %3448 = vrot.lane.b32.xlu0 %v3384_v18, %s18719_s5  ;;  %v15384_v38 = vor.u32 %v15381_v46, %v25100_v63  ;;  %v15386_v52 = vrot.slane %v15381_v46, 2  ;;  %v22478_v26 = vrot.slane %v15397_v14, 7  ;;  %v22486_v5 = vcombine.high %v22009_v41, %v22009_v41  ;;  %v22517_v63 = vpop.permute.xlu0 %10261 }
 0x2c9   : > { %v22476_v25 = vrot.slane %v25101_v61, 7  ;;  %v9308_v42 = vcombine.low %v9300_v50, %v9307_v16  ;;  %v22482_v18 = vsel %vm19323_vm4, %v18338_v13, %v15375_v3  ;;  %v22490_v45 = vcombine.high %v22448_v10, %v22448_v10 }
 0x2ca   : > { %25103 = vst [vmem:[#allocation8_spill] sm:$0xff] %v22478_v26  ;;  %v22494_v37 = vsel %vm19323_vm4, %v15377_v11, %v15384_v38  ;;  %v25104_v47 = vshll.u32 %v22242_v40, 16  ;;  %v15402_v13 = vor.u32 %v15400_v34, %v22478_v26  ;;  %v4421_v46 = vshrl.u32 %v22009_v41, 16 }
 0x2cb   : > { %25102 = vst [vmem:[#allocation3_spill] sm:$0xff] %v22476_v25  ;;  %v24937_v22 = vrot.slane %v22476_v25, 2  ;;  %9372 = vrot.lane.b32.xlu1 %v9308_v42, %s18720_s6  ;;  %v15645_v59 = vcombine.low %v22482_v18, %v22494_v37  ;;  %v4427_v14 = vshll.u32 %v22486_v5, 16  ;;  %v4432_v16 = vshrl.u32 %v22412_v30, 16 }
 0x2cc   : > { %v15393_v50 = vor.u32 %v22476_v25, %v25104_v47  ;;  %v4435_v3 = vshll.u32 %v22412_v30, 16  ;;  %v4441_v11 = vshll.u32 %v22438_v1, 16  ;;  %v4423_v42 = vrot.slane %v4421_v46, 6 }
 0x2cd   : > { %v15403_v34 = vsel %vm19323_vm4, %v24937_v22, %v15402_v13  ;;  %v15653_v61 = vrot.slane %v15645_v59, %v18814_v19  ;;  %v4434_v47 = vrot.slane %v4432_v16, 6  ;;  %v4445_v13 = vshrl.u32 %v22438_v1, 16  ;;  %v25105_v22 = vld [vmem:[#allocation12_spill] sm:$0xff] }
 0x2ce   : > { %v22509_v40 = vsel %vm19323_vm4, %v15386_v52, %v15393_v50  ;;  %v4429_v52 = vrot.slane %v4427_v14, 7  ;;  %v4437_v50 = vrot.slane %v4435_v3, 7  ;;  %v4443_v15 = vrot.slane %v4441_v11, 7 }
 0x2cf   : > { %v15646_v38 = vcombine.low %v22509_v40, %v15403_v34  ;;  %3892 = vrot.lane.b32.xlu1 %v3828_v32, %s18720_s6  ;;  %v4424_v4 = vor.u32 %v4423_v42, %v25105_v22  ;;  %v24943_v25 = vshll.u32 %v22448_v10, 16  ;;  %v24944_v34 = vshrl.u32 %v22448_v10, 16  ;;  %v22528_v59 = vld.sshfl [vmem:[%s18788_s27 + $0x44] sm:$0x33 pattern:$0x76325410]  ;;  %v5351_v42 = vpop.permute.xlu0 %5350 }
 0x2d0   : > { %v4438_v46 = vor.u32 %v4437_v50, %v4434_v47  ;;  %v4447_v14 = vrot.slane %v4445_v13, 6  ;;  %v4461_v16 = vshll.u32 %v22490_v45, 16  ;;  %v18661_v3 = vld.sshfl [vmem:[%s18788_s27 + $0x50] sm:$0x33 pattern:$0x76325410]  ;;  %v9743_v50 = vcombine.low %v22148_v33, %v22179_v36 }
 0x2d1   : > { %v15660_v30 = vrot.slane %v15646_v38, %v18814_v19  ;;  %v17872_v11 = vcombine.high %v18661_v3, %v22156_v62  ;;  %v18372_v1 = vld.sshfl [vmem:[%s18788_s27 + $0x48] sm:$0x30 pattern:$0x76325410]  ;;  %v4425_v32 = vrot.slane %v4424_v4, 2  ;;  %v4453_v38 = vrot.slane %v24943_v25, 7 }
 0x2d2   : > { %v4457_v22 = vrot.slane %v24944_v34, 6  ;;  %v4439_v9 = vrot.slane %v4438_v46, 2  ;;  %v4448_v26 = vor.u32 %v4447_v14, %v4443_v15  ;;  %v22538_v47 = vrot.slane %v4461_v16, 7  ;;  %5377 = vst.msk [vmem:[#allocation2 + $0x80] sm:$0xff] %vm5372_vm14, %v5351_v42 }
 0x2d3   : > { %v15661_v54 = vcombine.low %v15653_v61, %v15660_v30  ;;  %v4430_v62 = vsel %vm18975_vm13, %v4425_v32, %v4429_v52  ;;  %v9750_v61 = vrot.slane %v17872_v11, %v18814_v19  ;;  %v22549_v13 = vcombine.high %v22528_v59, %v22528_v59  ;;  %v18662_v3 = vld.sshfl [vmem:[%s18788_s27 + $0x5c] sm:$0x13 pattern:$0x76325410] }
 0x2d4   : > { %v4458_v4 = vor.u32 %v4457_v22, %v4453_v38  ;;  %v22553_v30 = vsel %vm18975_vm13, %v4439_v9, %v4443_v15  ;;  %v22555_v33 = vrot.slane %v4448_v26, 2  ;;  %v9757_v46 = vrot.slane %v9743_v50, %v18814_v19  ;;  %v22563_v32 = vld.sshfl [vmem:[%s18788_s27 + $0x5c] sm:$0x3 pattern:$0x76325410] }
 0x2d5   : > { %15740 = vrot.lane.b32.xlu0 %v15661_v54, %s18722_s8  ;;  %v15873_v14 = vcombine.high %v18372_v1, %v18372_v1  ;;  %v4695_v16 = vcombine.low %v4430_v62, %v22553_v30  ;;  %v16044_v52 = vcombine.low %v22528_v59, %v22549_v13  ;;  %v11322_v11 = vcombine.high %v18662_v3, %v18662_v3 }
 0x2d6   : > { %v4459_v54 = vrot.slane %v4458_v4, 2  ;;  %v4454_v15 = vsel %vm18975_vm13, %v22555_v33, %v4453_v38  ;;  %v9758_v9 = vcombine.low %v9750_v61, %v9757_v46  ;;  %v10185_v38 = vcombine.low %v22563_v32, %v22212_v53  ;;  %v17954_v61 = vld.sshfl [vmem:[%s18788_s27 + $0x44] sm:$0x13 pattern:$0x76325410] }
 0x2d7   : > { %v16045_v26 = vcombine.low %v15873_v14, %v22448_v10  ;;  %v4703_v22 = vrot.slane %v4695_v16, %v18814_v19  ;;  %v16052_v42 = vrot.slane %v16044_v52, %v18814_v19  ;;  %v11473_v50 = vrot.slane %v11322_v11, 7  ;;  %v25106_v46 = vld [vmem:[#allocation15_spill] sm:$0xff] }
 0x2d8   : > { %v4464_v1 = vsel %vm18975_vm13, %v4459_v54, %v22538_v47  ;;  %v10186_v54 = vcombine.low %v22238_v51, %v22221_v28  ;;  %v18663_v16 = vld.sshfl [vmem:[%s18788_s27 + $0x40] sm:$0x33 pattern:$0x76325410]  ;;  %v10412_v52 = vcombine.high %v17954_v61, %v17954_v61  ;;  %v11626_v53 = vcombine.low %v22365_v31, %v22373_v7 }
 0x2d9   : > { %v4696_v62 = vcombine.low %v4454_v15, %v4464_v1  ;;  %9822 = vrot.lane.b32.xlu0 %v9758_v9, %s18721_s7  ;;  %v16059_v4 = vrot.slane %v16045_v26, %v18814_v19  ;;  %v11474_v14 = vsel %vm18803_vm6, %v25106_v46, %v11473_v50  ;;  %v10404_v3 = vcombine.high %v18663_v16, %v18663_v16 }
 0x2da   : > { %v11625_v9 = vcombine.low %v11474_v14, %v22357_v57  ;;  %v10193_v26 = vrot.slane %v10185_v38, %v18814_v19  ;;  %v10200_v1 = vrot.slane %v10186_v54, %v18814_v19  ;;  %v10665_v50 = vshrl.u32 %v18663_v16, 16  ;;  %v25107_v16 = vld [vmem:[#allocation22_spill] sm:$0xff] }
 0x2db   : > { %v4710_v11 = vrot.slane %v4696_v62, %v18814_v19  ;;  %v22586_v15 = vcombine.low %v16052_v42, %v16059_v4  ;;  %v10671_v51 = vshll.u32 %v10404_v3, 16  ;;  %v10675_v62 = vshrl.u32 %v10404_v3, 16 }
 0x2dc   : > { %v11633_v28 = vrot.slane %v11625_v9, %v18814_v19  ;;  %v11640_v42 = vrot.slane %v11626_v53, %v18814_v19  ;;  %v10201_v57 = vcombine.low %v10193_v26, %v10200_v1  ;;  %v10667_v4 = vrot.slane %v10665_v50, 6  ;;  %v22601_v53 = vld.sshfl [vmem:[%s18788_s27 + $0x5c] sm:$0x33 pattern:$0x76325410]  ;;  %v16210_v50 = vld [vmem:[#allocation2 + $0x50] sm:$0xff] }
 0x2dd   : > { %v4711_v46 = vcombine.low %v4703_v22, %v4710_v11  ;;  %16192 = vst.msk [vmem:[#allocation2 + $0x58] sm:$0xff] %vm689_vm5, %v22586_v15  ;;  %v10681_v14 = vshll.u32 %v17954_v61, 16  ;;  %v10673_v31 = vrot.slane %v10671_v51, 7  ;;  %v10677_v7 = vrot.slane %v10675_v62, 6 }
 0x2de   : > { %v10685_v38 = vshrl.u32 %v17954_v61, 16  ;;  %v10691_v54 = vshll.u32 %v10412_v52, 16  ;;  %v11641_v22 = vcombine.low %v11633_v28, %v11640_v42  ;;  %10265 = vrot.lane.b32.xlu0 %v10201_v57, %s18722_s8  ;;  %v10668_v11 = vor.u32 %v10667_v4, %v25107_v16  ;;  %v25108_v16 = vld [vmem:[#allocation17_spill] sm:$0xff] }
 0x2df   : > { %4775 = vrot.lane.b32.xlu1 %v4711_v46, %s18721_s7  ;;  %v10683_v9 = vrot.slane %v10681_v14, 7  ;;  %v10678_v25 = vor.u32 %v10677_v7, %v10673_v31  ;;  %v11900_v26 = vcombine.high %v22601_v53, %v22601_v53  ;;  %v22611_v14 = vpop.permute.xlu1 %11701  ;;  %v22614_v7 = vld.sshfl [vmem:[%s18788_s27 + $0x48] sm:$0x32 pattern:$0x76325410] }
 0x2e0   : > { %v10687_v3 = vrot.slane %v10685_v38, 6  ;;  %v10693_v34 = vrot.slane %v10691_v54, 7  ;;  %v10669_v1 = vrot.slane %v10668_v11, 2  ;;  %v25109_v11 = vrot.slane %v25108_v16, 2 }
 0x2e1   : > { %v10679_v61 = vrot.slane %v10678_v25, 2  ;;  %v12211_v46 = vshrl.u32 %v11900_v26, 16  ;;  %v12214_v28 = vshll.u32 %v11900_v26, 16 }
 0x2e2   : > { %v10688_v52 = vor.u32 %v10687_v3, %v10683_v9  ;;  %v10674_v62 = vsel %vm18975_vm13, %v10669_v1, %v10673_v31  ;;  %v22626_v3 = vcombine.high %v22614_v7, %v22614_v7  ;;  %v17540_v26 = vld.sshfl [vmem:[%s18788_s27 + $0x34] sm:$0x33 pattern:$0x76325410] }
 0x2e3   : > { %11705 = vrot.lane.b32.xlu1 %v11641_v22, %s18717_s29  ;;  %v10684_v42 = vsel %vm18975_vm13, %v10679_v61, %v10683_v9  ;;  %v12213_v4 = vrot.slane %v12211_v46, 7  ;;  %v17503_v46 = vrot.slane %v22614_v7, 9 }
 0x2e4   : > { %v16211_v51 = vld [vmem:[#allocation2 + $0x58] sm:$0xff]  ;;  %v10689_v57 = vrot.slane %v10688_v52, 2  ;;  %v11016_v25 = vcombine.low %v10674_v62, %v10684_v42  ;;  %v22638_v62 = vpop.permute.xlu1 %12543 }
 0x2e5   : > { %18422 = vmatprep.mubr.msk.bf16.mxu1 %vm689_vm5, %v16211_v51  ;;  %v12216_v54 = vor.u32 %v12214_v28, %v12213_v4  ;;  %v17541_v52 = vld.sshfl [vmem:[%s18788_s27 + $0x38] sm:$0x33 pattern:$0x76325410]  ;;  %v5126_v28 = vrot.slane %v22626_v3, 7  ;;  %v5129_v51 = vrot.slane %v22448_v10, 7 }
 0x2e6   : > { %16639 = vmatmul.mubr.bf16.gmra.mrb[8].mxu1 %v16210_v50  ;;  %v10694_v38 = vsel %vm18975_vm13, %v10689_v57, %v10693_v34  ;;  %v11024_v22 = vrot.slane %v11016_v25, %v18814_v19  ;;  %v25110_v34 = vrot.slane %v22009_v41, 7  ;;  %v24945_v41 = vrot.slane %v22490_v45, 7 }
 0x2e7   : > { %v11017_v31 = vcombine.low %v10694_v38, %v22553_v30  ;;  %v12217_v9 = vsel %vm19323_vm4, %v25109_v11, %v12216_v54  ;;  %v5122_v30 = vrot.slane %v22486_v5, 7  ;;  %v5127_v5 = vsel %vm18803_vm6, %v17503_v46, %v5126_v28 }
 0x2e8   : > { %v12467_v50 = vcombine.low %v12217_v9, %v22482_v18  ;;  %v5121_v61 = vrot.slane %v25110_v34, 2  ;;  %v5128_v4 = vrot.slane %v5126_v28, 2  ;;  %v5131_v25 = vrot.slane %v5129_v51, 2 }
 0x2e9   : > { %v11031_v1 = vrot.slane %v11017_v31, %v18814_v19  ;;  %v12468_v38 = vcombine.low %v22494_v37, %v22509_v40  ;;  %v5518_v31 = vcombine.high %v17540_v26, %v17540_v26  ;;  %v5785_v9 = vshrl.u32 %v17540_v26, 16  ;;  %v22665_v28 = vld.sshfl [vmem:[%s18788_s27 + $0x50] sm:$0x33 pattern:$0x76325410] }
 0x2ea   : > { %v12475_v57 = vrot.slane %v12467_v50, %v18814_v19  ;;  %v5123_v18 = vsel %vm18803_vm6, %v5121_v61, %v5122_v30  ;;  %v5130_v16 = vsel %vm18803_vm6, %v5128_v4, %v5129_v51  ;;  %v5133_v11 = vsel %vm18803_vm6, %v5131_v25, %v24945_v41  ;;  %v22669_v51 = vpop.permute.xlu1 %12993  ;;  %v22675_v4 = vld.sshfl [vmem:[%s18788_s27 + $0x54] sm:$0x30 pattern:$0x76325410] }
 0x2eb   : > { %v11032_v42 = vcombine.low %v11024_v22, %v11031_v1  ;;  %v5274_v54 = vcombine.low %v5123_v18, %v5127_v5  ;;  %v5526_v22 = vcombine.high %v17541_v52, %v17541_v52  ;;  %v12482_v1 = vrot.slane %v12468_v38, %v18814_v19 }
 0x2ec   : > { %v5275_v50 = vcombine.low %v5130_v16, %v5133_v11  ;;  %v5788_v40 = vshll.u32 %v17540_v26, 16  ;;  %v5787_v34 = vrot.slane %v5785_v9, 7  ;;  %v5794_v61 = vshrl.u32 %v5518_v31, 16 }
 0x2ed   : > { %11148 = vst.msk [vmem:[#allocation2 + $0x70] sm:$0xff] %vm689_vm5, %v11032_v42  ;;  %v5282_v37 = vrot.slane %v5274_v54, %v18814_v19  ;;  %v5797_v30 = vshll.u32 %v5518_v31, 16  ;;  %v5803_v46 = vshrl.u32 %v17541_v52, 16  ;;  %v22671_v42 = vpop.permute.xlu0 %6625  ;;  %v12483_v18 = vcombine.low %v12475_v57, %v12482_v1 }
 0x2ee   : > { %11726 = vst.msk [vmem:[#allocation2 + $0x70] sm:$0xff] %vm1579_vm7, %v22107_v6  ;;  %v22662_v6 = vld.sshfl [vmem:[%s18788_s27 + $0x60] sm:$0x30 pattern:$0x76325410]  ;;  %v5289_v26 = vrot.slane %v5275_v50, %v18814_v19  ;;  %v5812_v5 = vshrl.u32 %v5526_v22, 16  ;;  %v5790_v25 = vor.u32 %v5788_v40, %v5787_v34 }
 0x2ef   : > { %12568 = vst.msk [vmem:[#allocation2 + $0x70] sm:$0xff] %vm2165_vm8, %v22124_v55  ;;  %v5806_v55 = vshll.u32 %v17541_v52, 16  ;;  %v5792_v38 = vrot.slane %v5787_v34, 2  ;;  %v5796_v54 = vrot.slane %v5794_v61, 7  ;;  %12547 = vrot.lane.b32.xlu1 %v12483_v18, %s18716_s28  ;;  %v5815_v52 = vshll.u32 %v5526_v22, 16 }
 0x2f0   : > { %13018 = vst.msk [vmem:[#allocation2 + $0x70] sm:$0xff] %vm3015_vm9, %v22150_v43  ;;  %v5805_v43 = vrot.slane %v5803_v46, 7  ;;  %v5290_v57 = vcombine.low %v5282_v37, %v5289_v26  ;;  %v5814_v31 = vrot.slane %v5812_v5, 7  ;;  %v18132_v16 = vcombine.high %v22601_v53, %v22662_v6 }
 0x2f1   : > { %13461 = vst.msk [vmem:[#allocation2 + $0x70] sm:$0xff] %vm3466_vm10, %v22187_v17  ;;  %v22685_v11 = vld.sshfl [vmem:[%s18788_s27 + $0x6c] sm:$0x33 pattern:$0x76325410]  ;;  %v25111_v17 = vld [vmem:[#allocation14_spill] sm:$0xff]  ;;  %v6396_v34 = vcombine.high %v22665_v28, %v22665_v28  ;;  %v22720_v5 = vpop.permute.xlu0 %7068 }
 0x2f2   : > { %14343 = vst.msk [vmem:[#allocation2 + $0x70] sm:$0xff] %vm3910_vm11, %v22225_v44  ;;  %v25112_v9 = vrot.slane %v25111_v17, 2  ;;  %v5799_v44 = vor.u32 %v5797_v30, %v5796_v54  ;;  %v5801_v50 = vrot.slane %v5796_v54, 2  ;;  %v5808_v37 = vor.u32 %v5806_v55, %v5805_v43  ;;  %5354 = vrot.lane.b32.xlu0 %v5290_v57, %s18722_s8  ;;  %v22718_v55 = vpop.permute.xlu1 %13436 }
 0x2f3   : > { %14921 = vst.msk [vmem:[#allocation2 + $0x70] sm:$0xff] %vm4793_vm12, %v22304_v49  ;;  %v22694_v40 = vld.sshfl [vmem:[%s18788_s27 + $0x58] sm:$0x33 pattern:$0x76325410]  ;;  %v5810_v53 = vrot.slane %v5805_v43, 2  ;;  %v5817_v22 = vor.u32 %v5815_v52, %v5814_v31  ;;  %v12925_v49 = vrot.slane %v18132_v16, %v18814_v19  ;;  %v22713_v18 = vcombine.high %v22685_v11, %v22685_v11 }
 0x2f4   : > { %v5791_v1 = vsel %vm19323_vm4, %v25112_v9, %v5790_v25  ;;  %15763 = vst.msk [vmem:[#allocation2 + $0x70] sm:$0xff] %vm5372_vm14, %v22430_v23  ;;  %v22703_v61 = vld.sshfl [vmem:[%s18788_s27 + $0x68] sm:$0x3 pattern:$0x76325410]  ;;  %v5800_v30 = vsel %vm19323_vm4, %v5792_v38, %v5799_v44  ;;  %v5809_v46 = vsel %vm19323_vm4, %v5801_v50, %v5808_v37  ;;  %v6404_v23 = vcombine.high %v22675_v4, %v22675_v4 }
 0x2f5   : > { %v22716_v26 = vld.sshfl [vmem:[%s18788_s27 + $0x60] sm:$0x33 pattern:$0x76325410]  ;;  %v5818_v25 = vsel %vm19323_vm4, %v5810_v53, %v5817_v22  ;;  %v6083_v38 = vcombine.low %v5791_v1, %v5800_v30  ;;  %v12933_v54 = vcombine.low %v12925_v49, %v22272_v8  ;;  %v6564_v43 = vcombine.low %v22665_v28, %v6396_v34 }
 0x2f6   : > { %v22727_v57 = vld.sshfl [vmem:[%s18788_s27 + $0x70] sm:$0x33 pattern:$0x76325410]  ;;  %v6084_v31 = vcombine.low %v5809_v46, %v5818_v25  ;;  %v6565_v52 = vcombine.low %v6404_v23, %v22694_v40  ;;  %v13360_v16 = vcombine.low %v22703_v61, %v22685_v11  ;;  %v22740_v50 = vcombine.high %v22716_v26, %v22716_v26 }
 0x2f7   : > { %v13361_v17 = vcombine.low %v22713_v18, %v22727_v57  ;;  %v6091_v9 = vrot.slane %v6083_v38, %v18814_v19  ;;  %12997 = vrot.lane.b32.xlu1 %v12933_v54, %s18718_s30  ;;  %v6572_v1 = vrot.slane %v6564_v43, %v18814_v19  ;;  %v18665_v8 = vld.sshfl [vmem:[%s18788_s27 + $0x58] sm:$0x33 pattern:$0x76325410]  ;;  %v22751_v46 = vcombine.high %v22311_v27, %v22311_v27 }
 0x2f8   : > { %v6834_v44 = vcombine.high %v18665_v8, %v18665_v8  ;;  %v6098_v37 = vrot.slane %v6084_v31, %v18814_v19  ;;  %v6579_v53 = vrot.slane %v6565_v52, %v18814_v19  ;;  %v13368_v22 = vrot.slane %v13360_v16, %v18814_v19  ;;  %v22758_v31 = vpop.permute.xlu1 %14318 }
 0x2f9   : > { %v13375_v49 = vrot.slane %v13361_v17, %v18814_v19  ;;  %v7008_v30 = vcombine.low %v22716_v26, %v22740_v50  ;;  %v22755_v23 = vcombine.high %v22727_v57, %v22727_v57  ;;  %v13968_v43 = vshrl.u32 %v22311_v27, 16 }
 0x2fa   : > { %v7007_v34 = vcombine.low %v6834_v44, %v22563_v32  ;;  %v6099_v25 = vcombine.low %v6091_v9, %v6098_v37  ;;  %v6580_v38 = vcombine.low %v6572_v1, %v6579_v53  ;;  %v22760_v32 = vpop.permute.xlu0 %7950  ;;  %v13974_v17 = vshll.u32 %v22751_v46, 16  ;;  %v22773_v53 = vld.sshfl [vmem:[%s18788_s27 + $0x5c] sm:$0x13 pattern:$0x76325410] }
 0x2fb   : > { %v13376_v54 = vcombine.low %v13368_v22, %v13375_v49  ;;  %v7022_v16 = vrot.slane %v7008_v30, %v18814_v19  ;;  %v13979_v8 = vshrl.u32 %v22685_v11, 16  ;;  %v13970_v9 = vrot.slane %v13968_v43, 6 }
 0x2fc   : > { %v7015_v52 = vrot.slane %v7007_v34, %v18814_v19  ;;  %6199 = vst.msk [vmem:[#allocation2 + $0x88] sm:$0xff] %vm689_vm5, %v6099_v25  ;;  %6629 = vrot.lane.b32.xlu0 %v6580_v38, %s18717_s29  ;;  %v13982_v1 = vshll.u32 %v22685_v11, 16  ;;  %v13988_v44 = vshll.u32 %v22713_v18, 16  ;;  %v13992_v37 = vshrl.u32 %v22713_v18, 16 }
 0x2fd   : > { %13440 = vrot.lane.b32.xlu1 %v13376_v54, %s18719_s5  ;;  %6649 = vst.msk [vmem:[#allocation2 + $0x88] sm:$0xff] %vm1579_vm7, %v22113_v35  ;;  %v13976_v49 = vrot.slane %v13974_v17, 7  ;;  %v13981_v34 = vrot.slane %v13979_v8, 6  ;;  %v24947_v30 = vshll.u32 %v22727_v57, 16  ;;  %v13971_v25 = vor.u32 %v13970_v9, %v22347_v20 }
 0x2fe   : > { %v7023_v22 = vcombine.low %v7015_v52, %v7022_v16  ;;  %7092 = vst.msk [vmem:[#allocation2 + $0x88] sm:$0xff] %vm2165_vm8, %v22131_v24  ;;  %v13984_v38 = vrot.slane %v13982_v1, 7  ;;  %v13990_v54 = vrot.slane %v13988_v44, 7  ;;  %v13994_v43 = vrot.slane %v13992_v37, 6  ;;  %v2996_v8 = vpop.permute.xlu0 %2995 }
 0x2ff   : > { %7974 = vst.msk [vmem:[#allocation2 + $0x88] sm:$0xff] %vm3015_vm9, %v22159_v48  ;;  %v14000_v41 = vrot.slane %v24947_v30, 7  ;;  %v24948_v35 = vshrl.u32 %v22727_v57, 16  ;;  %v24946_v52 = vshll.u32 %v22755_v23, 16  ;;  %v22789_v16 = vcombine.high %v22773_v53, %v22773_v53  ;;  %v22794_v48 = vpop.permute.xlu1 %8528  ;;  %3021 = vst.msk [vmem:[#allocation2 + $0xa0] sm:$0xff] %vm3015_vm9, %v2996_v8 }
 0x300   : > { %7072 = vrot.lane.b32.xlu0 %v7023_v22, %s18716_s28  ;;  %v13972_v24 = vrot.slane %v13971_v25, 2  ;;  %v13985_v20 = vor.u32 %v13984_v38, %v13981_v34  ;;  %v13995_v17 = vor.u32 %v13994_v43, %v13990_v54  ;;  %8552 = vst.msk [vmem:[#allocation2 + $0x88] sm:$0xff] %vm3466_vm10, %v22266_v0  ;;  %v7648_v44 = vshll.u32 %v22773_v53, 16 }
 0x301   : > { %v14004_v9 = vrot.slane %v24948_v35, 6  ;;  %v22800_v1 = vrot.slane %v24946_v52, 7  ;;  %v7652_v37 = vshrl.u32 %v22773_v53, 16  ;;  %9394 = vst.msk [vmem:[#allocation2 + $0x88] sm:$0xff] %vm3910_vm11, %v22341_v21  ;;  %v25113_v25 = vshrl.u32 %v22179_v36, 16 }
 0x302   : > { %v13977_v0 = vsel %vm18975_vm13, %v13972_v24, %v13976_v49  ;;  %v13986_v22 = vrot.slane %v13985_v20, 2  ;;  %v13996_v34 = vrot.slane %v13995_v17, 2  ;;  %9844 = vst.msk [vmem:[#allocation2 + $0x88] sm:$0xff] %vm4793_vm12, %v22469_v56  ;;  %v7650_v52 = vrot.slane %v7648_v44, 7 }
 0x303   : > { %v7644_v38 = vrot.slane %v25113_v25, 6  ;;  %v14005_v43 = vor.u32 %v14004_v9, %v14000_v41  ;;  %v7654_v30 = vrot.slane %v7652_v37, 6  ;;  %v7658_v35 = vshll.u32 %v22789_v16, 16  ;;  %10287 = vst.msk [vmem:[#allocation2 + $0x88] sm:$0xff] %vm5372_vm14, %v22517_v63  ;;  %v3447_v17 = vpop.permute.xlu1 %3446 }
 0x304   : > { %v13991_v21 = vsel %vm18975_vm13, %v13986_v22, %v13990_v54  ;;  %v14001_v49 = vsel %vm18975_vm13, %v13996_v34, %v14000_v41  ;;  %v22821_v24 = vld.sshfl [vmem:[%s18788_s27 + $0x64] sm:$0x33 pattern:$0x76325410]  ;;  %v7663_v56 = vshrl.u32 %v22716_v26, 16  ;;  %3472 = vst.msk [vmem:[#allocation2 + $0xa0] sm:$0xff] %vm3466_vm10, %v3447_v17 }
 0x305   : > { %v7645_v20 = vor.u32 %v7644_v38, %v22248_v39  ;;  %v14006_v8 = vrot.slane %v14005_v43, 2  ;;  %v14242_v9 = vcombine.low %v13977_v0, %v13991_v21  ;;  %v7655_v44 = vor.u32 %v7654_v30, %v7650_v52  ;;  %v22826_v25 = vld.sshfl [vmem:[%s18788_s27 + $0x60] sm:$0x32 pattern:$0x76325410] }
 0x306   : > { %v7660_v37 = vrot.slane %v7658_v35, 7  ;;  %v7665_v54 = vrot.slane %v7663_v56, 6  ;;  %v7666_v22 = vshll.u32 %v22716_v26, 16  ;;  %v7672_v41 = vshll.u32 %v22740_v50, 16 }
 0x307   : > { %v7646_v63 = vrot.slane %v7645_v20, 2  ;;  %v14011_v39 = vsel %vm18975_vm13, %v14006_v8, %v22800_v1  ;;  %v14250_v34 = vrot.slane %v14242_v9, %v18814_v19  ;;  %v7656_v38 = vrot.slane %v7655_v44, 2  ;;  %v16216_v8 = vld [vmem:[#allocation2 + $0x80] sm:$0xff] }
 0x308   : > { %v7676_v30 = vshrl.u32 %v22740_v50, 16  ;;  %v14243_v35 = vcombine.low %v14001_v49, %v14011_v39  ;;  %v7668_v43 = vrot.slane %v7666_v22, 7  ;;  %v7674_v21 = vrot.slane %v7672_v41, 7 }
 0x309   : > { %v7651_v0 = vsel %vm18975_vm13, %v7646_v63, %v7650_v52  ;;  %v7661_v26 = vsel %vm18975_vm13, %v7656_v38, %v7660_v37  ;;  %v24953_v56 = vshll.u32 %v22821_v24, 16  ;;  %v22843_v17 = vcombine.high %v22826_v25, %v22826_v25  ;;  %v22854_v38 = vpop.permute.xlu0 %14896 }
 0x30a   : > { %v7678_v20 = vrot.slane %v7676_v30, 6  ;;  %v14257_v9 = vrot.slane %v14243_v35, %v18814_v19  ;;  %v7669_v50 = vor.u32 %v7668_v43, %v7665_v54  ;;  %v7889_v49 = vcombine.low %v7651_v0, %v7661_v26  ;;  %v16217_v63 = vld [vmem:[#allocation2 + $0x88] sm:$0xff] }
 0x30b   : > { %v25114_v44 = vrot.slane %v22179_v36, 7  ;;  %v22850_v37 = vrot.slane %v24953_v56, 7  ;;  %v8311_v41 = vrot.slane %v22773_v53, 7  ;;  %v8314_v39 = vrot.slane %v22789_v16, 7  ;;  %16541 = vmatprep.mubr.bf16.mxu0 %v16217_v63 }
 0x30c   : > { %v7679_v22 = vor.u32 %v7678_v20, %v7674_v21  ;;  %v14258_v30 = vcombine.low %v14250_v34, %v14257_v9  ;;  %v7670_v35 = vrot.slane %v7669_v50, 2  ;;  %v7897_v54 = vrot.slane %v7889_v49, %v18814_v19  ;;  %16542 = vmatmul.mubr.bf16.gmra.mrb[16].mxu0 %v16216_v8  ;;  %v17395_v56 = vld.sshfl [vmem:[%s18788_s27 + $0x50] sm:$0x3 pattern:$0x76325410] }
 0x30d   : > { %v8310_v52 = vrot.slane %v25114_v44, 2  ;;  %v17764_v36 = vrot.slane %v22826_v25, 9  ;;  %v8313_v26 = vrot.slane %v8311_v41, 2  ;;  %v8318_v20 = vrot.slane %v22843_v17, 7 }
 0x30e   : > { %v7680_v0 = vrot.slane %v7679_v22, 2  ;;  %14322 = vrot.lane.b32.xlu1 %v14258_v30, %s18720_s6  ;;  %v7675_v53 = vsel %vm18975_vm13, %v7670_v35, %v7674_v21  ;;  %v24949_v16 = vrot.slane %v22821_v24, 7  ;;  %v2699_v34 = vrot.slane %v22302_v58, 2  ;;  %v22882_v35 = vpop.permute.xlu0 %9370 }
 0x30f   : > { %v8312_v43 = vsel %vm18803_vm6, %v8310_v52, %v8311_v41  ;;  %v2701_v9 = vshrl.u32 %v22528_v59, 16  ;;  %v8315_v50 = vsel %vm18803_vm6, %v8313_v26, %v8314_v39  ;;  %v8319_v49 = vsel %vm18803_vm6, %v17764_v36, %v8318_v20 }
 0x310   : > { %v7685_v8 = vsel %vm18975_vm13, %v7680_v0, %v22850_v37  ;;  %v8320_v44 = vrot.slane %v8318_v20, 2  ;;  %v8467_v21 = vcombine.low %v8312_v43, %v8315_v50  ;;  %v2704_v22 = vshll.u32 %v22528_v59, 16  ;;  %v18269_v59 = vld.sshfl [vmem:[%s18788_s27 + $0x6c] sm:$0x32 pattern:$0x76325410] }
 0x311   : > { %v7890_v52 = vcombine.low %v7675_v53, %v7685_v8  ;;  %v2703_v63 = vrot.slane %v2701_v9, 7  ;;  %v2710_v41 = vshrl.u32 %v22549_v13, 16  ;;  %v2713_v30 = vshll.u32 %v22549_v13, 16 }
 0x312   : > { %v8322_v58 = vsel %vm18803_vm6, %v8320_v44, %v24949_v16  ;;  %v2718_v39 = vshrl.u32 %v22614_v7, 16  ;;  %v8475_v43 = vrot.slane %v8467_v21, %v18814_v19  ;;  %v2723_v8 = vshrl.u32 %v22626_v3, 16 }
 0x313   : > { %v7904_v36 = vrot.slane %v7890_v52, %v18814_v19  ;;  %v8468_v0 = vcombine.low %v8319_v49, %v8322_v58  ;;  %v2706_v26 = vor.u32 %v2704_v22, %v2703_v63  ;;  %v2708_v20 = vrot.slane %v2703_v63, 2  ;;  %v22896_v63 = vpop.permute.xlu1 %15738 }
 0x314   : > { %v2712_v53 = vrot.slane %v2710_v41, 7  ;;  %v17324_v9 = vrot.slane %v2718_v39, 9  ;;  %v2726_v7 = vshll.u32 %v22626_v3, 16  ;;  %v2725_v52 = vrot.slane %v2723_v8, 7 }
 0x315   : > { %v7905_v50 = vcombine.low %v7897_v54, %v7904_v36  ;;  %v8482_v44 = vrot.slane %v8468_v0, %v18814_v19  ;;  %v2707_v13 = vsel %vm19323_vm4, %v2699_v34, %v2706_v26  ;;  %v25115_v49 = vshrl.u32 %v22448_v10, 16 }
 0x316   : > { %v2715_v16 = vor.u32 %v2713_v30, %v2712_v53  ;;  %v14525_v22 = vcombine.high %v18269_v59, %v18269_v59  ;;  %v25116_v54 = vrot.slane %v22311_v27, 7  ;;  %v14668_v39 = vrot.slane %v22751_v46, 7  ;;  %v3891_v53 = vpop.permute.xlu0 %3890 }
 0x317   : > { %v22894_v21 = vrot.slane %v25115_v49, 7  ;;  %7954 = vrot.lane.b32.xlu0 %v7905_v50, %s18718_s30  ;;  %v8483_v58 = vcombine.low %v8475_v43, %v8482_v44  ;;  %v18283_v34 = vrot.slane %v18269_v59, 9  ;;  %v2728_v30 = vor.u32 %v2726_v7, %v2725_v52  ;;  %3916 = vst.msk [vmem:[#allocation2 + $0xa0] sm:$0xff] %vm3910_vm11, %v3891_v53 }
 0x318   : > { %v14667_v41 = vrot.slane %v25116_v54, 2  ;;  %v2716_v3 = vsel %vm19323_vm4, %v2708_v20, %v2715_v16  ;;  %v2730_v36 = vrot.slane %v2725_v52, 2  ;;  %v25117_v0 = vshll.u32 %v22448_v10, 16 }
 0x319   : > { %8532 = vrot.lane.b32.xlu1 %v8483_v58, %s18719_s5  ;;  %v2934_v8 = vcombine.low %v2707_v13, %v2716_v3  ;;  %v14672_v43 = vrot.slane %v14525_v22, 7  ;;  %v14675_v46 = vrot.slane %v22727_v57, 7  ;;  %v2729_v16 = vsel %vm19323_vm4, %v17324_v9, %v2728_v30  ;;  %v25119_v58 = vld [vmem:[#allocation8_spill] sm:$0xff] }
 0x31a   : > { %v2737_v26 = vor.u32 %v25117_v0, %v22894_v21  ;;  %v14669_v27 = vsel %vm18803_vm6, %v14667_v41, %v14668_v39  ;;  %v24950_v10 = vrot.slane %v22755_v23, 7  ;;  %v15095_v50 = vcombine.high %v22455_v60, %v22455_v60  ;;  %v22928_v39 = vpop.permute.xlu1 %9820 }
 0x31b   : > { %v2942_v13 = vrot.slane %v2934_v8, %v18814_v19  ;;  %v22922_v7 = vsel %vm18803_vm6, %v18283_v34, %v14672_v43  ;;  %v14674_v52 = vrot.slane %v14672_v43, 2  ;;  %v22924_v49 = vrot.slane %v14675_v46, 2  ;;  %v22944_v8 = vld.sshfl [vmem:[%s18788_s27 + $0x5c] sm:$0x33 pattern:$0x76325410] }
 0x31c   : > { %v2738_v20 = vsel %vm19323_vm4, %v2730_v36, %v2737_v26  ;;  %v14820_v9 = vcombine.low %v14669_v27, %v22922_v7  ;;  %v15404_v54 = vrot.slane %v25119_v58, 2  ;;  %v15406_v41 = vshrl.u32 %v15095_v50, 16 }
 0x31d   : > { %v2935_v44 = vcombine.low %v2729_v16, %v2738_v20  ;;  %25118 = vst [vmem:[#allocation24_spill] sm:$0xff] %v22924_v49  ;;  %3450 = vrot.lane.b32.xlu1 %v22586_v15, %s18719_s5  ;;  %v22935_v34 = vsel %vm18803_vm6, %v14674_v52, %v14675_v46  ;;  %v15409_v3 = vshll.u32 %v15095_v50, 16  ;;  %v15414_v30 = vshrl.u32 %v18269_v59, 16 }
 0x31e   : > { %v14679_v36 = vsel %vm18803_vm6, %v22924_v49, %v24950_v10  ;;  %v14828_v0 = vrot.slane %v14820_v9, %v18814_v19  ;;  %v15408_v26 = vrot.slane %v15406_v41, 7  ;;  %v15419_v53 = vshrl.u32 %v14525_v22, 16 }
 0x31f   : > { %v2949_v60 = vrot.slane %v2935_v44, %v18814_v19  ;;  %v14821_v15 = vcombine.low %v22935_v34, %v14679_v36  ;;  %v18339_v43 = vrot.slane %v15414_v30, 9  ;;  %v15422_v46 = vshll.u32 %v14525_v22, 16 }
 0x320   : > { %v15411_v16 = vor.u32 %v15409_v3, %v15408_v26  ;;  %v15421_v20 = vrot.slane %v15419_v53, 7  ;;  %v25120_v59 = vshrl.u32 %v22727_v57, 16  ;;  %v24951_v44 = vshrl.u32 %v22755_v23, 16  ;;  %v22963_v26 = vpop.permute.xlu1 %10263 }
 0x321   : > { %v2950_v27 = vcombine.low %v2942_v13, %v2949_v60  ;;  %v14835_v52 = vrot.slane %v14821_v15, %v18814_v19  ;;  %v8749_v9 = vcombine.high %v22944_v8, %v22944_v8  ;;  %v25122_v13 = vld [vmem:[#allocation10_spill] sm:$0xff]  ;;  %v9076_v41 = vshrl.u32 %v22944_v8, 16 }
 0x322   : > { %v22949_v50 = vrot.slane %v25120_v59, 7  ;;  %v9074_v58 = vrot.slane %v25122_v13, 2  ;;  %v15412_v22 = vsel %vm19323_vm4, %v15404_v54, %v15411_v16  ;;  %v15424_v60 = vor.u32 %v15422_v46, %v15421_v20 }
 0x323   : > { %2999 = vrot.lane.b32.xlu0 %v2950_v27, %s18718_s30  ;;  %v15426_v3 = vrot.slane %v15421_v20, 2  ;;  %v25123_v30 = vshll.u32 %v22727_v57, 16  ;;  %v14836_v53 = vcombine.low %v14828_v0, %v14835_v52  ;;  %v22968_v15 = vrot.slane %v24951_v44, 7 }
 0x324   : > { %25121 = vst [vmem:[#allocation7_spill] sm:$0xff] %v22949_v50  ;;  %v24952_v27 = vrot.slane %v22949_v50, 2  ;;  %v9078_v59 = vrot.slane %v9076_v41, 7  ;;  %v22972_v13 = vsel %vm19323_vm4, %v18339_v43, %v15424_v60  ;;  %v9079_v57 = vshll.u32 %v22944_v8, 16 }
 0x325   : > { %v15433_v36 = vor.u32 %v22949_v50, %v25123_v30  ;;  %25124 = vst [vmem:[#allocation25_spill] sm:$0xff] %v22968_v15  ;;  %v9085_v46 = vshrl.u32 %v8749_v9, 16  ;;  %v25125_v0 = vshll.u32 %v22755_v23, 16  ;;  %v15662_v20 = vcombine.low %v15412_v22, %v22972_v13 }
 0x326   : > { %v9083_v52 = vrot.slane %v9078_v59, 2  ;;  %v9088_v41 = vshll.u32 %v8749_v9, 16  ;;  %v9081_v43 = vor.u32 %v9079_v57, %v9078_v59  ;;  %v9093_v30 = vshrl.u32 %v22826_v25, 16  ;;  %v5353_v25 = vpop.permute.xlu1 %5352 }
 0x327   : > { %v22976_v54 = vsel %vm19323_vm4, %v15426_v3, %v15433_v36  ;;  %14900 = vrot.lane.b32.xlu0 %v14836_v53, %s18721_s7  ;;  %v15442_v16 = vor.u32 %v22968_v15, %v25125_v0  ;;  %v9087_v60 = vrot.slane %v9085_v46, 7  ;;  %v9098_v3 = vshrl.u32 %v22843_v17, 16  ;;  %v4774_v36 = vpop.permute.xlu0 %4773  ;;  %v22994_v59 = vld.sshfl [vmem:[%s18788_s27 + $0x54] sm:$0x33 pattern:$0x76325410] }
 0x328   : > { %v15670_v10 = vrot.slane %v15662_v20, %v18814_v19  ;;  %v9101_v0 = vshll.u32 %v22843_v17, 16  ;;  %v24954_v22 = vshrl.u32 %v22821_v24, 16  ;;  %4799 = vst.msk [vmem:[#allocation2 + $0xa0] sm:$0xff] %vm4793_vm12, %v4774_v36  ;;  %v9082_v46 = vsel %vm19323_vm4, %v9074_v58, %v9081_v43 }
 0x329   : > { %v15443_v53 = vsel %vm19323_vm4, %v24952_v27, %v15442_v16  ;;  %v9090_v44 = vor.u32 %v9088_v41, %v9087_v60  ;;  %v17820_v16 = vrot.slane %v9093_v30, 9  ;;  %5378 = vst.msk [vmem:[#allocation2 + $0xa0] sm:$0xff] %vm5372_vm14, %v5353_v25  ;;  %v9100_v20 = vrot.slane %v9098_v3, 7 }
 0x32a   : > { %v15663_v57 = vcombine.low %v22976_v54, %v15443_v53  ;;  %v23003_v17 = vrot.slane %v24954_v22, 7  ;;  %v9599_v27 = vcombine.high %v22662_v6, %v22662_v6  ;;  %v9759_v36 = vcombine.low %v22944_v8, %v8749_v9  ;;  %v18666_v41 = vld.sshfl [vmem:[%s18788_s27 + $0x4c] sm:$0x33 pattern:$0x76325410] }
 0x32b   : > { %v9091_v58 = vsel %vm19323_vm4, %v9083_v52, %v9090_v44  ;;  %v23013_v43 = vcombine.high %v18666_v41, %v18666_v41  ;;  %v3671_v60 = vcombine.high %v22994_v59, %v22994_v59  ;;  %v9103_v30 = vor.u32 %v9101_v0, %v9100_v20  ;;  %v23030_v15 = vld.sshfl [vmem:[%s18788_s27 + $0x50] sm:$0x13 pattern:$0x76325410] }
 0x32c   : > { %v15677_v53 = vrot.slane %v15663_v57, %v18814_v19  ;;  %v9105_v3 = vrot.slane %v9100_v20, 2  ;;  %v25126_v25 = vshll.u32 %v22821_v24, 16  ;;  %v9309_v22 = vcombine.low %v9082_v46, %v9091_v58 }
 0x32d   : > { %v9760_v57 = vcombine.low %v9599_v27, %v22821_v24  ;;  %v9767_v44 = vrot.slane %v9759_v36, %v18814_v19  ;;  %v3829_v52 = vcombine.low %v23013_v43, %v17395_v56  ;;  %v9104_v41 = vsel %vm19323_vm4, %v17820_v16, %v9103_v30  ;;  %v18667_v56 = vld.sshfl [vmem:[%s18788_s27 + $0x64] sm:$0x33 pattern:$0x76325410] }
 0x32e   : > { %v9112_v9 = vor.u32 %v23003_v17, %v25126_v25  ;;  %v15678_v50 = vcombine.low %v15670_v10, %v15677_v53  ;;  %v9317_v20 = vrot.slane %v9309_v22, %v18814_v19  ;;  %v3830_v49 = vcombine.low %v22994_v59, %v3671_v60 }
 0x32f   : > { %v9774_v27 = vrot.slane %v9760_v57, %v18814_v19  ;;  %v3837_v46 = vrot.slane %v3829_v52, %v18814_v19  ;;  %v10029_v36 = vcombine.high %v18667_v56, %v18667_v56  ;;  %v10203_v53 = vcombine.low %v22685_v11, %v22713_v18 }
 0x330   : > { %v9113_v0 = vsel %vm19323_vm4, %v9105_v3, %v9112_v9  ;;  %15742 = vrot.lane.b32.xlu1 %v15678_v50, %s18722_s8  ;;  %v3844_v16 = vrot.slane %v3830_v49, %v18814_v19  ;;  %v23041_v22 = vcombine.high %v23030_v15, %v23030_v15  ;;  %v4465_v58 = vshrl.u32 %v22490_v45, 16 }
 0x331   : > { %v9310_v10 = vcombine.low %v9104_v41, %v9113_v0  ;;  %v9775_v30 = vcombine.low %v9767_v44, %v9774_v27  ;;  %v10202_v3 = vcombine.low %v10029_v36, %v22703_v61  ;;  %v4471_v25 = vshll.u32 %v23030_v15, 16  ;;  %v17956_v44 = vld.sshfl [vmem:[%s18788_s27 + $0x4c] sm:$0x33 pattern:$0x76325410] }
 0x332   : > { %v3845_v9 = vcombine.low %v3837_v46, %v3844_v16  ;;  %v10217_v49 = vrot.slane %v10203_v53, %v18814_v19  ;;  %v4467_v57 = vrot.slane %v4465_v58, 6  ;;  %v4475_v11 = vshrl.u32 %v23030_v15, 16 }
 0x333   : > { %v9324_v50 = vrot.slane %v9310_v10, %v18814_v19  ;;  %v10210_v52 = vrot.slane %v10202_v3, %v18814_v19  ;;  %v23051_v41 = vrot.slane %v4471_v25, 7  ;;  %v4481_v0 = vshll.u32 %v23041_v22, 16 }
 0x334   : > { %9824 = vrot.lane.b32.xlu1 %v9775_v30, %s18721_s7  ;;  %v4468_v61 = vor.u32 %v4467_v57, %v22538_v47  ;;  %v4477_v10 = vrot.slane %v4475_v11, 6  ;;  %v4486_v27 = vshrl.u32 %v22994_v59, 16  ;;  %v4489_v46 = vshll.u32 %v22994_v59, 16 }
 0x335   : > { %v9325_v18 = vcombine.low %v9317_v20, %v9324_v50  ;;  %v10218_v56 = vcombine.low %v10210_v52, %v10217_v49  ;;  %v4483_v20 = vrot.slane %v4481_v0, 7  ;;  %v4495_v36 = vshll.u32 %v3671_v60, 16 }
 0x336   : > { %v4499_v16 = vshrl.u32 %v3671_v60, 16  ;;  %v4469_v53 = vrot.slane %v4468_v61, 2  ;;  %v4478_v58 = vor.u32 %v4477_v10, %v23051_v41  ;;  %v4488_v50 = vrot.slane %v4486_v27, 6 }
 0x337   : > { %9374 = vrot.lane.b32.xlu0 %v9325_v18, %s18720_s6  ;;  %v4491_v30 = vrot.slane %v4489_v46, 7  ;;  %v4497_v3 = vrot.slane %v4495_v36, 7  ;;  %v4505_v25 = vshll.u32 %v22694_v40, 16  ;;  %v10428_v57 = vcombine.high %v17956_v44, %v17956_v44 }
 0x338   : > { %10267 = vrot.lane.b32.xlu1 %v10218_v56, %s18722_s8  ;;  %v4501_v47 = vrot.slane %v4499_v16, 6  ;;  %v4474_v59 = vsel %vm18975_vm13, %v4469_v53, %v23051_v41  ;;  %v4479_v49 = vrot.slane %v4478_v58, 2  ;;  %v10715_v52 = vshll.u32 %v17956_v44, 16 }
 0x339   : > { %v4492_v11 = vor.u32 %v4491_v30, %v4488_v50  ;;  %v23066_v18 = vrot.slane %v4505_v25, 7  ;;  %v10719_v0 = vshrl.u32 %v17956_v44, 16  ;;  %v10725_v27 = vshll.u32 %v10428_v57, 16 }
 0x33a   : > { %v4502_v60 = vor.u32 %v4501_v47, %v4497_v3  ;;  %v4484_v61 = vsel %vm18975_vm13, %v4479_v49, %v4483_v20  ;;  %v10717_v36 = vrot.slane %v10715_v52, 7  ;;  %v10729_v50 = vshrl.u32 %v10428_v57, 16 }
 0x33b   : > { %3894 = vrot.lane.b32.xlu0 %v3845_v9, %s18720_s6  ;;  %v4493_v10 = vrot.slane %v4492_v11, 2  ;;  %v4712_v56 = vcombine.low %v4474_v59, %v4484_v61  ;;  %v10721_v16 = vrot.slane %v10719_v0, 6  ;;  %v10727_v58 = vrot.slane %v10725_v27, 7 }
 0x33c   : > { %v4503_v46 = vrot.slane %v4502_v60, 2  ;;  %v23073_v9 = vld.sshfl [vmem:[%s18788_s27 + $0x54] sm:$0x32 pattern:$0x76325410]  ;;  %v16061_v47 = vcombine.low %v23013_v43, %v22665_v28  ;;  %v10731_v59 = vrot.slane %v10729_v50, 6 }
 0x33d   : > { %v4498_v53 = vsel %vm18975_vm13, %v4493_v10, %v4497_v3  ;;  %v4720_v20 = vrot.slane %v4712_v56, %v18814_v19  ;;  %v10722_v30 = vor.u32 %v10721_v16, %v10717_v36  ;;  %v18391_v3 = vcombine.high %v22665_v28, %v22675_v4  ;;  %v23096_v28 = vld.sshfl [vmem:[%s18788_s27 + $0x68] sm:$0x13 pattern:$0x76325410] }
 0x33e   : > { %v4508_v44 = vsel %vm18975_vm13, %v4503_v46, %v23066_v18  ;;  %v16069_v57 = vrot.slane %v16061_v47, %v18814_v19  ;;  %v23086_v11 = vcombine.high %v23073_v9, %v23073_v9  ;;  %v25127_v60 = vrot.slane %v22490_v45, 7 }
 0x33f   : > { %v4713_v25 = vcombine.low %v4498_v53, %v4508_v44  ;;  %v10723_v49 = vrot.slane %v10722_v30, 2  ;;  %v10718_v10 = vsel %vm18975_vm13, %v22555_v33, %v10717_v36  ;;  %v10732_v27 = vor.u32 %v10731_v59, %v10727_v58 }
 0x340   : > { %v5134_v52 = vrot.slane %v25127_v60, 2  ;;  %v16076_v46 = vrot.slane %v18391_v3, %v18814_v19  ;;  %v5135_v56 = vrot.slane %v23030_v15, 7  ;;  %v5138_v16 = vrot.slane %v23041_v22, 7 }
 0x341   : > { %v4727_v0 = vrot.slane %v4713_v25, %v18814_v19  ;;  %v10728_v4 = vsel %vm18975_vm13, %v10723_v49, %v10727_v58  ;;  %v17504_v45 = vrot.slane %v23073_v9, 9  ;;  %v10733_v50 = vrot.slane %v10732_v27, 2 }
 0x342   : > { %v11033_v44 = vcombine.low %v10718_v10, %v10728_v4  ;;  %v16077_v30 = vcombine.low %v16069_v57, %v16076_v46  ;;  %v5136_v33 = vsel %vm18803_vm6, %v5134_v52, %v5135_v56  ;;  %v5137_v36 = vrot.slane %v5135_v56, 2  ;;  %v23139_v46 = vld.sshfl [vmem:[%s18788_s27 + $0x68] sm:$0x33 pattern:$0x76325410]  ;;  %v23141_v4 = vpop.permute.xlu0 %11703  ;;  %v25128_v56 = vld [vmem:[#allocation13_spill] sm:$0xff] }
 0x343   : > { %v4728_v53 = vcombine.low %v4720_v20, %v4727_v0  ;;  %v5142_v47 = vrot.slane %v23086_v11, 7  ;;  %v24958_v25 = vrot.slane %v22694_v40, 7  ;;  %v10738_v15 = vsel %vm18975_vm13, %v10733_v50, %v23051_v41 }
 0x344   : > { %v11041_v22 = vrot.slane %v11033_v44, %v18814_v19  ;;  %16193 = vst.msk [vmem:[#allocation2 + $0x78] sm:$0xff] %vm689_vm5, %v16077_v30  ;;  %v23115_v58 = vcombine.high %v23096_v28, %v23096_v28  ;;  %v11034_v20 = vcombine.low %v10738_v15, %v4484_v61  ;;  %v5139_v59 = vsel %vm18803_vm6, %v5137_v36, %v5138_v16  ;;  %v17542_v30 = vld.sshfl [vmem:[%s18788_s27 + $0x3c] sm:$0x32 pattern:$0x76325410]  ;;  %v16214_v36 = vld [vmem:[#allocation2 + $0x70] sm:$0xff] }
 0x345   : > { %4777 = vrot.lane.b32.xlu0 %v4728_v53, %s18721_s7  ;;  %v5143_v3 = vsel %vm18803_vm6, %v17504_v45, %v5142_v47  ;;  %v5144_v49 = vrot.slane %v5142_v47, 2  ;;  %v5291_v57 = vcombine.low %v5136_v33, %v5139_v59  ;;  %v23122_v41 = vrot.slane %v23096_v28, 7  ;;  %v23154_v33 = vpop.permute.xlu1 %6627 }
 0x346   : > { %v11489_v60 = vrot.slane %v23115_v58, 7  ;;  %v11643_v52 = vcombine.low %v22922_v7, %v22935_v34  ;;  %v11048_v0 = vrot.slane %v11034_v20, %v18814_v19  ;;  %v23134_v10 = vcombine.high %v22694_v40, %v22694_v40  ;;  %v17543_v20 = vld.sshfl [vmem:[%s18788_s27 + $0x40] sm:$0x33 pattern:$0x76325410] }
 0x347   : > { %v5146_v61 = vsel %vm18803_vm6, %v5144_v49, %v24958_v25  ;;  %v17613_v27 = vcombine.high %v22944_v8, %v22662_v6  ;;  %v5299_v34 = vrot.slane %v5291_v57, %v18814_v19  ;;  %v11487_v16 = vsel %vm18803_vm6, %v25128_v56, %v23122_v41  ;;  %v23179_v56 = vpop.permute.xlu0 %12545  ;;  %v23283_v25 = vld.sshfl [vmem:[%s18788_s27 + $0x50] sm:$0x33 pattern:$0x76325410] }
 0x348   : > { %v5292_v7 = vcombine.low %v5143_v3, %v5146_v61  ;;  %v11488_v45 = vrot.slane %v23122_v41, 2  ;;  %v11049_v53 = vcombine.low %v11041_v22, %v11048_v0  ;;  %v11657_v50 = vrot.slane %v11643_v52, %v18814_v19 }
 0x349   : > { %v6581_v6 = vcombine.low %v23134_v10, %v22944_v8  ;;  %v6596_v44 = vrot.slane %v17613_v27, %v18814_v19  ;;  %v23163_v22 = vcombine.high %v23139_v46, %v23139_v46  ;;  %v12251_v49 = vshrl.u32 %v23139_v46, 16 }
 0x34a   : > { %v5306_v47 = vrot.slane %v5292_v7, %v18814_v19  ;;  %v23159_v15 = vsel %vm18803_vm6, %v11488_v45, %v11489_v60  ;;  %11149 = vst.msk [vmem:[#allocation2 + $0x90] sm:$0xff] %vm689_vm5, %v11049_v53  ;;  %v12254_v57 = vshll.u32 %v23139_v46, 16 }
 0x34b   : > { %v16215_v8 = vld [vmem:[#allocation2 + $0x78] sm:$0xff]  ;;  %v11642_v59 = vcombine.low %v11487_v16, %v23159_v15  ;;  %v6589_v3 = vrot.slane %v6581_v6, %v18814_v19  ;;  %11727 = vst.msk [vmem:[#allocation2 + $0x90] sm:$0xff] %vm1579_vm7, %v22611_v14  ;;  %v12260_v52 = vshrl.u32 %v23163_v22, 16  ;;  %v12263_v0 = vshll.u32 %v23163_v22, 16 }
 0x34c   : > { %18423 = vmatprep.mubr.msk.bf16.mxu1 %vm689_vm5, %v16215_v8  ;;  %v5307_v60 = vcombine.low %v5299_v34, %v5306_v47  ;;  %12569 = vst.msk [vmem:[#allocation2 + $0x90] sm:$0xff] %vm2165_vm8, %v22638_v62  ;;  %v12253_v7 = vrot.slane %v12251_v49, 7  ;;  %v5534_v34 = vcombine.high %v17542_v30, %v17542_v30  ;;  %v5542_v6 = vcombine.high %v17543_v20, %v17543_v20  ;;  %v23188_v62 = vpop.permute.xlu1 %7070  ;;  %v23211_v49 = vld.sshfl [vmem:[%s18788_s27 + $0x44] sm:$0x33 pattern:$0x76325410] }
 0x34d   : > { %16647 = vmatmul.mubr.bf16.gmra.mrb[12].mxu1 %v16214_v36  ;;  %v11650_v61 = vrot.slane %v11642_v59, %v18814_v19  ;;  %v6597_v27 = vcombine.low %v6589_v3, %v6596_v44  ;;  %v12262_v14 = vrot.slane %v12260_v52, 7  ;;  %13019 = vst.msk [vmem:[#allocation2 + $0x90] sm:$0xff] %vm3015_vm9, %v22669_v51  ;;  %25129 = vst [vmem:[#allocation4_spill] sm:$0xff] %v23188_v62  ;;  %v25130_v51 = vld [vmem:[#allocation3_spill] sm:$0xff]  ;;  %v5820_v47 = vshrl.u32 %v17542_v30, 16 }
 0x34e   : > { %5356 = vrot.lane.b32.xlu1 %v5307_v60, %s18722_s8  ;;  %v23184_v45 = vor.u32 %v12254_v57, %v12253_v7  ;;  %v12258_v53 = vrot.slane %v12253_v7, 2  ;;  %13462 = vst.msk [vmem:[#allocation2 + $0x90] sm:$0xff] %vm3466_vm10, %v22718_v55  ;;  %v25131_v36 = vrot.slane %v25130_v51, 2  ;;  %v5825_v8 = vshrl.u32 %v5534_v34, 16  ;;  %v23213_v60 = vpop.permute.xlu0 %12995 }
 0x34f   : > { %v11658_v16 = vcombine.low %v11650_v61, %v11657_v50  ;;  %v12265_v44 = vor.u32 %v12263_v0, %v12262_v14  ;;  %14344 = vst.msk [vmem:[#allocation2 + $0x90] sm:$0xff] %vm3910_vm11, %v22758_v31  ;;  %v5828_v59 = vshll.u32 %v5534_v34, 16  ;;  %v5834_v31 = vshrl.u32 %v17543_v20, 16 }
 0x350   : > { %v12257_v50 = vsel %vm19323_vm4, %v25131_v36, %v23184_v45  ;;  %14922 = vst.msk [vmem:[#allocation2 + $0x90] sm:$0xff] %vm4793_vm12, %v22854_v38  ;;  %v12485_v30 = vcombine.low %v22972_v13, %v22976_v54  ;;  %v17558_v57 = vrot.slane %v5820_v47, 9  ;;  %v5827_v38 = vrot.slane %v5825_v8, 7  ;;  %v23221_v54 = vpop.permute.xlu1 %7952 }
 0x351   : > { %11707 = vrot.lane.b32.xlu0 %v11658_v16, %s18717_s29  ;;  %v23203_v55 = vsel %vm19323_vm4, %v12258_v53, %v12265_v44  ;;  %15764 = vst.msk [vmem:[#allocation2 + $0x90] sm:$0xff] %vm5372_vm14, %v22896_v63  ;;  %v5836_v52 = vrot.slane %v5834_v31, 7  ;;  %v5837_v0 = vshll.u32 %v17543_v20, 16  ;;  %v5843_v61 = vshrl.u32 %v5542_v6, 16  ;;  %25132 = vst [vmem:[#allocation11_spill] sm:$0xff] %v23221_v54 }
 0x352   : > { %6631 = vrot.lane.b32.xlu1 %v6597_v27, %s18717_s29  ;;  %v12484_v3 = vcombine.low %v12257_v50, %v23203_v55  ;;  %v5846_v27 = vshll.u32 %v5542_v6, 16  ;;  %v23216_v7 = vld.sshfl [vmem:[%s18788_s27 + $0x6c] sm:$0x30 pattern:$0x76325410]  ;;  %v12499_v14 = vrot.slane %v12485_v30, %v18814_v19  ;;  %v5830_v34 = vor.u32 %v5828_v59, %v5827_v38 }
 0x353   : > { %v5832_v16 = vrot.slane %v5827_v38, 2  ;;  %v17658_v13 = vld.sshfl [vmem:[%s18788_s27 + $0x68] sm:$0x3 pattern:$0x76325410]  ;;  %v5839_v53 = vor.u32 %v5837_v0, %v5836_v52  ;;  %v5841_v44 = vrot.slane %v5836_v52, 2  ;;  %v23230_v8 = vcombine.high %v22821_v24, %v22821_v24 }
 0x354   : > { %v12492_v63 = vrot.slane %v12484_v3, %v18814_v19  ;;  %v5845_v51 = vrot.slane %v5843_v61, 7  ;;  %v5852_v20 = vshrl.u32 %v23211_v49, 16  ;;  %v5831_v6 = vsel %vm19323_vm4, %v17558_v57, %v5830_v34  ;;  %v17659_v47 = vld.sshfl [vmem:[%s18788_s27 + $0x6c] sm:$0x33 pattern:$0x76325410] }
 0x355   : > { %v5855_v50 = vshll.u32 %v23211_v49, 16  ;;  %v5840_v59 = vsel %vm19323_vm4, %v5832_v16, %v5839_v53  ;;  %v23237_v38 = vld.sshfl [vmem:[%s18788_s27 + $0x70] sm:$0x33 pattern:$0x76325410]  ;;  %v7024_v57 = vcombine.low %v22821_v24, %v23230_v8  ;;  %v7025_v0 = vcombine.low %v17658_v13, %v17659_v47 }
 0x356   : > { %v12500_v36 = vcombine.low %v12492_v63, %v12499_v14  ;;  %v5848_v31 = vor.u32 %v5846_v27, %v5845_v51  ;;  %v5850_v3 = vrot.slane %v5845_v51, 2  ;;  %v23234_v30 = vrot.slane %v5852_v20, 7  ;;  %v23244_v63 = vpop.permute.xlu0 %13438 }
 0x357   : > { %v6100_v52 = vcombine.low %v5831_v6, %v5840_v59  ;;  %v12774_v61 = vcombine.high %v23216_v7, %v23216_v7  ;;  %v12934_v34 = vcombine.low %v23139_v46, %v23163_v22  ;;  %v23251_v16 = vcombine.high %v17659_v47, %v17659_v47 }
 0x358   : > { %12549 = vrot.lane.b32.xlu0 %v12500_v36, %s18716_s28  ;;  %v5849_v27 = vsel %vm19323_vm4, %v5841_v44, %v5848_v31  ;;  %v5857_v14 = vor.u32 %v5855_v50, %v23234_v30  ;;  %v7032_v51 = vrot.slane %v7024_v57, %v18814_v19  ;;  %v7039_v13 = vrot.slane %v7025_v0, %v18814_v19  ;;  %v2998_v36 = vpop.permute.xlu1 %2997 }
 0x359   : > { %v6108_v53 = vrot.slane %v6100_v52, %v18814_v19  ;;  %v12935_v20 = vcombine.low %v12774_v61, %v23237_v38  ;;  %v12942_v44 = vrot.slane %v12934_v34, %v18814_v19  ;;  %v25133_v50 = vshrl.u32 %v22821_v24, 16  ;;  %3022 = vst.msk [vmem:[#allocation2 + $0xc0] sm:$0xff] %vm3015_vm9, %v2998_v36 }
 0x35a   : > { %v5858_v6 = vsel %vm19323_vm4, %v5850_v3, %v5857_v14  ;;  %v24959_v22 = vshll.u32 %v23230_v8, 16  ;;  %v7040_v52 = vcombine.low %v7032_v51, %v7039_v13  ;;  %v24960_v0 = vshrl.u32 %v23230_v8, 16 }
 0x35b   : > { %v7688_v59 = vrot.slane %v25133_v50, 6  ;;  %v6101_v31 = vcombine.low %v5849_v27, %v5858_v6  ;;  %v12949_v57 = vrot.slane %v12935_v20, %v18814_v19  ;;  %v7702_v14 = vshll.u32 %v23096_v28, 16  ;;  %v23277_v20 = vld.sshfl [vmem:[%s18788_s27 + $0x78] sm:$0x33 pattern:$0x76325410] }
 0x35c   : > { %v7694_v3 = vrot.slane %v24959_v22, 7  ;;  %v7706_v34 = vshrl.u32 %v23096_v28, 16  ;;  %7074 = vrot.lane.b32.xlu1 %v7040_v52, %s18716_s28  ;;  %v7698_v51 = vrot.slane %v24960_v0, 6  ;;  %v7712_v13 = vshll.u32 %v23115_v58, 16 }
 0x35d   : > { %v7689_v61 = vor.u32 %v7688_v59, %v22850_v37  ;;  %v6115_v50 = vrot.slane %v6101_v31, %v18814_v19  ;;  %v12950_v27 = vcombine.low %v12942_v44, %v12949_v57  ;;  %v23279_v37 = vpop.permute.xlu0 %14320  ;;  %v7704_v6 = vrot.slane %v7702_v14, 7 }
 0x35e   : > { %v7708_v59 = vrot.slane %v7706_v34, 6  ;;  %v7717_v28 = vshrl.u32 %v17659_v47, 16  ;;  %v7699_v52 = vor.u32 %v7698_v51, %v7694_v3  ;;  %v7714_v44 = vrot.slane %v7712_v13, 7 }
 0x35f   : > { %v7690_v36 = vrot.slane %v7689_v61, 2  ;;  %v6116_v31 = vcombine.low %v6108_v53, %v6115_v50  ;;  %12999 = vrot.lane.b32.xlu0 %v12950_v27, %s18718_s30  ;;  %v7720_v57 = vshll.u32 %v17659_v47, 16  ;;  %v7726_v54 = vshll.u32 %v23251_v16, 16 }
 0x360   : > { %v7709_v22 = vor.u32 %v7708_v59, %v7704_v6  ;;  %v7719_v0 = vrot.slane %v7717_v28, 6  ;;  %v23289_v61 = vld.sshfl [vmem:[%s18788_s27 + $0x74] sm:$0x3 pattern:$0x76325410]  ;;  %v7700_v14 = vrot.slane %v7699_v52, 2  ;;  %v23297_v47 = vcombine.high %v23277_v20, %v23277_v20 }
 0x361   : > { %v7695_v58 = vsel %vm18975_vm13, %v7690_v36, %v7694_v3  ;;  %6200 = vst.msk [vmem:[#allocation2 + $0xa8] sm:$0xff] %vm689_vm5, %v6116_v31  ;;  %v7722_v53 = vrot.slane %v7720_v57, 7  ;;  %v18668_v34 = vld.sshfl [vmem:[%s18788_s27 + $0x70] sm:$0x33 pattern:$0x76325410]  ;;  %v2391_v51 = vcombine.high %v23283_v25, %v23283_v25 }
 0x362   : > { %v23293_v50 = vcombine.high %v18668_v34, %v18668_v34  ;;  %6650 = vst.msk [vmem:[#allocation2 + $0xa8] sm:$0xff] %vm1579_vm7, %v22671_v42  ;;  %v7710_v3 = vrot.slane %v7709_v22, 2  ;;  %v23301_v27 = vrot.slane %v7726_v54, 7  ;;  %v2739_v13 = vrot.slane %v22894_v21, 2  ;;  %v23314_v54 = vpop.permute.xlu0 %8530 }
 0x363   : > { %7093 = vst.msk [vmem:[#allocation2 + $0xa8] sm:$0xff] %vm2165_vm8, %v22720_v5  ;;  %v7705_v36 = vsel %vm18975_vm13, %v7700_v14, %v7704_v6  ;;  %v7723_v59 = vor.u32 %v7722_v53, %v7719_v0  ;;  %v13378_v42 = vcombine.low %v23277_v20, %v23297_v47  ;;  %25135 = vst [vmem:[#allocation5_spill] sm:$0xff] %v23314_v54  ;;  %v2741_v5 = vshrl.u32 %v23013_v43, 16 }
 0x364   : > { %25134 = vst [vmem:[#allocation9_spill] sm:$0xff] %v23301_v27  ;;  %v13377_v28 = vcombine.low %v23293_v50, %v23289_v61  ;;  %v7715_v22 = vsel %vm18975_vm13, %v7710_v3, %v7714_v44  ;;  %v7906_v31 = vcombine.low %v7695_v58, %v7705_v36  ;;  %7975 = vst.msk [vmem:[#allocation2 + $0xa8] sm:$0xff] %vm3015_vm9, %v22760_v32  ;;  %v2744_v21 = vshll.u32 %v23013_v43, 16 }
 0x365   : > { %v7724_v0 = vrot.slane %v7723_v59, 2  ;;  %v13392_v52 = vrot.slane %v13378_v42, %v18814_v19  ;;  %v2750_v57 = vshrl.u32 %v23283_v25, 16  ;;  %8553 = vst.msk [vmem:[#allocation2 + $0xa8] sm:$0xff] %vm3466_vm10, %v22794_v48  ;;  %v2743_v58 = vrot.slane %v2741_v5, 7 }
 0x366   : > { %v13385_v6 = vrot.slane %v13377_v28, %v18814_v19  ;;  %v7914_v44 = vrot.slane %v7906_v31, %v18814_v19  ;;  %v2753_v14 = vshll.u32 %v23283_v25, 16  ;;  %v2759_v32 = vshrl.u32 %v2391_v51, 16  ;;  %9395 = vst.msk [vmem:[#allocation2 + $0xa8] sm:$0xff] %vm3910_vm11, %v22882_v35  ;;  %v3449_v48 = vpop.permute.xlu0 %3448 }
 0x367   : > { %v7729_v53 = vsel %vm18975_vm13, %v7724_v0, %v23301_v27  ;;  %v2752_v3 = vrot.slane %v2750_v57, 7  ;;  %v2762_v36 = vshll.u32 %v2391_v51, 16  ;;  %9845 = vst.msk [vmem:[#allocation2 + $0xa8] sm:$0xff] %vm4793_vm12, %v22928_v39  ;;  %v2746_v28 = vor.u32 %v2744_v21, %v2743_v58 }
 0x368   : > { %v13393_v34 = vcombine.low %v13385_v6, %v13392_v52  ;;  %v7907_v59 = vcombine.low %v7715_v22, %v7729_v53  ;;  %v2748_v42 = vrot.slane %v2743_v58, 2  ;;  %v2761_v31 = vrot.slane %v2759_v32, 7  ;;  %10288 = vst.msk [vmem:[#allocation2 + $0xa8] sm:$0xff] %vm5372_vm14, %v22963_v26  ;;  %v23347_v52 = vpop.permute.xlu1 %14898 }
 0x369   : > { %3473 = vst.msk [vmem:[#allocation2 + $0xc0] sm:$0xff] %vm3466_vm10, %v3449_v48  ;;  %v2755_v35 = vor.u32 %v2753_v14, %v2752_v3  ;;  %v2757_v5 = vrot.slane %v2752_v3, 2  ;;  %v2767_v51 = vshrl.u32 %v23073_v9, 16  ;;  %v2772_v39 = vshrl.u32 %v23086_v11, 16 }
 0x36a   : > { %13442 = vrot.lane.b32.xlu0 %v13393_v34, %s18719_s5  ;;  %v7921_v0 = vrot.slane %v7907_v59, %v18814_v19  ;;  %v2747_v22 = vsel %vm19323_vm4, %v2739_v13, %v2746_v28  ;;  %v2764_v21 = vor.u32 %v2762_v36, %v2761_v31  ;;  %v2775_v26 = vshll.u32 %v23086_v11, 16  ;;  %v18223_v6 = vld.sshfl [vmem:[%s18788_s27 + $0x74] sm:$0x13 pattern:$0x76325410] }
 0x36b   : > { %v2756_v57 = vsel %vm19323_vm4, %v2748_v42, %v2755_v35  ;;  %v17325_v58 = vrot.slane %v2767_v51, 9  ;;  %v23351_v14 = vrot.slane %v2772_v39, 7  ;;  %v23353_v9 = vcombine.high %v18223_v6, %v18223_v6  ;;  %v23358_v34 = vld.sshfl [vmem:[%s18788_s27 + $0x7c] sm:$0x33 pattern:$0x76325410] }
 0x36c   : > { %v7922_v32 = vcombine.low %v7914_v44, %v7921_v0  ;;  %v2765_v53 = vsel %vm19323_vm4, %v2757_v5, %v2764_v21  ;;  %v2951_v13 = vcombine.low %v2747_v22, %v2756_v57  ;;  %v14018_v3 = vshll.u32 %v18223_v6, 16  ;;  %v23363_v59 = vld.sshfl [vmem:[%s18788_s27 + $0x78] sm:$0x32 pattern:$0x76325410]  ;;  %v16220_v5 = vld [vmem:[#allocation2 + $0xa0] sm:$0xff] }
 0x36d   : > { %25136 = vst [vmem:[#allocation6_spill] sm:$0xff] %v23351_v14  ;;  %v2777_v11 = vor.u32 %v2775_v26, %v23351_v14  ;;  %v14022_v36 = vshrl.u32 %v18223_v6, 16  ;;  %v14028_v48 = vshll.u32 %v23353_v9, 16  ;;  %v25137_v44 = vshrl.u32 %v22755_v23, 16  ;;  %v23374_v14 = vpop.permute.xlu1 %9372 }
 0x36e   : > { %7956 = vrot.lane.b32.xlu1 %v7922_v32, %s18718_s30  ;;  %v2959_v28 = vrot.slane %v2951_v13, %v18814_v19  ;;  %v14033_v31 = vshrl.u32 %v23277_v20, 16  ;;  %v14036_v35 = vshll.u32 %v23277_v20, 16  ;;  %v14020_v39 = vrot.slane %v14018_v3, 7 }
 0x36f   : > { %v14014_v42 = vrot.slane %v25137_v44, 6  ;;  %v2778_v51 = vsel %vm19323_vm4, %v17325_v58, %v2777_v11  ;;  %v14024_v0 = vrot.slane %v14022_v36, 6  ;;  %v14030_v22 = vrot.slane %v14028_v48, 7  ;;  %v16221_v21 = vld [vmem:[#allocation2 + $0xa8] sm:$0xff] }
 0x370   : > { %v2952_v26 = vcombine.low %v2765_v53, %v2778_v51  ;;  %v14035_v32 = vrot.slane %v14033_v31, 6  ;;  %v14038_v13 = vrot.slane %v14036_v35, 7  ;;  %16549 = vmatprep.mubr.bf16.mxu0 %v16221_v21  ;;  %v14042_v27 = vshll.u32 %v23297_v47, 16 }
 0x371   : > { %v14015_v57 = vor.u32 %v14014_v42, %v22800_v1  ;;  %v14025_v44 = vor.u32 %v14024_v0, %v14020_v39  ;;  %v14046_v54 = vshrl.u32 %v23297_v47, 16  ;;  %v14052_v62 = vshll.u32 %v23358_v34, 16  ;;  %16550 = vmatmul.mubr.bf16.gmra.mrb[20].mxu0 %v16220_v5 }
 0x372   : > { %v2966_v58 = vrot.slane %v2952_v26, %v18814_v19  ;;  %v14039_v53 = vor.u32 %v14038_v13, %v14035_v32  ;;  %v23382_v1 = vcombine.high %v23363_v59, %v23363_v59  ;;  %v14044_v36 = vrot.slane %v14042_v27, 7  ;;  %v3893_v32 = vpop.permute.xlu1 %3892 }
 0x373   : > { %v14016_v11 = vrot.slane %v14015_v57, 2  ;;  %v14026_v3 = vrot.slane %v14025_v44, 2  ;;  %v14048_v48 = vrot.slane %v14046_v54, 6  ;;  %v23386_v42 = vrot.slane %v14052_v62, 7  ;;  %3917 = vst.msk [vmem:[#allocation2 + $0xc0] sm:$0xff] %vm3910_vm11, %v3893_v32 }
 0x374   : > { %v2967_v47 = vcombine.low %v2959_v28, %v2966_v58  ;;  %v14040_v35 = vrot.slane %v14039_v53, 2  ;;  %v25138_v5 = vrot.slane %v22755_v23, 7  ;;  %v23394_v26 = vrot.slane %v18223_v6, 7 }
 0x375   : > { %v14021_v31 = vsel %vm18975_vm13, %v14016_v11, %v14020_v39  ;;  %v14031_v0 = vsel %vm18975_vm13, %v14026_v3, %v14030_v22  ;;  %v14049_v21 = vor.u32 %v14048_v48, %v14044_v36  ;;  %v14684_v27 = vrot.slane %v23353_v9, 7  ;;  %v17755_v54 = vld.sshfl [vmem:[%s18788_s27 + $0x6c] sm:$0x32 pattern:$0x76325410] }
 0x376   : > { %v14680_v51 = vrot.slane %v25138_v5, 2  ;;  %3001 = vrot.lane.b32.xlu1 %v2967_v47, %s18718_s30  ;;  %v14045_v28 = vsel %vm18975_vm13, %v14040_v35, %v14044_v36  ;;  %v14259_v57 = vcombine.low %v14021_v31, %v14031_v0  ;;  %v18284_v39 = vrot.slane %v23363_v59, 9 }
 0x377   : > { %v14688_v23 = vrot.slane %v23382_v1, 7  ;;  %v14050_v13 = vrot.slane %v14049_v21, 2  ;;  %v14683_v22 = vrot.slane %v23394_v26, 2  ;;  %v24963_v9 = vrot.slane %v23358_v34, 7  ;;  %v4776_v21 = vpop.permute.xlu1 %4775 }
 0x378   : > { %v14682_v6 = vsel %vm18803_vm6, %v14680_v51, %v23394_v26  ;;  %v14267_v44 = vrot.slane %v14259_v57, %v18814_v19  ;;  %v23416_v53 = vcombine.high %v17755_v54, %v17755_v54  ;;  %v25141_v48 = vrot.slane %v22821_v24, 7  ;;  %4800 = vst.msk [vmem:[#allocation2 + $0xc0] sm:$0xff] %vm4793_vm12, %v4776_v21 }
 0x379   : > { %v23412_v58 = vsel %vm18803_vm6, %v18284_v39, %v14688_v23  ;;  %v23414_v11 = vrot.slane %v14688_v23, 2  ;;  %v14055_v3 = vsel %vm18975_vm13, %v14050_v13, %v23386_v42  ;;  %v23423_v36 = vsel %vm18803_vm6, %v14683_v22, %v14684_v27 }
 0x37a   : > { %25140 = vst [vmem:[#allocation20_spill] sm:$0xff] %v23416_v53  ;;  %v8323_v47 = vrot.slane %v25141_v48, 2  ;;  %v8324_v31 = vrot.slane %v23230_v8, 7  ;;  %v14260_v35 = vcombine.low %v14045_v28, %v14055_v3  ;;  %v14837_v51 = vcombine.low %v14682_v6, %v23423_v36 }
 0x37b   : > { %25139 = vst [vmem:[#allocation21_spill] sm:$0xff] %v23414_v11  ;;  %v14692_v5 = vsel %vm18803_vm6, %v23414_v11, %v24963_v9  ;;  %v17765_v0 = vrot.slane %v17755_v54, 9  ;;  %v24964_v28 = vrot.slane %v23416_v53, 7  ;;  %v9114_v32 = vrot.slane %v23003_v17, 2 }
 0x37c   : > { %v14838_v27 = vcombine.low %v23412_v58, %v14692_v5  ;;  %v8325_v24 = vsel %vm18803_vm6, %v8323_v47, %v8324_v31  ;;  %v8326_v57 = vrot.slane %v8324_v31, 2  ;;  %v14274_v39 = vrot.slane %v14260_v35, %v18814_v19  ;;  %v17347_v3 = vld.sshfl [vmem:[%s18788_s27 + $0x54] sm:$0x30 pattern:$0x76325410] }
 0x37d   : > { %v14845_v23 = vrot.slane %v14837_v51, %v18814_v19  ;;  %v8335_v22 = vsel %vm18803_vm6, %v17765_v0, %v24964_v28  ;;  %v25142_v35 = vshrl.u32 %v23230_v8, 16  ;;  %v23455_v5 = vld.sshfl [vmem:[%s18788_s27 + $0x58] sm:$0x33 pattern:$0x76325410]  ;;  %v9142_v21 = vshrl.u32 %v17755_v54, 16 }
 0x37e   : > { %v14852_v13 = vrot.slane %v14838_v27, %v18814_v19  ;;  %v8328_v6 = vsel %vm18803_vm6, %v8326_v57, %v23122_v41  ;;  %v14275_v48 = vcombine.low %v14267_v44, %v14274_v39  ;;  %v8485_v31 = vcombine.low %v23159_v15, %v8335_v22  ;;  %v23465_v39 = vld.sshfl [vmem:[%s18788_s27 + $0x74] sm:$0x33 pattern:$0x76325410] }
 0x37f   : > { %v8484_v47 = vcombine.low %v8325_v24, %v8328_v6  ;;  %v9118_v17 = vrot.slane %v25142_v35, 7  ;;  %v9147_v41 = vshrl.u32 %v23416_v53, 16  ;;  %v9150_v27 = vshll.u32 %v23416_v53, 16 }
 0x380   : > { %v14853_v51 = vcombine.low %v14845_v23, %v14852_v13  ;;  %14324 = vrot.lane.b32.xlu0 %v14275_v48, %s18720_s6  ;;  %v8499_v44 = vrot.slane %v8485_v31, %v18814_v19  ;;  %v25143_v15 = vshll.u32 %v23230_v8, 16  ;;  %v17821_v54 = vrot.slane %v9142_v21, 9  ;;  %v17398_v22 = vld.sshfl [vmem:[%s18788_s27 + $0x5c] sm:$0x3 pattern:$0x76325410]  ;;  %v23489_v21 = vpop.permute.xlu0 %15740 }
 0x381   : > { %v8492_v0 = vrot.slane %v8484_v47, %v18814_v19  ;;  %v9123_v57 = vrot.slane %v9118_v17, 2  ;;  %v23468_v23 = vrot.slane %v9147_v41, 7  ;;  %v3402_v13 = vcombine.low %v23013_v43, %v23283_v25 }
 0x382   : > { %v9121_v24 = vor.u32 %v9118_v17, %v25143_v15  ;;  %14902 = vrot.lane.b32.xlu1 %v14853_v51, %s18721_s7  ;;  %v17353_v6 = vcombine.high %v23283_v25, %v17347_v3  ;;  %v23481_v35 = vcombine.high %v23455_v5, %v23455_v5  ;;  %v23487_v3 = vld.sshfl [vmem:[%s18788_s27 + $0x60] sm:$0x33 pattern:$0x76325410]  ;;  %v15119_v41 = vcombine.high %v23465_v39, %v23465_v39 }
 0x383   : > { %25144 = vst [vmem:[#allocation16_spill] sm:$0xff] %v23468_v23  ;;  %v8500_v48 = vcombine.low %v8492_v0, %v8499_v44  ;;  %v9131_v31 = vsel %vm19323_vm4, %v9123_v57, %v23184_v45  ;;  %v9152_v17 = vor.u32 %v9150_v27, %v23468_v23  ;;  %v3410_v43 = vrot.slane %v3402_v13, %v18814_v19  ;;  %v25145_v27 = vld [vmem:[#allocation25_spill] sm:$0xff]  ;;  %v23567_v23 = vpop.f32.mrb[0].mxu0 }
 0x384   : > { %v9122_v47 = vsel %vm19323_vm4, %v9114_v32, %v9121_v24  ;;  %v3417_v25 = vrot.slane %v17353_v6, %v18814_v19  ;;  %v3846_v45 = vcombine.low %v23455_v5, %v23481_v35  ;;  %v3847_v32 = vcombine.low %v17398_v22, %v23487_v3  ;;  %25149 = vst [vmem:[#allocation12_spill] sm:$0xff] %v23567_v23 }
 0x385   : > { %v9326_v51 = vcombine.low %v9122_v47, %v9131_v31  ;;  %8534 = vrot.lane.b32.xlu0 %v8500_v48, %s18719_s5  ;;  %v15444_v0 = vrot.slane %v25145_v27, 2  ;;  %v9153_v44 = vsel %vm19323_vm4, %v17821_v54, %v9152_v17  ;;  %v15446_v57 = vshrl.u32 %v23465_v39, 16 }
 0x386   : > { %v3418_v24 = vcombine.low %v3410_v43, %v3417_v25  ;;  %v9327_v13 = vcombine.low %v23203_v55, %v9153_v44  ;;  %v23504_v6 = vrot.slane %v3846_v45, %v18814_v19  ;;  %v3861_v22 = vrot.slane %v3847_v32, %v18814_v19  ;;  %v23515_v25 = vld.sshfl [vmem:[%s18788_s27 + $0x5c] sm:$0x13 pattern:$0x76325410] }
 0x387   : > { %v9334_v15 = vrot.slane %v9326_v51, %v18814_v19  ;;  %v15449_v48 = vshll.u32 %v23465_v39, 16  ;;  %v15448_v47 = vrot.slane %v15446_v57, 7  ;;  %v15455_v31 = vshrl.u32 %v15119_v41, 16  ;;  %v23519_v57 = vpop.permute.xlu0 %9822 }
 0x388   : > { %v15458_v27 = vshll.u32 %v15119_v41, 16  ;;  %v15463_v54 = vshrl.u32 %v23363_v59, 16  ;;  %v9341_v17 = vrot.slane %v9327_v13, %v18814_v19  ;;  %v3862_v51 = vcombine.low %v23504_v6, %v3861_v22 }
 0x389   : > { %3452 = vrot.lane.b32.xlu0 %v3418_v24, %s18719_s5  ;;  %v15468_v55 = vshrl.u32 %v23382_v1, 16  ;;  %v15471_v43 = vshll.u32 %v23382_v1, 16  ;;  %v23517_v45 = vor.u32 %v15449_v48, %v15448_v47  ;;  %v15453_v32 = vrot.slane %v15448_v47, 2 }
 0x38a   : > { %v15457_v44 = vrot.slane %v15455_v31, 7  ;;  %v18340_v41 = vrot.slane %v15463_v54, 9  ;;  %v9342_v59 = vcombine.low %v9334_v15, %v9341_v17  ;;  %v24965_v24 = vshrl.u32 %v23358_v34, 16 }
 0x38b   : > { %v23521_v13 = vrot.slane %v15468_v55, 7  ;;  %v23526_v22 = vcombine.high %v23515_v25, %v23515_v25  ;;  %v15452_v1 = vsel %vm19323_vm4, %v15444_v0, %v23517_v45  ;;  %v23533_v47 = vcombine.high %v23487_v3, %v23487_v3  ;;  %v23536_v31 = vld.sshfl [vmem:[%s18788_s27 + $0x58] sm:$0x33 pattern:$0x76325410] }
 0x38c   : > { %v15460_v48 = vor.u32 %v15458_v27, %v15457_v44  ;;  %v4509_v15 = vshrl.u32 %v23536_v31, 16  ;;  %9376 = vrot.lane.b32.xlu1 %v9342_v59, %s18720_s6  ;;  %v23544_v55 = vrot.slane %v24965_v24, 7  ;;  %v4515_v0 = vshll.u32 %v23134_v10, 16 }
 0x38d   : > { %25146 = vst [vmem:[#allocation23_spill] sm:$0xff] %v23521_v13  ;;  %v15473_v54 = vor.u32 %v15471_v43, %v23521_v13  ;;  %v4519_v9 = vshrl.u32 %v23134_v10, 16  ;;  %v4525_v28 = vshll.u32 %v23515_v25, 16  ;;  %v4529_v10 = vshrl.u32 %v23515_v25, 16 }
 0x38e   : > { %25147 = vst [vmem:[#allocation19_spill] sm:$0xff] %v23544_v55  ;;  %v23549_v27 = vsel %vm19323_vm4, %v15453_v32, %v15460_v48  ;;  %v4511_v44 = vrot.slane %v4509_v15, 6  ;;  %v15482_v59 = vor.u32 %v23544_v55, %v14052_v62  ;;  %v4517_v17 = vrot.slane %v4515_v0, 7  ;;  %v23565_v15 = vpop.permute.xlu0 %10265 }
 0x38f   : > { %v23555_v43 = vsel %vm19323_vm4, %v18340_v41, %v15473_v54  ;;  %v15679_v24 = vcombine.low %v15452_v1, %v23549_v27  ;;  %v4521_v32 = vrot.slane %v4519_v9, 6  ;;  %v23562_v48 = vrot.slane %v4525_v28, 7  ;;  %25148 = vst [vmem:[#allocation18_spill] sm:$0xff] %v23565_v15  ;;  %v23577_v28 = vpop.f32.mrb[1].mxu0 }
 0x390   : > { %v4512_v11 = vor.u32 %v4511_v44, %v23066_v18  ;;  %3896 = vrot.lane.b32.xlu1 %v3862_v51, %s18720_s6  ;;  %v25150_v41 = vrot.slane %v23521_v13, 2  ;;  %v4535_v18 = vshll.u32 %v23526_v22, 16  ;;  %v4540_v9 = vshrl.u32 %v23487_v3, 16  ;;  %25151 = vst [vmem:[#allocation15_spill] sm:$0xff] %v23577_v28 }
 0x391   : > { %v15687_v1 = vrot.slane %v15679_v24, %v18814_v19  ;;  %v4522_v44 = vor.u32 %v4521_v32, %v4517_v17  ;;  %v4531_v23 = vrot.slane %v4529_v10, 6  ;;  %v23581_v55 = vld.sshfl [vmem:[%s18788_s27 + $0x5c] sm:$0x33 pattern:$0x76325410]  ;;  %v4543_v53 = vshll.u32 %v23487_v3, 16 }
 0x392   : > { %v15483_v62 = vsel %vm19323_vm4, %v25150_v41, %v15482_v59  ;;  %v4513_v0 = vrot.slane %v4512_v11, 2  ;;  %v4537_v51 = vrot.slane %v4535_v18, 7  ;;  %v4542_v13 = vrot.slane %v4540_v9, 6  ;;  %v5355_v9 = vpop.permute.xlu0 %5354 }
 0x393   : > { %v15680_v54 = vcombine.low %v23555_v43, %v15483_v62  ;;  %v4549_v59 = vshll.u32 %v23533_v47, 16  ;;  %v4523_v15 = vrot.slane %v4522_v44, 2  ;;  %v4532_v28 = vor.u32 %v4531_v23, %v23562_v48  ;;  %v23589_v62 = vpop.f32.mrb[2].mxu0  ;;  %5379 = vst.msk [vmem:[#allocation2 + $0xc0] sm:$0xff] %vm5372_vm14, %v5355_v9 }
 0x394   : > { %v4518_v41 = vsel %vm18975_vm13, %v4513_v0, %v4517_v17  ;;  %v4545_v11 = vrot.slane %v4543_v53, 7  ;;  %v9776_v10 = vcombine.low %v23230_v8, %v23139_v46  ;;  %v17873_v3 = vcombine.high %v23139_v46, %v23216_v7  ;;  %v23597_v18 = vpop.f32.mrb[3].mxu0  ;;  %v17958_v44 = vld.sshfl [vmem:[%s18788_s27 + $0x54] sm:$0x33 pattern:$0x76325410] }
 0x395   : > { %v15694_v24 = vrot.slane %v15680_v54, %v18814_v19  ;;  %v23591_v32 = vrot.slane %v4549_v59, 7  ;;  %v4528_v23 = vsel %vm18975_vm13, %v4523_v15, %v23562_v48  ;;  %v4533_v17 = vrot.slane %v4532_v28, 2 }
 0x396   : > { %v23604_v53 = vcombine.high %v23581_v55, %v23581_v55  ;;  %v4546_v8 = vor.u32 %v4545_v11, %v4542_v13  ;;  %v4729_v0 = vcombine.low %v4518_v41, %v4528_v23  ;;  %v9784_v46 = vrot.slane %v9776_v10, %v18814_v19  ;;  %v25152_v11 = vld [vmem:[#allocation24_spill] sm:$0xff] }
 0x397   : > { %v15695_v54 = vcombine.low %v15687_v1, %v15694_v24  ;;  %v9791_v7 = vrot.slane %v17873_v3, %v18814_v19  ;;  %v4538_v1 = vsel %vm18975_vm13, %v4533_v17, %v4537_v51  ;;  %v11499_v28 = vrot.slane %v23293_v50, 7 }
 0x398   : > { %v16079_v15 = vcombine.low %v23581_v55, %v23604_v53  ;;  %v4547_v59 = vrot.slane %v4546_v8, 2  ;;  %v4737_v24 = vrot.slane %v4729_v0, %v18814_v19  ;;  %v23623_v51 = vcombine.high %v23237_v38, %v23237_v38 }
 0x399   : > { %15744 = vrot.lane.b32.xlu0 %v15695_v54, %s18722_s8  ;;  %v9792_v13 = vcombine.low %v9784_v46, %v9791_v7  ;;  %v11500_v10 = vsel %vm18803_vm6, %v25152_v11, %v11499_v28  ;;  %v11501_v3 = vrot.slane %v11499_v28, 2  ;;  %v10220_v54 = vcombine.low %v23289_v61, %v23277_v20 }
 0x39a   : > { %v16093_v41 = vrot.slane %v16079_v15, %v18814_v19  ;;  %v4552_v9 = vsel %vm18975_vm13, %v4547_v59, %v23591_v32  ;;  %v10444_v23 = vcombine.high %v17958_v44, %v17958_v44  ;;  %v11660_v46 = vcombine.low %v23423_v36, %v23412_v58 }
 0x39b   : > { %v4730_v17 = vcombine.low %v4538_v1, %v4552_v9  ;;  %v11503_v0 = vsel %vm18803_vm6, %v11501_v3, %v23394_v26  ;;  %v10219_v15 = vcombine.low %v23237_v38, %v23623_v51  ;;  %v10234_v20 = vrot.slane %v10220_v54, %v18814_v19 }
 0x39c   : > { %v23632_v8 = vcombine.low %v23504_v6, %v16093_v41  ;;  %v11659_v7 = vcombine.low %v11500_v10, %v11503_v0  ;;  %v10750_v61 = vshrl.u32 %v17958_v44, 16  ;;  %v11674_v6 = vrot.slane %v11660_v46, %v18814_v19 }
 0x39d   : > { %9826 = vrot.lane.b32.xlu0 %v9792_v13, %s18721_s7  ;;  %v4744_v1 = vrot.slane %v4730_v17, %v18814_v19  ;;  %v10753_v28 = vshll.u32 %v17958_v44, 16  ;;  %v10759_v59 = vshll.u32 %v10444_v23, 16  ;;  %v10227_v58 = vrot.slane %v10219_v15, %v18814_v19 }
 0x39e   : > { %16194 = vst.msk [vmem:[#allocation2 + $0x98] sm:$0xff] %vm689_vm5, %v23632_v8  ;;  %v11667_v26 = vrot.slane %v11659_v7, %v18814_v19  ;;  %v10752_v36 = vrot.slane %v10750_v61, 6  ;;  %v10763_v13 = vshrl.u32 %v10444_v23, 16  ;;  %v24974_v10 = vshll.u32 %v23455_v5, 16  ;;  %v23655_v23 = vpop.permute.xlu1 %11705 }
 0x39f   : > { %v4745_v41 = vcombine.low %v4737_v24, %v4744_v1  ;;  %v10755_v38 = vrot.slane %v10753_v28, 7  ;;  %v10761_v11 = vrot.slane %v10759_v59, 7  ;;  %v10235_v9 = vcombine.low %v10227_v58, %v10234_v20  ;;  %v17495_v61 = vld.sshfl [vmem:[%s18788_s27 + $0x60] sm:$0x32 pattern:$0x76325410] }
 0x3a0   : > { %v11675_v3 = vcombine.low %v11667_v26, %v11674_v6  ;;  %v10765_v54 = vrot.slane %v10763_v13, 6  ;;  %v24975_v17 = vshrl.u32 %v23455_v5, 16  ;;  %v10771_v0 = vrot.slane %v24974_v10, 7  ;;  %v16218_v1 = vld [vmem:[#allocation2 + $0x90] sm:$0xff] }
 0x3a1   : > { %4779 = vrot.lane.b32.xlu1 %v4745_v41, %s18721_s7  ;;  %v10756_v44 = vor.u32 %v10755_v38, %v10752_v36  ;;  %v24971_v46 = vshll.u32 %v23481_v35, 16  ;;  %v24972_v24 = vshrl.u32 %v23481_v35, 16  ;;  %10269 = vrot.lane.b32.xlu0 %v10235_v9, %s18722_s8  ;;  %v12291_v20 = vshrl.u32 %v23293_v50, 16 }
 0x3a2   : > { %v10766_v7 = vor.u32 %v10765_v54, %v10761_v11  ;;  %v10775_v15 = vrot.slane %v24975_v17, 6  ;;  %v12294_v26 = vshll.u32 %v23293_v50, 16  ;;  %v5011_v54 = vcombine.high %v23536_v31, %v23536_v31 }
 0x3a3   : > { %v10757_v6 = vrot.slane %v10756_v44, 2  ;;  %v10781_v28 = vrot.slane %v24971_v46, 7  ;;  %v10785_v59 = vrot.slane %v24972_v24, 6  ;;  %v12293_v41 = vrot.slane %v12291_v20, 7  ;;  %v23675_v24 = vpop.permute.xlu1 %12547 }
 0x3a4   : > { %v10767_v36 = vrot.slane %v10766_v7, 2  ;;  %v10776_v13 = vor.u32 %v10775_v15, %v10771_v0 }
 0x3a5   : > { %v16219_v58 = vld [vmem:[#allocation2 + $0x98] sm:$0xff]  ;;  %11709 = vrot.lane.b32.xlu1 %v11675_v3, %s18717_s29  ;;  %v10762_v38 = vsel %vm18975_vm13, %v10757_v6, %v10761_v11  ;;  %v10786_v9 = vor.u32 %v10785_v59, %v10781_v28  ;;  %v12296_v7 = vor.u32 %v12294_v26, %v12293_v41  ;;  %v12298_v15 = vrot.slane %v12293_v41, 2  ;;  %v25153_v3 = vld [vmem:[#allocation7_spill] sm:$0xff] }
 0x3a6   : > { %18424 = vmatprep.mubr.msk.bf16.mxu1 %vm689_vm5, %v16219_v58  ;;  %v10772_v50 = vsel %vm18975_vm13, %v10767_v36, %v10771_v0  ;;  %v10777_v44 = vrot.slane %v10776_v13, 2  ;;  %v5027_v58 = vcombine.high %v17495_v61, %v17495_v61  ;;  %v25154_v6 = vrot.slane %v25153_v3, 2  ;;  %v23711_v3 = vpop.permute.xlu0 %6629 }
 0x3a7   : > { %16655 = vmatmul.mubr.bf16.gmra.mrb[16].mxu1 %v16218_v1  ;;  %v10787_v20 = vrot.slane %v10786_v9, 2  ;;  %v11050_v46 = vcombine.low %v10762_v38, %v10772_v50  ;;  %v12306_v0 = vsel %vm19323_vm4, %v12298_v15, %v23517_v45  ;;  %v25155_v1 = vrot.slane %v22694_v40, 7  ;;  %v17546_v40 = vld.sshfl [vmem:[%s18788_s27 + $0x4c] sm:$0x33 pattern:$0x76325410] }
 0x3a8   : > { %v10782_v11 = vsel %vm18975_vm13, %v10777_v44, %v10781_v28  ;;  %v12297_v31 = vsel %vm19323_vm4, %v25154_v6, %v12296_v7  ;;  %v17545_v28 = vld.sshfl [vmem:[%s18788_s27 + $0x48] sm:$0x32 pattern:$0x76325410]  ;;  %v5148_v38 = vrot.slane %v5011_v54, 7  ;;  %v5151_v9 = vrot.slane %v23515_v25, 7 }
 0x3a9   : > { %v5147_v59 = vrot.slane %v25155_v1, 2  ;;  %v10792_v26 = vsel %vm18975_vm13, %v10787_v20, %v23562_v48  ;;  %v11058_v36 = vrot.slane %v11050_v46, %v18814_v19  ;;  %v12501_v13 = vcombine.low %v12297_v31, %v12306_v0 }
 0x3aa   : > { %v11051_v41 = vcombine.low %v10782_v11, %v10792_v26  ;;  %v5154_v50 = vrot.slane %v23526_v22, 7  ;;  %v17505_v45 = vrot.slane %v17495_v61, 9  ;;  %v23696_v7 = vrot.slane %v5027_v58, 7  ;;  %v23709_v58 = vpop.permute.xlu1 %12997 }
 0x3ab   : > { %v12509_v44 = vrot.slane %v12501_v13, %v18814_v19  ;;  %v12502_v20 = vcombine.low %v23549_v27, %v23555_v43  ;;  %v5149_v46 = vsel %vm18803_vm6, %v5147_v59, %v5148_v38  ;;  %v5150_v11 = vrot.slane %v5148_v38, 2  ;;  %v18127_v38 = vld.sshfl [vmem:[%s18788_s27 + $0x78] sm:$0x30 pattern:$0x76325410] }
 0x3ac   : > { %v11065_v15 = vrot.slane %v11051_v41, %v18814_v19  ;;  %v5153_v54 = vrot.slane %v5151_v9, 2  ;;  %v5159_v25 = vsel %vm18803_vm6, %v17505_v45, %v23696_v7  ;;  %v5550_v22 = vcombine.high %v23211_v49, %v23211_v49 }
 0x3ad   : > { %v5558_v61 = vcombine.high %v17545_v28, %v17545_v28  ;;  %v12516_v27 = vrot.slane %v12502_v20, %v18814_v19  ;;  %v5152_v43 = vsel %vm18803_vm6, %v5150_v11, %v5151_v9  ;;  %v5566_v31 = vcombine.high %v17546_v40, %v17546_v40 }
 0x3ae   : > { %v11066_v6 = vcombine.low %v11058_v36, %v11065_v15  ;;  %v5155_v0 = vsel %vm18803_vm6, %v5153_v54, %v5154_v50  ;;  %v5308_v1 = vcombine.low %v5149_v46, %v5152_v43  ;;  %v5859_v59 = vrot.slane %v23234_v30, 2  ;;  %v23741_v43 = vld.sshfl [vmem:[%s18788_s27 + $0x68] sm:$0x33 pattern:$0x76325410] }
 0x3af   : > { %v5861_v49 = vshrl.u32 %v5550_v22, 16  ;;  %v12517_v26 = vcombine.low %v12509_v44, %v12516_v27  ;;  %v5309_v13 = vcombine.low %v5155_v0, %v5159_v25  ;;  %v5864_v41 = vshll.u32 %v5550_v22, 16  ;;  %v23733_v22 = vpop.permute.xlu1 %13440 }
 0x3b0   : > { %11150 = vst.msk [vmem:[#allocation2 + $0xb0] sm:$0xff] %vm689_vm5, %v11066_v6  ;;  %v5869_v36 = vshrl.u32 %v17545_v28, 16  ;;  %v5316_v9 = vrot.slane %v5308_v1, %v18814_v19  ;;  %v5874_v15 = vshrl.u32 %v5558_v61, 16  ;;  %v5877_v50 = vshll.u32 %v5558_v61, 16  ;;  %v23735_v61 = vpop.permute.xlu0 %7072 }
 0x3b1   : > { %11728 = vst.msk [vmem:[#allocation2 + $0xb0] sm:$0xff] %vm1579_vm7, %v23141_v4  ;;  %v5863_v45 = vrot.slane %v5861_v49, 7  ;;  %12551 = vrot.lane.b32.xlu1 %v12517_v26, %s18716_s28  ;;  %v5323_v30 = vrot.slane %v5309_v13, %v18814_v19  ;;  %v5883_v44 = vshrl.u32 %v17546_v40, 16  ;;  %v5886_v46 = vshll.u32 %v17546_v40, 16 }
 0x3b2   : > { %v17559_v20 = vrot.slane %v5869_v36, 9  ;;  %12570 = vst.msk [vmem:[#allocation2 + $0xb0] sm:$0xff] %vm2165_vm8, %v23179_v56  ;;  %v23729_v28 = vld.sshfl [vmem:[%s18788_s27 + $0x64] sm:$0x33 pattern:$0x76325410]  ;;  %v12951_v40 = vcombine.low %v23623_v51, %v23465_v39  ;;  %v18133_v56 = vcombine.high %v23465_v39, %v18127_v38 }
 0x3b3   : > { %v5866_v11 = vor.u32 %v5864_v41, %v5863_v45  ;;  %v5876_v4 = vrot.slane %v5874_v15, 7  ;;  %v5892_v54 = vshrl.u32 %v5566_v31, 16  ;;  %v5895_v25 = vshll.u32 %v5566_v31, 16  ;;  %13020 = vst.msk [vmem:[#allocation2 + $0xb0] sm:$0xff] %vm3015_vm9, %v23213_v60 }
 0x3b4   : > { %v5324_v6 = vcombine.low %v5316_v9, %v5323_v30  ;;  %v5885_v27 = vrot.slane %v5883_v44, 7  ;;  %13463 = vst.msk [vmem:[#allocation2 + $0xb0] sm:$0xff] %vm3466_vm10, %v23244_v63  ;;  %v12959_v49 = vrot.slane %v12951_v40, %v18814_v19  ;;  %v12966_v63 = vrot.slane %v18133_v56, %v18814_v19  ;;  %v23755_v26 = vld.sshfl [vmem:[%s18788_s27 + $0x80] sm:$0x3 pattern:$0x76325410]  ;;  %v23789_v44 = vpop.permute.xlu1 %14322 }
 0x3b5   : > { %v5867_v60 = vsel %vm19323_vm4, %v5859_v59, %v5866_v11  ;;  %v5879_v31 = vor.u32 %v5877_v50, %v5876_v4  ;;  %v5881_v0 = vrot.slane %v5876_v4, 2  ;;  %v23747_v1 = vrot.slane %v5892_v54, 7  ;;  %14345 = vst.msk [vmem:[#allocation2 + $0xb0] sm:$0xff] %vm3910_vm11, %v23279_v37 }
 0x3b6   : > { %5358 = vrot.lane.b32.xlu0 %v5324_v6, %s18722_s8  ;;  %v5888_v51 = vor.u32 %v5886_v46, %v5885_v27  ;;  %v5890_v39 = vrot.slane %v5885_v27, 2  ;;  %14923 = vst.msk [vmem:[#allocation2 + $0xb0] sm:$0xff] %vm4793_vm12, %v23347_v52  ;;  %v23764_v37 = vcombine.high %v23729_v28, %v23729_v28  ;;  %v6444_v41 = vcombine.high %v23741_v43, %v23741_v43  ;;  %v23769_v36 = vld.sshfl [vmem:[%s18788_s27 + $0x84] sm:$0x33 pattern:$0x76325410]  ;;  %v23791_v46 = vpop.permute.xlu0 %7954 }
 0x3b7   : > { %v5880_v59 = vsel %vm19323_vm4, %v17559_v20, %v5879_v31  ;;  %v5897_v13 = vor.u32 %v5895_v25, %v23747_v1  ;;  %15765 = vst.msk [vmem:[#allocation2 + $0xb0] sm:$0xff] %vm5372_vm14, %v23489_v21  ;;  %v12967_v9 = vcombine.low %v12959_v49, %v12966_v63  ;;  %v23777_v45 = vcombine.high %v23358_v34, %v23358_v34  ;;  %v23780_v15 = vld.sshfl [vmem:[%s18788_s27 + $0x70] sm:$0x33 pattern:$0x76325410]  ;;  %v23798_v6 = vpop.f32.mrb[0].mxu1 }
 0x3b8   : > { %v5889_v52 = vsel %vm19323_vm4, %v5881_v0, %v5888_v51  ;;  %v6117_v38 = vcombine.low %v5867_v60, %v5880_v59  ;;  %v6598_v30 = vcombine.low %v23729_v28, %v23764_v37  ;;  %v6599_v21 = vcombine.low %v23741_v43, %v6444_v41  ;;  %25156 = vst [vmem:[#allocation22_spill] sm:$0xff] %v23791_v46  ;;  %v17661_v25 = vld.sshfl [vmem:[%s18788_s27 + $0x74] sm:$0x3 pattern:$0x76325410]  ;;  %v16626_v0 = vpop.f32.mrb[1].mxu1 }
 0x3b9   : > { %v5898_v50 = vsel %vm19323_vm4, %v5890_v39, %v5897_v13  ;;  %v13395_v20 = vcombine.low %v23755_v26, %v23769_v36  ;;  %13001 = vrot.lane.b32.xlu1 %v12967_v9, %s18718_s30  ;;  %v13394_v54 = vcombine.low %v23358_v34, %v23777_v45  ;;  %25157 = vst [vmem:[#allocation17_spill] sm:$0xff] %v23798_v6  ;;  %v23808_v31 = vld.sshfl [vmem:[%s18788_s27 + $0x80] sm:$0x13 pattern:$0x76325410]  ;;  %v23818_v59 = vpop.f32.mrb[2].mxu1 }
 0x3ba   : > { %v6118_v11 = vcombine.low %v5889_v52, %v5898_v50  ;;  %v6125_v4 = vrot.slane %v6117_v38, %v18814_v19  ;;  %v6606_v27 = vrot.slane %v6598_v30, %v18814_v19  ;;  %v6613_v40 = vrot.slane %v6599_v21, %v18814_v19  ;;  %25158 = vst [vmem:[#allocation14_spill] sm:$0xff] %v23818_v59  ;;  %v23827_v50 = vpop.permute.xlu1 %8532  ;;  %v3000_v30 = vpop.permute.xlu0 %2999 }
 0x3bb   : > { %v13409_v56 = vrot.slane %v13395_v20, %v18814_v19  ;;  %v23805_v60 = vcombine.high %v23780_v15, %v23780_v15  ;;  %v13402_v39 = vrot.slane %v13394_v54, %v18814_v19  ;;  %v7041_v49 = vcombine.low %v23251_v16, %v23780_v15  ;;  %25160 = vst [vmem:[#allocation8_spill] sm:$0xff] %v23827_v50 }
 0x3bc   : > { %v6132_v51 = vrot.slane %v6118_v11, %v18814_v19  ;;  %v23816_v63 = vcombine.high %v23808_v31, %v23808_v31  ;;  %v6614_v13 = vcombine.low %v6606_v27, %v6613_v40  ;;  %v23823_v52 = vcombine.high %v23769_v36, %v23769_v36  ;;  %3023 = vst.msk [vmem:[#allocation2 + $0xe0] sm:$0xff] %vm3015_vm9, %v3000_v30 }
 0x3bd   : > { %v7042_v41 = vcombine.low %v23805_v60, %v17661_v25  ;;  %v25159_v38 = vshrl.u32 %v23358_v34, 16  ;;  %v13410_v20 = vcombine.low %v13402_v39, %v13409_v56  ;;  %v7049_v11 = vrot.slane %v7041_v49, %v18814_v19  ;;  %v16629_v25 = vpop.f32.mrb[3].mxu1  ;;  %v23845_v49 = vld.sshfl [vmem:[%s18788_s27 + $0x74] sm:$0x13 pattern:$0x76325410] }
 0x3be   : > { %v6133_v21 = vcombine.low %v6125_v4, %v6132_v51  ;;  %v24973_v54 = vshll.u32 %v23777_v45, 16  ;;  %6633 = vrot.lane.b32.xlu0 %v6614_v13, %s18717_s29  ;;  %v24976_v0 = vshrl.u32 %v23777_v45, 16  ;;  %v14076_v56 = vshrl.u32 %v23808_v31, 16  ;;  %v3451_v30 = vpop.permute.xlu1 %3450 }
 0x3bf   : > { %v14058_v9 = vrot.slane %v25159_v38, 6  ;;  %v7056_v27 = vrot.slane %v7042_v41, %v18814_v19  ;;  %v14072_v38 = vshll.u32 %v23808_v31, 16  ;;  %13444 = vrot.lane.b32.xlu1 %v13410_v20, %s18719_s5  ;;  %v14082_v51 = vshll.u32 %v23816_v63, 16  ;;  %v25161_v20 = vld [vmem:[#allocation4_spill] sm:$0xff]  ;;  %3474 = vst.msk [vmem:[#allocation2 + $0xe0] sm:$0xff] %vm3466_vm10, %v3451_v30 }
 0x3c0   : > { %6201 = vst.msk [vmem:[#allocation2 + $0xc8] sm:$0xff] %vm689_vm5, %v6133_v21  ;;  %v14064_v4 = vrot.slane %v24973_v54, 7  ;;  %v14087_v39 = vshrl.u32 %v23769_v36, 16  ;;  %v14068_v41 = vrot.slane %v24976_v0, 6  ;;  %v23851_v21 = vpop.permute.xlu0 %14900  ;;  %v14078_v25 = vrot.slane %v14076_v56, 6 }
 0x3c1   : > { %v14059_v40 = vor.u32 %v14058_v9, %v23386_v42  ;;  %6651 = vst.msk [vmem:[#allocation2 + $0xc8] sm:$0xff] %vm1579_vm7, %v23154_v33  ;;  %v7057_v42 = vcombine.low %v7049_v11, %v7056_v27  ;;  %v14074_v9 = vrot.slane %v14072_v38, 7  ;;  %v14084_v54 = vrot.slane %v14082_v51, 7  ;;  %v23857_v33 = vpop.f32.mrb[4].mxu0  ;;  %v25163_v11 = vld [vmem:[#allocation11_spill] sm:$0xff] }
 0x3c2   : > { %7094 = vst.msk [vmem:[#allocation2 + $0xc8] sm:$0xff] %vm2165_vm8, %v25161_v20  ;;  %v14089_v10 = vrot.slane %v14087_v39, 6  ;;  %v14090_v17 = vshll.u32 %v23769_v36, 16  ;;  %25162 = vst [vmem:[#allocation10_spill] sm:$0xff] %v23857_v33  ;;  %v14096_v38 = vshll.u32 %v23823_v52, 16  ;;  %v23867_v56 = vcombine.high %v23845_v49, %v23845_v49  ;;  %v23869_v36 = vpop.f32.mrb[5].mxu0 }
 0x3c3   : > { %v14060_v13 = vrot.slane %v14059_v40, 2  ;;  %7076 = vrot.lane.b32.xlu0 %v7057_v42, %s18716_s28  ;;  %7976 = vst.msk [vmem:[#allocation2 + $0xc8] sm:$0xff] %vm3015_vm9, %v25163_v11  ;;  %v14069_v40 = vor.u32 %v14068_v41, %v14064_v4  ;;  %25164 = vst [vmem:[#allocation13_spill] sm:$0xff] %v23869_v36  ;;  %v14079_v51 = vor.u32 %v14078_v25, %v14074_v9  ;;  %v7730_v30 = vshrl.u32 %v23251_v16, 16  ;;  %v25165_v20 = vld [vmem:[#allocation5_spill] sm:$0xff]  ;;  %v23875_v11 = vpop.f32.mrb[6].mxu0 }
 0x3c4   : > { %v14092_v39 = vrot.slane %v14090_v17, 7  ;;  %8554 = vst.msk [vmem:[#allocation2 + $0xc8] sm:$0xff] %vm3466_vm10, %v25165_v20  ;;  %25166 = vst [vmem:[#allocation3_spill] sm:$0xff] %v23875_v11  ;;  %v24978_v41 = vshrl.u32 %v23780_v15, 16  ;;  %v24977_v0 = vshll.u32 %v23805_v60, 16  ;;  %v23883_v17 = vpop.permute.xlu1 %15742  ;;  %v23885_v16 = vpop.permute.xlu0 %9374  ;;  %v25168_v20 = vshll.u32 %v23780_v15, 16 }
 0x3c5   : > { %v14065_v27 = vsel %vm18975_vm13, %v14060_v13, %v14064_v4  ;;  %v14070_v4 = vrot.slane %v14069_v40, 2  ;;  %v23877_v13 = vrot.slane %v14096_v38, 7  ;;  %9396 = vst.msk [vmem:[#allocation2 + $0xc8] sm:$0xff] %vm3910_vm11, %v23374_v14  ;;  %25167 = vst [vmem:[#allocation25_spill] sm:$0xff] %v23885_v16  ;;  %v14080_v25 = vrot.slane %v14079_v51, 2  ;;  %v23891_v40 = vpop.f32.mrb[7].mxu0 }
 0x3c6   : > { %v14093_v42 = vor.u32 %v14092_v39, %v14089_v10  ;;  %v7732_v36 = vrot.slane %v7730_v30, 6  ;;  %v7738_v11 = vrot.slane %v25168_v20, 7  ;;  %9846 = vst.msk [vmem:[#allocation2 + $0xc8] sm:$0xff] %vm4793_vm12, %v23519_v57  ;;  %25169 = vst [vmem:[#allocation24_spill] sm:$0xff] %v23891_v40  ;;  %v7742_v14 = vrot.slane %v24978_v41, 6  ;;  %v25170_v51 = vld [vmem:[#allocation18_spill] sm:$0xff] }
 0x3c7   : > { %v14075_v38 = vsel %vm18975_vm13, %v14070_v4, %v14074_v9  ;;  %v7748_v33 = vrot.slane %v24977_v0, 7  ;;  %v24979_v10 = vshrl.u32 %v23805_v60, 16  ;;  %10289 = vst.msk [vmem:[#allocation2 + $0xc8] sm:$0xff] %vm5372_vm14, %v25170_v51  ;;  %v14085_v39 = vsel %vm18975_vm13, %v14080_v25, %v14084_v54  ;;  %v25171_v20 = vld [vmem:[#allocation9_spill] sm:$0xff]  ;;  %v25173_v16 = vld [vmem:[#allocation20_spill] sm:$0xff] }
 0x3c8   : > { %v14094_v57 = vrot.slane %v14093_v42, 2  ;;  %v14276_v30 = vcombine.low %v14065_v27, %v14075_v38  ;;  %v7733_v40 = vor.u32 %v7732_v36, %v25171_v20  ;;  %v7743_v59 = vor.u32 %v7742_v14, %v7738_v11  ;;  %v23909_v41 = vpop.permute.xlu1 %9824  ;;  %v3895_v6 = vpop.permute.xlu0 %3894 }
 0x3c9   : > { %v7752_v9 = vrot.slane %v24979_v10, 6  ;;  %v7756_v4 = vshll.u32 %v23845_v49, 16  ;;  %v7760_v0 = vshrl.u32 %v23845_v49, 16  ;;  %25172 = vst [vmem:[#allocation7_spill] sm:$0xff] %v23909_v41  ;;  %v7766_v36 = vshll.u32 %v23867_v56, 16  ;;  %3918 = vst.msk [vmem:[#allocation2 + $0xe0] sm:$0xff] %vm3910_vm11, %v3895_v6 }
 0x3ca   : > { %v14099_v51 = vsel %vm18975_vm13, %v14094_v57, %v23877_v13  ;;  %v14284_v54 = vrot.slane %v14276_v30, %v18814_v19  ;;  %v7734_v27 = vrot.slane %v7733_v40, 2  ;;  %v7744_v25 = vrot.slane %v7743_v59, 2 }
 0x3cb   : > { %v14277_v42 = vcombine.low %v14085_v39, %v14099_v51  ;;  %v7753_v38 = vor.u32 %v7752_v9, %v7748_v33  ;;  %v7758_v14 = vrot.slane %v7756_v4, 7  ;;  %v7762_v10 = vrot.slane %v7760_v0, 6  ;;  %v16224_v39 = vld [vmem:[#allocation2 + $0xc0] sm:$0xff] }
 0x3cc   : > { %v7739_v20 = vsel %vm18975_vm13, %v7734_v27, %v7738_v11  ;;  %v7768_v41 = vrot.slane %v7766_v36, 7  ;;  %v25174_v50 = vrot.slane %v25173_v16, 7  ;;  %v7749_v40 = vsel %vm18975_vm13, %v7744_v25, %v7748_v33  ;;  %v23925_v59 = vpop.permute.xlu1 %10267  ;;  %v4778_v9 = vpop.permute.xlu0 %4777 }
 0x3cd   : > { %v14291_v57 = vrot.slane %v14277_v42, %v18814_v19  ;;  %v7754_v30 = vrot.slane %v7753_v38, 2  ;;  %v8337_v6 = vrot.slane %v23780_v15, 7  ;;  %v7763_v4 = vor.u32 %v7762_v10, %v7758_v14  ;;  %4801 = vst.msk [vmem:[#allocation2 + $0xe0] sm:$0xff] %vm4793_vm12, %v4778_v9  ;;  %v23947_v9 = vpop.f32.mrb[4].mxu1 }
 0x3ce   : > { %v8336_v46 = vrot.slane %v25174_v50, 2  ;;  %v7923_v51 = vcombine.low %v7739_v20, %v7749_v40  ;;  %v8340_v0 = vrot.slane %v23805_v60, 7  ;;  %v8343_v11 = vrot.slane %v23845_v49, 7  ;;  %v16225_v16 = vld [vmem:[#allocation2 + $0xc8] sm:$0xff] }
 0x3cf   : > { %v14292_v50 = vcombine.low %v14284_v54, %v14291_v57  ;;  %v7759_v33 = vsel %vm18975_vm13, %v7754_v30, %v7758_v14  ;;  %v8339_v36 = vrot.slane %v8337_v6, 2  ;;  %16557 = vmatprep.mubr.bf16.mxu0 %v16225_v16  ;;  %v7764_v42 = vrot.slane %v7763_v4, 2  ;;  %v25175_v14 = vld [vmem:[#allocation6_spill] sm:$0xff] }
 0x3d0   : > { %v8338_v27 = vsel %vm18803_vm6, %v8336_v46, %v8337_v6  ;;  %v7931_v10 = vrot.slane %v7923_v51, %v18814_v19  ;;  %v8342_v25 = vrot.slane %v8340_v0, 2  ;;  %v8345_v38 = vrot.slane %v8343_v11, 2  ;;  %16558 = vmatmul.mubr.bf16.gmra.mrb[24].mxu0 %v16224_v39  ;;  %v5357_v40 = vpop.permute.xlu1 %5356 }
 0x3d1   : > { %14326 = vrot.lane.b32.xlu1 %v14292_v50, %s18720_s6  ;;  %v8341_v49 = vsel %vm18803_vm6, %v8339_v36, %v8340_v0  ;;  %v8346_v54 = vrot.slane %v23867_v56, 7  ;;  %v2779_v20 = vrot.slane %v25175_v14, 2  ;;  %v25176_v46 = vshrl.u32 %v23455_v5, 16  ;;  %5380 = vst.msk [vmem:[#allocation2 + $0xe0] sm:$0xff] %vm5372_vm14, %v5357_v40  ;;  %v16634_v36 = vpop.f32.mrb[5].mxu1 }
 0x3d2   : > { %v7769_v30 = vsel %vm18975_vm13, %v7764_v42, %v7768_v41  ;;  %v8344_v6 = vsel %vm18803_vm6, %v8342_v25, %v8343_v11  ;;  %v8501_v39 = vcombine.low %v8338_v27, %v8341_v49  ;;  %v25177_v51 = vshll.u32 %v23455_v5, 16  ;;  %v23954_v50 = vld.sshfl [vmem:[%s18788_s27 + $0x84] sm:$0x32 pattern:$0x76325410]  ;;  %v23959_v25 = vpop.f32.mrb[6].mxu1 }
 0x3d3   : > { %v2783_v57 = vrot.slane %v25176_v46, 7  ;;  %v7924_v4 = vcombine.low %v7759_v33, %v7769_v30  ;;  %v8347_v56 = vsel %vm18803_vm6, %v8345_v38, %v8346_v54  ;;  %v25178_v11 = vshrl.u32 %v23481_v35, 16  ;;  %25179 = vst [vmem:[#allocation4_spill] sm:$0xff] %v23959_v25  ;;  %v23961_v49 = vpop.f32.mrb[8].mxu0 }
 0x3d4   : > { %v8502_v41 = vcombine.low %v8344_v6, %v8347_v56  ;;  %v8509_v42 = vrot.slane %v8501_v39, %v18814_v19  ;;  %25180 = vst [vmem:[#allocation11_spill] sm:$0xff] %v23961_v49  ;;  %v2799_v38 = vshrl.u32 %v23581_v55, 16  ;;  %v2802_v54 = vshll.u32 %v23581_v55, 16  ;;  %v23968_v14 = vpop.permute.xlu1 %6631  ;;  %v16637_v39 = vpop.f32.mrb[7].mxu1 }
 0x3d5   : > { %v2786_v0 = vor.u32 %v25177_v51, %v2783_v57  ;;  %v2788_v16 = vrot.slane %v2783_v57, 2  ;;  %v2792_v27 = vrot.slane %v25178_v11, 7  ;;  %v7938_v33 = vrot.slane %v7924_v4, %v18814_v19  ;;  %25181 = vst [vmem:[#allocation5_spill] sm:$0xff] %v23968_v14  ;;  %v23974_v56 = vpop.f32.mrb[9].mxu0 }
 0x3d6   : > { %v8516_v46 = vrot.slane %v8502_v41, %v18814_v19  ;;  %v25182_v57 = vshll.u32 %v23481_v35, 16  ;;  %v2808_v6 = vshrl.u32 %v23604_v53, 16  ;;  %25183 = vst [vmem:[#allocation18_spill] sm:$0xff] %v23974_v56  ;;  %v2811_v51 = vshll.u32 %v23604_v53, 16  ;;  %v24092_v56 = vpop.f32.mrb[8].mxu1 }
 0x3d7   : > { %v2787_v5 = vsel %vm19323_vm4, %v2779_v20, %v2786_v0  ;;  %v2797_v30 = vrot.slane %v2792_v27, 2  ;;  %v7939_v4 = vcombine.low %v7931_v10, %v7938_v33  ;;  %v2801_v20 = vrot.slane %v2799_v38, 7  ;;  %v23981_v0 = vpop.f32.mrb[10].mxu0  ;;  %25200 = vst [vmem:[#allocation28_spill] sm:$0xff] %v24092_v56 }
 0x3d8   : > { %v2795_v40 = vor.u32 %v25182_v57, %v2792_v27  ;;  %v23979_v55 = vcombine.high %v23954_v50, %v23954_v50  ;;  %25184 = vst [vmem:[#allocation9_spill] sm:$0xff] %v23981_v0  ;;  %v8517_v36 = vcombine.low %v8509_v42, %v8516_v46  ;;  %v2810_v41 = vrot.slane %v2808_v6, 7  ;;  %v23987_v57 = vpop.f32.mrb[11].mxu0 }
 0x3d9   : > { %v25185_v11 = vrot.slane %v23358_v34, 7  ;;  %25186 = vst [vmem:[#allocation20_spill] sm:$0xff] %v23987_v57  ;;  %7958 = vrot.lane.b32.xlu0 %v7939_v4, %s18718_s30  ;;  %v2804_v10 = vor.u32 %v2802_v54, %v2801_v20  ;;  %v2806_v53 = vrot.slane %v2801_v20, 2  ;;  %v14694_v38 = vrot.slane %v23777_v45, 7 }
 0x3da   : > { %v2796_v35 = vsel %vm19323_vm4, %v2788_v16, %v2795_v40  ;;  %v23992_v39 = vld.sshfl [vmem:[%s18788_s27 + $0x80] sm:$0x33 pattern:$0x76325410]  ;;  %8536 = vrot.lane.b32.xlu1 %v8517_v36, %s18719_s5  ;;  %v2813_v42 = vor.u32 %v2811_v51, %v2810_v41  ;;  %v23996_v16 = vrot.slane %v23808_v31, 7  ;;  %v14700_v34 = vrot.slane %v23816_v63, 7  ;;  %v24000_v40 = vpop.permute.xlu0 %11707  ;;  %v24015_v36 = vpop.permute.xlu1 %7074 }
 0x3db   : > { %v14693_v27 = vrot.slane %v25185_v11, 2  ;;  %v2968_v33 = vcombine.low %v2787_v5, %v2796_v35  ;;  %v18285_v46 = vrot.slane %v23954_v50, 9  ;;  %25187 = vst [vmem:[#allocation6_spill] sm:$0xff] %v24000_v40  ;;  %v2805_v54 = vsel %vm19323_vm4, %v2797_v30, %v2804_v10  ;;  %25188 = vst [vmem:[#allocation26_spill] sm:$0xff] %v24015_v36  ;;  %v25189_v41 = vld [vmem:[#allocation19_spill] sm:$0xff] }
 0x3dc   : > { %v14696_v4 = vrot.slane %v14694_v38, 2  ;;  %v2814_v20 = vsel %vm19323_vm4, %v2806_v53, %v2813_v42  ;;  %v14699_v31 = vrot.slane %v23996_v16, 2  ;;  %v24980_v63 = vrot.slane %v23979_v55, 7 }
 0x3dd   : > { %v2976_v5 = vrot.slane %v2968_v33, %v18814_v19  ;;  %v14695_v6 = vsel %vm18803_vm6, %v14693_v27, %v14694_v38  ;;  %v24013_v51 = vcombine.high %v23992_v39, %v23992_v39  ;;  %v2969_v30 = vcombine.low %v2805_v54, %v2814_v20  ;;  %v17401_v0 = vld.sshfl [vmem:[%s18788_s27 + $0x68] sm:$0x3 pattern:$0x76325410] }
 0x3de   : > { %v14698_v35 = vsel %vm18803_vm6, %v14696_v4, %v23996_v16  ;;  %v15484_v11 = vrot.slane %v25189_v41, 2  ;;  %3454 = vrot.lane.b32.xlu1 %v23632_v8, %s18719_s5  ;;  %v24025_v27 = vsel %vm18803_vm6, %v14699_v31, %v14700_v34  ;;  %v14705_v10 = vsel %vm18803_vm6, %v18285_v46, %v24980_v63  ;;  %v24037_v8 = vld.sshfl [vmem:[%s18788_s27 + $0x74] sm:$0x33 pattern:$0x76325410] }
 0x3df   : > { %v14854_v53 = vcombine.low %v14695_v6, %v14698_v35  ;;  %v2983_v33 = vrot.slane %v2969_v30, %v18814_v19  ;;  %v14855_v38 = vcombine.low %v24025_v27, %v14705_v10  ;;  %v25190_v42 = vshrl.u32 %v23777_v45, 16  ;;  %v24043_v6 = vpop.permute.xlu0 %12549  ;;  %v24104_v56 = vld.sshfl [vmem:[%s18788_s27 + $0x7c] sm:$0x33 pattern:$0x76325410] }
 0x3e0   : > { %v15495_v4 = vshrl.u32 %v23992_v39, 16  ;;  %v15498_v20 = vshll.u32 %v23992_v39, 16  ;;  %v15504_v31 = vshrl.u32 %v24013_v51, 16  ;;  %v15507_v46 = vshll.u32 %v24013_v51, 16  ;;  %25191 = vst [vmem:[#allocation19_spill] sm:$0xff] %v24043_v6  ;;  %v24050_v40 = vpop.permute.xlu1 %7956 }
 0x3e1   : > { %v15488_v54 = vrot.slane %v25190_v42, 7  ;;  %v14862_v34 = vrot.slane %v14854_v53, %v18814_v19  ;;  %v2984_v30 = vcombine.low %v2976_v5, %v2983_v33  ;;  %v14869_v35 = vrot.slane %v14855_v38, %v18814_v19  ;;  %25193 = vst [vmem:[#allocation27_spill] sm:$0xff] %v24050_v40  ;;  %v18378_v25 = vld.sshfl [vmem:[%s18788_s27 + $0x60] sm:$0x30 pattern:$0x76325410] }
 0x3e2   : > { %v25192_v41 = vshll.u32 %v23777_v45, 16  ;;  %v15497_v63 = vrot.slane %v15495_v4, 7  ;;  %v15506_v36 = vrot.slane %v15504_v31, 7  ;;  %v15512_v14 = vshrl.u32 %v23954_v50, 16 }
 0x3e3   : > { %v15493_v42 = vrot.slane %v15488_v54, 2  ;;  %v15517_v53 = vshrl.u32 %v23979_v55, 16  ;;  %3003 = vrot.lane.b32.xlu0 %v2984_v30, %s18718_s30  ;;  %v14870_v57 = vcombine.low %v14862_v34, %v14869_v35  ;;  %v15520_v33 = vshll.u32 %v23979_v55, 16 }
 0x3e4   : > { %v15491_v10 = vor.u32 %v15488_v54, %v25192_v41  ;;  %v8797_v45 = vcombine.high %v24037_v8, %v24037_v8  ;;  %v24058_v38 = vor.u32 %v15498_v20, %v15497_v63  ;;  %v15502_v54 = vrot.slane %v15497_v63, 2  ;;  %v25194_v41 = vld [vmem:[#allocation16_spill] sm:$0xff]  ;;  %v24073_v63 = vpop.permute.xlu0 %12999 }
 0x3e5   : > { %v15509_v4 = vor.u32 %v15507_v46, %v15506_v36  ;;  %v18341_v50 = vrot.slane %v15512_v14, 9  ;;  %v24060_v31 = vrot.slane %v15517_v53, 7  ;;  %v9154_v40 = vrot.slane %v25194_v41, 2  ;;  %25196 = vst [vmem:[#allocation16_spill] sm:$0xff] %v24073_v63 }
 0x3e6   : > { %v15492_v5 = vsel %vm19323_vm4, %v15484_v11, %v15491_v10  ;;  %v25195_v30 = vshrl.u32 %v23780_v15, 16  ;;  %v15501_v11 = vsel %vm19323_vm4, %v15493_v42, %v24058_v38  ;;  %v9174_v20 = vshrl.u32 %v24037_v8, 16 }
 0x3e7   : > { %v24070_v35 = vsel %vm19323_vm4, %v15502_v54, %v15509_v4  ;;  %14904 = vrot.lane.b32.xlu0 %v14870_v57, %s18721_s7  ;;  %v15522_v14 = vor.u32 %v15520_v33, %v24060_v31  ;;  %v15696_v36 = vcombine.low %v15492_v5, %v15501_v11  ;;  %v25197_v46 = vshll.u32 %v23780_v15, 16 }
 0x3e8   : > { %v9158_v34 = vrot.slane %v25195_v30, 7  ;;  %v25198_v42 = vshrl.u32 %v23805_v60, 16  ;;  %v9176_v30 = vrot.slane %v9174_v20, 7  ;;  %v9177_v54 = vshll.u32 %v24037_v8, 16  ;;  %v3002_v6 = vpop.permute.xlu1 %3001 }
 0x3e9   : > { %v9183_v4 = vshrl.u32 %v8797_v45, 16  ;;  %v15523_v63 = vsel %vm19323_vm4, %v18341_v50, %v15522_v14  ;;  %v15704_v57 = vrot.slane %v15696_v36, %v18814_v19  ;;  %v9186_v33 = vshll.u32 %v8797_v45, 16  ;;  %3024 = vst.msk [vmem:[#allocation2 + $0x100] sm:$0xff] %vm3015_vm9, %v3002_v6 }
 0x3ea   : > { %v9161_v10 = vor.u32 %v9158_v34, %v25197_v46  ;;  %v9163_v53 = vrot.slane %v9158_v34, 2  ;;  %v9167_v41 = vrot.slane %v25198_v42, 7  ;;  %v15697_v34 = vcombine.low %v24070_v35, %v15523_v63 }
 0x3eb   : > { %v25199_v11 = vshll.u32 %v23805_v60, 16  ;;  %v9179_v42 = vor.u32 %v9177_v54, %v9176_v30  ;;  %v9181_v50 = vrot.slane %v9176_v30, 2  ;;  %v9185_v14 = vrot.slane %v9183_v4, 7  ;;  %v24106_v30 = vpop.permute.xlu0 %13442 }
 0x3ec   : > { %v9162_v5 = vsel %vm19323_vm4, %v9154_v40, %v9161_v10  ;;  %v9172_v46 = vrot.slane %v9167_v41, 2  ;;  %v9793_v40 = vcombine.low %v23780_v15, %v23805_v60  ;;  %v9794_v36 = vcombine.low %v24037_v8, %v8797_v45  ;;  %v16642_v10 = vpop.f32.mrb[9].mxu1  ;;  %v18670_v54 = vld.sshfl [vmem:[%s18788_s27 + $0x60] sm:$0x33 pattern:$0x76325410] }
 0x3ed   : > { %v9170_v20 = vor.u32 %v9167_v41, %v25199_v11  ;;  %v15711_v6 = vrot.slane %v15697_v34, %v18814_v19  ;;  %v3694_v11 = vcombine.high %v18670_v54, %v18670_v54  ;;  %25201 = vst [vmem:[#allocation29_spill] sm:$0xff] %v24106_v30  ;;  %v24108_v4 = vpop.f32.mrb[10].mxu1  ;;  %v9188_v15 = vor.u32 %v9186_v33, %v9185_v14  ;;  %v18671_v10 = vld.sshfl [vmem:[%s18788_s27 + $0x78] sm:$0x33 pattern:$0x76325410] }
 0x3ee   : > { %v9180_v41 = vsel %vm19323_vm4, %v9172_v46, %v9179_v42  ;;  %25202 = vst [vmem:[#allocation30_spill] sm:$0xff] %v24108_v4  ;;  %v9801_v8 = vrot.slane %v9793_v40, %v18814_v19  ;;  %v9808_v45 = vrot.slane %v9794_v36, %v18814_v19  ;;  %v16645_v34 = vpop.f32.mrb[11].mxu1  ;;  %v3864_v42 = vcombine.low %v23764_v37, %v17401_v0 }
 0x3ef   : > { %v9171_v63 = vsel %vm19323_vm4, %v9163_v53, %v9170_v20  ;;  %v24112_v53 = vpop.f32.mrb[12].mxu0  ;;  %v15712_v20 = vcombine.low %v15704_v57, %v15711_v6  ;;  %v3863_v46 = vcombine.low %v3694_v11, %v23729_v28  ;;  %v10067_v54 = vcombine.high %v18671_v10, %v18671_v10 }
 0x3f0   : > { %v9343_v60 = vcombine.low %v9162_v5, %v9171_v63  ;;  %25203 = vst [vmem:[#allocation31_spill] sm:$0xff] %v24112_v53  ;;  %v24117_v30 = vpop.f32.mrb[13].mxu0  ;;  %v9189_v5 = vsel %vm19323_vm4, %v9181_v50, %v9188_v15  ;;  %v9809_v14 = vcombine.low %v9801_v8, %v9808_v45  ;;  %v24124_v40 = vcombine.high %v24104_v56, %v24104_v56  ;;  %v24133_v50 = vld.sshfl [vmem:[%s18788_s27 + $0x68] sm:$0x13 pattern:$0x76325410] }
 0x3f1   : > { %25204 = vst [vmem:[#allocation32_spill] sm:$0xff] %v24117_v30  ;;  %v24126_v57 = vpop.f32.mrb[14].mxu0  ;;  %15746 = vrot.lane.b32.xlu1 %v15712_v20, %s18722_s8  ;;  %v9344_v0 = vcombine.low %v9180_v41, %v9189_v5  ;;  %v3871_v36 = vrot.slane %v3863_v46, %v18814_v19  ;;  %v3878_v6 = vrot.slane %v3864_v42, %v18814_v19  ;;  %v4553_v8 = vshrl.u32 %v23533_v47, 16 }
 0x3f2   : > { %v9351_v33 = vrot.slane %v9343_v60, %v18814_v19  ;;  %25205 = vst [vmem:[#allocation33_spill] sm:$0xff] %v24126_v57  ;;  %v10236_v63 = vcombine.low %v10067_v54, %v24104_v56  ;;  %v24135_v11 = vpop.f32.mrb[15].mxu0  ;;  %v10237_v15 = vcombine.low %v24124_v40, %v23755_v26  ;;  %v24141_v60 = vcombine.high %v24133_v50, %v24133_v50  ;;  %v17961_v42 = vld.sshfl [vmem:[%s18788_s27 + $0x60] sm:$0x33 pattern:$0x76325410]  ;;  %v24149_v10 = vpop.permute.xlu0 %14324 }
 0x3f3   : > { %25206 = vst [vmem:[#allocation34_spill] sm:$0xff] %v24135_v11  ;;  %v4559_v41 = vshll.u32 %v23729_v28, 16  ;;  %v9358_v45 = vrot.slane %v9344_v0, %v18814_v19  ;;  %v3879_v34 = vcombine.low %v3871_v36, %v3878_v6  ;;  %v4563_v46 = vshrl.u32 %v23729_v28, 16  ;;  %25207 = vst [vmem:[#allocation35_spill] sm:$0xff] %v24149_v10 }
 0x3f4   : > { %v10244_v20 = vrot.slane %v10236_v63, %v18814_v19  ;;  %v10251_v26 = vrot.slane %v10237_v15, %v18814_v19  ;;  %v4555_v54 = vrot.slane %v4553_v8, 6  ;;  %v4569_v4 = vshll.u32 %v23764_v37, 16  ;;  %v18672_v53 = vld.sshfl [vmem:[%s18788_s27 + $0x5c] sm:$0x13 pattern:$0x76325410] }
 0x3f5   : > { %v24152_v5 = vrot.slane %v4559_v41, 7  ;;  %v9359_v47 = vcombine.low %v9351_v33, %v9358_v45  ;;  %9828 = vrot.lane.b32.xlu1 %v9809_v14, %s18721_s7  ;;  %v4565_v0 = vrot.slane %v4563_v46, 6  ;;  %v4573_v36 = vshrl.u32 %v23764_v37, 16 }
 0x3f6   : > { %v4579_v6 = vshll.u32 %v24133_v50, 16  ;;  %v10252_v63 = vcombine.low %v10244_v20, %v10251_v26  ;;  %v4556_v11 = vor.u32 %v4555_v54, %v23591_v32  ;;  %v4571_v57 = vrot.slane %v4569_v4, 7 }
 0x3f7   : > { %v4583_v15 = vshrl.u32 %v24133_v50, 16  ;;  %9378 = vrot.lane.b32.xlu0 %v9359_v47, %s18720_s6  ;;  %v4566_v8 = vor.u32 %v4565_v0, %v24152_v5  ;;  %v4575_v41 = vrot.slane %v4573_v36, 6  ;;  %v4589_v14 = vshll.u32 %v24141_v60, 16  ;;  %v24163_v45 = vpop.permute.xlu0 %8534  ;;  %v24167_v47 = vpop.permute.xlu1 %14902 }
 0x3f8   : > { %v4581_v33 = vrot.slane %v4579_v6, 7  ;;  %25208 = vst [vmem:[#allocation36_spill] sm:$0xff] %v24163_v45  ;;  %v4557_v46 = vrot.slane %v4556_v11, 2  ;;  %v10460_v10 = vcombine.high %v18672_v53, %v18672_v53  ;;  %v10468_v20 = vcombine.high %v17961_v42, %v17961_v42  ;;  %25209 = vst [vmem:[#allocation37_spill] sm:$0xff] %v24167_v47 }
 0x3f9   : > { %v4585_v30 = vrot.slane %v4583_v15, 6  ;;  %10271 = vrot.lane.b32.xlu1 %v10252_v63, %s18722_s8  ;;  %v4567_v32 = vrot.slane %v4566_v8, 2  ;;  %v4576_v4 = vor.u32 %v4575_v41, %v4571_v57  ;;  %v4591_v26 = vrot.slane %v4589_v14, 7 }
 0x3fa   : > { %v10793_v54 = vshrl.u32 %v18672_v53, 16  ;;  %v4562_v0 = vsel %vm18975_vm13, %v4557_v46, %v24152_v5  ;;  %v10799_v6 = vshll.u32 %v10460_v10, 16  ;;  %v10804_v45 = vshrl.u32 %v17961_v42, 16 }
 0x3fb   : > { %v4586_v36 = vor.u32 %v4585_v30, %v4581_v33  ;;  %3898 = vrot.lane.b32.xlu0 %v3879_v34, %s18720_s6  ;;  %v4572_v11 = vsel %vm18975_vm13, %v4567_v32, %v4571_v57  ;;  %v4577_v63 = vrot.slane %v4576_v4, 2  ;;  %v10807_v8 = vshll.u32 %v17961_v42, 16  ;;  %v3453_v41 = vpop.permute.xlu0 %3452 }
 0x3fc   : > { %v10795_v15 = vrot.slane %v10793_v54, 6  ;;  %v4746_v14 = vcombine.low %v4562_v0, %v4572_v11  ;;  %v10801_v47 = vrot.slane %v10799_v6, 7  ;;  %v10806_v49 = vrot.slane %v10804_v45, 6  ;;  %3475 = vst.msk [vmem:[#allocation2 + $0x100] sm:$0xff] %vm3466_vm10, %v3453_v41 }
 0x3fd   : > { %v4587_v53 = vrot.slane %v4586_v36, 2  ;;  %v4582_v30 = vsel %vm18975_vm13, %v4577_v63, %v4581_v33  ;;  %v10809_v46 = vrot.slane %v10807_v8, 7  ;;  %v10813_v34 = vshll.u32 %v10468_v20, 16 }
 0x3fe   : > { %v10796_v10 = vor.u32 %v10795_v15, %v23562_v48  ;;  %v4754_v42 = vrot.slane %v4746_v14, %v18814_v19  ;;  %v10817_v32 = vshrl.u32 %v10468_v20, 16  ;;  %v24183_v36 = vpop.permute.xlu1 %9376  ;;  %v15921_v41 = vcombine.high %v18378_v25, %v18378_v25  ;;  %v25210_v15 = vld [vmem:[#allocation12_spill] sm:$0xff]  ;;  %v25211_v20 = vld [vmem:[#allocation15_spill] sm:$0xff] }
 0x3ff   : > { %v4592_v57 = vsel %vm18975_vm13, %v4587_v53, %v4591_v26  ;;  %v10810_v0 = vor.u32 %v10809_v46, %v10806_v49  ;;  %v10815_v45 = vrot.slane %v10813_v34, 7  ;;  %v16096_v48 = vcombine.low %v23764_v37, %v23741_v43 }
 0x400   : > { %v4747_v4 = vcombine.low %v4582_v30, %v4592_v57  ;;  %v10797_v54 = vrot.slane %v10796_v10, 2  ;;  %v10819_v6 = vrot.slane %v10817_v32, 6  ;;  %v24194_v8 = vadd.f32 %v25211_v20, %v25210_v15 }
 0x401   : > { %v10811_v63 = vrot.slane %v10810_v0, 2  ;;  %v16095_v53 = vcombine.low %v15921_v41, %v23729_v28  ;;  %v16110_v14 = vrot.slane %v16096_v48, %v18814_v19  ;;  %v5160_v30 = vrot.slane %v23696_v7, 2 }
 0x402   : > { %v24188_v33 = vrot.slane %v4747_v4, %v18814_v19  ;;  %v10802_v26 = vsel %vm18975_vm13, %v10797_v54, %v10801_v47  ;;  %v10820_v49 = vor.u32 %v10819_v6, %v10815_v45  ;;  %v5161_v10 = vrot.slane %v23729_v28, 7  ;;  %v3897_v47 = vpop.permute.xlu1 %3896 }
 0x403   : > { %v10816_v43 = vsel %vm18975_vm13, %v10811_v63, %v10815_v45  ;;  %v16103_v57 = vrot.slane %v16095_v53, %v18814_v19  ;;  %v5164_v32 = vrot.slane %v23764_v37, 7  ;;  %3919 = vst.msk [vmem:[#allocation2 + $0x100] sm:$0xff] %vm3910_vm11, %v3897_v47  ;;  %v5167_v54 = vrot.slane %v24133_v50, 7  ;;  %v25212_v53 = vld [vmem:[#allocation21_spill] sm:$0xff] }
 0x404   : > { %v4762_v25 = vcombine.low %v4754_v42, %v24188_v33  ;;  %v10821_v46 = vrot.slane %v10820_v49, 2  ;;  %v11067_v34 = vcombine.low %v10802_v26, %v10816_v43  ;;  %v5162_v42 = vsel %vm18803_vm6, %v5160_v30, %v5161_v10 }
 0x405   : > { %v5163_v4 = vrot.slane %v5161_v10, 2  ;;  %v5170_v7 = vrot.slane %v24141_v60, 7  ;;  %v16111_v45 = vcombine.low %v16103_v57, %v16110_v14  ;;  %v5166_v37 = vrot.slane %v5164_v32, 2 }
 0x406   : > { %4781 = vrot.lane.b32.xlu0 %v4762_v25, %s18721_s7  ;;  %v10826_v28 = vsel %vm18975_vm13, %v10821_v46, %v24152_v5  ;;  %v11075_v0 = vrot.slane %v11067_v34, %v18814_v19  ;;  %v5169_v48 = vrot.slane %v5167_v54, 2  ;;  %v11512_v60 = vrot.slane %v24104_v56, 7 }
 0x407   : > { %v11068_v6 = vcombine.low %v10826_v28, %v4572_v11  ;;  %v5165_v41 = vsel %vm18803_vm6, %v5163_v4, %v5164_v32  ;;  %16195 = vst.msk [vmem:[#allocation2 + $0xb8] sm:$0xff] %vm689_vm5, %v16111_v45  ;;  %v5168_v50 = vsel %vm18803_vm6, %v5166_v37, %v5167_v54  ;;  %v11515_v5 = vrot.slane %v24124_v40, 7  ;;  %v16222_v4 = vld [vmem:[#allocation2 + $0xb0] sm:$0xff] }
 0x408   : > { %v5325_v26 = vcombine.low %v5162_v42, %v5165_v41  ;;  %v5171_v11 = vsel %vm18803_vm6, %v5169_v48, %v5170_v7  ;;  %v24227_v15 = vadd.f32 %v23597_v18, %v23589_v62  ;;  %v11513_v14 = vsel %vm18803_vm6, %v25212_v53, %v11512_v60  ;;  %v17547_v18 = vld.sshfl [vmem:[%s18788_s27 + $0x50] sm:$0x33 pattern:$0x76325410] }
 0x409   : > { %v11082_v63 = vrot.slane %v11068_v6, %v18814_v19  ;;  %v5326_v20 = vcombine.low %v5168_v50, %v5171_v11  ;;  %v11514_v25 = vrot.slane %v11512_v60, 2  ;;  %v11517_v30 = vrot.slane %v11515_v5, 2  ;;  %v17548_v45 = vld.sshfl [vmem:[%s18788_s27 + $0x54] sm:$0x32 pattern:$0x76325410] }
 0x40a   : > { %v5333_v49 = vrot.slane %v5325_v26, %v18814_v19  ;;  %v12331_v46 = vshrl.u32 %v24104_v56, 16  ;;  %v12334_v62 = vshll.u32 %v24104_v56, 16  ;;  %v12340_v32 = vshrl.u32 %v24124_v40, 16  ;;  %v25213_v60 = vld [vmem:[#allocation23_spill] sm:$0xff] }
 0x40b   : > { %v11083_v43 = vcombine.low %v11075_v0, %v11082_v63  ;;  %v5340_v10 = vrot.slane %v5326_v20, %v18814_v19  ;;  %v11516_v47 = vsel %vm18803_vm6, %v11514_v25, %v11515_v5  ;;  %v11519_v34 = vsel %vm18803_vm6, %v11517_v30, %v23996_v16  ;;  %v24278_v53 = vld.sshfl [vmem:[%s18788_s27 + $0x58] sm:$0x33 pattern:$0x76325410] }
 0x40c   : > { %v11676_v57 = vcombine.low %v11513_v14, %v11516_v47  ;;  %v12343_v42 = vshll.u32 %v24124_v40, 16  ;;  %v11677_v7 = vcombine.low %v11519_v34, %v24025_v27  ;;  %v12333_v28 = vrot.slane %v12331_v46, 7  ;;  %v24292_v34 = vld.sshfl [vmem:[%s18788_s27 + $0x88] sm:$0x33 pattern:$0x76325410] }
 0x40d   : > { %11151 = vst.msk [vmem:[#allocation2 + $0xd0] sm:$0xff] %vm689_vm5, %v11083_v43  ;;  %v5341_v54 = vcombine.low %v5333_v49, %v5340_v10  ;;  %v12968_v0 = vcombine.low %v24104_v56, %v24124_v40  ;;  %v12342_v6 = vrot.slane %v12340_v32, 7  ;;  %v12969_v41 = vcombine.low %v23992_v39, %v24013_v51 }
 0x40e   : > { %11729 = vst.msk [vmem:[#allocation2 + $0xd0] sm:$0xff] %vm1579_vm7, %v23655_v23  ;;  %v16223_v37 = vld [vmem:[#allocation2 + $0xb8] sm:$0xff]  ;;  %v11684_v16 = vrot.slane %v11676_v57, %v18814_v19  ;;  %v5574_v23 = vcombine.high %v17547_v18, %v17547_v18  ;;  %v11691_v27 = vrot.slane %v11677_v7, %v18814_v19  ;;  %v12336_v48 = vor.u32 %v12334_v62, %v12333_v28 }
 0x40f   : > { %12571 = vst.msk [vmem:[#allocation2 + $0xd0] sm:$0xff] %vm2165_vm8, %v23675_v24  ;;  %18425 = vmatprep.mubr.msk.bf16.mxu1 %vm689_vm5, %v16223_v37  ;;  %5360 = vrot.lane.b32.xlu1 %v5341_v54, %s18722_s8  ;;  %v12338_v56 = vrot.slane %v12333_v28, 2  ;;  %v12976_v40 = vrot.slane %v12968_v0, %v18814_v19  ;;  %v12345_v24 = vor.u32 %v12343_v42, %v12342_v6  ;;  %v12347_v50 = vrot.slane %v12342_v6, 2 }
 0x410   : > { %13021 = vst.msk [vmem:[#allocation2 + $0xd0] sm:$0xff] %vm3015_vm9, %v23709_v58  ;;  %16663 = vmatmul.mubr.bf16.gmra.mrb[20].mxu1 %v16222_v4  ;;  %v12983_v39 = vrot.slane %v12969_v41, %v18814_v19  ;;  %v5582_v51 = vcombine.high %v17548_v45, %v17548_v45  ;;  %v11692_v26 = vcombine.low %v11684_v16, %v11691_v27  ;;  %v25214_v5 = vrot.slane %v25213_v60, 2  ;;  %v24302_v4 = vpop.permute.xlu0 %15744  ;;  %v24308_v0 = vld.sshfl [vmem:[%s18788_s27 + $0x8c] sm:$0x13 pattern:$0x76325410] }
 0x411   : > { %13464 = vst.msk [vmem:[#allocation2 + $0xd0] sm:$0xff] %vm3466_vm10, %v23733_v22  ;;  %v5899_v11 = vrot.slane %v23747_v1, 2  ;;  %v5901_v20 = vshrl.u32 %v17547_v18, 16  ;;  %v12346_v58 = vsel %vm19323_vm4, %v12338_v56, %v12345_v24  ;;  %v12355_v22 = vsel %vm19323_vm4, %v12347_v50, %v24058_v38 }
 0x412   : > { %v12337_v63 = vsel %vm19323_vm4, %v25214_v5, %v12336_v48  ;;  %14346 = vst.msk [vmem:[#allocation2 + $0xd0] sm:$0xff] %vm3910_vm11, %v23789_v44  ;;  %v12984_v49 = vcombine.low %v12976_v40, %v12983_v39  ;;  %v5904_v14 = vshll.u32 %v17547_v18, 16  ;;  %11711 = vrot.lane.b32.xlu0 %v11692_v26, %s18717_s29  ;;  %v12519_v25 = vcombine.low %v12355_v22, %v24070_v35  ;;  %v18181_v41 = vld.sshfl [vmem:[%s18788_s27 + $0x8c] sm:$0x3 pattern:$0x76325410] }
 0x413   : > { %14924 = vst.msk [vmem:[#allocation2 + $0xd0] sm:$0xff] %vm4793_vm12, %v23851_v21  ;;  %v12518_v1 = vcombine.low %v12337_v63, %v12346_v58  ;;  %v5903_v44 = vrot.slane %v5901_v20, 7  ;;  %v5910_v43 = vshrl.u32 %v5574_v23, 16  ;;  %v4780_v38 = vpop.permute.xlu1 %4779  ;;  %v5913_v30 = vshll.u32 %v5574_v23, 16 }
 0x414   : > { %15766 = vst.msk [vmem:[#allocation2 + $0xd0] sm:$0xff] %vm5372_vm14, %v23883_v17  ;;  %13003 = vrot.lane.b32.xlu1 %v12984_v49, %s18718_s30  ;;  %v5918_v10 = vshrl.u32 %v17548_v45, 16  ;;  %v5923_v21 = vshrl.u32 %v5582_v51, 16  ;;  %v5926_v47 = vshll.u32 %v5582_v51, 16  ;;  %v12533_v46 = vrot.slane %v12519_v25, %v18814_v19  ;;  %v24350_v58 = vpop.permute.xlu0 %9826 }
 0x415   : > { %4802 = vst.msk [vmem:[#allocation2 + $0x100] sm:$0xff] %vm4793_vm12, %v4780_v38  ;;  %v12526_v35 = vrot.slane %v12518_v1, %v18814_v19  ;;  %v5906_v62 = vor.u32 %v5904_v14, %v5903_v44  ;;  %v5908_v18 = vrot.slane %v5903_v44, 2  ;;  %v5912_v17 = vrot.slane %v5910_v43, 7 }
 0x416   : > { %v17560_v57 = vrot.slane %v5918_v10, 9  ;;  %v5925_v32 = vrot.slane %v5923_v21, 7  ;;  %v5932_v42 = vshrl.u32 %v24278_v53, 16  ;;  %v5935_v28 = vshll.u32 %v24278_v53, 16 }
 0x417   : > { %v12534_v54 = vcombine.low %v12526_v35, %v12533_v46  ;;  %v5907_v7 = vsel %vm19323_vm4, %v5899_v11, %v5906_v62  ;;  %v5915_v45 = vor.u32 %v5913_v30, %v5912_v17  ;;  %v24316_v23 = vcombine.high %v24292_v34, %v24292_v34 }
 0x418   : > { %v5928_v37 = vor.u32 %v5926_v47, %v5925_v32  ;;  %v5930_v16 = vrot.slane %v5925_v32, 2  ;;  %v24310_v6 = vrot.slane %v5932_v42, 7  ;;  %v13411_v27 = vcombine.low %v23823_v52, %v24292_v34 }
 0x419   : > { %12553 = vrot.lane.b32.xlu0 %v12534_v54, %s18716_s28  ;;  %v24322_v48 = vcombine.high %v24308_v0, %v24308_v0  ;;  %v14100_v56 = vshrl.u32 %v23823_v52, 16  ;;  %v5916_v40 = vsel %vm19323_vm4, %v5908_v18, %v5915_v45  ;;  %v14106_v39 = vshll.u32 %v24292_v34, 16  ;;  %s18576_s28 = smul.u32 3, %s25263_s22 }
 0x41a   : > { %v5929_v24 = vsel %vm19323_vm4, %v17560_v57, %v5928_v37  ;;  %v5937_v50 = vor.u32 %v5935_v28, %v24310_v6  ;;  %v6134_v51 = vcombine.low %v5907_v7, %v5916_v40  ;;  %v13412_v52 = vcombine.low %v24316_v23, %v18181_v41  ;;  %v24372_v54 = vld.sshfl [vmem:[%s18788_s27 + $0x8c] sm:$0x33 pattern:$0x76325410] }
 0x41b   : > { %v13419_v26 = vrot.slane %v13411_v27, %v18814_v19  ;;  %v14102_v60 = vrot.slane %v14100_v56, 6  ;;  %v14108_v63 = vrot.slane %v14106_v39, 7  ;;  %v14110_v11 = vshrl.u32 %v24292_v34, 16  ;;  %s24375_s16 = sadd.s32 %s18577_s15, %s18576_s28 }
 0x41c   : > { %v5938_v5 = vsel %vm19323_vm4, %v5930_v16, %v5937_v50  ;;  %v14116_v20 = vshll.u32 %v24316_v23, 16  ;;  %v6142_v49 = vrot.slane %v6134_v51, %v18814_v19  ;;  %v13426_v14 = vrot.slane %v13412_v52, %v18814_v19  ;;  %v24377_v16 = vpop.permute.xlu0 %10269  ;;  %s17211_s30 = sshll.u32 %s24375_s16, 2 }
 0x41d   : > { %v6135_v22 = vcombine.low %v5929_v24, %v5938_v5  ;;  %v14103_v1 = vor.u32 %v14102_v60, %v23877_v13  ;;  %v14112_v25 = vrot.slane %v14110_v11, 6  ;;  %v14120_v43 = vshrl.u32 %v24316_v23, 16  ;;  %s24415_s24 = scalar_lea.vmem %s24857_s3, %s17211_s30  ;;  %s24501_s9 = scalar_lea.vmem %s24858_s4, %s17211_s30 }
 0x41e   : > { %v14118_v44 = vrot.slane %v14116_v20, 7  ;;  %v14126_v38 = vshll.u32 %v24308_v0, 16  ;;  %v13427_v10 = vcombine.low %v13419_v26, %v13426_v14  ;;  %v14130_v47 = vshrl.u32 %v24308_v0, 16 }
 0x41f   : > { %v6149_v30 = vrot.slane %v6135_v22, %v18814_v19  ;;  %v14104_v21 = vrot.slane %v14103_v1, 2  ;;  %v14113_v35 = vor.u32 %v14112_v25, %v14108_v63  ;;  %v14122_v13 = vrot.slane %v14120_v43, 6  ;;  %v25217_v22 = vld [vmem:[#allocation22_spill] sm:$0xff]  ;;  %v25218_v25 = vld [vmem:[#allocation8_spill] sm:$0xff] }
 0x420   : > { %v14128_v46 = vrot.slane %v14126_v38, 7  ;;  %v14136_v62 = vshll.u32 %v24322_v48, 16  ;;  %13446 = vrot.lane.b32.xlu0 %v13427_v10, %s18719_s5  ;;  %v14132_v57 = vrot.slane %v14130_v47, 6  ;;  %v25216_v32 = vrot.slane %v23979_v55, 7  ;;  %v25219_v10 = vld [vmem:[#allocation25_spill] sm:$0xff] }
 0x421   : > { %v6150_v18 = vcombine.low %v6142_v49, %v6149_v30  ;;  %v14109_v17 = vsel %vm18975_vm13, %v14104_v21, %v14108_v63  ;;  %v14114_v7 = vrot.slane %v14113_v35, 2  ;;  %v14123_v28 = vor.u32 %v14122_v13, %v14118_v44  ;;  %v25220_v35 = vld [vmem:[#allocation7_spill] sm:$0xff] }
 0x422   : > { %v14706_v42 = vrot.slane %v25216_v32, 2  ;;  %v14138_v45 = vrot.slane %v14136_v62, 7  ;;  %v14707_v37 = vrot.slane %v24292_v34, 7  ;;  %v14133_v41 = vor.u32 %v14132_v57, %v14128_v46 }
 0x423   : > { %6202 = vst.msk [vmem:[#allocation2 + $0xe8] sm:$0xff] %vm689_vm5, %v6150_v18  ;;  %v14710_v27 = vrot.slane %v24316_v23, 7  ;;  %v14713_v55 = vrot.slane %v24308_v0, 7  ;;  %v14716_v56 = vrot.slane %v24322_v48, 7  ;;  %v14119_v40 = vsel %vm18975_vm13, %v14114_v7, %v14118_v44  ;;  %v24432_v18 = vld [vmem:[%s24856_s2] ss:$0 sm:$0xff] }
 0x424   : > { %6652 = vst.msk [vmem:[#allocation2 + $0xe8] sm:$0xff] %vm1579_vm7, %v23711_v3  ;;  %v14124_v24 = vrot.slane %v14123_v28, 2  ;;  %v14708_v50 = vsel %vm18803_vm6, %v14706_v42, %v14707_v37  ;;  %v14709_v51 = vrot.slane %v14707_v37, 2  ;;  %v14134_v52 = vrot.slane %v14133_v41, 2 }
 0x425   : > { %v14293_v26 = vcombine.low %v14109_v17, %v14119_v40  ;;  %7095 = vst.msk [vmem:[#allocation2 + $0xe8] sm:$0xff] %vm2165_vm8, %v23735_v61  ;;  %v14712_v60 = vrot.slane %v14710_v27, 2  ;;  %v14715_v0 = vrot.slane %v14713_v55, 2  ;;  %v15167_v5 = vcombine.high %v24372_v54, %v24372_v54 }
 0x426   : > { %v14129_v3 = vsel %vm18975_vm13, %v14124_v24, %v14128_v46  ;;  %v14711_v48 = vsel %vm18803_vm6, %v14709_v51, %v14710_v27  ;;  %v15524_v63 = vrot.slane %v24060_v31, 2  ;;  %7977 = vst.msk [vmem:[#allocation2 + $0xe8] sm:$0xff] %vm3015_vm9, %v25217_v22  ;;  %v14139_v61 = vsel %vm18975_vm13, %v14134_v52, %v14138_v45  ;;  %v24440_v45 = vpop.f32.mrb[12].mxu1  ;;  %v24462_v22 = vpop.permute.xlu1 %11709 }
 0x427   : > { %v14301_v49 = vrot.slane %v14293_v26, %v18814_v19  ;;  %v14714_v14 = vsel %vm18803_vm6, %v14712_v60, %v14713_v55  ;;  %v14717_v1 = vsel %vm18803_vm6, %v14715_v0, %v14716_v56  ;;  %8555 = vst.msk [vmem:[#allocation2 + $0xe8] sm:$0xff] %vm3466_vm10, %v25218_v25  ;;  %v14294_v44 = vcombine.low %v14129_v3, %v14139_v61  ;;  %v24447_v55 = vld.sshfl [vmem:[%s18788_s27 + $0x70] sm:$0x33 pattern:$0x76325410]  ;;  %v25222_v61 = vld [vmem:[#allocation14_spill] sm:$0xff] }
 0x428   : > { %v14871_v38 = vcombine.low %v14708_v50, %v14711_v48  ;;  %v14872_v31 = vcombine.low %v14714_v14, %v14717_v1  ;;  %v15528_v30 = vrot.slane %v14110_v11, 7  ;;  %9397 = vst.msk [vmem:[#allocation2 + $0xe8] sm:$0xff] %vm3910_vm11, %v25219_v10  ;;  %v5359_v21 = vpop.permute.xlu0 %5358  ;;  %v15544_v12 = vshrl.u32 %v24372_v54, 16 }
 0x429   : > { %v15547_v47 = vshll.u32 %v24372_v54, 16  ;;  %9847 = vst.msk [vmem:[#allocation2 + $0xe8] sm:$0xff] %vm4793_vm12, %v25220_v35  ;;  %v14308_v11 = vrot.slane %v14294_v44, %v18814_v19  ;;  %v15537_v57 = vrot.slane %v14120_v43, 7  ;;  %v15553_v42 = vshrl.u32 %v15167_v5, 16  ;;  %v18481_v54 = vld [vmem:[%s24415_s24] sm:$0xff]   ;;  %v16650_v43 = vpop.f32.mrb[13].mxu1 }
 0x42a   : > { %5381 = vst.msk [vmem:[#allocation2 + $0x100] sm:$0xff] %vm5372_vm14, %v5359_v21  ;;  %v14879_v13 = vrot.slane %v14871_v38, %v18814_v19  ;;  %v14886_v46 = vrot.slane %v14872_v31, %v18814_v19  ;;  %v15531_v62 = vor.u32 %v15528_v30, %v14106_v39  ;;  %10290 = vst.msk [vmem:[#allocation2 + $0xe8] sm:$0xff] %vm5372_vm14, %v23925_v59  ;;  %v15533_v17 = vrot.slane %v15528_v30, 2  ;;  %v24453_v51 = vpop.f32.mrb[14].mxu1 }
 0x42b   : > { %v15546_v32 = vrot.slane %v15544_v12, 7  ;;  %v14309_v7 = vcombine.low %v14301_v49, %v14308_v11  ;;  %v15556_v34 = vshll.u32 %v15167_v5, 16  ;;  %v18381_v39 = vld.sshfl [vmem:[%s18788_s27 + $0x6c] sm:$0x30 pattern:$0x76325410]  ;;  %v15540_v41 = vor.u32 %v15537_v57, %v14116_v20 }
 0x42c   : > { %v14887_v28 = vcombine.low %v14879_v13, %v14886_v46  ;;  %v15532_v37 = vsel %vm19323_vm4, %v15524_v63, %v15531_v62  ;;  %v15542_v59 = vrot.slane %v15537_v57, 2  ;;  %v15555_v40 = vrot.slane %v15553_v42, 7  ;;  %v16653_v60 = vpop.f32.mrb[15].mxu1  ;;  %v16228_v63 = vld [vmem:[#allocation2 + $0xe0] sm:$0xff]  ;;  %v25223_v62 = vld [vmem:[#allocation10_spill] sm:$0xff]  ;;  %v25226_v42 = vld [vmem:[#allocation24_spill] sm:$0xff] }
 0x42d   : > { %v15549_v27 = vor.u32 %v15547_v47, %v15546_v32  ;;  %14328 = vrot.lane.b32.xlu1 %v14309_v7, %s18720_s6  ;;  %v15551_v56 = vrot.slane %v15546_v32, 2  ;;  %v16512_v24 = vadd.f32 %v24194_v8, %v24432_v18  ;;  %v18482_v50 = vunpack.c.l.bf16 %v18481_v54  ;;  %v25221_v8 = vld [vmem:[#allocation17_spill] sm:$0xff]  ;;  %v18673_v25 = vld.sshfl [vmem:[%s18788_s27 + $0x68] sm:$0x33 pattern:$0x76325410] }
 0x42e   : > { %14906 = vrot.lane.b32.xlu0 %v14887_v28, %s18721_s7  ;;  %v15541_v23 = vsel %vm19323_vm4, %v15533_v17, %v15540_v41  ;;  %vm17067_vm6 = vcmask 257024   ;;  %v16515_v52 = vadd.f32 %v24227_v15, %v24432_v18  ;;  %v18483_v26 = vunpack.c.h.bf16 %v18481_v54  ;;  %v17964_v21 = vld.sshfl [vmem:[%s18788_s27 + $0x6c] sm:$0x33 pattern:$0x76325410]  ;;  %v25224_v17 = vld [vmem:[#allocation13_spill] sm:$0xff] }
 0x42f   : > { %v15550_v20 = vsel %vm19323_vm4, %v15542_v59, %v15549_v27  ;;  %v15558_v0 = vor.u32 %v15556_v34, %v15555_v40  ;;  %v15713_v3 = vcombine.low %v15532_v37, %v15541_v23  ;;  %v16625_v48 = vadd.f32 %v25221_v8, %v16512_v24  ;;  %v25225_v32 = vld [vmem:[#allocation3_spill] sm:$0xff]  ;;  %v24485_v7 = vpop.f32.mrb[16].mxu0  ;;  %v17550_v41 = vld.sshfl [vmem:[%s18788_s27 + $0x5c] sm:$0x33 pattern:$0x76325410]  ;;  %v24492_v40 = vpop.permute.xlu1 %12551 }
 0x430   : > { %v16827_v5 = vcombine.high %v18482_v50, %v18482_v50  ;;  %v16628_v49 = vadd.f32 %v25222_v61, %v16515_v52  ;;  %v16828_v14 = vcombine.high %v18483_v26, %v18483_v26  ;;  %v24467_v1 = vcombine.high %v24447_v55, %v24447_v55  ;;  %v24490_v59 = vpop.f32.mrb[17].mxu0 }
 0x431   : > { %v18392_v15 = vcombine.high %v18673_v25, %v18381_v39  ;;  %v16229_v44 = vld [vmem:[#allocation2 + $0xe8] sm:$0xff]  ;;  %v15559_v38 = vsel %vm19323_vm4, %v15551_v56, %v15558_v0  ;;  %v15721_v31 = vrot.slane %v15713_v3, %v18814_v19  ;;  %v16723_v30 = vcombine.high %v16625_v48, %v16625_v48  ;;  %v24494_v24 = vpop.f32.mrb[18].mxu0 }
 0x432   : > { %v16859_v10 = vadd.f32 %v18482_v50, %v16625_v48  ;;  %16565 = vmatprep.mubr.bf16.mxu0 %v16229_v44  ;;  %v15714_v12 = vcombine.low %v15550_v20, %v15559_v38  ;;  %v16724_v47 = vcombine.high %v16628_v49, %v16628_v49  ;;  %v16861_v35 = vadd.f32 %v18483_v26, %v16628_v49  ;;  %v17551_v26 = vld.sshfl [vmem:[%s18788_s27 + $0x60] sm:$0x32 pattern:$0x76325410]  ;;  %v24504_v60 = vpop.f32.mrb[19].mxu0 }
 0x433   : > { %v16113_v11 = vcombine.low %v24447_v55, %v24467_v1  ;;  %16566 = vmatmul.mubr.bf16.gmra.mrb[28].mxu0 %v16228_v63  ;;  %v16860_v13 = vadd.f32 %v16827_v5, %v16723_v30  ;;  %v16120_v46 = vrot.slane %v18392_v15, %v18814_v19  ;;  %v24479_v57 = vadd.f32 %v25224_v17, %v25223_v62  ;;  %v16226_v17 = vld [vmem:[#allocation2 + $0xd0] sm:$0xff] }
 0x434   : > { %v24483_v54 = vadd.f32 %v25226_v42, %v25225_v32  ;;  %v15728_v28 = vrot.slane %v15714_v12, %v18814_v19  ;;  %v16862_v34 = vadd.f32 %v16828_v14, %v16724_v47  ;;  %v10492_v37 = vcombine.high %v17964_v21, %v17964_v21  ;;  %v24518_v12 = vpop.permute.xlu1 %13001 }
 0x435   : > { %v16127_v39 = vrot.slane %v16113_v11, %v18814_v19  ;;  %v16931_v27 = vcombine.low %v16859_v10, %v16860_v13  ;;  %v10858_v43 = vshrl.u32 %v17964_v21, 16  ;;  %v10861_v56 = vshll.u32 %v17964_v21, 16 }
 0x436   : > { %v15729_v50 = vcombine.low %v15721_v31, %v15728_v28  ;;  %v16932_v23 = vcombine.low %v16861_v35, %v16862_v34  ;;  %v10867_v52 = vshll.u32 %v10492_v37, 16  ;;  %v10871_v63 = vshrl.u32 %v10492_v37, 16 }
 0x437   : > { %v16128_v20 = vcombine.low %v16120_v46, %v16127_v39  ;;  %v18456_v0 = vpack.c.bf16 %v16931_v27, %v16931_v27  ;;  %v10860_v3 = vrot.slane %v10858_v43, 6  ;;  %v10863_v8 = vrot.slane %v10861_v56, 7 }
 0x438   : > { %15748 = vrot.lane.b32.xlu1 %v15729_v50, %s18722_s8  ;;  %v18457_v48 = vpack.c.bf16 %v16932_v23, %v16932_v23  ;;  %v10869_v5 = vrot.slane %v10867_v52, 7  ;;  %v10877_v61 = vshll.u32 %v24447_v55, 16  ;;  %v5590_v14 = vcombine.high %v24278_v53, %v24278_v53  ;;  %v16765_v50 = vld [vmem:[%s24415_s24 + $0x8] sm:$0x3] }
 0x439   : > { %16196 = vst.msk [vmem:[#allocation2 + $0xd8] sm:$0xff] %vm689_vm5, %v16128_v20  ;;  %v10864_v49 = vor.u32 %v10863_v8, %v10860_v3  ;;  %v5598_v25 = vcombine.high %v17550_v41, %v17550_v41  ;;  %v10873_v15 = vrot.slane %v10871_v63, 6  ;;  %v5606_v38 = vcombine.high %v17551_v26, %v17551_v26  ;;  %v16766_v3 = vld [vmem:[%s24415_s24 + $0xc] sm:$0xff]   ;;  %v24530_v8 = vpop.permute.xlu1 %13444 }
 0x43a   : > { %17068 = vst.msk [vmem:[%s24501_s9] sm:$0xf] %vm17067_vm6, %v18456_v0  ;;  %17069 = vst.msk [vmem:[%s24501_s9 + $0x4] sm:$0xf] %vm17067_vm6, %v18457_v48  ;;  %v24515_v44 = vrot.slane %v10877_v61, 7  ;;  %v5939_v31 = vrot.slane %v24310_v6, 2  ;;  %v16520_v63 = vadd.f32 %v24479_v57, %v24432_v18  ;;  %v24538_v61 = vpop.permute.xlu0 %6633 }
 0x43b   : > { %v10865_v30 = vrot.slane %v10864_v49, 2  ;;  %v5941_v10 = vshrl.u32 %v5590_v14, 16  ;;  %v5944_v21 = vshll.u32 %v5590_v14, 16  ;;  %v10874_v47 = vor.u32 %v10873_v15, %v10869_v5 }
 0x43c   : > { %v5950_v35 = vshrl.u32 %v17550_v41, 16  ;;  %v5953_v11 = vshll.u32 %v17550_v41, 16  ;;  %v5959_v13 = vshrl.u32 %v5598_v25, 16  ;;  %v5962_v62 = vshll.u32 %v5598_v25, 16 }
 0x43d   : > { %v10870_v53 = vsel %vm18975_vm13, %v10865_v30, %v10869_v5  ;;  %v5943_v46 = vrot.slane %v5941_v10, 7  ;;  %v10875_v32 = vrot.slane %v10874_v47, 2  ;;  %v5967_v37 = vshrl.u32 %v17551_v26, 16 }
 0x43e   : > { %v5952_v42 = vrot.slane %v5950_v35, 7  ;;  %v5961_v28 = vrot.slane %v5959_v13, 7  ;;  %v5972_v27 = vshrl.u32 %v5606_v38, 16  ;;  %v5975_v5 = vshll.u32 %v5606_v38, 16 }
 0x43f   : > { %v5946_v34 = vor.u32 %v5944_v21, %v5943_v46  ;;  %v5948_v39 = vrot.slane %v5943_v46, 2  ;;  %v10880_v41 = vsel %vm18975_vm13, %v10875_v32, %v24515_v44  ;;  %v17561_v0 = vrot.slane %v5967_v37, 9  ;;  %v25231_v37 = vld [vmem:[#allocation20_spill] sm:$0xff] }
 0x440   : > { %v16227_v6 = vld [vmem:[#allocation2 + $0xd8] sm:$0xff]  ;;  %v5955_v43 = vor.u32 %v5953_v11, %v5952_v42  ;;  %v5957_v56 = vrot.slane %v5952_v42, 2  ;;  %v11085_v23 = vcombine.low %v10870_v53, %v10880_v41  ;;  %v5964_v52 = vor.u32 %v5962_v62, %v5961_v28  ;;  %v25227_v42 = vld [vmem:[#allocation4_spill] sm:$0xff] }
 0x441   : > { %18426 = vmatprep.mubr.msk.bf16.mxu1 %vm689_vm5, %v16227_v6  ;;  %v5947_v20 = vsel %vm19323_vm4, %v5939_v31, %v5946_v34  ;;  %v24534_v48 = vrot.slane %v5972_v27, 7  ;;  %v16789_v15 = vunpack.c.l.bf16 %v16765_v50  ;;  %v16633_v10 = vadd.f32 %v23947_v9, %v16520_v63  ;;  %v25228_v6 = vld [vmem:[#allocation11_spill] sm:$0xff]  ;;  %v17967_v41 = vld.sshfl [vmem:[%s18788_s27 + $0x78] sm:$0x33 pattern:$0x76325410] }
 0x442   : > { %16671 = vmatmul.mubr.bf16.gmra.mrb[24].mxu1 %v16226_v17  ;;  %v5956_v26 = vsel %vm19323_vm4, %v5948_v39, %v5955_v43  ;;  %v11099_v49 = vrot.slane %v11085_v23, %v18814_v19  ;;  %v5965_v14 = vsel %vm19323_vm4, %v5957_v56, %v5964_v52  ;;  %v16790_v38 = vunpack.c.l.bf16 %v16766_v3  ;;  %v17966_v17 = vld.sshfl [vmem:[%s18788_s27 + $0x74] sm:$0x13 pattern:$0x76325410]  ;;  %v25232_v56 = vld [vmem:[#allocation6_spill] sm:$0xff] }
 0x443   : > { %v6151_v25 = vcombine.low %v5947_v20, %v5956_v26  ;;  %v5977_v30 = vor.u32 %v5975_v5, %v24534_v48  ;;  %v16523_v35 = vadd.f32 %v24483_v54, %v24432_v18  ;;  %v24553_v11 = vunpack.c.h.bf16 %v16766_v3  ;;  %v25229_v54 = vld [vmem:[#allocation18_spill] sm:$0xff]  ;;  %v25230_v39 = vld [vmem:[#allocation9_spill] sm:$0xff]  ;;  %v24573_v43 = vpop.permute.xlu1 %14326  ;;  %v25233_v26 = vld [vmem:[#allocation19_spill] sm:$0xff] }
 0x444   : > { %v24543_v31 = vpop.f32.mrb[20].mxu0  ;;  %v11100_v57 = vcombine.low %v24188_v33, %v11099_v49  ;;  %v16725_v9 = vcombine.high %v16633_v10, %v16633_v10  ;;  %v16863_v46 = vadd.f32 %v16789_v15, %v16633_v10  ;;  %v16829_v62 = vcombine.high %v16790_v38, %v16790_v38 }
 0x445   : > { %v24547_v21 = vpop.f32.mrb[21].mxu0  ;;  %v6159_v47 = vrot.slane %v6151_v25, %v18814_v19  ;;  %v5978_v53 = vsel %vm19323_vm4, %v17561_v0, %v5977_v30  ;;  %v16636_v28 = vadd.f32 %v25227_v42, %v16523_v35  ;;  %v24566_v34 = vadd.f32 %v25229_v54, %v25228_v6  ;;  %v24579_v0 = vpop.permute.xlu0 %7076 }
 0x446   : > { %v24555_v13 = vpop.f32.mrb[22].mxu0  ;;  %11152 = vst.msk [vmem:[#allocation2 + $0xf0] sm:$0xff] %vm689_vm5, %v11100_v57  ;;  %v6152_v33 = vcombine.low %v5965_v14, %v5978_v53  ;;  %v24570_v27 = vadd.f32 %v25231_v37, %v25230_v39  ;;  %v16864_v50 = vadd.f32 %v16790_v38, %v16725_v9  ;;  %v18458_v23 = vpack.c.bf16 %v16863_v46, %v16863_v46  ;;  %v25234_v14 = vld [vmem:[#allocation16_spill] sm:$0xff]  ;;  %v25235_v57 = vld [vmem:[#allocation29_spill] sm:$0xff]  ;;  %v25236_v46 = vld [vmem:[#allocation35_spill] sm:$0xff] }
 0x447   : > { %v24560_v32 = vpop.f32.mrb[23].mxu0  ;;  %11730 = vst.msk [vmem:[#allocation2 + $0xf0] sm:$0xff] %vm1579_vm7, %v25232_v56  ;;  %v10508_v20 = vcombine.high %v17966_v17, %v17966_v17  ;;  %v24577_v52 = vcombine.high %v17967_v41, %v17967_v41  ;;  %v16726_v5 = vcombine.high %v16636_v28, %v16636_v28  ;;  %v16865_v63 = vadd.f32 %v16829_v62, %v16636_v28  ;;  %v18383_v9 = vld.sshfl [vmem:[%s18788_s27 + $0x74] sm:$0x33 pattern:$0x76325410] }
 0x448   : > { %v6166_v3 = vrot.slane %v6152_v33, %v18814_v19  ;;  %12572 = vst.msk [vmem:[#allocation2 + $0xf0] sm:$0xff] %vm2165_vm8, %v25233_v26  ;;  %v10881_v49 = vshrl.u32 %v24447_v55, 16  ;;  %v10887_v25 = vshll.u32 %v24467_v1, 16  ;;  %v10891_v15 = vshrl.u32 %v24467_v1, 16 }
 0x449   : > { %13022 = vst.msk [vmem:[#allocation2 + $0xf0] sm:$0xff] %vm3015_vm9, %v25234_v14  ;;  %v10897_v30 = vshll.u32 %v17966_v17, 16  ;;  %v10901_v10 = vshrl.u32 %v17966_v17, 16  ;;  %v24594_v35 = vadd.f32 %v24553_v11, %v16726_v5  ;;  %v16933_v55 = vcombine.low %v16864_v50, %v16865_v63  ;;  %v25238_v50 = vld [vmem:[#allocation5_spill] sm:$0xff] }
 0x44a   : > { %17071 = vst.msk [vmem:[%s24501_s9 + $0x8] sm:$0x3] %vm17070_vm15, %v18458_v23  ;;  %v6167_v38 = vcombine.low %v6159_v47, %v6166_v3  ;;  %v10883_v53 = vrot.slane %v10881_v49, 6  ;;  %v10889_v62 = vrot.slane %v10887_v25, 7  ;;  %v10893_v33 = vrot.slane %v10891_v15, 6  ;;  %v25237_v47 = vld [vmem:[#allocation37_spill] sm:$0xff] }
 0x44b   : > { %13465 = vst.msk [vmem:[#allocation2 + $0xf0] sm:$0xff] %vm3466_vm10, %v25235_v57  ;;  %v10899_v42 = vrot.slane %v10897_v30, 7  ;;  %v10903_v1 = vrot.slane %v10901_v10, 6  ;;  %v18459_v28 = vpack.c.bf16 %v16933_v55, %v16933_v55  ;;  %v10907_v54 = vshll.u32 %v10508_v20, 16  ;;  %v25239_v20 = vld [vmem:[#allocation26_spill] sm:$0xff]  ;;  %v25241_v55 = vld [vmem:[#allocation36_spill] sm:$0xff] }
 0x44c   : > { %14347 = vst.msk [vmem:[#allocation2 + $0xf0] sm:$0xff] %vm3910_vm11, %v25236_v46  ;;  %v18384_v17 = vld.sshfl [vmem:[%s18788_s27 + $0x78] sm:$0x30 pattern:$0x76325410]  ;;  %v10884_v6 = vor.u32 %v10883_v53, %v24515_v44  ;;  %v10912_v39 = vshrl.u32 %v17967_v41, 16  ;;  %v24605_v56 = vpop.permute.xlu1 %8536  ;;  %v10894_v23 = vor.u32 %v10893_v33, %v10889_v62  ;;  %v24616_v44 = vpop.permute.xlu0 %7958  ;;  %v15961_v30 = vcombine.high %v18383_v9, %v18383_v9 }
 0x44d   : > { %6203 = vst.msk [vmem:[#allocation2 + $0x108] sm:$0xff] %vm689_vm5, %v6167_v38  ;;  %v17552_v37 = vld.sshfl [vmem:[%s18788_s27 + $0x64] sm:$0x33 pattern:$0x76325410]  ;;  %v10904_v3 = vor.u32 %v10903_v1, %v10899_v42  ;;  %v10915_v26 = vshll.u32 %v17967_v41, 16  ;;  %v15969_v46 = vcombine.high %v18384_v17, %v18384_v17 }
 0x44e   : > { %14925 = vst.msk [vmem:[#allocation2 + $0xf0] sm:$0xff] %vm4793_vm12, %v25237_v47  ;;  %v10921_v5 = vshll.u32 %v24577_v52, 16  ;;  %v24613_v63 = vld.sshfl [vmem:[%s18788_s27 + $0x7c] sm:$0x33 pattern:$0x76325410]  ;;  %v16129_v33 = vcombine.low %v18383_v9, %v15961_v30  ;;  %v5614_v1 = vcombine.high %v17552_v37, %v17552_v37 }
 0x44f   : > { %6653 = vst.msk [vmem:[#allocation2 + $0x108] sm:$0xff] %vm1579_vm7, %v25238_v50  ;;  %v17553_v49 = vld.sshfl [vmem:[%s18788_s27 + $0x68] sm:$0x33 pattern:$0x76325410]  ;;  %v10885_v14 = vrot.slane %v10884_v6, 2 }
 0x450   : > { %15767 = vst.msk [vmem:[#allocation2 + $0xf0] sm:$0xff] %vm5372_vm14, %v24302_v4  ;;  %v10909_v25 = vrot.slane %v10907_v54, 7  ;;  %v10914_v15 = vrot.slane %v10912_v39, 6  ;;  %v25240_v4 = vld [vmem:[#allocation27_spill] sm:$0xff]  ;;  %v10895_v41 = vrot.slane %v10894_v23, 2  ;;  %v10905_v10 = vrot.slane %v10904_v3, 2  ;;  %v3455_v50 = vpop.permute.xlu1 %3454 }
 0x451   : > { %7096 = vst.msk [vmem:[#allocation2 + $0x108] sm:$0xff] %vm2165_vm8, %v25239_v20  ;;  %v10917_v38 = vrot.slane %v10915_v26, 7  ;;  %v24624_v57 = vrot.slane %v10921_v5, 7  ;;  %v10890_v53 = vsel %vm18975_vm13, %v10885_v14, %v10889_v62  ;;  %v5622_v54 = vcombine.high %v17553_v49, %v17553_v49 }
 0x452   : > { %17072 = vst.msk [vmem:[%s24501_s9 + $0xc] sm:$0xf] %vm17067_vm6, %v18459_v28  ;;  %v10900_v47 = vsel %vm18975_vm13, %v10895_v41, %v10899_v42  ;;  %v10910_v28 = vsel %vm18975_vm13, %v10905_v10, %v10909_v25  ;;  %v16130_v62 = vcombine.low %v15969_v46, %v24613_v63  ;;  %v16137_v9 = vrot.slane %v16129_v33, %v18814_v19  ;;  %v16768_v46 = vld [vmem:[%s24415_s24 + $0x14] sm:$0x3] }
 0x453   : > { %7978 = vst.msk [vmem:[#allocation2 + $0x108] sm:$0xff] %vm3015_vm9, %v25240_v4  ;;  %v10918_v6 = vor.u32 %v10917_v38, %v10914_v15  ;;  %v11101_v39 = vcombine.low %v10890_v53, %v10900_v47  ;;  %v5979_v17 = vrot.slane %v24534_v48, 2  ;;  %v5981_v42 = vshrl.u32 %v17552_v37, 16 }
 0x454   : > { %8556 = vst.msk [vmem:[#allocation2 + $0x108] sm:$0xff] %vm3466_vm10, %v25241_v55  ;;  %v5984_v23 = vshll.u32 %v17552_v37, 16  ;;  %v5990_v3 = vshrl.u32 %v5614_v1, 16  ;;  %v5993_v20 = vshll.u32 %v5614_v1, 16  ;;  %v5999_v14 = vshrl.u32 %v17553_v49, 16 }
 0x455   : > { %9398 = vst.msk [vmem:[#allocation2 + $0x108] sm:$0xff] %vm3910_vm11, %v24183_v36  ;;  %v10919_v36 = vrot.slane %v10918_v6, 2  ;;  %v3004_v26 = vpop.permute.xlu0 %3003  ;;  %v11109_v5 = vrot.slane %v11101_v39, %v18814_v19  ;;  %v5983_v25 = vrot.slane %v5981_v42, 7  ;;  %v6008_v41 = vshrl.u32 %v5622_v54, 16 }
 0x456   : > { %9848 = vst.msk [vmem:[#allocation2 + $0x108] sm:$0xff] %vm4793_vm12, %v24350_v58  ;;  %v16144_v58 = vrot.slane %v16130_v62, %v18814_v19  ;;  %v5992_v15 = vrot.slane %v5990_v3, 7  ;;  %v6001_v4 = vrot.slane %v5999_v14, 7  ;;  %v6011_v39 = vshll.u32 %v5622_v54, 16  ;;  %v16232_v62 = vld [vmem:[#allocation2 + $0x100] sm:$0xff] }
 0x457   : > { %10291 = vst.msk [vmem:[#allocation2 + $0x108] sm:$0xff] %vm5372_vm14, %v24377_v16  ;;  %v10924_v48 = vsel %vm18975_vm13, %v10919_v36, %v24624_v57  ;;  %v6002_v16 = vshll.u32 %v17553_v49, 16  ;;  %v5986_v10 = vor.u32 %v5984_v23, %v5983_v25  ;;  %v5988_v38 = vrot.slane %v5983_v25, 2 }
 0x458   : > { %3025 = vst.msk [vmem:[#allocation2 + $0x120] sm:$0xff] %vm3015_vm9, %v3004_v26  ;;  %v11102_v37 = vcombine.low %v10910_v28, %v10924_v48  ;;  %v16145_v30 = vcombine.low %v16137_v9, %v16144_v58  ;;  %v5995_v55 = vor.u32 %v5993_v20, %v5992_v15  ;;  %v5997_v53 = vrot.slane %v5992_v15, 2  ;;  %v18386_v58 = vld.sshfl [vmem:[%s18788_s27 + $0x80] sm:$0x33 pattern:$0x76325410] }
 0x459   : > { %3476 = vst.msk [vmem:[#allocation2 + $0x120] sm:$0xff] %vm3466_vm10, %v3455_v50  ;;  %v6004_v1 = vor.u32 %v6002_v16, %v6001_v4  ;;  %v6006_v47 = vrot.slane %v6001_v4, 2  ;;  %v6010_v49 = vrot.slane %v6008_v41, 7  ;;  %v5987_v28 = vsel %vm19323_vm4, %v5979_v17, %v5986_v10  ;;  %v24660_v50 = vld [vmem:[%s24415_s24 + $0x18] sm:$0xff]   ;;  %v25242_v20 = vld [vmem:[#allocation28_spill] sm:$0xff]  ;;  %v25243_v15 = vld [vmem:[#allocation31_spill] sm:$0xff] }
 0x45a   : > { %v11116_v33 = vrot.slane %v11102_v37, %v18814_v19  ;;  %16197 = vst.msk [vmem:[#allocation2 + $0xf8] sm:$0xff] %vm689_vm5, %v16145_v30  ;;  %v5996_v6 = vsel %vm19323_vm4, %v5988_v38, %v5995_v55  ;;  %v16528_v9 = vadd.f32 %v24566_v34, %v24432_v18  ;;  %v16792_v26 = vunpack.c.l.bf16 %v16768_v46  ;;  %v18387_v48 = vld.sshfl [vmem:[%s18788_s27 + $0x84] sm:$0x30 pattern:$0x76325410]  ;;  %v25244_v16 = vld [vmem:[#allocation32_spill] sm:$0xff] }
 0x45b   : > { %v6005_v42 = vsel %vm19323_vm4, %v5997_v53, %v6004_v1  ;;  %v6168_v23 = vcombine.low %v5987_v28, %v5996_v6  ;;  %v6013_v17 = vor.u32 %v6011_v39, %v6010_v49  ;;  %v16830_v54 = vcombine.high %v24553_v11, %v24553_v11  ;;  %v25245_v30 = vld [vmem:[#allocation33_spill] sm:$0xff]  ;;  %v25246_v4 = vld [vmem:[#allocation34_spill] sm:$0xff]  ;;  %v14905_v39 = vpop.permute.xlu0 %14904 }
 0x45c   : > { %v11117_v36 = vcombine.low %v11109_v5, %v11116_v33  ;;  %v16641_v14 = vadd.f32 %v25242_v20, %v16528_v9  ;;  %v16531_v34 = vadd.f32 %v24570_v27, %v24432_v18  ;;  %v18486_v25 = vunpack.c.l.bf16 %v24660_v50  ;;  %v25247_v38 = vld [vmem:[#allocation30_spill] sm:$0xff]  ;;  %v16230_v53 = vld [vmem:[#allocation2 + $0xf0] sm:$0xff] }
 0x45d   : > { %v6176_v5 = vrot.slane %v6168_v23, %v18814_v19  ;;  %v24676_v37 = vadd.f32 %v25244_v16, %v25243_v15  ;;  %v24680_v41 = vadd.f32 %v25246_v4, %v25245_v30  ;;  %v6014_v11 = vsel %vm19323_vm4, %v6006_v47, %v6013_v17 }
 0x45e   : > { %v16233_v3 = vld [vmem:[#allocation2 + $0x108] sm:$0xff]  ;;  %11153 = vst.msk [vmem:[#allocation2 + $0x110] sm:$0xff] %vm689_vm5, %v11117_v36  ;;  %v16727_v27 = vcombine.high %v16641_v14, %v16641_v14  ;;  %v16867_v10 = vadd.f32 %v16830_v54, %v16641_v14  ;;  %v16644_v55 = vadd.f32 %v25247_v38, %v16531_v34  ;;  %v6169_v46 = vcombine.low %v6005_v42, %v6014_v11 }
 0x45f   : > { %16573 = vmatprep.mubr.bf16.mxu0 %v16233_v3  ;;  %11731 = vst.msk [vmem:[#allocation2 + $0x110] sm:$0xff] %vm1579_vm7, %v24462_v22  ;;  %v16831_v33 = vcombine.high %v18486_v25, %v18486_v25  ;;  %v15977_v1 = vcombine.high %v24613_v63, %v24613_v63  ;;  %v18393_v49 = vcombine.high %v18386_v58, %v18387_v48  ;;  %v10931_v20 = vshll.u32 %v24613_v63, 16  ;;  %v18388_v11 = vld.sshfl [vmem:[%s18788_s27 + $0x88] sm:$0x33 pattern:$0x76325410] }
 0x460   : > { %16574 = vmatmul.mubr.bf16.gmra.mrb[32].mxu0 %v16232_v62  ;;  %12573 = vst.msk [vmem:[#allocation2 + $0x110] sm:$0xff] %vm2165_vm8, %v24492_v40  ;;  %v16868_v29 = vadd.f32 %v16792_v26, %v16727_v27  ;;  %v16934_v22 = vcombine.low %v24594_v35, %v16867_v10  ;;  %v16728_v47 = vcombine.high %v16644_v55, %v16644_v55  ;;  %v17969_v62 = vld.sshfl [vmem:[%s18788_s27 + $0x80] sm:$0x13 pattern:$0x76325410]  ;;  %v10925_v26 = vshrl.u32 %v24577_v52, 16 }
 0x461   : > { %v16231_v28 = vld [vmem:[#allocation2 + $0xf8] sm:$0xff]  ;;  %13023 = vst.msk [vmem:[#allocation2 + $0x110] sm:$0xff] %vm3015_vm9, %v24518_v12  ;;  %v16869_v6 = vadd.f32 %v18486_v25, %v16644_v55  ;;  %v6183_v40 = vrot.slane %v6169_v46, %v18814_v19  ;;  %v16146_v36 = vcombine.low %v15977_v1, %v18386_v58  ;;  %v16161_v12 = vrot.slane %v18393_v49, %v18814_v19 }
 0x462   : > { %18427 = vmatprep.mubr.msk.bf16.mxu1 %vm689_vm5, %v16231_v28  ;;  %13466 = vst.msk [vmem:[#allocation2 + $0x110] sm:$0xff] %vm3466_vm10, %v24530_v8  ;;  %v10532_v42 = vcombine.high %v17969_v62, %v17969_v62  ;;  %v18460_v35 = vpack.c.bf16 %v16934_v22, %v16934_v22  ;;  %v18461_v23 = vpack.c.bf16 %v16868_v29, %v16868_v29  ;;  %v10935_v58 = vshrl.u32 %v24613_v63, 16 }
 0x463   : > { %v15747_v9 = vpop.permute.xlu1 %15746  ;;  %16679 = vmatmul.mubr.bf16.gmra.mrb[28].mxu1 %v16230_v53  ;;  %14348 = vst.msk [vmem:[#allocation2 + $0x110] sm:$0xff] %vm3910_vm11, %v24573_v43  ;;  %v16870_v3 = vadd.f32 %v16831_v33, %v16728_v47  ;;  %v6184_v17 = vcombine.low %v6176_v5, %v6183_v40  ;;  %v16154_v8 = vrot.slane %v16146_v36, %v18814_v19  ;;  %v10927_v43 = vrot.slane %v10925_v26, 6 }
 0x464   : > { %14926 = vst.msk [vmem:[#allocation2 + $0x110] sm:$0xff] %vm4793_vm12, %v14905_v39  ;;  %v10941_v54 = vshll.u32 %v15977_v1, 16  ;;  %v10945_v52 = vshrl.u32 %v15977_v1, 16  ;;  %v10933_v5 = vrot.slane %v10931_v20, 7  ;;  %v10937_v25 = vrot.slane %v10935_v58, 6 }
 0x465   : > { %17073 = vst.msk [vmem:[%s24501_s9 + $0x10] sm:$0xf] %vm17067_vm6, %v18460_v35  ;;  %v16935_v14 = vcombine.low %v16869_v6, %v16870_v3  ;;  %v16162_v48 = vcombine.low %v16154_v8, %v16161_v12  ;;  %v10951_v15 = vshll.u32 %v17969_v62, 16  ;;  %v10928_v16 = vor.u32 %v10927_v43, %v24624_v57 }
 0x466   : > { %17074 = vst.msk [vmem:[%s24501_s9 + $0x14] sm:$0x3] %vm17070_vm15, %v18461_v23  ;;  %v10943_v30 = vrot.slane %v10941_v54, 7  ;;  %v10947_v4 = vrot.slane %v10945_v52, 6  ;;  %v10938_v10 = vor.u32 %v10937_v25, %v10933_v5  ;;  %v10955_v55 = vshrl.u32 %v17969_v62, 16 }
 0x467   : > { %15768 = vst.msk [vmem:[#allocation2 + $0x110] sm:$0xff] %vm5372_vm14, %v15747_v9  ;;  %v9829_v34 = vpop.permute.xlu1 %9828  ;;  %v18462_v63 = vpack.c.bf16 %v16935_v14, %v16935_v14  ;;  %v10953_v38 = vrot.slane %v10951_v15, 7  ;;  %v10961_v53 = vshll.u32 %v10532_v42, 16  ;;  %v16536_v46 = vadd.f32 %v24676_v37, %v24432_v18  ;;  %v16771_v9 = vld [vmem:[%s24415_s24 + $0x20] sm:$0x3] }
 0x468   : > { %6204 = vst.msk [vmem:[#allocation2 + $0x128] sm:$0xff] %vm689_vm5, %v6184_v17  ;;  %16198 = vst.msk [vmem:[#allocation2 + $0x118] sm:$0xff] %vm689_vm5, %v16162_v48  ;;  %v10948_v57 = vor.u32 %v10947_v4, %v10943_v30  ;;  %v18487_v33 = vunpack.c.h.bf16 %v24660_v50  ;;  %v10939_v49 = vrot.slane %v10938_v10, 2  ;;  %v10957_v28 = vrot.slane %v10955_v55, 6 }
 0x469   : > { %6654 = vst.msk [vmem:[#allocation2 + $0x128] sm:$0xff] %vm1579_vm7, %v24538_v61  ;;  %v9379_v27 = vpop.permute.xlu0 %9378  ;;  %v10929_v61 = vrot.slane %v10928_v16, 2  ;;  %v10963_v29 = vrot.slane %v10961_v53, 7  ;;  %v16001_v22 = vcombine.high %v18388_v11, %v18388_v11  ;;  %v16649_v37 = vadd.f32 %v24440_v45, %v16536_v46  ;;  %v16772_v16 = vld [vmem:[%s24415_s24 + $0x24] sm:$0xff]  }
 0x46a   : > { %7097 = vst.msk [vmem:[#allocation2 + $0x128] sm:$0xff] %vm2165_vm8, %v24579_v0  ;;  %v18389_v0 = vld.sshfl [vmem:[%s18788_s27 + $0x8c] sm:$0x33 pattern:$0x76325410]  ;;  %v10949_v47 = vrot.slane %v10948_v57, 2  ;;  %v16832_v6 = vcombine.high %v18487_v33, %v18487_v33  ;;  %v10958_v39 = vor.u32 %v10957_v28, %v10953_v38  ;;  %v16539_v26 = vadd.f32 %v24680_v41, %v24432_v18 }
 0x46b   : > { %7979 = vst.msk [vmem:[#allocation2 + $0x128] sm:$0xff] %vm3015_vm9, %v24616_v44  ;;  %v10272_v1 = vpop.permute.xlu1 %10271  ;;  %v10934_v44 = vsel %vm18975_vm13, %v10929_v61, %v10933_v5  ;;  %v16009_v62 = vcombine.high %v18389_v0, %v18389_v0  ;;  %v16163_v40 = vcombine.low %v18388_v11, %v16001_v22  ;;  %v16729_v45 = vcombine.high %v16649_v37, %v16649_v37 }
 0x46c   : > { %17075 = vst.msk [vmem:[%s24501_s9 + $0x18] sm:$0xf] %vm17067_vm6, %v18462_v63  ;;  %v10954_v36 = vsel %vm18975_vm13, %v10949_v47, %v10953_v38  ;;  %v10959_v35 = vrot.slane %v10958_v39, 2  ;;  %v16871_v8 = vadd.f32 %v18487_v33, %v16649_v37  ;;  %v16795_v58 = vunpack.c.l.bf16 %v16771_v9 }
 0x46d   : > { %8557 = vst.msk [vmem:[#allocation2 + $0x128] sm:$0xff] %vm3466_vm10, %v24605_v56  ;;  %v3899_v50 = vpop.permute.xlu0 %3898  ;;  %v10944_v56 = vsel %vm18975_vm13, %v10939_v49, %v10943_v30  ;;  %v16164_v23 = vcombine.low %v18389_v0, %v16009_v62  ;;  %v16171_v3 = vrot.slane %v16163_v40, %v18814_v19  ;;  %v16872_v20 = vadd.f32 %v16832_v6, %v16729_v45 }
 0x46e   : > { %9399 = vst.msk [vmem:[#allocation2 + $0x128] sm:$0xff] %vm3910_vm11, %v9379_v27  ;;  %3920 = vst.msk [vmem:[#allocation2 + $0x120] sm:$0xff] %vm3910_vm11, %v3899_v50  ;;  %v11118_v12 = vcombine.low %v10934_v44, %v10944_v56  ;;  %v16234_v42 = vld [vmem:[#allocation2 + $0x110] sm:$0xff]  ;;  %v10964_v14 = vsel %vm18975_vm13, %v10959_v35, %v10963_v29  ;;  %v16652_v54 = vadd.f32 %v24453_v51, %v16539_v26  ;;  %v16797_v4 = vunpack.c.h.bf16 %v16772_v16 }
 0x46f   : > { %9849 = vst.msk [vmem:[#allocation2 + $0x128] sm:$0xff] %vm4793_vm12, %v9829_v34  ;;  %v16235_v17 = vld [vmem:[#allocation2 + $0x118] sm:$0xff]  ;;  %v16178_v43 = vrot.slane %v16164_v23, %v18814_v19  ;;  %v18541_v52 = vadd.f32 %v24490_v59, %v24485_v7  ;;  %v11119_v41 = vcombine.low %v10954_v36, %v10964_v14  ;;  %v16936_v48 = vcombine.low %v16871_v8, %v16872_v20  ;;  %v18497_v14 = vld [vmem:[%s24415_s24 + $0x30] sm:$0xff]  }
 0x470   : > { %10292 = vst.msk [vmem:[#allocation2 + $0x128] sm:$0xff] %vm5372_vm14, %v10272_v1  ;;  %18428 = vmatprep.mubr.msk.bf16.mxu1 %vm689_vm5, %v16235_v17  ;;  %v11126_v34 = vrot.slane %v11118_v12, %v18814_v19  ;;  %v18544_v5 = vadd.f32 %v24504_v60, %v24494_v24  ;;  %v16873_v2 = vadd.f32 %v16795_v58, %v16652_v54  ;;  %v16796_v60 = vunpack.c.l.bf16 %v16772_v16 }
 0x471   : > { %16687 = vmatmul.mubr.bf16.gmra.mrb[32].mxu1 %v16234_v42  ;;  %v16179_v25 = vcombine.low %v16171_v3, %v16178_v43  ;;  %v11133_v15 = vrot.slane %v11119_v41, %v18814_v19  ;;  %v18463_v63 = vpack.c.bf16 %v16936_v48, %v16936_v48  ;;  %v24762_v30 = vadd.f32 %v24547_v21, %v24543_v31  ;;  %v16774_v31 = vld [vmem:[%s24415_s24 + $0x2c] sm:$0x3] }
 0x472   : > { %v18464_v7 = vpack.c.bf16 %v16873_v2, %v16873_v2  ;;  %v24766_v24 = vadd.f32 %v24560_v32, %v24555_v13  ;;  %v16730_v11 = vcombine.high %v16652_v54, %v16652_v54  ;;  %v16544_v27 = vadd.f32 %v18541_v52, %v24432_v18 }
 0x473   : > { %16199 = vst.msk [vmem:[#allocation2 + $0x138] sm:$0xff] %vm689_vm5, %v16179_v25  ;;  %v11134_v59 = vcombine.low %v11126_v34, %v11133_v15  ;;  %v16833_v10 = vcombine.high %v16796_v60, %v16796_v60  ;;  %v16547_v13 = vadd.f32 %v18544_v5, %v24432_v18  ;;  %v16834_v32 = vcombine.high %v16797_v4, %v16797_v4 }
 0x474   : > { %17076 = vst.msk [vmem:[%s24501_s9 + $0x1c] sm:$0xf] %vm17067_vm6, %v18463_v63  ;;  %v16874_v61 = vadd.f32 %v16796_v60, %v16730_v11  ;;  %v16798_v1 = vunpack.c.l.bf16 %v16774_v31  ;;  %v18490_v43 = vunpack.c.l.bf16 %v18497_v14  ;;  %v16552_v54 = vadd.f32 %v24762_v30, %v24432_v18 }
 0x475   : > { %17077 = vst.msk [vmem:[%s24501_s9 + $0x20] sm:$0x3] %vm17070_vm15, %v18464_v7  ;;  %v18491_v52 = vunpack.c.h.bf16 %v18497_v14  ;;  %v16555_v25 = vadd.f32 %v24766_v24, %v24432_v18 }
 0x476   : > { %11154 = vst.msk [vmem:[#allocation2 + $0x130] sm:$0xff] %vm689_vm5, %v11134_v59  ;;  %v16835_v48 = vcombine.high %v18490_v43, %v18490_v43 }
 0x477   : > { %v16237_v51 = vld [vmem:[#allocation2 + $0x128] sm:$0xff]  ;;  %v16836_v16 = vcombine.high %v18491_v52, %v18491_v52 }
 0x478   : > { %16581 = vmatprep.mubr.bf16.mxu0 %v16237_v51  ;;  %v4782_v19 = vpop.permute.xlu0 %4781 }
 0x479   : > { %4803 = vst.msk [vmem:[#allocation2 + $0x120] sm:$0xff] %vm4793_vm12, %v4782_v19 }
 0x47a   : > { %v16656_v38 = vpop.f32.mrb[16].mxu1  ;;  %v16239_v53 = vld [vmem:[#allocation2 + $0x138] sm:$0xff] }
 0x47b   : > { %v16657_v21 = vadd.f32 %v16656_v38, %v16544_v27  ;;  %v16658_v55 = vpop.f32.mrb[17].mxu1  ;;  %18429 = vmatprep.mubr.msk.bf16.mxu1 %vm689_vm5, %v16239_v53 }
 0x47c   : > { %v16659_v57 = vpop.f32.mrb[18].mxu1 }
 0x47d   : > { %v16731_v46 = vcombine.high %v16657_v21, %v16657_v21  ;;  %v16875_v33 = vadd.f32 %v16833_v10, %v16657_v21  ;;  %v16660_v0 = vadd.f32 %v16659_v57, %v16547_v13  ;;  %v16661_v49 = vpop.f32.mrb[19].mxu1  ;;  %v16778_v13 = vld [vmem:[%s24415_s24 + $0x3c] sm:$0xff]  }
 0x47e   : > { %v16802_v53 = vunpack.c.l.bf16 %v16778_v13 }
 0x47f   : > { %v16876_v28 = vadd.f32 %v16797_v4, %v16731_v46  ;;  %v16937_v29 = vcombine.low %v16874_v61, %v16875_v33  ;;  %v16732_v22 = vcombine.high %v16660_v0, %v16660_v0  ;;  %v16877_v44 = vadd.f32 %v16834_v32, %v16660_v0  ;;  %v16777_v32 = vld [vmem:[%s24415_s24 + $0x38] sm:$0x3]  ;;  %v24804_v61 = vld [vmem:[%s24856_s2] ss:$0 sm:$0xff] }
 0x480   : > { %v16801_v46 = vunpack.c.l.bf16 %v16777_v32 }
 0x481   : > { %v18465_v47 = vpack.c.bf16 %v16937_v29, %v16937_v29  ;;  %v16878_v37 = vadd.f32 %v16798_v1, %v16732_v22  ;;  %v16938_v6 = vcombine.low %v16876_v28, %v16877_v44  ;;  %v5361_v50 = vpop.permute.xlu1 %5360  ;;  %v16837_v28 = vcombine.high %v16802_v53, %v16802_v53 }
 0x482   : > { %5382 = vst.msk [vmem:[#allocation2 + $0x120] sm:$0xff] %vm5372_vm14, %v5361_v50 }
 0x483   : > { %17078 = vst.msk [vmem:[%s24501_s9 + $0x24] sm:$0xf] %vm17067_vm6, %v18465_v47  ;;  %v18466_v56 = vpack.c.bf16 %v16938_v6, %v16938_v6  ;;  %v18467_v39 = vpack.c.bf16 %v16878_v37, %v16878_v37 }
 0x484   : > { %v11712_v62 = vpop.permute.xlu0 %11711 }
 0x485   : > { %17079 = vst.msk [vmem:[%s24501_s9 + $0x28] sm:$0xf] %vm17067_vm6, %v18466_v56 }
 0x486   : > { %17080 = vst.msk [vmem:[%s24501_s9 + $0x2c] sm:$0x3] %vm17070_vm15, %v18467_v39  ;;  %v13004_v9 = vpop.permute.xlu1 %13003 }
 0x487   : > { %11732 = vst.msk [vmem:[#allocation2 + $0x130] sm:$0xff] %vm1579_vm7, %v11712_v62 }
 0x489   : > { %v16236_v40 = vld [vmem:[#allocation2 + $0x120] sm:$0xff] }
 0x48a   : > { %16582 = vmatmul.mubr.bf16.gmra.mrb[36].mxu0 %v16236_v40  ;;  %v18498_v40 = vld [vmem:[%s24415_s24 + $0x48] sm:$0xff]  }
 0x48b   : > { %v12554_v36 = vpop.permute.xlu0 %12553 }
 0x48c   : > { %12574 = vst.msk [vmem:[#allocation2 + $0x130] sm:$0xff] %vm2165_vm8, %v12554_v36 }
 0x48d   : > { %13024 = vst.msk [vmem:[#allocation2 + $0x130] sm:$0xff] %vm3015_vm9, %v13004_v9 }
 0x492   : > { %v13447_v12 = vpop.permute.xlu0 %13446 }
 0x493   : > { %13467 = vst.msk [vmem:[#allocation2 + $0x130] sm:$0xff] %vm3466_vm10, %v13447_v12  ;;  %v16803_v12 = vunpack.c.h.bf16 %v16778_v13 }
 0x49f   : > { %v14329_v45 = vpop.permute.xlu1 %14328 }
 0x4a0   : > { %v14907_v42 = vpop.permute.xlu0 %14906  ;;  %14349 = vst.msk [vmem:[#allocation2 + $0x130] sm:$0xff] %vm3910_vm11, %v14329_v45 }
 0x4a1   : > { %14927 = vst.msk [vmem:[#allocation2 + $0x130] sm:$0xff] %vm4793_vm12, %v14907_v42 }
 0x4a3   : > { %v18551_v35 = vpop.f32.mrb[24].mxu0 }
 0x4a4   : > { %v18552_v23 = vpop.f32.mrb[25].mxu0 }
 0x4a5   : > { %v18553_v3 = vadd.f32 %v18552_v23, %v18551_v35  ;;  %v18554_v26 = vpop.f32.mrb[26].mxu0  ;;  %v16780_v35 = vld [vmem:[%s24415_s24 + $0x44] sm:$0x3]  ;;  %v18494_v23 = vunpack.c.l.bf16 %v18498_v40 }
 0x4a6   : > { %v18555_v17 = vpop.f32.mrb[27].mxu0 }
 0x4a7   : > { %v18556_v8 = vadd.f32 %v18555_v17, %v18554_v26  ;;  %v16560_v57 = vadd.f32 %v24804_v61, %v18553_v3 }
 0x4a9   : > { %v16563_v49 = vadd.f32 %v24804_v61, %v18556_v8  ;;  %v16838_v8 = vcombine.high %v16803_v12, %v16803_v12 }
 0x4aa   : > { %v15749_v20 = vpop.permute.xlu1 %15748 }
 0x4ab   : > { %15769 = vst.msk [vmem:[#allocation2 + $0x130] sm:$0xff] %vm5372_vm14, %v15749_v20 }
 0x4b2   : > { %v16238_v58 = vld [vmem:[#allocation2 + $0x130] sm:$0xff] }
 0x4b3   : > { %16695 = vmatmul.mubr.bf16.gmra.mrb[36].mxu1 %v16238_v58 }
 0x4e3   : > { %v16664_v41 = vpop.f32.mrb[20].mxu1 }
 0x4e4   : > { %v16665_v34 = vadd.f32 %v16664_v41, %v16552_v54  ;;  %v16666_v5 = vpop.f32.mrb[21].mxu1 }
 0x4e5   : > { %v16667_v2 = vpop.f32.mrb[22].mxu1 }
 0x4e6   : > { %v16733_v15 = vcombine.high %v16665_v34, %v16665_v34  ;;  %v16668_v63 = vadd.f32 %v16667_v2, %v16555_v25  ;;  %v16669_v51 = vpop.f32.mrb[23].mxu1  ;;  %v16879_v7 = vadd.f32 %v18490_v43, %v16665_v34  ;;  %v16804_v43 = vunpack.c.l.bf16 %v16780_v35 }
 0x4e7   : > { %v16839_v34 = vcombine.high %v18494_v23, %v18494_v23 }
 0x4e8   : > { %v16880_v59 = vadd.f32 %v16835_v48, %v16733_v15  ;;  %v16734_v19 = vcombine.high %v16668_v63, %v16668_v63  ;;  %v16881_v60 = vadd.f32 %v18491_v52, %v16668_v63 }
 0x4ea   : > { %v16939_v30 = vcombine.low %v16879_v7, %v16880_v59  ;;  %v16882_v4 = vadd.f32 %v16836_v16, %v16734_v19 }
 0x4ec   : > { %v18468_v11 = vpack.c.bf16 %v16939_v30, %v16939_v30  ;;  %v16940_v27 = vcombine.low %v16881_v60, %v16882_v4 }
 0x4ee   : > { %17081 = vst.msk [vmem:[%s24501_s9 + $0x30] sm:$0xf] %vm17067_vm6, %v18468_v11  ;;  %v18469_v10 = vpack.c.bf16 %v16940_v27, %v16940_v27  ;;  %v18495_v11 = vunpack.c.h.bf16 %v18498_v40  ;;  %v16783_v27 = vld [vmem:[%s24415_s24 + $0x50] sm:$0x3] }
 0x4f0   : > { %17082 = vst.msk [vmem:[%s24501_s9 + $0x34] sm:$0xf] %vm17067_vm6, %v18469_v10 }
 0x506   : > { %v18557_v18 = vpop.f32.mrb[28].mxu0 }
 0x507   : > { %v18558_v24 = vpop.f32.mrb[29].mxu0 }
 0x508   : > { %v18559_v38 = vadd.f32 %v18558_v24, %v18557_v18  ;;  %v18560_v31 = vpop.f32.mrb[30].mxu0 }
 0x509   : > { %v18561_v21 = vpop.f32.mrb[31].mxu0 }
 0x50a   : > { %v18562_v55 = vadd.f32 %v18561_v21, %v18560_v31  ;;  %v16568_v17 = vadd.f32 %v24804_v61, %v18559_v38  ;;  %v16840_v38 = vcombine.high %v18495_v11, %v18495_v11 }
 0x50c   : > { %v16571_v52 = vadd.f32 %v24804_v61, %v18562_v55  ;;  %v16807_v55 = vunpack.c.l.bf16 %v16783_v27 }
 0x515   : > { %v16672_v33 = vpop.f32.mrb[24].mxu1 }
 0x516   : > { %v16673_v0 = vadd.f32 %v16672_v33, %v16560_v57  ;;  %v16674_v1 = vpop.f32.mrb[25].mxu1 }
 0x517   : > { %v16675_v29 = vpop.f32.mrb[26].mxu1 }
 0x518   : > { %v16735_v22 = vcombine.high %v16673_v0, %v16673_v0  ;;  %v16883_v44 = vadd.f32 %v16801_v46, %v16673_v0  ;;  %v16676_v47 = vadd.f32 %v16675_v29, %v16563_v49  ;;  %v16677_v37 = vpop.f32.mrb[27].mxu1 }
 0x51a   : > { %v16884_v6 = vadd.f32 %v16802_v53, %v16735_v22  ;;  %v18470_v50 = vpack.c.bf16 %v16883_v44, %v16883_v44  ;;  %v16885_v56 = vadd.f32 %v16837_v28, %v16676_v47  ;;  %v16736_v26 = vcombine.high %v16676_v47, %v16676_v47 }
 0x51c   : > { %17083 = vst.msk [vmem:[%s24501_s9 + $0x38] sm:$0x3] %vm17070_vm15, %v18470_v50  ;;  %v16941_v39 = vcombine.low %v16884_v6, %v16885_v56  ;;  %v16886_v48 = vadd.f32 %v16803_v12, %v16736_v26  ;;  %v16784_v50 = vld [vmem:[%s24415_s24 + $0x54] sm:$0xff]  }
 0x51d   : > { %v16808_v56 = vunpack.c.l.bf16 %v16784_v50 }
 0x51e   : > { %v18471_v62 = vpack.c.bf16 %v16941_v39, %v16941_v39  ;;  %v16809_v39 = vunpack.c.h.bf16 %v16784_v50 }
 0x520   : > { %17084 = vst.msk [vmem:[%s24501_s9 + $0x3c] sm:$0xf] %vm17067_vm6, %v18471_v62 }
 0x533   : > { %v18563_v9 = vpop.f32.mrb[32].mxu0 }
 0x534   : > { %v18564_v36 = vpop.f32.mrb[33].mxu0 }
 0x535   : > { %v18565_v45 = vadd.f32 %v18564_v36, %v18563_v9  ;;  %v18566_v42 = vpop.f32.mrb[34].mxu0  ;;  %v16841_v9 = vcombine.high %v16808_v56, %v16808_v56  ;;  %v16786_v36 = vld [vmem:[%s24415_s24 + $0x5c] sm:$0x3] }
 0x536   : > { %v18567_v3 = vpop.f32.mrb[35].mxu0  ;;  %v16680_v58 = vpop.f32.mrb[28].mxu1  ;;  %v16810_v26 = vunpack.c.l.bf16 %v16786_v36 }
 0x537   : > { %v18568_v20 = vadd.f32 %v18567_v3, %v18566_v42  ;;  %v16681_v14 = vadd.f32 %v16680_v58, %v16568_v17  ;;  %v16682_v54 = vpop.f32.mrb[29].mxu1  ;;  %v16576_v10 = vadd.f32 %v24804_v61, %v18565_v45 }
 0x538   : > { %v16683_v41 = vpop.f32.mrb[30].mxu1 }
 0x539   : > { %v16737_v5 = vcombine.high %v16681_v14, %v16681_v14  ;;  %v16887_v25 = vadd.f32 %v16838_v8, %v16681_v14  ;;  %v16684_v2 = vadd.f32 %v16683_v41, %v16571_v52  ;;  %v16685_v15 = vpop.f32.mrb[31].mxu1  ;;  %v16579_v21 = vadd.f32 %v24804_v61, %v18568_v20 }
 0x53b   : > { %v16888_v63 = vadd.f32 %v16804_v43, %v16737_v5  ;;  %v16942_v16 = vcombine.low %v16886_v48, %v16887_v25  ;;  %v16738_v51 = vcombine.high %v16684_v2, %v16684_v2  ;;  %v16889_v19 = vadd.f32 %v18494_v23, %v16684_v2 }
 0x53c   : > { %v16842_v23 = vcombine.high %v16809_v39, %v16809_v39 }
 0x53d   : > { %v18472_v7 = vpack.c.bf16 %v16942_v16, %v16942_v16  ;;  %v18473_v59 = vpack.c.bf16 %v16888_v63, %v16888_v63  ;;  %v16890_v30 = vadd.f32 %v16839_v34, %v16738_v51 }
 0x53f   : > { %17085 = vst.msk [vmem:[%s24501_s9 + $0x40] sm:$0xf] %vm17067_vm6, %v18472_v7  ;;  %v16943_v60 = vcombine.low %v16889_v19, %v16890_v30 }
 0x540   : > { %17086 = vst.msk [vmem:[%s24501_s9 + $0x44] sm:$0x3] %vm17070_vm15, %v18473_v59 }
 0x541   : > { %v18474_v4 = vpack.c.bf16 %v16943_v60, %v16943_v60 }
 0x543   : > { %17087 = vst.msk [vmem:[%s24501_s9 + $0x48] sm:$0xf] %vm17067_vm6, %v18474_v4 }
 0x544   : > { %v16688_v18 = vpop.f32.mrb[32].mxu1 }
 0x545   : > { %v16689_v24 = vadd.f32 %v16688_v18, %v16576_v10  ;;  %v16690_v31 = vpop.f32.mrb[33].mxu1 }
 0x546   : > { %v16691_v13 = vpop.f32.mrb[34].mxu1 }
 0x547   : > { %v16739_v32 = vcombine.high %v16689_v24, %v16689_v24  ;;  %v16692_v53 = vadd.f32 %v16691_v13, %v16579_v21  ;;  %v16693_v57 = vpop.f32.mrb[35].mxu1  ;;  %v16891_v46 = vadd.f32 %v18495_v11, %v16689_v24 }
 0x549   : > { %v16892_v33 = vadd.f32 %v16840_v38, %v16739_v32  ;;  %v16893_v0 = vadd.f32 %v16807_v55, %v16692_v53  ;;  %v16740_v62 = vcombine.high %v16692_v53, %v16692_v53 }
 0x54b   : > { %v16944_v1 = vcombine.low %v16891_v46, %v16892_v33  ;;  %v18476_v49 = vpack.c.bf16 %v16893_v0, %v16893_v0  ;;  %v16894_v17 = vadd.f32 %v16808_v56, %v16740_v62 }
 0x54d   : > { %v18475_v28 = vpack.c.bf16 %v16944_v1, %v16944_v1  ;;  %17089 = vst.msk [vmem:[%s24501_s9 + $0x50] sm:$0x3] %vm17070_vm15, %v18476_v49 }
 0x54f   : > { %17088 = vst.msk [vmem:[%s24501_s9 + $0x4c] sm:$0xf] %vm17067_vm6, %v18475_v28 }
 0x55d   : > { %v18569_v29 = vpop.f32.mrb[36].mxu0 }
 0x55e   : > { %v18570_v22 = vpop.f32.mrb[37].mxu0 }
 0x55f   : > { %v18571_v44 = vadd.f32 %v18570_v22, %v18569_v29  ;;  %v18572_v47 = vpop.f32.mrb[38].mxu0 }
 0x560   : > { %v18573_v37 = vpop.f32.mrb[39].mxu0 }
 0x561   : > { %v18574_v6 = vadd.f32 %v18573_v37, %v18572_v47  ;;  %v16584_v40 = vadd.f32 %v24804_v61, %v18571_v44 }
 0x563   : > { %v16587_v35 = vadd.f32 %v24804_v61, %v18574_v6 }
 0x586   : > { %v16696_v12 = vpop.f32.mrb[36].mxu1 }
 0x587   : > { %v16697_v45 = vadd.f32 %v16696_v12, %v16584_v40  ;;  %v16698_v42 = vpop.f32.mrb[37].mxu1 }
 0x588   : > { %v16699_v3 = vpop.f32.mrb[38].mxu1 }
 0x589   : > { %v16741_v8 = vcombine.high %v16697_v45, %v16697_v45  ;;  %v16895_v20 = vadd.f32 %v16841_v9, %v16697_v45  ;;  %v16700_v58 = vadd.f32 %v16699_v3, %v16587_v35  ;;  %v16701_v14 = vpop.f32.mrb[39].mxu1 }
 0x58b   : > { %v16896_v43 = vadd.f32 %v16809_v39, %v16741_v8  ;;  %v16945_v54 = vcombine.low %v16894_v17, %v16895_v20  ;;  %v16742_v52 = vcombine.high %v16700_v58, %v16700_v58  ;;  %v16897_v41 = vadd.f32 %v16842_v23, %v16700_v58 }
 0x58d   : > { %v18477_v34 = vpack.c.bf16 %v16945_v54, %v16945_v54  ;;  %v16898_v48 = vadd.f32 %v16810_v26, %v16742_v52  ;;  %v16946_v5 = vcombine.low %v16896_v43, %v16897_v41 }
 0x58f   : > { %17090 = vst.msk [vmem:[%s24501_s9 + $0x54] sm:$0xf] %vm17067_vm6, %v18477_v34  ;;  %v18478_v61 = vpack.c.bf16 %v16946_v5, %v16946_v5  ;;  %v18479_v25 = vpack.c.bf16 %v16898_v48, %v16898_v48 }
 0x591   : > { %17091 = vst.msk [vmem:[%s24501_s9 + $0x58] sm:$0xf] %vm17067_vm6, %v18478_v61 }
 0x592   : > { %17092 = vst.msk [vmem:[%s24501_s9 + $0x5c] sm:$0x3] %vm17070_vm15, %v18479_v25 }
 0x593 PF: > { %s14_s19 = sadd.s32 1, %s18713_s19   ;;  %s25248_s15 = smov %s18705_s17 }
 0x594   : > { %p11_p8 = scmp.ge.s32.totalorder %s14_s19, 8   ;;  %s25249_s16 = smov %s18709_s18 }
 0x595   : > { %s25250_s17 = smov %s25253_s20  ;;  %s25251_s18 = smov %s25257_s21 }
 0x596   :  { %13 = sbr.rel (!%p11_p8) target bundleno = 3 (0x3), region = 73 }

</bundles_post_ra>
